<compile_context>
chip_gen: v7x
topology: tpu7x:2x2x1
jax: 0.10.0
libtpu: 0.0.40
codegen_flags: <defaults>
</compile_context>

<pallas_src>
import jax
import jax.numpy as jnp
from jax.experimental import pallas as pl
from jax.experimental.pallas import tpu as pltpu

LANE = 128
INPUT_SIZE = 1024
HIDDEN_SIZES = (1024, 512, 256)
OUTPUT_SIZE = 2


def _round_up(n, m):
    return -(-n // m) * m


# ---------------------------------------------------------------------------
# Kernel
# ---------------------------------------------------------------------------
def mlp_kernel(x_ref,
               w1_ref, b1_ref,
               w2_ref, b2_ref,
               w3_ref, b3_ref,
               w4_ref, b4_ref,
               o_ref):
    def hidden(h, w_ref, b_ref):
        # bf16 x bf16 matmul on the MXU, f32 accumulation; bias + ReLU.
        z = jnp.dot(h.astype(jnp.bfloat16), w_ref[...],
                    preferred_element_type=jnp.float32)
        return jnp.maximum(z + b_ref[...], 0.0)

    h = hidden(x_ref[...], w1_ref, b1_ref)
    h = hidden(h, w2_ref, b2_ref)
    h = hidden(h, w3_ref, b3_ref)
    out = jnp.dot(h.astype(jnp.bfloat16), w4_ref[...],
                  preferred_element_type=jnp.float32) + b4_ref[...]
    o_ref[...] = out.astype(o_ref.dtype)


# ---------------------------------------------------------------------------
# Wrapper
# ---------------------------------------------------------------------------
def _build_call(bm, nb, in_features, out_lanes, weight_args,
                single_buffer_weights):
    def resident_spec(shape):
        # Constant block index => loaded once, stays resident across the grid.
        kwargs = {}
        if single_buffer_weights:
            kwargs["pipeline_mode"] = pl.Buffered(1)  # never re-fetched
        return pl.BlockSpec(shape, lambda *_: (0,) * len(shape), **kwargs)

    in_specs = [pl.BlockSpec((bm, in_features), lambda i: (i, 0))]
    in_specs += [resident_spec(a.shape) for a in weight_args]

    rows = bm * nb
    flops = 2 * rows * (INPUT_SIZE * HIDDEN_SIZES[0]
                        + HIDDEN_SIZES[0] * HIDDEN_SIZES[1]
                        + HIDDEN_SIZES[1] * HIDDEN_SIZES[2]
                        + HIDDEN_SIZES[2] * out_lanes)
    bytes_accessed = (sum(int(a.size) * a.dtype.itemsize for a in weight_args)
                      + rows * in_features * 4 + rows * out_lanes * 4)

    return pl.pallas_call(
        mlp_kernel,
        out_shape=jax.ShapeDtypeStruct((rows, out_lanes), jnp.float32),
        grid_spec=pltpu.PrefetchScalarGridSpec(
            num_scalar_prefetch=0,
            grid=(nb,),
            in_specs=in_specs,
            out_specs=pl.BlockSpec((bm, out_lanes), lambda i: (i, 0)),
        ),
        compiler_params=pltpu.CompilerParams(
            dimension_semantics=("parallel",),            # megacore-friendly
            vmem_limit_bytes=32 * 1024 * 1024,            # fits v7x 64 MiB VMEM
        ),
        cost_estimate=pl.CostEstimate(flops=flops, transcendentals=0,
                                      bytes_accessed=bytes_accessed),
    )


def mlp_forward(x, params, *, output_size=OUTPUT_SIZE, block_m_max=512):
    """x: (B, 1024) f32.  params: dict from fold_params (bf16 weights with BN
    folded in, f32 biases, final layer padded to 128 output lanes)."""
    B, F = x.shape
    out_lanes = params["w4"].shape[1]                      # 128 (lane-dense)

    # Batch tile: multiple of 8 sublanes, up to block_m_max rows.
    bm = min(block_m_max, _round_up(B, 8))
    # v7x has 2 TensorCores: give the "parallel" batch axis >= 2 blocks when
    # the batch is big enough to split on 8-row boundaries.
    if B >= 16 and _round_up(B, bm) // bm < 2:
        bm = _round_up(pl.cdiv(B, 2), 8)
    Bp = _round_up(B, bm)
    if Bp != B:
        x = jnp.pad(x, ((0, Bp - B), (0, 0)))
    nb = Bp // bm

    weight_args = (params["w1"], params["b1"], params["w2"], params["b2"],
                   params["w3"], params["b3"], params["w4"], params["b4"])

    try:
        call = _build_call(bm, nb, F, out_lanes, weight_args, True)
        out_padded = call(x, *weight_args)
    except Exception:
        # pl.Buffered(1) not supported by this JAX/Mosaic version: use the
        # default (double-buffered) pipelining for the resident blocks.
        call = _build_call(bm, nb, F, out_lanes, weight_args, False)
        out_padded = call(x, *weight_args)

    return out_padded[:B, :output_size]


# ---------------------------------------------------------------------------
# Parameters (synthetic, deterministic) + BN folding + reference
# ---------------------------------------------------------------------------
def make_raw_params(key, input_size=INPUT_SIZE, hidden_sizes=HIDDEN_SIZES,
                    output_size=OUTPUT_SIZE):
    """f32 Linear weights/biases plus BatchNorm1d (gamma, beta, running mean,
    running var) per hidden layer — mirrors the PyTorch module's parameters."""
    dims = [input_size, *hidden_sizes]
    raw = {"hidden": []}
    for fi, fo in zip(dims[:-1], dims[1:]):
        key, kw, kb, kg, kbe, km, kv = jax.random.split(key, 7)
        raw["hidden"].append(dict(
            w=jax.random.normal(kw, (fi, fo), jnp.float32) / jnp.sqrt(fi),
            b=0.01 * jax.random.normal(kb, (fo,), jnp.float32),
            gamma=1.0 + 0.1 * jax.random.normal(kg, (fo,), jnp.float32),
            beta=0.1 * jax.random.normal(kbe, (fo,), jnp.float32),
            mean=0.1 * jax.random.normal(km, (fo,), jnp.float32),
            var=1.0 + 0.1 * jnp.abs(jax.random.normal(kv, (fo,), jnp.float32)),
        ))
    key, kw, kb = jax.random.split(key, 3)
    fi = hidden_sizes[-1]
    raw["w_out"] = jax.random.normal(kw, (fi, output_size), jnp.float32) / jnp.sqrt(fi)
    raw["b_out"] = 0.01 * jax.random.normal(kb, (output_size,), jnp.float32)
    return raw


def fold_params(raw, eps=1e-5):
    """Fold eval-mode BN (y = x*s + t, s = gamma/sqrt(var+eps),
    t = beta - mean*s) of layer i into Linear i+1, all in f32, then cast the
    weights to bf16.  Final layer zero-padded to a lane-dense 128 columns."""
    params = {}
    carry_s = carry_t = None
    for i, lp in enumerate(raw["hidden"], start=1):
        w, b = lp["w"], lp["b"]
        if carry_s is not None:
            b = b + carry_t @ w
            w = w * carry_s[:, None]
        params[f"w{i}"] = w.astype(jnp.bfloat16)
        params[f"b{i}"] = b[None, :]                       # (1, fo) f32
        inv_std = 1.0 / jnp.sqrt(lp["var"] + eps)
        carry_s = lp["gamma"] * inv_std
        carry_t = lp["beta"] - lp["mean"] * carry_s
    w, b = raw["w_out"], raw["b_out"]
    b = b + carry_t @ w
    w = w * carry_s[:, None]
    out_lanes = _round_up(w.shape[1], LANE)
    pad = out_lanes - w.shape[1]
    params["w4"] = jnp.pad(w, ((0, 0), (0, pad))).astype(jnp.bfloat16)
    params["b4"] = jnp.pad(b, (0, pad))[None, :]
    return params


def reference_forward(x, raw, eps=1e-5):
    """Pure-JAX f32 reference with the original PyTorch (eval-mode) semantics:
    Linear -> ReLU -> BatchNorm1d per hidden layer, then final Linear."""
    h = x
    for lp in raw["hidden"]:
        z = jnp.maximum(h @ lp["w"] + lp["b"], 0.0)
        h = (z - lp["mean"]) / jnp.sqrt(lp["var"] + eps) * lp["gamma"] + lp["beta"]
    return h @ raw["w_out"] + raw["b_out"]


# ---------------------------------------------------------------------------
if __name__ == "__main__":
    key = jax.random.PRNGKey(0)
    kp, kx = jax.random.split(key)

    B = 8
    raw = make_raw_params(kp)
    params = fold_params(raw)
    x = jax.random.normal(kx, (B, INPUT_SIZE), jnp.float32)

    out = mlp_forward(x, params, output_size=OUTPUT_SIZE)
    out = jax.block_until_ready(out)

    ref = reference_forward(x, raw)
    assert out.shape == (B, OUTPUT_SIZE), out.shape
    max_err = float(jnp.max(jnp.abs(out - ref)))
    assert jnp.allclose(out, ref, atol=5e-2, rtol=5e-2), max_err
    print("KERNEL_OK")
</pallas_src>

<mosaic_0001>
module attributes {stable_mosaic.version = 11 : i64} {
  func.func @mlp_kernel(%arg0: i32, %arg1: memref<8x1024xf32, #tpu.memory_space<vmem>>, %arg2: memref<1024x1024xbf16, #tpu.memory_space<vmem>>, %arg3: memref<1x1024xf32, #tpu.memory_space<vmem>>, %arg4: memref<1024x512xbf16, #tpu.memory_space<vmem>>, %arg5: memref<1x512xf32, #tpu.memory_space<vmem>>, %arg6: memref<512x256xbf16, #tpu.memory_space<vmem>>, %arg7: memref<1x256xf32, #tpu.memory_space<vmem>>, %arg8: memref<256x128xbf16, #tpu.memory_space<vmem>>, %arg9: memref<1x128xf32, #tpu.memory_space<vmem>>, %arg10: memref<8x128xf32, #tpu.memory_space<vmem>>) attributes {dimension_semantics = [#tpu.dimension_semantics<parallel>], iteration_bounds = array<i64: 1>, scalar_prefetch = 0 : i64, scratch_operands = 0 : i64, tpu.core_type = #tpu.core_type<tc>, window_params = [{transform_indices = @transform_0, window_bounds = array<i64: 8, 1024>}, {pipeline_mode = #tpu.pipeline_mode<synchronous>, transform_indices = @transform_1, window_bounds = array<i64: 1024, 1024>}, {pipeline_mode = #tpu.pipeline_mode<synchronous>, transform_indices = @transform_2, window_bounds = array<i64: 1, 1024>}, {pipeline_mode = #tpu.pipeline_mode<synchronous>, transform_indices = @transform_3, window_bounds = array<i64: 1024, 512>}, {pipeline_mode = #tpu.pipeline_mode<synchronous>, transform_indices = @transform_4, window_bounds = array<i64: 1, 512>}, {pipeline_mode = #tpu.pipeline_mode<synchronous>, transform_indices = @transform_5, window_bounds = array<i64: 512, 256>}, {pipeline_mode = #tpu.pipeline_mode<synchronous>, transform_indices = @transform_6, window_bounds = array<i64: 1, 256>}, {pipeline_mode = #tpu.pipeline_mode<synchronous>, transform_indices = @transform_7, window_bounds = array<i64: 256, 128>}, {pipeline_mode = #tpu.pipeline_mode<synchronous>, transform_indices = @transform_8, window_bounds = array<i64: 1, 128>}, {transform_indices = @transform_9, window_bounds = array<i64: 8, 128>}]} {
    %c0 = arith.constant 0 : index
    %c0_0 = arith.constant 0 : index
    %0 = vector.load %arg1[%c0, %c0_0] : memref<8x1024xf32, #tpu.memory_space<vmem>>, vector<8x1024xf32>
    %1 = arith.truncf %0 : vector<8x1024xf32> to vector<8x1024xbf16>
    %c0_1 = arith.constant 0 : index
    %c0_2 = arith.constant 0 : index
    %2 = vector.load %arg2[%c0_1, %c0_2] : memref<1024x1024xbf16, #tpu.memory_space<vmem>>, vector<1024x1024xbf16>
    %cst = arith.constant dense<0.000000e+00> : vector<8x1024xf32>
    %3 = tpu.matmul %1, %2, %cst {dimension_numbers = #tpu.dot_dimension_numbers<[1], [0], [0], [1], [0, 0, 1, 1], [], []>} : vector<8x1024xbf16>, vector<1024x1024xbf16>, vector<8x1024xf32> -> vector<8x1024xf32>
    %c0_3 = arith.constant 0 : index
    %c0_4 = arith.constant 0 : index
    %4 = vector.load %arg3[%c0_3, %c0_4] : memref<1x1024xf32, #tpu.memory_space<vmem>>, vector<1x1024xf32>
    %5 = vector.broadcast %4 : vector<1x1024xf32> to vector<8x1024xf32>
    %6 = arith.addf %3, %5 : vector<8x1024xf32>
    %cst_5 = arith.constant 0.000000e+00 : f32
    %7 = vector.broadcast %cst_5 : f32 to vector<8x1024xf32>
    %8 = arith.maximumf %6, %7 : vector<8x1024xf32>
    %9 = arith.truncf %8 : vector<8x1024xf32> to vector<8x1024xbf16>
    %c0_6 = arith.constant 0 : index
    %c0_7 = arith.constant 0 : index
    %10 = vector.load %arg4[%c0_6, %c0_7] : memref<1024x512xbf16, #tpu.memory_space<vmem>>, vector<1024x512xbf16>
    %cst_8 = arith.constant dense<0.000000e+00> : vector<8x512xf32>
    %11 = tpu.matmul %9, %10, %cst_8 {dimension_numbers = #tpu.dot_dimension_numbers<[1], [0], [0], [1], [0, 0, 1, 1], [], []>} : vector<8x1024xbf16>, vector<1024x512xbf16>, vector<8x512xf32> -> vector<8x512xf32>
    %c0_9 = arith.constant 0 : index
    %c0_10 = arith.constant 0 : index
    %12 = vector.load %arg5[%c0_9, %c0_10] : memref<1x512xf32, #tpu.memory_space<vmem>>, vector<1x512xf32>
    %13 = vector.broadcast %12 : vector<1x512xf32> to vector<8x512xf32>
    %14 = arith.addf %11, %13 : vector<8x512xf32>
    %cst_11 = arith.constant 0.000000e+00 : f32
    %15 = vector.broadcast %cst_11 : f32 to vector<8x512xf32>
    %16 = arith.maximumf %14, %15 : vector<8x512xf32>
    %17 = arith.truncf %16 : vector<8x512xf32> to vector<8x512xbf16>
    %c0_12 = arith.constant 0 : index
    %c0_13 = arith.constant 0 : index
    %18 = vector.load %arg6[%c0_12, %c0_13] : memref<512x256xbf16, #tpu.memory_space<vmem>>, vector<512x256xbf16>
    %cst_14 = arith.constant dense<0.000000e+00> : vector<8x256xf32>
    %19 = tpu.matmul %17, %18, %cst_14 {dimension_numbers = #tpu.dot_dimension_numbers<[1], [0], [0], [1], [0, 0, 1, 1], [], []>} : vector<8x512xbf16>, vector<512x256xbf16>, vector<8x256xf32> -> vector<8x256xf32>
    %c0_15 = arith.constant 0 : index
    %c0_16 = arith.constant 0 : index
    %20 = vector.load %arg7[%c0_15, %c0_16] : memref<1x256xf32, #tpu.memory_space<vmem>>, vector<1x256xf32>
    %21 = vector.broadcast %20 : vector<1x256xf32> to vector<8x256xf32>
    %22 = arith.addf %19, %21 : vector<8x256xf32>
    %cst_17 = arith.constant 0.000000e+00 : f32
    %23 = vector.broadcast %cst_17 : f32 to vector<8x256xf32>
    %24 = arith.maximumf %22, %23 : vector<8x256xf32>
    %25 = arith.truncf %24 : vector<8x256xf32> to vector<8x256xbf16>
    %c0_18 = arith.constant 0 : index
    %c0_19 = arith.constant 0 : index
    %26 = vector.load %arg8[%c0_18, %c0_19] : memref<256x128xbf16, #tpu.memory_space<vmem>>, vector<256x128xbf16>
    %cst_20 = arith.constant dense<0.000000e+00> : vector<8x128xf32>
    %27 = tpu.matmul %25, %26, %cst_20 {dimension_numbers = #tpu.dot_dimension_numbers<[1], [0], [0], [1], [0, 0, 1, 1], [], []>} : vector<8x256xbf16>, vector<256x128xbf16>, vector<8x128xf32> -> vector<8x128xf32>
    %c0_21 = arith.constant 0 : index
    %c0_22 = arith.constant 0 : index
    %28 = vector.load %arg9[%c0_21, %c0_22] : memref<1x128xf32, #tpu.memory_space<vmem>>, vector<1x128xf32>
    %29 = vector.broadcast %28 : vector<1x128xf32> to vector<8x128xf32>
    %30 = arith.addf %27, %29 : vector<8x128xf32>
    %c0_23 = arith.constant 0 : index
    %c0_24 = arith.constant 0 : index
    %31 = vector.load %arg10[%c0_23, %c0_24] : memref<8x128xf32, #tpu.memory_space<vmem>>, vector<8x128xf32>
    tpu.vector_store %arg10[%c0_23, %c0_24], %30 {strides = array<i32>} : memref<8x128xf32, #tpu.memory_space<vmem>>, vector<8x128xf32>,
    return
  }
  func.func @transform_0(%arg0: i32) -> (i32, i32) {
    %c0_i32 = arith.constant 0 : i32
    %c0_i32_0 = arith.constant 0 : i32
    return %arg0, %c0_i32 : i32, i32
  }
  func.func @transform_1(%arg0: i32) -> (i32, i32) {
    %c0_i32 = arith.constant 0 : i32
    %c0_i32_0 = arith.constant 0 : i32
    %c0_i32_1 = arith.constant 0 : i32
    return %c0_i32, %c0_i32_0 : i32, i32
  }
  func.func @transform_2(%arg0: i32) -> (i32, i32) {
    %c0_i32 = arith.constant 0 : i32
    %c0_i32_0 = arith.constant 0 : i32
    %c0_i32_1 = arith.constant 0 : i32
    return %c0_i32, %c0_i32_0 : i32, i32
  }
  func.func @transform_3(%arg0: i32) -> (i32, i32) {
    %c0_i32 = arith.constant 0 : i32
    %c0_i32_0 = arith.constant 0 : i32
    %c0_i32_1 = arith.constant 0 : i32
    return %c0_i32, %c0_i32_0 : i32, i32
  }
  func.func @transform_4(%arg0: i32) -> (i32, i32) {
    %c0_i32 = arith.constant 0 : i32
    %c0_i32_0 = arith.constant 0 : i32
    %c0_i32_1 = arith.constant 0 : i32
    return %c0_i32, %c0_i32_0 : i32, i32
  }
  func.func @transform_5(%arg0: i32) -> (i32, i32) {
    %c0_i32 = arith.constant 0 : i32
    %c0_i32_0 = arith.constant 0 : i32
    %c0_i32_1 = arith.constant 0 : i32
    return %c0_i32, %c0_i32_0 : i32, i32
  }
  func.func @transform_6(%arg0: i32) -> (i32, i32) {
    %c0_i32 = arith.constant 0 : i32
    %c0_i32_0 = arith.constant 0 : i32
    %c0_i32_1 = arith.constant 0 : i32
    return %c0_i32, %c0_i32_0 : i32, i32
  }
  func.func @transform_7(%arg0: i32) -> (i32, i32) {
    %c0_i32 = arith.constant 0 : i32
    %c0_i32_0 = arith.constant 0 : i32
    %c0_i32_1 = arith.constant 0 : i32
    return %c0_i32, %c0_i32_0 : i32, i32
  }
  func.func @transform_8(%arg0: i32) -> (i32, i32) {
    %c0_i32 = arith.constant 0 : i32
    %c0_i32_0 = arith.constant 0 : i32
    %c0_i32_1 = arith.constant 0 : i32
    return %c0_i32, %c0_i32_0 : i32, i32
  }
  func.func @transform_9(%arg0: i32) -> (i32, i32) {
    %c0_i32 = arith.constant 0 : i32
    %c0_i32_0 = arith.constant 0 : i32
    return %arg0, %c0_i32 : i32, i32
  }
}

module attributes {stable_mosaic.version = 11 : i64} {
  func.func @mlp_kernel(%arg0: i32, %arg1: memref<8x1024xf32, #tpu.memory_space<vmem>>, %arg2: memref<1024x1024xbf16, #tpu.memory_space<vmem>>, %arg3: memref<1x1024xf32, #tpu.memory_space<vmem>>, %arg4: memref<1024x512xbf16, #tpu.memory_space<vmem>>, %arg5: memref<1x512xf32, #tpu.memory_space<vmem>>, %arg6: memref<512x256xbf16, #tpu.memory_space<vmem>>, %arg7: memref<1x256xf32, #tpu.memory_space<vmem>>, %arg8: memref<256x128xbf16, #tpu.memory_space<vmem>>, %arg9: memref<1x128xf32, #tpu.memory_space<vmem>>, %arg10: memref<8x128xf32, #tpu.memory_space<vmem>>) attributes {dimension_semantics = [#tpu.dimension_semantics<parallel>], iteration_bounds = array<i64: 1>, scalar_prefetch = 0 : i64, scratch_operands = 0 : i64, tpu.core_type = #tpu.core_type<tc>, window_params = [{transform_indices = @transform_0, window_bounds = array<i64: 8, 1024>}, {pipeline_mode = #tpu.pipeline_mode<synchronous>, transform_indices = @transform_1, window_bounds = array<i64: 1024, 1024>}, {pipeline_mode = #tpu.pipeline_mode<synchronous>, transform_indices = @transform_2, window_bounds = array<i64: 1, 1024>}, {pipeline_mode = #tpu.pipeline_mode<synchronous>, transform_indices = @transform_3, window_bounds = array<i64: 1024, 512>}, {pipeline_mode = #tpu.pipeline_mode<synchronous>, transform_indices = @transform_4, window_bounds = array<i64: 1, 512>}, {pipeline_mode = #tpu.pipeline_mode<synchronous>, transform_indices = @transform_5, window_bounds = array<i64: 512, 256>}, {pipeline_mode = #tpu.pipeline_mode<synchronous>, transform_indices = @transform_6, window_bounds = array<i64: 1, 256>}, {pipeline_mode = #tpu.pipeline_mode<synchronous>, transform_indices = @transform_7, window_bounds = array<i64: 256, 128>}, {pipeline_mode = #tpu.pipeline_mode<synchronous>, transform_indices = @transform_8, window_bounds = array<i64: 1, 128>}, {transform_indices = @transform_9, window_bounds = array<i64: 8, 128>}]} {
    %c0 = arith.constant 0 : index
    %c0_0 = arith.constant 0 : index
    %0 = vector.load %arg1[%c0, %c0_0] : memref<8x1024xf32, #tpu.memory_space<vmem>>, vector<8x1024xf32>
    %1 = arith.truncf %0 : vector<8x1024xf32> to vector<8x1024xbf16>
    %c0_1 = arith.constant 0 : index
    %c0_2 = arith.constant 0 : index
    %2 = vector.load %arg2[%c0_1, %c0_2] : memref<1024x1024xbf16, #tpu.memory_space<vmem>>, vector<1024x1024xbf16>
    %cst = arith.constant dense<0.000000e+00> : vector<8x1024xf32>
    %3 = tpu.matmul %1, %2, %cst {dimension_numbers = #tpu.dot_dimension_numbers<[1], [0], [0], [1], [0, 0, 1, 1], [], []>} : vector<8x1024xbf16>, vector<1024x1024xbf16>, vector<8x1024xf32> -> vector<8x1024xf32>
    %c0_3 = arith.constant 0 : index
    %c0_4 = arith.constant 0 : index
    %4 = vector.load %arg3[%c0_3, %c0_4] : memref<1x1024xf32, #tpu.memory_space<vmem>>, vector<1x1024xf32>
    %5 = vector.broadcast %4 : vector<1x1024xf32> to vector<8x1024xf32>
    %6 = arith.addf %3, %5 : vector<8x1024xf32>
    %cst_5 = arith.constant 0.000000e+00 : f32
    %7 = vector.broadcast %cst_5 : f32 to vector<8x1024xf32>
    %8 = arith.maximumf %6, %7 : vector<8x1024xf32>
    %9 = arith.truncf %8 : vector<8x1024xf32> to vector<8x1024xbf16>
    %c0_6 = arith.constant 0 : index
    %c0_7 = arith.constant 0 : index
    %10 = vector.load %arg4[%c0_6, %c0_7] : memref<1024x512xbf16, #tpu.memory_space<vmem>>, vector<1024x512xbf16>
    %cst_8 = arith.constant dense<0.000000e+00> : vector<8x512xf32>
    %11 = tpu.matmul %9, %10, %cst_8 {dimension_numbers = #tpu.dot_dimension_numbers<[1], [0], [0], [1], [0, 0, 1, 1], [], []>} : vector<8x1024xbf16>, vector<1024x512xbf16>, vector<8x512xf32> -> vector<8x512xf32>
    %c0_9 = arith.constant 0 : index
    %c0_10 = arith.constant 0 : index
    %12 = vector.load %arg5[%c0_9, %c0_10] : memref<1x512xf32, #tpu.memory_space<vmem>>, vector<1x512xf32>
    %13 = vector.broadcast %12 : vector<1x512xf32> to vector<8x512xf32>
    %14 = arith.addf %11, %13 : vector<8x512xf32>
    %cst_11 = arith.constant 0.000000e+00 : f32
    %15 = vector.broadcast %cst_11 : f32 to vector<8x512xf32>
    %16 = arith.maximumf %14, %15 : vector<8x512xf32>
    %17 = arith.truncf %16 : vector<8x512xf32> to vector<8x512xbf16>
    %c0_12 = arith.constant 0 : index
    %c0_13 = arith.constant 0 : index
    %18 = vector.load %arg6[%c0_12, %c0_13] : memref<512x256xbf16, #tpu.memory_space<vmem>>, vector<512x256xbf16>
    %cst_14 = arith.constant dense<0.000000e+00> : vector<8x256xf32>
    %19 = tpu.matmul %17, %18, %cst_14 {dimension_numbers = #tpu.dot_dimension_numbers<[1], [0], [0], [1], [0, 0, 1, 1], [], []>} : vector<8x512xbf16>, vector<512x256xbf16>, vector<8x256xf32> -> vector<8x256xf32>
    %c0_15 = arith.constant 0 : index
    %c0_16 = arith.constant 0 : index
    %20 = vector.load %arg7[%c0_15, %c0_16] : memref<1x256xf32, #tpu.memory_space<vmem>>, vector<1x256xf32>
    %21 = vector.broadcast %20 : vector<1x256xf32> to vector<8x256xf32>
    %22 = arith.addf %19, %21 : vector<8x256xf32>
    %cst_17 = arith.constant 0.000000e+00 : f32
    %23 = vector.broadcast %cst_17 : f32 to vector<8x256xf32>
    %24 = arith.maximumf %22, %23 : vector<8x256xf32>
    %25 = arith.truncf %24 : vector<8x256xf32> to vector<8x256xbf16>
    %c0_18 = arith.constant 0 : index
    %c0_19 = arith.constant 0 : index
    %26 = vector.load %arg8[%c0_18, %c0_19] : memref<256x128xbf16, #tpu.memory_space<vmem>>, vector<256x128xbf16>
    %cst_20 = arith.constant dense<0.000000e+00> : vector<8x128xf32>
    %27 = tpu.matmul %25, %26, %cst_20 {dimension_numbers = #tpu.dot_dimension_numbers<[1], [0], [0], [1], [0, 0, 1, 1], [], []>} : vector<8x256xbf16>, vector<256x128xbf16>, vector<8x128xf32> -> vector<8x128xf32>
    %c0_21 = arith.constant 0 : index
    %c0_22 = arith.constant 0 : index
    %28 = vector.load %arg9[%c0_21, %c0_22] : memref<1x128xf32, #tpu.memory_space<vmem>>, vector<1x128xf32>
    %29 = vector.broadcast %28 : vector<1x128xf32> to vector<8x128xf32>
    %30 = arith.addf %27, %29 : vector<8x128xf32>
    %c0_23 = arith.constant 0 : index
    %c0_24 = arith.constant 0 : index
    %31 = vector.load %arg10[%c0_23, %c0_24] : memref<8x128xf32, #tpu.memory_space<vmem>>, vector<8x128xf32>
    tpu.vector_store %arg10[%c0_23, %c0_24], %30 {strides = array<i32>} : memref<8x128xf32, #tpu.memory_space<vmem>>, vector<8x128xf32>,
    return
  }
  func.func @transform_0(%arg0: i32) -> (i32, i32) {
    %c0_i32 = arith.constant 0 : i32
    %c0_i32_0 = arith.constant 0 : i32
    return %arg0, %c0_i32 : i32, i32
  }
  func.func @transform_1(%arg0: i32) -> (i32, i32) {
    %c0_i32 = arith.constant 0 : i32
    %c0_i32_0 = arith.constant 0 : i32
    %c0_i32_1 = arith.constant 0 : i32
    return %c0_i32, %c0_i32_0 : i32, i32
  }
  func.func @transform_2(%arg0: i32) -> (i32, i32) {
    %c0_i32 = arith.constant 0 : i32
    %c0_i32_0 = arith.constant 0 : i32
    %c0_i32_1 = arith.constant 0 : i32
    return %c0_i32, %c0_i32_0 : i32, i32
  }
  func.func @transform_3(%arg0: i32) -> (i32, i32) {
    %c0_i32 = arith.constant 0 : i32
    %c0_i32_0 = arith.constant 0 : i32
    %c0_i32_1 = arith.constant 0 : i32
    return %c0_i32, %c0_i32_0 : i32, i32
  }
  func.func @transform_4(%arg0: i32) -> (i32, i32) {
    %c0_i32 = arith.constant 0 : i32
    %c0_i32_0 = arith.constant 0 : i32
    %c0_i32_1 = arith.constant 0 : i32
    return %c0_i32, %c0_i32_0 : i32, i32
  }
  func.func @transform_5(%arg0: i32) -> (i32, i32) {
    %c0_i32 = arith.constant 0 : i32
    %c0_i32_0 = arith.constant 0 : i32
    %c0_i32_1 = arith.constant 0 : i32
    return %c0_i32, %c0_i32_0 : i32, i32
  }
  func.func @transform_6(%arg0: i32) -> (i32, i32) {
    %c0_i32 = arith.constant 0 : i32
    %c0_i32_0 = arith.constant 0 : i32
    %c0_i32_1 = arith.constant 0 : i32
    return %c0_i32, %c0_i32_0 : i32, i32
  }
  func.func @transform_7(%arg0: i32) -> (i32, i32) {
    %c0_i32 = arith.constant 0 : i32
    %c0_i32_0 = arith.constant 0 : i32
    %c0_i32_1 = arith.constant 0 : i32
    return %c0_i32, %c0_i32_0 : i32, i32
  }
  func.func @transform_8(%arg0: i32) -> (i32, i32) {
    %c0_i32 = arith.constant 0 : i32
    %c0_i32_0 = arith.constant 0 : i32
    %c0_i32_1 = arith.constant 0 : i32
    return %c0_i32, %c0_i32_0 : i32, i32
  }
  func.func @transform_9(%arg0: i32) -> (i32, i32) {
    %c0_i32 = arith.constant 0 : i32
    %c0_i32_0 = arith.constant 0 : i32
    return %arg0, %c0_i32 : i32, i32
  }
}

</mosaic_0001>

<bundles_post_ra>
// kernel: tpu_custom_call.1
= control target key start
LH: loop header
LB: loop body
LE: loop exit
PB: predicated region body
PF: predicated region fallthrough
CT: control target
= control target key end

     0   :  { %14 = vsyncpa [#allocation3], 0  ;;  %s8550_s0 = inlined_call_operand.hbm [shape: f32[8,1024], index: 0, kind: input, shape index: {}]   ;;  %s8551_s1 = inlined_call_operand.hbm [shape: bf16[1024,1024], index: 1, kind: input, shape index: {}]   ;;  %s8552_s2 = inlined_call_operand.hbm [shape: f32[1,1024], index: 2, kind: input, shape index: {}]   ;;  %s8553_s3 = inlined_call_operand.hbm [shape: bf16[1024,512], index: 3, kind: input, shape index: {}]   ;;  %s8554_s4 = inlined_call_operand.hbm [shape: f32[1,512], index: 4, kind: input, shape index: {}]   ;;  %s8555_s5 = inlined_call_operand.hbm [shape: bf16[512,256], index: 5, kind: input, shape index: {}]   ;;  %s8556_s6 = inlined_call_operand.hbm [shape: f32[1,256], index: 6, kind: input, shape index: {}]   ;;  %s8557_s7 = inlined_call_operand.hbm [shape: bf16[256,128], index: 7, kind: input, shape index: {}]   ;;  %s8558_s8 = inlined_call_operand.hbm [shape: f32[1,128], index: 8, kind: input, shape index: {}]   ;;  %s8559_s9 = inlined_call_operand.hbm [shape: f32[8,128], index: 9, kind: output, shape index: {}]  }
   0x1   :  { %15 = vsyncpa [#allocation6], 0 }
   0x2   :  { %16 = vsyncpa [#allocation9], 0 }
   0x3   :  { %17 = vsyncpa [#allocation12], 0 }
   0x4   :  { %18 = vsyncpa [#allocation15], 0 }
   0x5   :  { %19 = vsyncpa [#allocation4], 0  ;;  %s8225_s30 = smov [#allocation5]   ;;  %s7993_s13 = scalar_lea.hbm %s8551_s1, 65536 }
   0x6   :  { %s35_s10 = sshll.u32 %s8225_s30, 4  ;;  %p7994_p0 = scmp.ne.s32.totalorder %s8551_s1, %s7993_s13  ;;  %s36_s10 = int_to_ptr.vmem [resolvable:$true] %s35_s10 }
   0x7   :  { %p7997_p1 = scmp.lt.u32.totalorder %s7993_s13, %s8551_s1 }
   0x9   :  { %p7999_p2 = pnand %p7997_p1, %p7994_p0 }
   0xb   :  { %8002 = shalt.err (!%p7999_p2)
}
   0xc   :  { %s8003_s18 = scalar_lea.vmem %s36_s10, 65536  ;;  %p8008_p4 = scmp.lt.s32.totalorder %s36_s10, %s36_s10 }
   0xd   :  { %p8004_p3 = scmp.ne.s32.totalorder %s36_s10, %s8003_s18  ;;  %p8009_p5 = scmp.lt.s32.totalorder %s8003_s18, %s8003_s18 }
   0xf   :  { %p8010_p6 = por %p8009_p5, %p8008_p4 }
  0x11   :  { %p8011_p7 = pnand %p8010_p6, %p8004_p3 }
  0x13   :  { %8014 = shalt.err (!%p8011_p7)
}
  0x14   :  { %s8226_s19 = smov 512   ;;  %s8227_s20 = smov 32  }
  0x15   :  { %41 = dma.hbm_to_vmem [thread:$0]  %s8551_s1, 65536, %s36_s10, [#allocation6], %s8226_s19, %s8226_s19, %s8227_s20  }
  0x16   :  { %s8228_s23 = smov [#allocation8]   ;;  %s8015_s27 = scalar_lea.hbm %s8553_s3, 32768 }
  0x17   :  { %s57_s24 = sshll.u32 %s8228_s23, 4  ;;  %p8016_p8 = scmp.ne.s32.totalorder %s8553_s3, %s8015_s27  ;;  %s58_s24 = int_to_ptr.vmem [resolvable:$true] %s57_s24 }
  0x18   :  { %p8019_p9 = scmp.lt.u32.totalorder %s8015_s27, %s8553_s3 }
  0x1a   :  { %p8021_p10 = pnand %p8019_p9, %p8016_p8 }
  0x1c   :  { %8024 = shalt.err (!%p8021_p10)
}
  0x1d   :  { %s8025_s12 = scalar_lea.vmem %s58_s24, 32768  ;;  %p8030_p12 = scmp.lt.s32.totalorder %s58_s24, %s58_s24 }
  0x1e   :  { %p8026_p11 = scmp.ne.s32.totalorder %s58_s24, %s8025_s12  ;;  %p8031_p13 = scmp.lt.s32.totalorder %s8025_s12, %s8025_s12 }
  0x20   :  { %p8032_p0 = por %p8031_p13, %p8030_p12 }
  0x22   :  { %p8033_p1 = pnand %p8032_p0, %p8026_p11 }
  0x24   :  { %8036 = shalt.err (!%p8033_p1)
}
  0x25   :  { %s8229_s1 = smov 256   ;;  %s8230_s10 = smov 16  }
  0x26   :  { %63 = dma.hbm_to_vmem [thread:$0]  %s8553_s3, 32768, %s58_s24, [#allocation9], %s8229_s1, %s8229_s1, %s8230_s10  }
  0x27   :  { %s8231_s15 = smov [#allocation11]   ;;  %s8037_s19 = scalar_lea.hbm %s8555_s5, 8192 }
  0x28   :  { %s79_s16 = sshll.u32 %s8231_s15, 4  ;;  %p8038_p2 = scmp.ne.s32.totalorder %s8555_s5, %s8037_s19  ;;  %s80_s16 = int_to_ptr.vmem [resolvable:$true] %s79_s16 }
  0x29   :  { %p8041_p3 = scmp.lt.u32.totalorder %s8037_s19, %s8555_s5 }
  0x2b   :  { %p8043_p4 = pnand %p8041_p3, %p8038_p2 }
  0x2d   :  { %8046 = shalt.err (!%p8043_p4)
}
  0x2e   :  { %s8047_s25 = scalar_lea.vmem %s80_s16, 8192  ;;  %p8052_p6 = scmp.lt.s32.totalorder %s80_s16, %s80_s16 }
  0x2f   :  { %p8048_p5 = scmp.ne.s32.totalorder %s80_s16, %s8047_s25  ;;  %p8053_p7 = scmp.lt.s32.totalorder %s8047_s25, %s8047_s25 }
  0x31   :  { %p8054_p8 = por %p8053_p7, %p8052_p6 }
  0x33   :  { %p8055_p9 = pnand %p8054_p8, %p8048_p5 }
  0x35   :  { %8058 = shalt.err (!%p8055_p9)
}
  0x36   :  { %s8232_s3 = smov 128   ;;  %s8233_s24 = smov 8  }
  0x37   :  { %85 = dma.hbm_to_vmem [thread:$0]  %s8555_s5, 8192, %s80_s16, [#allocation12], %s8232_s3, %s8232_s3, %s8233_s24  }
  0x38   :  { %s8234_s28 = smov [#allocation14]   ;;  %s8059_s12 = scalar_lea.hbm %s8557_s7, 2048 }
  0x39   :  { %s101_s29 = sshll.u32 %s8234_s28, 4  ;;  %p8060_p10 = scmp.ne.s32.totalorder %s8557_s7, %s8059_s12  ;;  %s102_s29 = int_to_ptr.vmem [resolvable:$true] %s101_s29 }
  0x3a   :  { %p8063_p11 = scmp.lt.u32.totalorder %s8059_s12, %s8557_s7 }
  0x3c   :  { %p8065_p12 = pnand %p8063_p11, %p8060_p10 }
  0x3e   :  { %8068 = shalt.err (!%p8065_p12)
}
  0x3f   :  { %s8069_s15 = scalar_lea.vmem %s102_s29, 2048  ;;  %p8074_p0 = scmp.lt.s32.totalorder %s102_s29, %s102_s29 }
  0x40   :  { %p8070_p13 = scmp.ne.s32.totalorder %s102_s29, %s8069_s15  ;;  %p8075_p1 = scmp.lt.s32.totalorder %s8069_s15, %s8069_s15 }
  0x42   :  { %p8076_p2 = por %p8075_p1, %p8074_p0 }
  0x44   :  { %p8077_p3 = pnand %p8076_p2, %p8070_p13 }
  0x46   :  { %8080 = shalt.err (!%p8077_p3)
}
  0x47   :  { %s8235_s5 = smov 64   ;;  %s8236_s16 = smov 4  }
  0x48   :  { %107 = dma.hbm_to_vmem [thread:$0]  %s8557_s7, 2048, %s102_s29, [#allocation15], %s8235_s5, %s8235_s5, %s8236_s16  }
  0x49   :  { %s8237_s19 = smov [#allocation2]   ;;  %s8238_s21 = smov [#allocation7]  }
  0x4a   :  { %s26_s20 = sshll.u32 %s8237_s19, 4  ;;  %s48_s22 = sshll.u32 %s8238_s21, 4  ;;  %s27_s20 = int_to_ptr.vmem [resolvable:$true] %s26_s20  ;;  %s49_s22 = int_to_ptr.vmem [resolvable:$true] %s48_s22 }
  0x4b   :  { %s8081_s3 = scalar_lea.hbm %s8550_s0, 1024 }
  0x4c   :  { %p8082_p4 = scmp.ne.s32.totalorder %s8550_s0, %s8081_s3  ;;  %p8085_p5 = scmp.lt.u32.totalorder %s8081_s3, %s8550_s0 }
  0x4e   :  { %p8087_p6 = pnand %p8085_p5, %p8082_p4 }
  0x50   :  { %8090 = shalt.err (!%p8087_p6)
}
  0x51   :  { %s8091_s7 = scalar_lea.vmem %s27_s20, 1024  ;;  %p8096_p8 = scmp.lt.s32.totalorder %s27_s20, %s27_s20 }
  0x52   :  { %p8092_p7 = scmp.ne.s32.totalorder %s27_s20, %s8091_s7  ;;  %p8097_p9 = scmp.lt.s32.totalorder %s8091_s7, %s8091_s7 }
  0x54   :  { %p8098_p10 = por %p8097_p9, %p8096_p8 }
  0x56   :  { %p8099_p11 = pnand %p8098_p10, %p8092_p7 }
  0x58   :  { %8102 = shalt.err (!%p8099_p11)
}
  0x59   :  { %29 = dma.hbm_to_vmem [thread:$0]  %s8550_s0, 1024, %s27_s20, [#allocation3]  }
  0x5a   :  { %s8103_s1 = scalar_lea.hbm %s8552_s2, 128 }
  0x5b   :  { %p8104_p12 = scmp.ne.s32.totalorder %s8552_s2, %s8103_s1  ;;  %p8107_p13 = scmp.lt.u32.totalorder %s8103_s1, %s8552_s2 }
  0x5d   :  { %p8109_p0 = pnand %p8107_p13, %p8104_p12 }
  0x5f   :  { %8112 = shalt.err (!%p8109_p0)
}
  0x60   :  { %s8113_s5 = scalar_lea.vmem %s49_s22, 128  ;;  %p8118_p2 = scmp.lt.s32.totalorder %s49_s22, %s49_s22 }
  0x61   :  { %p8114_p1 = scmp.ne.s32.totalorder %s49_s22, %s8113_s5  ;;  %p8119_p3 = scmp.lt.s32.totalorder %s8113_s5, %s8113_s5 }
  0x63   :  { %p8120_p4 = por %p8119_p3, %p8118_p2 }
  0x65   :  { %p8121_p5 = pnand %p8120_p4, %p8114_p1 }
  0x67   :  { %8124 = shalt.err (!%p8121_p5)
}
  0x68   :  { %51 = dma.hbm_to_vmem [thread:$0]  %s8552_s2, 128, %s49_s22, [#allocation6]  }
  0x69   :  { %s8239_s17 = smov [#allocation10]   ;;  %s8240_s19 = smov [#allocation13]  }
  0x6a   :  { %s70_s18 = sshll.u32 %s8239_s17, 4  ;;  %s92_s20 = sshll.u32 %s8240_s19, 4  ;;  %s71_s18 = int_to_ptr.vmem [resolvable:$true] %s70_s18  ;;  %s93_s20 = int_to_ptr.vmem [resolvable:$true] %s92_s20 }
  0x6b   :  { %s8125_s25 = scalar_lea.hbm %s8554_s4, 64 }
  0x6c   :  { %p8126_p6 = scmp.ne.s32.totalorder %s8554_s4, %s8125_s25  ;;  %p8129_p7 = scmp.lt.u32.totalorder %s8125_s25, %s8554_s4 }
  0x6e   :  { %p8131_p8 = pnand %p8129_p7, %p8126_p6 }
  0x70   :  { %8134 = shalt.err (!%p8131_p8)
}
  0x71   :  { %s8135_s2 = scalar_lea.vmem %s71_s18, 64  ;;  %p8140_p10 = scmp.lt.s32.totalorder %s71_s18, %s71_s18 }
  0x72   :  { %p8136_p9 = scmp.ne.s32.totalorder %s71_s18, %s8135_s2  ;;  %p8141_p11 = scmp.lt.s32.totalorder %s8135_s2, %s8135_s2 }
  0x74   :  { %p8142_p12 = por %p8141_p11, %p8140_p10 }
  0x76   :  { %p8143_p13 = pnand %p8142_p12, %p8136_p9 }
  0x78   :  { %8146 = shalt.err (!%p8143_p13)
}
  0x79   :  { %73 = dma.hbm_to_vmem [thread:$0]  %s8554_s4, 64, %s71_s18, [#allocation9]  }
  0x7a   :  { %s8147_s30 = scalar_lea.hbm %s8556_s6, 32 }
  0x7b   :  { %p8148_p0 = scmp.ne.s32.totalorder %s8556_s6, %s8147_s30  ;;  %p8151_p1 = scmp.lt.u32.totalorder %s8147_s30, %s8556_s6 }
  0x7d   :  { %p8153_p2 = pnand %p8151_p1, %p8148_p0 }
  0x7f   :  { %8156 = shalt.err (!%p8153_p2)
}
  0x80   :  { %s8157_s13 = scalar_lea.vmem %s93_s20, 32  ;;  %p8162_p4 = scmp.lt.s32.totalorder %s93_s20, %s93_s20 }
  0x81   :  { %p8158_p3 = scmp.ne.s32.totalorder %s93_s20, %s8157_s13  ;;  %p8163_p5 = scmp.lt.s32.totalorder %s8157_s13, %s8157_s13 }
  0x83   :  { %p8164_p6 = por %p8163_p5, %p8162_p4 }
  0x85   :  { %p8165_p7 = pnand %p8164_p6, %p8158_p3 }
  0x87   :  { %8168 = shalt.err (!%p8165_p7)
}
  0x88   :  { %95 = dma.hbm_to_vmem [thread:$0]  %s8556_s6, 32, %s93_s20, [#allocation12]  }
  0x89   :  { %s8241_s15 = smov [#allocation16]   ;;  %s8169_s17 = scalar_lea.hbm %s8558_s8, 16 }
  0x8a   :  { %s114_s5 = sshll.u32 %s8241_s15, 4  ;;  %p8170_p8 = scmp.ne.s32.totalorder %s8558_s8, %s8169_s17  ;;  %s115_s5 = int_to_ptr.vmem [resolvable:$true] %s114_s5 }
  0x8b   :  { %p8173_p9 = scmp.lt.u32.totalorder %s8169_s17, %s8558_s8 }
  0x8d   :  { %p8175_p10 = pnand %p8173_p9, %p8170_p8 }
  0x8f   :  { %8178 = shalt.err (!%p8175_p10)
}
  0x90   :  { %s8179_s25 = scalar_lea.vmem %s115_s5, 16  ;;  %s8183_s6 = scalar_lea.vmem %s115_s5, 32 }
  0x91   :  { %p8180_p11 = scmp.ne.s32.totalorder %s115_s5, %s8179_s25  ;;  %p8184_p12 = scmp.lt.s32.totalorder %s115_s5, %s115_s5 }
  0x92   :  { %p8185_p13 = scmp.lt.s32.totalorder %s8183_s6, %s8179_s25 }
  0x94   :  { %p8186_p0 = por %p8185_p13, %p8184_p12 }
  0x96   :  { %p8187_p1 = pnand %p8186_p0, %p8180_p11 }
  0x98   :  { %8190 = shalt.err (!%p8187_p1)
}
  0x99   :  { %117 = dma.hbm_to_vmem [thread:$0]  %s8558_s8, 16, %s115_s5, [#allocation15]  }
  0x9a   :  { %8213 = dma.done.wait [#allocation3], 1024  }
  0x9b   :  { %8214 = vsyncadd [#allocation3], 4294966272 }
  0x9c   :  { %8215 = dma.done.wait [#allocation6], 65664  }
  0x9d   :  { %8216 = vsyncadd [#allocation6], 4294901632 }
  0x9e   :  { %8217 = dma.done.wait [#allocation9], 32832  }
  0x9f   :  { %8218 = vsyncadd [#allocation9], 4294934464 }
  0xa0   :  { %8219 = dma.done.wait [#allocation12], 8224  }
  0xa1   :  { %8220 = vsyncadd [#allocation12], 4294959072 }
  0xa2   :  { %8221 = dma.done.wait [#allocation15], 2064  }
  0xa3   :  { %8222 = vsyncadd [#allocation15], 4294965232  ;;  %v162_v0 = vld [vmem:[#allocation5] sm:$0xff]  ;;  %v147_v53 = vld [vmem:[#allocation2 + $0x8] sm:$0xff]  ;;  %s8242_s8 = smov [#allocation17]  }
  0xa4   :  { %v166_v1 = vld [vmem:[#allocation5 + $0x20] sm:$0xff]  ;;  %v8401_v57 = vpack.c.bf16 %v147_v53, %v147_v53  ;;  %v149_v58 = vld [vmem:[#allocation2 + $0x18] sm:$0xff]  ;;  %s6506_s24 = sshll.u32 %s8242_s8, 4  ;;  %s6507_s24 = int_to_ptr.vmem [resolvable:$true] %s6506_s24 }
  0xa5   :  { %v290_v2 = vld [vmem:[#allocation5 + $0x400] sm:$0xff]  ;;  %v6520_v3 = vcombine.high %v162_v0, %v166_v1  ;;  %v6519_v5 = vcombine.low %v162_v0, %v166_v1  ;;  %v8403_v61 = vpack.c.bf16 %v149_v58, %v149_v58  ;;  %s8191_s26 = scalar_lea.vmem %s6507_s24, 128  ;;  %p8196_p3 = scmp.lt.s32.totalorder %s6507_s24, %s6507_s24 }
  0xa6   :  { %v294_v4 = vld [vmem:[#allocation5 + $0x420] sm:$0xff]  ;;  %3308 = vmatprep.mubr.bf16.mxu1 %v8401_v57  ;;  %p8192_p2 = scmp.ne.s32.totalorder %s6507_s24, %s8191_s26  ;;  %p8197_p4 = scmp.lt.s32.totalorder %s8191_s26, %s8191_s26 }
  0xa7   :  { %v170_v6 = vld [vmem:[#allocation5 + $0x40] sm:$0xff]  ;;  %v6648_v8 = vcombine.high %v290_v2, %v294_v4  ;;  %v6647_v9 = vcombine.low %v290_v2, %v294_v4  ;;  %3276 = vmatprep.subr.bf16.mxu1 %v6520_v3  ;;  %3349 = vmatprep.mubr.bf16.mxu0 %v8403_v61 }
  0xa8   :  { %v174_v7 = vld [vmem:[#allocation5 + $0x60] sm:$0xff]  ;;  %3277 = vmatpush1.bf16.msra.mxu1 %v6519_v5  ;;  %p8198_p5 = por %p8197_p4, %p8196_p3 }
  0xa9   :  { %v6528_v10 = vcombine.high %v170_v6, %v174_v7  ;;  %v298_v11 = vld [vmem:[#allocation5 + $0x440] sm:$0xff]  ;;  %3317 = vmatprep.subr.bf16.mxu0 %v6648_v8  ;;  %v6527_v18 = vcombine.low %v170_v6, %v174_v7 }
  0xaa   :  { %v302_v12 = vld [vmem:[#allocation5 + $0x460] sm:$0xff]  ;;  %3318 = vmatpush1.bf16.msra.mxu0 %v6647_v9  ;;  %p8199_p6 = pnand %p8198_p5, %p8192_p2 }
  0xab   :  { %v178_v13 = vld [vmem:[#allocation5 + $0x80] sm:$0xff]  ;;  %v6656_v14 = vcombine.high %v298_v11, %v302_v12  ;;  %3278 = vmatprep.subr.bf16.mxu1 %v6528_v10  ;;  %v6655_v19 = vcombine.low %v298_v11, %v302_v12 }
  0xac   :  { %v182_v15 = vld [vmem:[#allocation5 + $0xa0] sm:$0xff]  ;;  %3279 = vmatpush1.bf16.msra.mxu1 %v6527_v18 }
  0xad   :  { %v306_v16 = vld [vmem:[#allocation5 + $0x480] sm:$0xff]  ;;  %v6536_v20 = vcombine.high %v178_v13, %v182_v15  ;;  %3319 = vmatprep.subr.bf16.mxu0 %v6656_v14  ;;  %v6535_v26 = vcombine.low %v178_v13, %v182_v15 }
  0xae   :  { %v310_v17 = vld [vmem:[#allocation5 + $0x4a0] sm:$0xff]  ;;  %3320 = vmatpush1.bf16.msra.mxu0 %v6655_v19 }
  0xaf   :  { %v6664_v21 = vcombine.high %v306_v16, %v310_v17  ;;  %v186_v22 = vld [vmem:[#allocation5 + $0xc0] sm:$0xff]  ;;  %3280 = vmatprep.subr.bf16.mxu1 %v6536_v20  ;;  %v6663_v27 = vcombine.low %v306_v16, %v310_v17 }
  0xb0   :  { %v190_v23 = vld [vmem:[#allocation5 + $0xe0] sm:$0xff]  ;;  %3281 = vmatpush1.bf16.msra.mxu1 %v6535_v26 }
  0xb1   :  { %v314_v24 = vld [vmem:[#allocation5 + $0x4c0] sm:$0xff]  ;;  %v6544_v28 = vcombine.high %v186_v22, %v190_v23  ;;  %3321 = vmatprep.subr.bf16.mxu0 %v6664_v21  ;;  %v6543_v34 = vcombine.low %v186_v22, %v190_v23 }
  0xb2   :  { %v318_v25 = vld [vmem:[#allocation5 + $0x4e0] sm:$0xff]  ;;  %3322 = vmatpush1.bf16.msra.mxu0 %v6663_v27 }
  0xb3   :  { %v6672_v29 = vcombine.high %v314_v24, %v318_v25  ;;  %v194_v30 = vld [vmem:[#allocation5 + $0x100] sm:$0xff]  ;;  %3282 = vmatprep.subr.bf16.mxu1 %v6544_v28  ;;  %v6671_v35 = vcombine.low %v314_v24, %v318_v25 }
  0xb4   :  { %v198_v31 = vld [vmem:[#allocation5 + $0x120] sm:$0xff]  ;;  %3283 = vmatpush1.bf16.msra.mxu1 %v6543_v34 }
  0xb5   :  { %v322_v32 = vld [vmem:[#allocation5 + $0x500] sm:$0xff]  ;;  %v6552_v36 = vcombine.high %v194_v30, %v198_v31  ;;  %3323 = vmatprep.subr.bf16.mxu0 %v6672_v29  ;;  %v6551_v42 = vcombine.low %v194_v30, %v198_v31 }
  0xb6   :  { %v326_v33 = vld [vmem:[#allocation5 + $0x520] sm:$0xff]  ;;  %3324 = vmatpush1.bf16.msra.mxu0 %v6671_v35 }
  0xb7   :  { %v6680_v37 = vcombine.high %v322_v32, %v326_v33  ;;  %v202_v38 = vld [vmem:[#allocation5 + $0x140] sm:$0xff]  ;;  %3284 = vmatprep.subr.bf16.mxu1 %v6552_v36  ;;  %v6679_v43 = vcombine.low %v322_v32, %v326_v33 }
  0xb8   :  { %v206_v39 = vld [vmem:[#allocation5 + $0x160] sm:$0xff]  ;;  %3285 = vmatpush1.bf16.msra.mxu1 %v6551_v42 }
  0xb9   :  { %v330_v40 = vld [vmem:[#allocation5 + $0x540] sm:$0xff]  ;;  %v6560_v44 = vcombine.high %v202_v38, %v206_v39  ;;  %3325 = vmatprep.subr.bf16.mxu0 %v6680_v37  ;;  %v6559_v50 = vcombine.low %v202_v38, %v206_v39 }
  0xba   :  { %v334_v41 = vld [vmem:[#allocation5 + $0x560] sm:$0xff]  ;;  %3326 = vmatpush1.bf16.msra.mxu0 %v6679_v43 }
  0xbb   :  { %v6688_v45 = vcombine.high %v330_v40, %v334_v41  ;;  %v210_v46 = vld [vmem:[#allocation5 + $0x180] sm:$0xff]  ;;  %3286 = vmatprep.subr.bf16.mxu1 %v6560_v44  ;;  %v6687_v51 = vcombine.low %v330_v40, %v334_v41 }
  0xbc   :  { %v214_v47 = vld [vmem:[#allocation5 + $0x1a0] sm:$0xff]  ;;  %3287 = vmatpush1.bf16.msra.mxu1 %v6559_v50 }
  0xbd   :  { %v338_v48 = vld [vmem:[#allocation5 + $0x580] sm:$0xff]  ;;  %v6568_v52 = vcombine.high %v210_v46, %v214_v47  ;;  %3327 = vmatprep.subr.bf16.mxu0 %v6688_v45  ;;  %v6567_v62 = vcombine.low %v210_v46, %v214_v47 }
  0xbe   :  { %v342_v49 = vld [vmem:[#allocation5 + $0x5a0] sm:$0xff]  ;;  %3328 = vmatpush1.bf16.msra.mxu0 %v6687_v51 }
  0xbf   :  { %v6696_v54 = vcombine.high %v338_v48, %v342_v49  ;;  %v218_v55 = vld [vmem:[#allocation5 + $0x1c0] sm:$0xff]  ;;  %3288 = vmatprep.subr.bf16.mxu1 %v6568_v52  ;;  %v6695_v63 = vcombine.low %v338_v48, %v342_v49 }
  0xc0   :  { %v222_v56 = vld [vmem:[#allocation5 + $0x1e0] sm:$0xff]  ;;  %3289 = vmatpush1.bf16.msra.mxu1 %v6567_v62 }
  0xc1   :  { %v346_v59 = vld [vmem:[#allocation5 + $0x5c0] sm:$0xff]  ;;  %v6576_v0 = vcombine.high %v218_v55, %v222_v56  ;;  %3329 = vmatprep.subr.bf16.mxu0 %v6696_v54  ;;  %v6575_v6 = vcombine.low %v218_v55, %v222_v56 }
  0xc2   :  { %v350_v60 = vld [vmem:[#allocation5 + $0x5e0] sm:$0xff]  ;;  %3330 = vmatpush1.bf16.msra.mxu0 %v6695_v63 }
  0xc3   :  { %v6704_v1 = vcombine.high %v346_v59, %v350_v60  ;;  %v226_v2 = vld [vmem:[#allocation5 + $0x200] sm:$0xff]  ;;  %3290 = vmatprep.subr.bf16.mxu1 %v6576_v0  ;;  %v6703_v7 = vcombine.low %v346_v59, %v350_v60 }
  0xc4   :  { %v230_v3 = vld [vmem:[#allocation5 + $0x220] sm:$0xff]  ;;  %3291 = vmatpush1.bf16.msra.mxu1 %v6575_v6 }
  0xc5   :  { %v354_v4 = vld [vmem:[#allocation5 + $0x600] sm:$0xff]  ;;  %v6584_v8 = vcombine.high %v226_v2, %v230_v3  ;;  %3331 = vmatprep.subr.bf16.mxu0 %v6704_v1  ;;  %v6583_v14 = vcombine.low %v226_v2, %v230_v3 }
  0xc6   :  { %v358_v5 = vld [vmem:[#allocation5 + $0x620] sm:$0xff]  ;;  %3332 = vmatpush1.bf16.msra.mxu0 %v6703_v7 }
  0xc7   :  { %v6712_v9 = vcombine.high %v354_v4, %v358_v5  ;;  %v234_v10 = vld [vmem:[#allocation5 + $0x240] sm:$0xff]  ;;  %3292 = vmatprep.subr.bf16.mxu1 %v6584_v8  ;;  %v6711_v15 = vcombine.low %v354_v4, %v358_v5  ;;  %v163_v4 = vld [vmem:[#allocation5 + $0x8] sm:$0xff] }
  0xc8   :  { %v238_v11 = vld [vmem:[#allocation5 + $0x260] sm:$0xff]  ;;  %3293 = vmatpush1.bf16.msra.mxu1 %v6583_v14  ;;  %v167_v5 = vld [vmem:[#allocation5 + $0x28] sm:$0xff] }
  0xc9   :  { %v362_v12 = vld [vmem:[#allocation5 + $0x640] sm:$0xff]  ;;  %v6592_v16 = vcombine.high %v234_v10, %v238_v11  ;;  %3333 = vmatprep.subr.bf16.mxu0 %v6712_v9  ;;  %v6591_v22 = vcombine.low %v234_v10, %v238_v11  ;;  %v6522_v11 = vcombine.high %v163_v4, %v167_v5  ;;  %v171_v14 = vld [vmem:[#allocation5 + $0x48] sm:$0xff] }
  0xca   :  { %v366_v13 = vld [vmem:[#allocation5 + $0x660] sm:$0xff]  ;;  %3334 = vmatpush1.bf16.msra.mxu0 %v6711_v15  ;;  %v175_v15 = vld [vmem:[#allocation5 + $0x68] sm:$0xff] }
  0xcb   :  { %v6720_v17 = vcombine.high %v362_v12, %v366_v13  ;;  %v242_v18 = vld [vmem:[#allocation5 + $0x280] sm:$0xff]  ;;  %3294 = vmatprep.subr.bf16.mxu1 %v6592_v16  ;;  %v6719_v23 = vcombine.low %v362_v12, %v366_v13  ;;  %v148_v12 = vld [vmem:[#allocation2 + $0x10] sm:$0xff] }
  0xcc   :  { %v246_v19 = vld [vmem:[#allocation5 + $0x2a0] sm:$0xff]  ;;  %3295 = vmatpush1.bf16.msra.mxu1 %v6591_v22 }
  0xcd   :  { %v370_v20 = vld [vmem:[#allocation5 + $0x680] sm:$0xff]  ;;  %v6600_v24 = vcombine.high %v242_v18, %v246_v19  ;;  %3335 = vmatprep.subr.bf16.mxu0 %v6720_v17  ;;  %v6599_v30 = vcombine.low %v242_v18, %v246_v19  ;;  %v151_v19 = vld [vmem:[#allocation2 + $0x28] sm:$0xff] }
  0xce   :  { %v374_v21 = vld [vmem:[#allocation5 + $0x6a0] sm:$0xff]  ;;  %3336 = vmatpush1.bf16.msra.mxu0 %v6719_v23  ;;  %v6530_v23 = vcombine.high %v171_v14, %v175_v15 }
  0xcf   :  { %v6728_v25 = vcombine.high %v370_v20, %v374_v21  ;;  %v250_v26 = vld [vmem:[#allocation5 + $0x2c0] sm:$0xff]  ;;  %3296 = vmatprep.subr.bf16.mxu1 %v6600_v24  ;;  %v6727_v31 = vcombine.low %v370_v20, %v374_v21  ;;  %v6521_v20 = vcombine.low %v163_v4, %v167_v5  ;;  %v8409_v21 = vpack.c.bf16 %v148_v12, %v148_v12  ;;  %v219_v5 = vld [vmem:[#allocation5 + $0x1c8] sm:$0xff] }
  0xd0   :  { %v254_v27 = vld [vmem:[#allocation5 + $0x2e0] sm:$0xff]  ;;  %3297 = vmatpush1.bf16.msra.mxu1 %v6599_v30  ;;  %v6529_v30 = vcombine.low %v171_v14, %v175_v15  ;;  %v231_v15 = vld [vmem:[#allocation5 + $0x228] sm:$0xff] }
  0xd1   :  { %v378_v28 = vld [vmem:[#allocation5 + $0x6c0] sm:$0xff]  ;;  %v6608_v32 = vcombine.high %v250_v26, %v254_v27  ;;  %3337 = vmatprep.subr.bf16.mxu0 %v6728_v25  ;;  %v6607_v38 = vcombine.low %v250_v26, %v254_v27  ;;  %v179_v25 = vld [vmem:[#allocation5 + $0x88] sm:$0xff]  ;;  %v8411_v27 = vpack.c.bf16 %v151_v19, %v151_v19 }
  0xd2   :  { %v382_v29 = vld [vmem:[#allocation5 + $0x6e0] sm:$0xff]  ;;  %3338 = vmatpush1.bf16.msra.mxu0 %v6727_v31  ;;  %v183_v26 = vld [vmem:[#allocation5 + $0xa8] sm:$0xff] }
  0xd3   :  { %v6736_v33 = vcombine.high %v378_v28, %v382_v29  ;;  %v258_v34 = vld [vmem:[#allocation5 + $0x300] sm:$0xff]  ;;  %3298 = vmatprep.subr.bf16.mxu1 %v6608_v32  ;;  %v6735_v39 = vcombine.low %v378_v28, %v382_v29  ;;  %v6538_v32 = vcombine.high %v179_v25, %v183_v26 }
  0xd4   :  { %v262_v35 = vld [vmem:[#allocation5 + $0x320] sm:$0xff]  ;;  %3299 = vmatpush1.bf16.msra.mxu1 %v6607_v38  ;;  %v6537_v38 = vcombine.low %v179_v25, %v183_v26  ;;  %v239_v25 = vld [vmem:[#allocation5 + $0x268] sm:$0xff] }
  0xd5   :  { %v386_v36 = vld [vmem:[#allocation5 + $0x700] sm:$0xff]  ;;  %v6616_v40 = vcombine.high %v258_v34, %v262_v35  ;;  %3339 = vmatprep.subr.bf16.mxu0 %v6736_v33  ;;  %v6615_v46 = vcombine.low %v258_v34, %v262_v35  ;;  %v187_v35 = vld [vmem:[#allocation5 + $0xc8] sm:$0xff] }
  0xd6   :  { %v390_v37 = vld [vmem:[#allocation5 + $0x720] sm:$0xff]  ;;  %3340 = vmatpush1.bf16.msra.mxu0 %v6735_v39 }
  0xd7   :  { %v6744_v41 = vcombine.high %v386_v36, %v390_v37  ;;  %v266_v42 = vld [vmem:[#allocation5 + $0x340] sm:$0xff]  ;;  %3300 = vmatprep.subr.bf16.mxu1 %v6616_v40  ;;  %v6743_v47 = vcombine.low %v386_v36, %v390_v37  ;;  %v191_v37 = vld [vmem:[#allocation5 + $0xe8] sm:$0xff] }
  0xd8   :  { %v270_v43 = vld [vmem:[#allocation5 + $0x360] sm:$0xff]  ;;  %3301 = vmatpush1.bf16.msra.mxu1 %v6615_v46  ;;  %v6546_v40 = vcombine.high %v187_v35, %v191_v37  ;;  %v6545_v46 = vcombine.low %v187_v35, %v191_v37 }
  0xd9   :  { %v394_v44 = vld [vmem:[#allocation5 + $0x740] sm:$0xff]  ;;  %v6624_v48 = vcombine.high %v266_v42, %v270_v43  ;;  %3341 = vmatprep.subr.bf16.mxu0 %v6744_v41  ;;  %v6623_v54 = vcombine.low %v266_v42, %v270_v43  ;;  %v195_v43 = vld [vmem:[#allocation5 + $0x108] sm:$0xff] }
  0xda   :  { %v398_v45 = vld [vmem:[#allocation5 + $0x760] sm:$0xff]  ;;  %3342 = vmatpush1.bf16.msra.mxu0 %v6743_v47 }
  0xdb   :  { %v6752_v49 = vcombine.high %v394_v44, %v398_v45  ;;  %v274_v50 = vld [vmem:[#allocation5 + $0x380] sm:$0xff]  ;;  %3302 = vmatprep.subr.bf16.mxu1 %v6624_v48  ;;  %v6751_v55 = vcombine.low %v394_v44, %v398_v45  ;;  %v199_v45 = vld [vmem:[#allocation5 + $0x128] sm:$0xff] }
  0xdc   :  { %v278_v51 = vld [vmem:[#allocation5 + $0x3a0] sm:$0xff]  ;;  %3303 = vmatpush1.bf16.msra.mxu1 %v6623_v54  ;;  %v6554_v48 = vcombine.high %v195_v43, %v199_v45  ;;  %v6553_v54 = vcombine.low %v195_v43, %v199_v45 }
  0xdd   :  { %v402_v52 = vld [vmem:[#allocation5 + $0x780] sm:$0xff]  ;;  %v6632_v56 = vcombine.high %v274_v50, %v278_v51  ;;  %3343 = vmatprep.subr.bf16.mxu0 %v6752_v49  ;;  %v6631_v0 = vcombine.low %v274_v50, %v278_v51  ;;  %v203_v51 = vld [vmem:[#allocation5 + $0x148] sm:$0xff] }
  0xde   :  { %v406_v53 = vld [vmem:[#allocation5 + $0x7a0] sm:$0xff]  ;;  %3344 = vmatpush1.bf16.msra.mxu0 %v6751_v55 }
  0xdf   :  { %v6760_v58 = vcombine.high %v402_v52, %v406_v53  ;;  %v282_v59 = vld [vmem:[#allocation5 + $0x3c0] sm:$0xff]  ;;  %3304 = vmatprep.subr.bf16.mxu1 %v6632_v56  ;;  %v6759_v1 = vcombine.low %v402_v52, %v406_v53  ;;  %v207_v53 = vld [vmem:[#allocation5 + $0x168] sm:$0xff] }
  0xe0   :  { %v286_v60 = vld [vmem:[#allocation5 + $0x3e0] sm:$0xff]  ;;  %3305 = vmatpush1.bf16.msra.mxu1 %v6631_v0  ;;  %v6562_v56 = vcombine.high %v203_v51, %v207_v53  ;;  %v6561_v0 = vcombine.low %v203_v51, %v207_v53 }
  0xe1   :  { %v410_v62 = vld [vmem:[#allocation5 + $0x7c0] sm:$0xff]  ;;  %v6640_v2 = vcombine.high %v282_v59, %v286_v60  ;;  %3345 = vmatprep.subr.bf16.mxu0 %v6760_v58  ;;  %v6639_v8 = vcombine.low %v282_v59, %v286_v60  ;;  %v211_v60 = vld [vmem:[#allocation5 + $0x188] sm:$0xff] }
  0xe2   :  { %v414_v63 = vld [vmem:[#allocation5 + $0x7e0] sm:$0xff]  ;;  %3346 = vmatpush1.bf16.msra.mxu0 %v6759_v1 }
  0xe3   :  { %v6768_v3 = vcombine.high %v410_v62, %v414_v63  ;;  %v418_v6 = vld [vmem:[#allocation5 + $0x800] sm:$0xff]  ;;  %3306 = vmatprep.subr.bf16.mxu1 %v6640_v2  ;;  %v6767_v10 = vcombine.low %v410_v62, %v414_v63  ;;  %v215_v63 = vld [vmem:[#allocation5 + $0x1a8] sm:$0xff] }
  0xe4   :  { %v422_v7 = vld [vmem:[#allocation5 + $0x820] sm:$0xff]  ;;  %3307 = vmatpush1.bf16.msra.mxu1 %v6639_v8  ;;  %v6570_v2 = vcombine.high %v211_v60, %v215_v63  ;;  %v6569_v8 = vcombine.low %v211_v60, %v215_v63 }
  0xe5   :  { %v146_v9 = vld [vmem:[#allocation2] sm:$0xff]  ;;  %3347 = vmatprep.subr.bf16.mxu0 %v6768_v3  ;;  %v6776_v13 = vcombine.high %v418_v6, %v422_v7  ;;  %v6775_v22 = vcombine.low %v418_v6, %v422_v7  ;;  %3440 = vmatprep.subr.bf16.mxu1 %v6522_v11  ;;  %v223_v7 = vld [vmem:[#allocation5 + $0x1e8] sm:$0xff] }
  0xe6   :  { %v8407_v16 = vpack.c.bf16 %v146_v9, %v146_v9  ;;  %v426_v17 = vld [vmem:[#allocation5 + $0x840] sm:$0xff]  ;;  %3348 = vmatpush1.bf16.msra.mxu0 %v6767_v10  ;;  %v6578_v10 = vcombine.high %v219_v5, %v223_v7 }
  0xe7   :  { %v430_v18 = vld [vmem:[#allocation5 + $0x860] sm:$0xff]  ;;  %3358 = vmatprep.subr.bf16.mxu0 %v6776_v13  ;;  %v227_v13 = vld [vmem:[#allocation5 + $0x208] sm:$0xff] }
  0xe8   :  { %v6784_v24 = vcombine.high %v426_v17, %v430_v18  ;;  %3309 = vmatmul.mubr.bf16.vlgmr.msra.gmra.mrb[0].mxu1 %v8407_v16  ;;  %v434_v28 = vld [vmem:[#allocation5 + $0x880] sm:$0xff]  ;;  %v6783_v31 = vcombine.low %v426_v17, %v430_v18  ;;  %v6577_v17 = vcombine.low %v219_v5, %v223_v7  ;;  %v6586_v19 = vcombine.high %v227_v13, %v231_v15 }
  0xe9   :  { %v438_v29 = vld [vmem:[#allocation5 + $0x8a0] sm:$0xff]  ;;  %3350 = vmatmul.mubr.bf16.vlgmr.msra.gmra.mrb[0].mxu0 %v8409_v21  ;;  %3441 = vmatpush1.bf16.msra.mxu1 %v6521_v20  ;;  %v6585_v26 = vcombine.low %v227_v13, %v231_v15 }
  0xea   :  { %3359 = vmatpush1.bf16.msra.mxu0 %v6775_v22  ;;  %3442 = vmatprep.subr.bf16.mxu1 %v6530_v23  ;;  %v442_v33 = vld [vmem:[#allocation5 + $0x8c0] sm:$0xff]  ;;  %v6792_v36 = vcombine.high %v434_v28, %v438_v29  ;;  %v6791_v39 = vcombine.low %v434_v28, %v438_v29  ;;  %v235_v23 = vld [vmem:[#allocation5 + $0x248] sm:$0xff] }
  0xeb   :  { %v446_v34 = vld [vmem:[#allocation5 + $0x8e0] sm:$0xff]  ;;  %3360 = vmatprep.subr.bf16.mxu0 %v6784_v24  ;;  %3390 = vmatprep.mubr.bf16.mxu0 %v8411_v27  ;;  %v6594_v29 = vcombine.high %v235_v23, %v239_v25  ;;  %v6593_v35 = vcombine.low %v235_v23, %v239_v25 }
  0xec   :  { %3472 = vmatprep.mubr.bf16.mxu1 %v8401_v57  ;;  %v450_v41 = vld [vmem:[#allocation5 + $0x900] sm:$0xff]  ;;  %v6800_v44 = vcombine.high %v442_v33, %v446_v34  ;;  %v6799_v47 = vcombine.low %v442_v33, %v446_v34  ;;  %v247_v34 = vld [vmem:[#allocation5 + $0x2a8] sm:$0xff] }
  0xed   :  { %3443 = vmatpush1.bf16.msra.mxu1 %v6529_v30  ;;  %v454_v42 = vld [vmem:[#allocation5 + $0x920] sm:$0xff] }
  0xee   :  { %3361 = vmatpush1.bf16.msra.mxu0 %v6783_v31  ;;  %3444 = vmatprep.subr.bf16.mxu1 %v6538_v32  ;;  %v458_v49 = vld [vmem:[#allocation5 + $0x940] sm:$0xff]  ;;  %v6808_v52 = vcombine.high %v450_v41, %v454_v42  ;;  %v6807_v55 = vcombine.low %v450_v41, %v454_v42  ;;  %v243_v32 = vld [vmem:[#allocation5 + $0x288] sm:$0xff] }
  0xef   :  { %3362 = vmatprep.subr.bf16.mxu0 %v6792_v36  ;;  %v462_v50 = vld [vmem:[#allocation5 + $0x960] sm:$0xff]  ;;  %v6602_v37 = vcombine.high %v243_v32, %v247_v34  ;;  %v255_v42 = vld [vmem:[#allocation5 + $0x2e8] sm:$0xff]  ;;  %v6601_v43 = vcombine.low %v243_v32, %v247_v34 }
  0xf0   :  { %v466_v58 = vld [vmem:[#allocation5 + $0x980] sm:$0xff]  ;;  %v6816_v62 = vcombine.high %v458_v49, %v462_v50  ;;  %v6815_v1 = vcombine.low %v458_v49, %v462_v50  ;;  %v263_v50 = vld [vmem:[#allocation5 + $0x328] sm:$0xff] }
  0xf1   :  { %3445 = vmatpush1.bf16.msra.mxu1 %v6537_v38  ;;  %v470_v59 = vld [vmem:[#allocation5 + $0x9a0] sm:$0xff] }
  0xf2   :  { %3363 = vmatpush1.bf16.msra.mxu0 %v6791_v39  ;;  %3446 = vmatprep.subr.bf16.mxu1 %v6546_v40  ;;  %v474_v3 = vld [vmem:[#allocation5 + $0x9c0] sm:$0xff]  ;;  %v6824_v6 = vcombine.high %v466_v58, %v470_v59  ;;  %v6823_v9 = vcombine.low %v466_v58, %v470_v59  ;;  %v251_v40 = vld [vmem:[#allocation5 + $0x2c8] sm:$0xff] }
  0xf3   :  { %3364 = vmatprep.subr.bf16.mxu0 %v6800_v44  ;;  %v478_v4 = vld [vmem:[#allocation5 + $0x9e0] sm:$0xff]  ;;  %v6610_v45 = vcombine.high %v251_v40, %v255_v42  ;;  %v6609_v51 = vcombine.low %v251_v40, %v255_v42  ;;  %v271_v59 = vld [vmem:[#allocation5 + $0x368] sm:$0xff] }
  0xf4   :  { %v482_v11 = vld [vmem:[#allocation5 + $0xa00] sm:$0xff]  ;;  %v6832_v14 = vcombine.high %v474_v3, %v478_v4  ;;  %v6831_v18 = vcombine.low %v474_v3, %v478_v4  ;;  %v279_v4 = vld [vmem:[#allocation5 + $0x3a8] sm:$0xff] }
  0xf5   :  { %3447 = vmatpush1.bf16.msra.mxu1 %v6545_v46  ;;  %v486_v12 = vld [vmem:[#allocation5 + $0xa20] sm:$0xff]  ;;  %v307_v40 = vld [vmem:[#allocation5 + $0x488] sm:$0xff] }
  0xf6   :  { %3365 = vmatpush1.bf16.msra.mxu0 %v6799_v47  ;;  %3448 = vmatprep.subr.bf16.mxu1 %v6554_v48  ;;  %v490_v20 = vld [vmem:[#allocation5 + $0xa40] sm:$0xff]  ;;  %v6840_v24 = vcombine.high %v482_v11, %v486_v12  ;;  %v6839_v28 = vcombine.low %v482_v11, %v486_v12  ;;  %v259_v48 = vld [vmem:[#allocation5 + $0x308] sm:$0xff] }
  0xf7   :  { %3366 = vmatprep.subr.bf16.mxu0 %v6808_v52  ;;  %v494_v22 = vld [vmem:[#allocation5 + $0xa60] sm:$0xff]  ;;  %v6618_v53 = vcombine.high %v259_v48, %v263_v50  ;;  %v6617_v60 = vcombine.low %v259_v48, %v263_v50  ;;  %v287_v12 = vld [vmem:[#allocation5 + $0x3e8] sm:$0xff] }
  0xf8   :  { %v498_v30 = vld [vmem:[#allocation5 + $0xa80] sm:$0xff]  ;;  %v6848_v33 = vcombine.high %v490_v20, %v494_v22  ;;  %v6847_v36 = vcombine.low %v490_v20, %v494_v22  ;;  %v295_v22 = vld [vmem:[#allocation5 + $0x428] sm:$0xff] }
  0xf9   :  { %3449 = vmatpush1.bf16.msra.mxu1 %v6553_v54  ;;  %v502_v31 = vld [vmem:[#allocation5 + $0xaa0] sm:$0xff]  ;;  %v311_v42 = vld [vmem:[#allocation5 + $0x4a8] sm:$0xff] }
  0xfa   :  { %3367 = vmatpush1.bf16.msra.mxu0 %v6807_v55  ;;  %3450 = vmatprep.subr.bf16.mxu1 %v6562_v56  ;;  %v506_v38 = vld [vmem:[#allocation5 + $0xac0] sm:$0xff]  ;;  %v6856_v41 = vcombine.high %v498_v30, %v502_v31  ;;  %v6855_v44 = vcombine.low %v498_v30, %v502_v31  ;;  %v267_v56 = vld [vmem:[#allocation5 + $0x348] sm:$0xff] }
  0xfb   :  { %3368 = vmatprep.subr.bf16.mxu0 %v6816_v62  ;;  %v510_v39 = vld [vmem:[#allocation5 + $0xae0] sm:$0xff]  ;;  %v6626_v63 = vcombine.high %v267_v56, %v271_v59  ;;  %v6625_v5 = vcombine.low %v267_v56, %v271_v59  ;;  %v299_v30 = vld [vmem:[#allocation5 + $0x448] sm:$0xff] }
  0xfc   :  { %v514_v46 = vld [vmem:[#allocation5 + $0xb00] sm:$0xff]  ;;  %v6864_v49 = vcombine.high %v506_v38, %v510_v39  ;;  %v6863_v52 = vcombine.low %v506_v38, %v510_v39  ;;  %v303_v31 = vld [vmem:[#allocation5 + $0x468] sm:$0xff] }
  0xfd   :  { %3451 = vmatpush1.bf16.msra.mxu1 %v6561_v0  ;;  %v518_v47 = vld [vmem:[#allocation5 + $0xb20] sm:$0xff] }
  0xfe   :  { %3369 = vmatpush1.bf16.msra.mxu0 %v6815_v1  ;;  %3452 = vmatprep.subr.bf16.mxu1 %v6570_v2  ;;  %v522_v54 = vld [vmem:[#allocation5 + $0xb40] sm:$0xff]  ;;  %v6872_v58 = vcombine.high %v514_v46, %v518_v47  ;;  %v6871_v62 = vcombine.low %v514_v46, %v518_v47  ;;  %v275_v2 = vld [vmem:[#allocation5 + $0x388] sm:$0xff]  ;;  %v6666_v46 = vcombine.high %v307_v40, %v311_v42 }
  0xff   :  { %3370 = vmatprep.subr.bf16.mxu0 %v6824_v6  ;;  %v526_v55 = vld [vmem:[#allocation5 + $0xb60] sm:$0xff]  ;;  %v6634_v7 = vcombine.high %v275_v2, %v279_v4  ;;  %v6633_v13 = vcombine.low %v275_v2, %v279_v4 }
 0x100   :  { %v530_v0 = vld [vmem:[#allocation5 + $0xb80] sm:$0xff]  ;;  %v6880_v3 = vcombine.high %v522_v54, %v526_v55  ;;  %v6879_v6 = vcombine.low %v522_v54, %v526_v55 }
 0x101   :  { %3453 = vmatpush1.bf16.msra.mxu1 %v6569_v8  ;;  %v534_v1 = vld [vmem:[#allocation5 + $0xba0] sm:$0xff] }
 0x102   :  { %3371 = vmatpush1.bf16.msra.mxu0 %v6823_v9  ;;  %3454 = vmatprep.subr.bf16.mxu1 %v6578_v10  ;;  %v538_v8 = vld [vmem:[#allocation5 + $0xbc0] sm:$0xff]  ;;  %v283_v10 = vld [vmem:[#allocation5 + $0x3c8] sm:$0xff]  ;;  %v6888_v11 = vcombine.high %v530_v0, %v534_v1 }
 0x103   :  { %3372 = vmatprep.subr.bf16.mxu0 %v6832_v14  ;;  %v542_v9 = vld [vmem:[#allocation5 + $0xbe0] sm:$0xff]  ;;  %v6887_v14 = vcombine.low %v530_v0, %v534_v1  ;;  %v6642_v15 = vcombine.high %v283_v10, %v287_v12 }
 0x104   :  { %v6896_v20 = vcombine.high %v538_v8, %v542_v9  ;;  %v150_v23 = vld [vmem:[#allocation2 + $0x20] sm:$0xff]  ;;  %v6895_v25 = vcombine.low %v538_v8, %v542_v9 }
 0x105   :  { %3455 = vmatpush1.bf16.msra.mxu1 %v6577_v17  ;;  %v546_v17 = vld [vmem:[#allocation5 + $0xc00] sm:$0xff] }
 0x106   :  { %3373 = vmatpush1.bf16.msra.mxu0 %v6831_v18  ;;  %3456 = vmatprep.subr.bf16.mxu1 %v6586_v19  ;;  %v550_v18 = vld [vmem:[#allocation5 + $0xc20] sm:$0xff]  ;;  %v291_v19 = vld [vmem:[#allocation5 + $0x408] sm:$0xff] }
 0x107   :  { %3374 = vmatprep.subr.bf16.mxu0 %v6840_v24  ;;  %v6641_v24 = vcombine.low %v283_v10, %v287_v12  ;;  %v6904_v32 = vcombine.high %v546_v17, %v550_v18  ;;  %v6649_v34 = vcombine.low %v291_v19, %v295_v22  ;;  %v562_v38 = vld [vmem:[#allocation5 + $0xc80] sm:$0xff] }
 0x108   :  { %v566_v39 = vld [vmem:[#allocation5 + $0xca0] sm:$0xff] }
 0x109   :  { %3457 = vmatpush1.bf16.msra.mxu1 %v6585_v26  ;;  %v6650_v26 = vcombine.high %v291_v19, %v295_v22  ;;  %v570_v47 = vld [vmem:[#allocation5 + $0xcc0] sm:$0xff]  ;;  %v6920_v50 = vcombine.high %v562_v38, %v566_v39  ;;  %v347_v22 = vld [vmem:[#allocation5 + $0x5c8] sm:$0xff] }
 0x10a   :  { %3375 = vmatpush1.bf16.msra.mxu0 %v6839_v28  ;;  %3458 = vmatprep.subr.bf16.mxu1 %v6594_v29  ;;  %v554_v28 = vld [vmem:[#allocation5 + $0xc40] sm:$0xff] }
 0x10b   :  { %3376 = vmatprep.subr.bf16.mxu0 %v6848_v33  ;;  %v558_v29 = vld [vmem:[#allocation5 + $0xc60] sm:$0xff]  ;;  %v153_v33 = vld [vmem:[#allocation2 + $0x38] sm:$0xff] }
 0x10c   :  { %v574_v48 = vld [vmem:[#allocation5 + $0xce0] sm:$0xff] }
 0x10d   :  { %3459 = vmatpush1.bf16.msra.mxu1 %v6593_v35  ;;  %v8417_v35 = vpack.c.bf16 %v150_v23, %v150_v23  ;;  %v578_v55 = vld [vmem:[#allocation5 + $0xd00] sm:$0xff]  ;;  %v6928_v59 = vcombine.high %v570_v47, %v574_v48  ;;  %v351_v23 = vld [vmem:[#allocation5 + $0x5e8] sm:$0xff] }
 0x10e   :  { %3377 = vmatpush1.bf16.msra.mxu0 %v6847_v36  ;;  %3460 = vmatprep.subr.bf16.mxu1 %v6602_v37  ;;  %v6903_v36 = vcombine.low %v546_v17, %v550_v18  ;;  %v6658_v37 = vcombine.high %v299_v30, %v303_v31  ;;  %v582_v56 = vld [vmem:[#allocation5 + $0xd20] sm:$0xff] }
 0x10f   :  { %3378 = vmatprep.subr.bf16.mxu0 %v6856_v41  ;;  %v6912_v41 = vcombine.high %v554_v28, %v558_v29  ;;  %v586_v1 = vld [vmem:[#allocation5 + $0xd40] sm:$0xff]  ;;  %v6936_v4 = vcombine.high %v578_v55, %v582_v56 }
 0x110   :  { %v590_v2 = vld [vmem:[#allocation5 + $0xd60] sm:$0xff] }
 0x111   :  { %3461 = vmatpush1.bf16.msra.mxu1 %v6601_v43  ;;  %v8419_v43 = vpack.c.bf16 %v153_v33, %v153_v33  ;;  %v594_v9 = vld [vmem:[#allocation5 + $0xd80] sm:$0xff]  ;;  %v6944_v12 = vcombine.high %v586_v1, %v590_v2  ;;  %v6705_v33 = vcombine.low %v347_v22, %v351_v23 }
 0x112   :  { %3379 = vmatpush1.bf16.msra.mxu0 %v6855_v44  ;;  %3462 = vmatprep.subr.bf16.mxu1 %v6610_v45  ;;  %v6657_v44 = vcombine.low %v299_v30, %v303_v31  ;;  %v6911_v45 = vcombine.low %v554_v28, %v558_v29  ;;  %v598_v10 = vld [vmem:[#allocation5 + $0xda0] sm:$0xff]  ;;  %v355_v30 = vld [vmem:[#allocation5 + $0x608] sm:$0xff] }
 0x113   :  { %3380 = vmatprep.subr.bf16.mxu0 %v6864_v49  ;;  %v315_v49 = vld [vmem:[#allocation5 + $0x4c8] sm:$0xff]  ;;  %v602_v18 = vld [vmem:[#allocation5 + $0xdc0] sm:$0xff] }
 0x114   :  { %v606_v19 = vld [vmem:[#allocation5 + $0xde0] sm:$0xff] }
 0x115   :  { %3463 = vmatpush1.bf16.msra.mxu1 %v6609_v51  ;;  %v319_v51 = vld [vmem:[#allocation5 + $0x4e8] sm:$0xff]  ;;  %v610_v28 = vld [vmem:[#allocation5 + $0xe00] sm:$0xff]  ;;  %v6960_v31 = vcombine.high %v602_v18, %v606_v19 }
 0x116   :  { %3381 = vmatpush1.bf16.msra.mxu0 %v6863_v52  ;;  %3464 = vmatprep.subr.bf16.mxu1 %v6618_v53  ;;  %v6665_v52 = vcombine.low %v307_v40, %v311_v42  ;;  %v6919_v53 = vcombine.low %v562_v38, %v566_v39  ;;  %v6674_v54 = vcombine.high %v315_v49, %v319_v51  ;;  %v614_v29 = vld [vmem:[#allocation5 + $0xe20] sm:$0xff]  ;;  %v363_v39 = vld [vmem:[#allocation5 + $0x648] sm:$0xff] }
 0x117   :  { %3382 = vmatprep.subr.bf16.mxu0 %v6872_v58  ;;  %v323_v58 = vld [vmem:[#allocation5 + $0x508] sm:$0xff]  ;;  %v622_v38 = vld [vmem:[#allocation5 + $0xe60] sm:$0xff]  ;;  %v6968_v40 = vcombine.high %v610_v28, %v614_v29 }
 0x119   :  { %3465 = vmatpush1.bf16.msra.mxu1 %v6617_v60  ;;  %v327_v60 = vld [vmem:[#allocation5 + $0x528] sm:$0xff] }
 0x11a   :  { %3383 = vmatpush1.bf16.msra.mxu0 %v6871_v62  ;;  %3466 = vmatprep.subr.bf16.mxu1 %v6626_v63  ;;  %v6673_v62 = vcombine.low %v315_v49, %v319_v51  ;;  %v6927_v63 = vcombine.low %v570_v47, %v574_v48  ;;  %v6682_v0 = vcombine.high %v323_v58, %v327_v60  ;;  %v630_v47 = vld [vmem:[#allocation5 + $0xea0] sm:$0xff]  ;;  %v371_v48 = vld [vmem:[#allocation5 + $0x688] sm:$0xff] }
 0x11b   :  { %3384 = vmatprep.subr.bf16.mxu0 %v6880_v3  ;;  %v331_v3 = vld [vmem:[#allocation5 + $0x548] sm:$0xff] }
 0x11d   :  { %3467 = vmatpush1.bf16.msra.mxu1 %v6625_v5  ;;  %v335_v5 = vld [vmem:[#allocation5 + $0x568] sm:$0xff] }
 0x11e   :  { %3385 = vmatpush1.bf16.msra.mxu0 %v6879_v6  ;;  %3468 = vmatprep.subr.bf16.mxu1 %v6634_v7  ;;  %v6681_v6 = vcombine.low %v323_v58, %v327_v60  ;;  %v6935_v7 = vcombine.low %v578_v55, %v582_v56  ;;  %v6690_v8 = vcombine.high %v331_v3, %v335_v5  ;;  %v638_v55 = vld [vmem:[#allocation5 + $0xee0] sm:$0xff]  ;;  %v379_v56 = vld [vmem:[#allocation5 + $0x6c8] sm:$0xff] }
 0x11f   :  { %3386 = vmatprep.subr.bf16.mxu0 %v6888_v11  ;;  %v339_v11 = vld [vmem:[#allocation5 + $0x588] sm:$0xff] }
 0x121   :  { %3469 = vmatpush1.bf16.msra.mxu1 %v6633_v13  ;;  %v343_v13 = vld [vmem:[#allocation5 + $0x5a8] sm:$0xff] }
 0x122   :  { %3387 = vmatpush1.bf16.msra.mxu0 %v6887_v14  ;;  %3470 = vmatprep.subr.bf16.mxu1 %v6642_v15  ;;  %v6689_v14 = vcombine.low %v331_v3, %v335_v5  ;;  %v6943_v15 = vcombine.low %v586_v1, %v590_v2  ;;  %v6698_v17 = vcombine.high %v339_v11, %v343_v13  ;;  %v646_v1 = vld [vmem:[#allocation5 + $0xf20] sm:$0xff]  ;;  %v387_v2 = vld [vmem:[#allocation5 + $0x708] sm:$0xff] }
 0x123   :  { %3388 = vmatprep.subr.bf16.mxu0 %v6896_v20  ;;  %v6952_v20 = vcombine.high %v594_v9, %v598_v10 }
 0x125   :  { %3471 = vmatpush1.bf16.msra.mxu1 %v6641_v24  ;;  %v6697_v24 = vcombine.low %v339_v11, %v343_v13 }
 0x126   :  { %3389 = vmatpush1.bf16.msra.mxu0 %v6895_v25  ;;  %3481 = vmatprep.subr.bf16.mxu1 %v6650_v26  ;;  %v6951_v25 = vcombine.low %v594_v9, %v598_v10  ;;  %v6706_v26 = vcombine.high %v347_v22, %v351_v23  ;;  %v654_v9 = vld [vmem:[#allocation5 + $0xf60] sm:$0xff]  ;;  %v395_v10 = vld [vmem:[#allocation5 + $0x748] sm:$0xff] }
 0x127   :  { %3399 = vmatprep.subr.bf16.mxu0 %v6904_v32  ;;  %v359_v32 = vld [vmem:[#allocation5 + $0x628] sm:$0xff] }
 0x128   :  { %3473 = vmatmul.mubr.bf16.vlgmr.msra.gmra.mrb[4].mxu1 %v8407_v16  ;;  %v6713_v42 = vcombine.low %v355_v30, %v359_v32  ;;  %v407_v22 = vld [vmem:[#allocation5 + $0x7a8] sm:$0xff] }
 0x129   :  { %3391 = vmatmul.mubr.bf16.vlgmr.msra.gmra.mrb[0].mxu0 %v8417_v35  ;;  %3482 = vmatpush1.bf16.msra.mxu1 %v6649_v34  ;;  %v6959_v34 = vcombine.low %v602_v18, %v606_v19  ;;  %v662_v18 = vld [vmem:[#allocation5 + $0xfa0] sm:$0xff]  ;;  %v403_v19 = vld [vmem:[#allocation5 + $0x788] sm:$0xff] }
 0x12a   :  { %3400 = vmatpush1.bf16.msra.mxu0 %v6903_v36  ;;  %3483 = vmatprep.subr.bf16.mxu1 %v6658_v37  ;;  %v6714_v36 = vcombine.high %v355_v30, %v359_v32  ;;  %v618_v37 = vld [vmem:[#allocation5 + $0xe40] sm:$0xff]  ;;  %v6761_v32 = vcombine.low %v403_v19, %v407_v22 }
 0x12b   :  { %3401 = vmatprep.subr.bf16.mxu0 %v6912_v41  ;;  %3431 = vmatprep.mubr.bf16.mxu0 %v8419_v43  ;;  %v367_v41 = vld [vmem:[#allocation5 + $0x668] sm:$0xff]  ;;  %v6976_v49 = vcombine.high %v618_v37, %v622_v38 }
 0x12c   :  { %3513 = vmatprep.mubr.bf16.mxu1 %v8403_v61  ;;  %v6721_v51 = vcombine.low %v363_v39, %v367_v41 }
 0x12d   :  { %3484 = vmatpush1.bf16.msra.mxu1 %v6657_v44  ;;  %v6967_v44 = vcombine.low %v610_v28, %v614_v29  ;;  %v670_v28 = vld [vmem:[#allocation5 + $0xfe0] sm:$0xff]  ;;  %v411_v29 = vld [vmem:[#allocation5 + $0x7c8] sm:$0xff] }
 0x12e   :  { %3402 = vmatpush1.bf16.msra.mxu0 %v6911_v45  ;;  %3485 = vmatprep.subr.bf16.mxu1 %v6666_v46  ;;  %v6722_v45 = vcombine.high %v363_v39, %v367_v41  ;;  %v626_v46 = vld [vmem:[#allocation5 + $0xe80] sm:$0xff]  ;;  %v152_v41 = vld [vmem:[#allocation2 + $0x30] sm:$0xff] }
 0x12f   :  { %3403 = vmatprep.subr.bf16.mxu0 %v6920_v50  ;;  %v375_v50 = vld [vmem:[#allocation5 + $0x6a8] sm:$0xff]  ;;  %v6984_v58 = vcombine.high %v626_v46, %v630_v47 }
 0x130   :  { %v6729_v60 = vcombine.low %v371_v48, %v375_v50 }
 0x131   :  { %3486 = vmatpush1.bf16.msra.mxu1 %v6665_v52  ;;  %v6975_v52 = vcombine.low %v618_v37, %v622_v38  ;;  %v423_v37 = vld [vmem:[#allocation5 + $0x828] sm:$0xff]  ;;  %v164_v38 = vld [vmem:[#allocation5 + $0x10] sm:$0xff] }
 0x132   :  { %3404 = vmatpush1.bf16.msra.mxu0 %v6919_v53  ;;  %3487 = vmatprep.subr.bf16.mxu1 %v6674_v54  ;;  %v6730_v53 = vcombine.high %v371_v48, %v375_v50  ;;  %v634_v54 = vld [vmem:[#allocation5 + $0xec0] sm:$0xff]  ;;  %v172_v48 = vld [vmem:[#allocation5 + $0x50] sm:$0xff] }
 0x133   :  { %3405 = vmatprep.subr.bf16.mxu0 %v6928_v59  ;;  %v383_v59 = vld [vmem:[#allocation5 + $0x6e8] sm:$0xff]  ;;  %v6992_v3 = vcombine.high %v634_v54, %v638_v55  ;;  %v176_v50 = vld [vmem:[#allocation5 + $0x70] sm:$0xff] }
 0x134   :  { %v6737_v5 = vcombine.low %v379_v56, %v383_v59 }
 0x135   :  { %3488 = vmatpush1.bf16.msra.mxu1 %v6673_v62  ;;  %v6983_v62 = vcombine.low %v626_v46, %v630_v47  ;;  %v427_v46 = vld [vmem:[#allocation5 + $0x848] sm:$0xff] }
 0x136   :  { %3406 = vmatpush1.bf16.msra.mxu0 %v6927_v63  ;;  %3489 = vmatprep.subr.bf16.mxu1 %v6682_v0  ;;  %v6738_v63 = vcombine.high %v379_v56, %v383_v59  ;;  %v642_v0 = vld [vmem:[#allocation5 + $0xf00] sm:$0xff]  ;;  %v431_v47 = vld [vmem:[#allocation5 + $0x868] sm:$0xff]  ;;  %v6532_v59 = vcombine.high %v172_v48, %v176_v50 }
 0x137   :  { %3407 = vmatprep.subr.bf16.mxu0 %v6936_v4  ;;  %v391_v4 = vld [vmem:[#allocation5 + $0x728] sm:$0xff]  ;;  %v7000_v11 = vcombine.high %v642_v0, %v646_v1 }
 0x138   :  { %v6745_v13 = vcombine.low %v387_v2, %v391_v4  ;;  %v439_v56 = vld [vmem:[#allocation5 + $0x8a8] sm:$0xff] }
 0x139   :  { %3490 = vmatpush1.bf16.msra.mxu1 %v6681_v6  ;;  %v6991_v6 = vcombine.low %v634_v54, %v638_v55  ;;  %v6786_v54 = vcombine.high %v427_v46, %v431_v47  ;;  %v435_v55 = vld [vmem:[#allocation5 + $0x888] sm:$0xff] }
 0x13a   :  { %3408 = vmatpush1.bf16.msra.mxu0 %v6935_v7  ;;  %3491 = vmatprep.subr.bf16.mxu1 %v6690_v8  ;;  %v6746_v7 = vcombine.high %v387_v2, %v391_v4  ;;  %v650_v8 = vld [vmem:[#allocation5 + $0xf40] sm:$0xff]  ;;  %v447_v2 = vld [vmem:[#allocation5 + $0x8e8] sm:$0xff] }
 0x13b   :  { %3409 = vmatprep.subr.bf16.mxu0 %v6944_v12  ;;  %v399_v12 = vld [vmem:[#allocation5 + $0x768] sm:$0xff] }
 0x13c   :  { %v6753_v23 = vcombine.low %v395_v10, %v399_v12 }
 0x13d   :  { %3492 = vmatpush1.bf16.msra.mxu1 %v6689_v14  ;;  %v6999_v14 = vcombine.low %v642_v0, %v646_v1  ;;  %v6794_v0 = vcombine.high %v435_v55, %v439_v56  ;;  %v443_v1 = vld [vmem:[#allocation5 + $0x8c8] sm:$0xff] }
 0x13e   :  { %3410 = vmatpush1.bf16.msra.mxu0 %v6943_v15  ;;  %3493 = vmatprep.subr.bf16.mxu1 %v6698_v17  ;;  %v6754_v15 = vcombine.high %v395_v10, %v399_v12  ;;  %v658_v17 = vld [vmem:[#allocation5 + $0xf80] sm:$0xff]  ;;  %v455_v10 = vld [vmem:[#allocation5 + $0x928] sm:$0xff] }
 0x13f   :  { %3411 = vmatprep.subr.bf16.mxu0 %v6952_v20  ;;  %v7008_v20 = vcombine.high %v650_v8, %v654_v9  ;;  %v7016_v30 = vcombine.high %v658_v17, %v662_v18 }
 0x141   :  { %3494 = vmatpush1.bf16.msra.mxu1 %v6697_v24  ;;  %v7007_v24 = vcombine.low %v650_v8, %v654_v9  ;;  %v6802_v8 = vcombine.high %v443_v1, %v447_v2  ;;  %v451_v9 = vld [vmem:[#allocation5 + $0x908] sm:$0xff] }
 0x142   :  { %3412 = vmatpush1.bf16.msra.mxu0 %v6951_v25  ;;  %3495 = vmatprep.subr.bf16.mxu1 %v6706_v26  ;;  %v6762_v25 = vcombine.high %v403_v19, %v407_v22  ;;  %v666_v26 = vld [vmem:[#allocation5 + $0xfc0] sm:$0xff]  ;;  %v463_v19 = vld [vmem:[#allocation5 + $0x968] sm:$0xff] }
 0x143   :  { %3413 = vmatprep.subr.bf16.mxu0 %v6960_v31  ;;  %v415_v31 = vld [vmem:[#allocation5 + $0x7e8] sm:$0xff]  ;;  %v7024_v39 = vcombine.high %v666_v26, %v670_v28 }
 0x145   :  { %3496 = vmatpush1.bf16.msra.mxu1 %v6705_v33  ;;  %v7015_v33 = vcombine.low %v658_v17, %v662_v18  ;;  %v6810_v17 = vcombine.high %v451_v9, %v455_v10  ;;  %v459_v18 = vld [vmem:[#allocation5 + $0x948] sm:$0xff] }
 0x146   :  { %3414 = vmatpush1.bf16.msra.mxu0 %v6959_v34  ;;  %3497 = vmatprep.subr.bf16.mxu1 %v6714_v36  ;;  %v6770_v34 = vcombine.high %v411_v29, %v415_v31  ;;  %v419_v36 = vld [vmem:[#allocation5 + $0x808] sm:$0xff] }
 0x147   :  { %3415 = vmatprep.subr.bf16.mxu0 %v6968_v40  ;;  %v168_v40 = vld [vmem:[#allocation5 + $0x30] sm:$0xff] }
 0x149   :  { %3498 = vmatpush1.bf16.msra.mxu1 %v6713_v42  ;;  %v6769_v42 = vcombine.low %v411_v29, %v415_v31  ;;  %v471_v29 = vld [vmem:[#allocation5 + $0x9a8] sm:$0xff] }
 0x14a   :  { %3416 = vmatpush1.bf16.msra.mxu0 %v6967_v44  ;;  %3499 = vmatprep.subr.bf16.mxu1 %v6722_v45  ;;  %v7023_v44 = vcombine.low %v666_v26, %v670_v28  ;;  %v6778_v45 = vcombine.high %v419_v36, %v423_v37  ;;  %v6818_v26 = vcombine.high %v459_v18, %v463_v19  ;;  %v467_v28 = vld [vmem:[#allocation5 + $0x988] sm:$0xff] }
 0x14b   :  { %3417 = vmatprep.subr.bf16.mxu0 %v6976_v49  ;;  %v6524_v49 = vcombine.high %v164_v38, %v168_v40 }
 0x14d   :  { %3500 = vmatpush1.bf16.msra.mxu1 %v6721_v51  ;;  %v8425_v51 = vpack.c.bf16 %v152_v41, %v152_v41  ;;  %v224_v41 = vld [vmem:[#allocation5 + $0x1f0] sm:$0xff] }
 0x14e   :  { %3418 = vmatpush1.bf16.msra.mxu0 %v6975_v52  ;;  %3501 = vmatprep.subr.bf16.mxu1 %v6730_v53  ;;  %v6777_v52 = vcombine.low %v419_v36, %v423_v37  ;;  %v6523_v53 = vcombine.low %v164_v38, %v168_v40  ;;  %v6826_v36 = vcombine.high %v467_v28, %v471_v29  ;;  %v475_v37 = vld [vmem:[#allocation5 + $0x9c8] sm:$0xff] }
 0x14f   :  { %3419 = vmatprep.subr.bf16.mxu0 %v6984_v58  ;;  %v180_v58 = vld [vmem:[#allocation5 + $0x90] sm:$0xff]  ;;  %v479_v38 = vld [vmem:[#allocation5 + $0x9e8] sm:$0xff] }
 0x151   :  { %3502 = vmatpush1.bf16.msra.mxu1 %v6729_v60  ;;  %v184_v60 = vld [vmem:[#allocation5 + $0xb0] sm:$0xff] }
 0x152   :  { %3420 = vmatpush1.bf16.msra.mxu0 %v6983_v62  ;;  %3503 = vmatprep.subr.bf16.mxu1 %v6738_v63  ;;  %v6785_v62 = vcombine.low %v427_v46, %v431_v47  ;;  %v6531_v63 = vcombine.low %v172_v48, %v176_v50  ;;  %v6540_v4 = vcombine.high %v180_v58, %v184_v60  ;;  %v483_v46 = vld [vmem:[#allocation5 + $0xa08] sm:$0xff]  ;;  %v228_v48 = vld [vmem:[#allocation5 + $0x210] sm:$0xff] }
 0x153   :  { %3421 = vmatprep.subr.bf16.mxu0 %v6992_v3  ;;  %v188_v3 = vld [vmem:[#allocation5 + $0xd0] sm:$0xff]  ;;  %v487_v47 = vld [vmem:[#allocation5 + $0xa28] sm:$0xff] }
 0x154   :  { %v232_v50 = vld [vmem:[#allocation5 + $0x230] sm:$0xff] }
 0x155   :  { %3504 = vmatpush1.bf16.msra.mxu1 %v6737_v5  ;;  %v192_v5 = vld [vmem:[#allocation5 + $0xf0] sm:$0xff] }
 0x156   :  { %3422 = vmatpush1.bf16.msra.mxu0 %v6991_v6  ;;  %3505 = vmatprep.subr.bf16.mxu1 %v6746_v7  ;;  %v6793_v6 = vcombine.low %v435_v55, %v439_v56  ;;  %v6539_v7 = vcombine.low %v180_v58, %v184_v60  ;;  %v6548_v12 = vcombine.high %v188_v3, %v192_v5  ;;  %v491_v55 = vld [vmem:[#allocation5 + $0xa48] sm:$0xff]  ;;  %v236_v58 = vld [vmem:[#allocation5 + $0x250] sm:$0xff] }
 0x157   :  { %3423 = vmatprep.subr.bf16.mxu0 %v7000_v11  ;;  %v196_v11 = vld [vmem:[#allocation5 + $0x110] sm:$0xff]  ;;  %v495_v56 = vld [vmem:[#allocation5 + $0xa68] sm:$0xff] }
 0x158   :  { %v240_v60 = vld [vmem:[#allocation5 + $0x270] sm:$0xff] }
 0x159   :  { %3506 = vmatpush1.bf16.msra.mxu1 %v6745_v13  ;;  %v200_v13 = vld [vmem:[#allocation5 + $0x130] sm:$0xff] }
 0x15a   :  { %3424 = vmatpush1.bf16.msra.mxu0 %v6999_v14  ;;  %3507 = vmatprep.subr.bf16.mxu1 %v6754_v15  ;;  %v6801_v14 = vcombine.low %v443_v1, %v447_v2  ;;  %v6547_v15 = vcombine.low %v188_v3, %v192_v5  ;;  %v6556_v22 = vcombine.high %v196_v11, %v200_v13  ;;  %v499_v1 = vld [vmem:[#allocation5 + $0xa88] sm:$0xff]  ;;  %v244_v3 = vld [vmem:[#allocation5 + $0x290] sm:$0xff] }
 0x15b   :  { %3425 = vmatprep.subr.bf16.mxu0 %v7008_v20  ;;  %v204_v20 = vld [vmem:[#allocation5 + $0x150] sm:$0xff]  ;;  %v503_v2 = vld [vmem:[#allocation5 + $0xaa8] sm:$0xff] }
 0x15c   :  { %v248_v5 = vld [vmem:[#allocation5 + $0x2b0] sm:$0xff] }
 0x15d   :  { %3508 = vmatpush1.bf16.msra.mxu1 %v6753_v23  ;;  %v208_v23 = vld [vmem:[#allocation5 + $0x170] sm:$0xff] }
 0x15e   :  { %3426 = vmatpush1.bf16.msra.mxu0 %v7007_v24  ;;  %3509 = vmatprep.subr.bf16.mxu1 %v6762_v25  ;;  %v6809_v24 = vcombine.low %v451_v9, %v455_v10  ;;  %v6555_v25 = vcombine.low %v196_v11, %v200_v13  ;;  %v6564_v31 = vcombine.high %v204_v20, %v208_v23  ;;  %v507_v9 = vld [vmem:[#allocation5 + $0xac8] sm:$0xff]  ;;  %v252_v11 = vld [vmem:[#allocation5 + $0x2d0] sm:$0xff] }
 0x15f   :  { %3427 = vmatprep.subr.bf16.mxu0 %v7016_v30  ;;  %v212_v30 = vld [vmem:[#allocation5 + $0x190] sm:$0xff]  ;;  %v511_v10 = vld [vmem:[#allocation5 + $0xae8] sm:$0xff] }
 0x160   :  { %v256_v13 = vld [vmem:[#allocation5 + $0x2f0] sm:$0xff] }
 0x161   :  { %3510 = vmatpush1.bf16.msra.mxu1 %v6761_v32  ;;  %v216_v32 = vld [vmem:[#allocation5 + $0x1b0] sm:$0xff] }
 0x162   :  { %3428 = vmatpush1.bf16.msra.mxu0 %v7015_v33  ;;  %3511 = vmatprep.subr.bf16.mxu1 %v6770_v34  ;;  %v6817_v33 = vcombine.low %v459_v18, %v463_v19  ;;  %v6563_v34 = vcombine.low %v204_v20, %v208_v23  ;;  %v6572_v40 = vcombine.high %v212_v30, %v216_v32  ;;  %v515_v18 = vld [vmem:[#allocation5 + $0xb08] sm:$0xff]  ;;  %v260_v20 = vld [vmem:[#allocation5 + $0x310] sm:$0xff] }
 0x163   :  { %3429 = vmatprep.subr.bf16.mxu0 %v7024_v39  ;;  %v220_v39 = vld [vmem:[#allocation5 + $0x1d0] sm:$0xff]  ;;  %v519_v19 = vld [vmem:[#allocation5 + $0xb28] sm:$0xff] }
 0x164   :  { %v264_v23 = vld [vmem:[#allocation5 + $0x330] sm:$0xff] }
 0x165   :  { %3512 = vmatpush1.bf16.msra.mxu1 %v6769_v42  ;;  %v6825_v42 = vcombine.low %v467_v28, %v471_v29  ;;  %v523_v28 = vld [vmem:[#allocation5 + $0xb48] sm:$0xff] }
 0x166   :  { %3430 = vmatpush1.bf16.msra.mxu0 %v7023_v44  ;;  %3522 = vmatprep.subr.bf16.mxu1 %v6778_v45  ;;  %v6571_v44 = vcombine.low %v212_v30, %v216_v32  ;;  %v6834_v45 = vcombine.high %v475_v37, %v479_v38  ;;  %v527_v29 = vld [vmem:[#allocation5 + $0xb68] sm:$0xff]  ;;  %v268_v30 = vld [vmem:[#allocation5 + $0x350] sm:$0xff] }
 0x167   :  { %3604 = vmatprep.subr.bf16.mxu0 %v6524_v49  ;;  %v6580_v49 = vcombine.high %v220_v39, %v224_v41  ;;  %v272_v32 = vld [vmem:[#allocation5 + $0x370] sm:$0xff] }
 0x168   :  { %3514 = vmatmul.mubr.bf16.vlgmr.msra.gmra.mrb[4].mxu1 %v8409_v21 }
 0x169   :  { %3432 = vmatmul.mubr.bf16.vlgmr.msra.gmra.mrb[0].mxu0 %v8425_v51  ;;  %3523 = vmatpush1.bf16.msra.mxu1 %v6777_v52  ;;  %v6833_v52 = vcombine.low %v475_v37, %v479_v38  ;;  %v531_v37 = vld [vmem:[#allocation5 + $0xb88] sm:$0xff] }
 0x16a   :  { %3605 = vmatpush1.bf16.msra.mxu0 %v6523_v53  ;;  %3524 = vmatprep.subr.bf16.mxu1 %v6786_v54  ;;  %v6579_v53 = vcombine.low %v220_v39, %v224_v41  ;;  %v6842_v54 = vcombine.high %v483_v46, %v487_v47  ;;  %v535_v38 = vld [vmem:[#allocation5 + $0xba8] sm:$0xff]  ;;  %v276_v39 = vld [vmem:[#allocation5 + $0x390] sm:$0xff] }
 0x16b   :  { %3606 = vmatprep.subr.bf16.mxu0 %v6532_v59  ;;  %3554 = vmatprep.mubr.bf16.mxu1 %v8411_v27  ;;  %v6588_v59 = vcombine.high %v228_v48, %v232_v50  ;;  %v280_v41 = vld [vmem:[#allocation5 + $0x3b0] sm:$0xff] }
 0x16c   :  { %3636 = vmatprep.mubr.bf16.mxu0 %v8401_v57 }
 0x16d   :  { %3525 = vmatpush1.bf16.msra.mxu1 %v6785_v62  ;;  %v6841_v62 = vcombine.low %v483_v46, %v487_v47  ;;  %v6636_v46 = vcombine.high %v276_v39, %v280_v41  ;;  %v539_v47 = vld [vmem:[#allocation5 + $0xbc8] sm:$0xff] }
 0x16e   :  { %3607 = vmatpush1.bf16.msra.mxu0 %v6531_v63  ;;  %3526 = vmatprep.subr.bf16.mxu1 %v6794_v0  ;;  %v6587_v63 = vcombine.low %v228_v48, %v232_v50  ;;  %v6850_v0 = vcombine.high %v491_v55, %v495_v56  ;;  %v543_v48 = vld [vmem:[#allocation5 + $0xbe8] sm:$0xff]  ;;  %v288_v50 = vld [vmem:[#allocation5 + $0x3f0] sm:$0xff] }
 0x16f   :  { %3608 = vmatprep.subr.bf16.mxu0 %v6540_v4  ;;  %v6596_v4 = vcombine.high %v236_v58, %v240_v60 }
 0x171   :  { %3527 = vmatpush1.bf16.msra.mxu1 %v6793_v6  ;;  %v6849_v6 = vcombine.low %v491_v55, %v495_v56  ;;  %v547_v56 = vld [vmem:[#allocation5 + $0xc08] sm:$0xff] }
 0x172   :  { %3609 = vmatpush1.bf16.msra.mxu0 %v6539_v7  ;;  %3528 = vmatprep.subr.bf16.mxu1 %v6802_v8  ;;  %v6595_v7 = vcombine.low %v236_v58, %v240_v60  ;;  %v6858_v8 = vcombine.high %v499_v1, %v503_v2  ;;  %v551_v58 = vld [vmem:[#allocation5 + $0xc28] sm:$0xff]  ;;  %v296_v60 = vld [vmem:[#allocation5 + $0x430] sm:$0xff] }
 0x173   :  { %3610 = vmatprep.subr.bf16.mxu0 %v6548_v12  ;;  %v6604_v12 = vcombine.high %v244_v3, %v248_v5 }
 0x175   :  { %3529 = vmatpush1.bf16.msra.mxu1 %v6801_v14  ;;  %v6857_v14 = vcombine.low %v499_v1, %v503_v2  ;;  %v555_v2 = vld [vmem:[#allocation5 + $0xc48] sm:$0xff] }
 0x176   :  { %3611 = vmatpush1.bf16.msra.mxu0 %v6547_v15  ;;  %3530 = vmatprep.subr.bf16.mxu1 %v6810_v17  ;;  %v6603_v15 = vcombine.low %v244_v3, %v248_v5  ;;  %v6866_v17 = vcombine.high %v507_v9, %v511_v10  ;;  %v559_v3 = vld [vmem:[#allocation5 + $0xc68] sm:$0xff]  ;;  %v304_v5 = vld [vmem:[#allocation5 + $0x470] sm:$0xff] }
 0x177   :  { %3612 = vmatprep.subr.bf16.mxu0 %v6556_v22  ;;  %v6612_v22 = vcombine.high %v252_v11, %v256_v13 }
 0x179   :  { %3531 = vmatpush1.bf16.msra.mxu1 %v6809_v24  ;;  %v6865_v24 = vcombine.low %v507_v9, %v511_v10  ;;  %v563_v10 = vld [vmem:[#allocation5 + $0xc88] sm:$0xff] }
 0x17a   :  { %3613 = vmatpush1.bf16.msra.mxu0 %v6555_v25  ;;  %3532 = vmatprep.subr.bf16.mxu1 %v6818_v26  ;;  %v6611_v25 = vcombine.low %v252_v11, %v256_v13  ;;  %v6874_v26 = vcombine.high %v515_v18, %v519_v19  ;;  %v567_v11 = vld [vmem:[#allocation5 + $0xca8] sm:$0xff]  ;;  %v312_v13 = vld [vmem:[#allocation5 + $0x4b0] sm:$0xff] }
 0x17b   :  { %3614 = vmatprep.subr.bf16.mxu0 %v6564_v31  ;;  %v6620_v31 = vcombine.high %v260_v20, %v264_v23 }
 0x17d   :  { %3533 = vmatpush1.bf16.msra.mxu1 %v6817_v33  ;;  %v6873_v33 = vcombine.low %v515_v18, %v519_v19  ;;  %v571_v19 = vld [vmem:[#allocation5 + $0xcc8] sm:$0xff] }
 0x17e   :  { %3615 = vmatpush1.bf16.msra.mxu0 %v6563_v34  ;;  %3534 = vmatprep.subr.bf16.mxu1 %v6826_v36  ;;  %v6619_v34 = vcombine.low %v260_v20, %v264_v23  ;;  %v6882_v36 = vcombine.high %v523_v28, %v527_v29  ;;  %v575_v20 = vld [vmem:[#allocation5 + $0xce8] sm:$0xff]  ;;  %v320_v23 = vld [vmem:[#allocation5 + $0x4f0] sm:$0xff] }
 0x17f   :  { %3616 = vmatprep.subr.bf16.mxu0 %v6572_v40  ;;  %v6628_v40 = vcombine.high %v268_v30, %v272_v32 }
 0x181   :  { %3535 = vmatpush1.bf16.msra.mxu1 %v6825_v42  ;;  %v6881_v42 = vcombine.low %v523_v28, %v527_v29  ;;  %v579_v29 = vld [vmem:[#allocation5 + $0xd08] sm:$0xff] }
 0x182   :  { %3617 = vmatpush1.bf16.msra.mxu0 %v6571_v44  ;;  %3536 = vmatprep.subr.bf16.mxu1 %v6834_v45  ;;  %v6627_v44 = vcombine.low %v268_v30, %v272_v32  ;;  %v6890_v45 = vcombine.high %v531_v37, %v535_v38  ;;  %v583_v30 = vld [vmem:[#allocation5 + $0xd28] sm:$0xff]  ;;  %v328_v32 = vld [vmem:[#allocation5 + $0x530] sm:$0xff] }
 0x183   :  { %3618 = vmatprep.subr.bf16.mxu0 %v6580_v49  ;;  %v284_v49 = vld [vmem:[#allocation5 + $0x3d0] sm:$0xff] }
 0x184   :  { %v6644_v55 = vcombine.high %v284_v49, %v288_v50 }
 0x185   :  { %3537 = vmatpush1.bf16.msra.mxu1 %v6833_v52  ;;  %v6889_v52 = vcombine.low %v531_v37, %v535_v38  ;;  %v587_v38 = vld [vmem:[#allocation5 + $0xd48] sm:$0xff] }
 0x186   :  { %3619 = vmatpush1.bf16.msra.mxu0 %v6579_v53  ;;  %3538 = vmatprep.subr.bf16.mxu1 %v6842_v54  ;;  %v6635_v53 = vcombine.low %v276_v39, %v280_v41  ;;  %v6898_v54 = vcombine.high %v539_v47, %v543_v48  ;;  %v591_v39 = vld [vmem:[#allocation5 + $0xd68] sm:$0xff]  ;;  %v336_v41 = vld [vmem:[#allocation5 + $0x570] sm:$0xff] }
 0x187   :  { %3620 = vmatprep.subr.bf16.mxu0 %v6588_v59  ;;  %v292_v59 = vld [vmem:[#allocation5 + $0x410] sm:$0xff] }
 0x188   :  { %v6652_v1 = vcombine.high %v292_v59, %v296_v60 }
 0x189   :  { %3539 = vmatpush1.bf16.msra.mxu1 %v6841_v62  ;;  %v6897_v62 = vcombine.low %v539_v47, %v543_v48  ;;  %v595_v47 = vld [vmem:[#allocation5 + $0xd88] sm:$0xff] }
 0x18a   :  { %3621 = vmatpush1.bf16.msra.mxu0 %v6587_v63  ;;  %3540 = vmatprep.subr.bf16.mxu1 %v6850_v0  ;;  %v6643_v63 = vcombine.low %v284_v49, %v288_v50  ;;  %v6906_v0 = vcombine.high %v547_v56, %v551_v58  ;;  %v599_v48 = vld [vmem:[#allocation5 + $0xda8] sm:$0xff]  ;;  %v340_v49 = vld [vmem:[#allocation5 + $0x590] sm:$0xff] }
 0x18b   :  { %3622 = vmatprep.subr.bf16.mxu0 %v6596_v4  ;;  %v300_v4 = vld [vmem:[#allocation5 + $0x450] sm:$0xff] }
 0x18c   :  { %v6660_v9 = vcombine.high %v300_v4, %v304_v5  ;;  %v344_v50 = vld [vmem:[#allocation5 + $0x5b0] sm:$0xff] }
 0x18d   :  { %3541 = vmatpush1.bf16.msra.mxu1 %v6849_v6  ;;  %v6905_v6 = vcombine.low %v547_v56, %v551_v58  ;;  %v6700_v56 = vcombine.high %v340_v49, %v344_v50  ;;  %v603_v58 = vld [vmem:[#allocation5 + $0xdc8] sm:$0xff] }
 0x18e   :  { %3623 = vmatpush1.bf16.msra.mxu0 %v6595_v7  ;;  %3542 = vmatprep.subr.bf16.mxu1 %v6858_v8  ;;  %v6651_v7 = vcombine.low %v292_v59, %v296_v60  ;;  %v6914_v8 = vcombine.high %v555_v2, %v559_v3  ;;  %v607_v59 = vld [vmem:[#allocation5 + $0xde8] sm:$0xff] }
 0x18f   :  { %3624 = vmatprep.subr.bf16.mxu0 %v6604_v12  ;;  %v308_v12 = vld [vmem:[#allocation5 + $0x490] sm:$0xff] }
 0x190   :  { %v6668_v18 = vcombine.high %v308_v12, %v312_v13 }
 0x191   :  { %3543 = vmatpush1.bf16.msra.mxu1 %v6857_v14  ;;  %v6913_v14 = vcombine.low %v555_v2, %v559_v3  ;;  %v6699_v3 = vcombine.low %v340_v49, %v344_v50 }
 0x192   :  { %3625 = vmatpush1.bf16.msra.mxu0 %v6603_v15  ;;  %3544 = vmatprep.subr.bf16.mxu1 %v6866_v17  ;;  %v6659_v15 = vcombine.low %v300_v4, %v304_v5  ;;  %v6922_v17 = vcombine.high %v563_v10, %v567_v11  ;;  %v6962_v4 = vcombine.high %v603_v58, %v607_v59 }
 0x193   :  { %3626 = vmatprep.subr.bf16.mxu0 %v6612_v22  ;;  %v316_v22 = vld [vmem:[#allocation5 + $0x4d0] sm:$0xff] }
 0x194   :  { %v6676_v28 = vcombine.high %v316_v22, %v320_v23 }
 0x195   :  { %3545 = vmatpush1.bf16.msra.mxu1 %v6865_v24  ;;  %v6921_v24 = vcombine.low %v563_v10, %v567_v11  ;;  %v6961_v10 = vcombine.low %v603_v58, %v607_v59 }
 0x196   :  { %3627 = vmatpush1.bf16.msra.mxu0 %v6611_v25  ;;  %3546 = vmatprep.subr.bf16.mxu1 %v6874_v26  ;;  %v6667_v25 = vcombine.low %v308_v12, %v312_v13  ;;  %v6930_v26 = vcombine.high %v571_v19, %v575_v20 }
 0x197   :  { %3628 = vmatprep.subr.bf16.mxu0 %v6620_v31  ;;  %v324_v31 = vld [vmem:[#allocation5 + $0x510] sm:$0xff] }
 0x198   :  { %v6684_v37 = vcombine.high %v324_v31, %v328_v32 }
 0x199   :  { %3547 = vmatpush1.bf16.msra.mxu1 %v6873_v33  ;;  %v6929_v33 = vcombine.low %v571_v19, %v575_v20 }
 0x19a   :  { %3629 = vmatpush1.bf16.msra.mxu0 %v6619_v34  ;;  %3548 = vmatprep.subr.bf16.mxu1 %v6882_v36  ;;  %v6675_v34 = vcombine.low %v316_v22, %v320_v23  ;;  %v6938_v36 = vcombine.high %v579_v29, %v583_v30 }
 0x19b   :  { %3630 = vmatprep.subr.bf16.mxu0 %v6628_v40  ;;  %v332_v40 = vld [vmem:[#allocation5 + $0x550] sm:$0xff] }
 0x19d   :  { %3549 = vmatpush1.bf16.msra.mxu1 %v6881_v42  ;;  %v6937_v42 = vcombine.low %v579_v29, %v583_v30 }
 0x19e   :  { %3631 = vmatpush1.bf16.msra.mxu0 %v6627_v44  ;;  %3550 = vmatprep.subr.bf16.mxu1 %v6890_v45  ;;  %v6683_v44 = vcombine.low %v324_v31, %v328_v32  ;;  %v6946_v45 = vcombine.high %v587_v38, %v591_v39 }
 0x19f   :  { %3632 = vmatprep.subr.bf16.mxu0 %v6636_v46  ;;  %v6692_v46 = vcombine.high %v332_v40, %v336_v41 }
 0x1a1   :  { %3551 = vmatpush1.bf16.msra.mxu1 %v6889_v52  ;;  %v6945_v52 = vcombine.low %v587_v38, %v591_v39 }
 0x1a2   :  { %3633 = vmatpush1.bf16.msra.mxu0 %v6635_v53  ;;  %3552 = vmatprep.subr.bf16.mxu1 %v6898_v54  ;;  %v6691_v53 = vcombine.low %v332_v40, %v336_v41  ;;  %v6954_v54 = vcombine.high %v595_v47, %v599_v48 }
 0x1a3   :  { %3634 = vmatprep.subr.bf16.mxu0 %v6644_v55 }
 0x1a5   :  { %3553 = vmatpush1.bf16.msra.mxu1 %v6897_v62  ;;  %v348_v62 = vld [vmem:[#allocation5 + $0x5d0] sm:$0xff] }
 0x1a6   :  { %3635 = vmatpush1.bf16.msra.mxu0 %v6643_v63  ;;  %3563 = vmatprep.subr.bf16.mxu1 %v6906_v0  ;;  %v352_v63 = vld [vmem:[#allocation5 + $0x5f0] sm:$0xff] }
 0x1a7   :  { %3645 = vmatprep.subr.bf16.mxu0 %v6652_v1  ;;  %v6953_v1 = vcombine.low %v595_v47, %v599_v48  ;;  %v6708_v5 = vcombine.high %v348_v62, %v352_v63  ;;  %v6707_v11 = vcombine.low %v348_v62, %v352_v63 }
 0x1a8   :  { %3555 = vmatmul.mubr.bf16.vlgmr.msra.gmra.mrb[4].mxu1 %v8417_v35 }
 0x1a9   :  { %3564 = vmatpush1.bf16.msra.mxu1 %v6905_v6  ;;  %3637 = vmatmul.mubr.bf16.vlgmr.msra.gmra.mrb[4].mxu0 %v8407_v16  ;;  %v611_v6 = vld [vmem:[#allocation5 + $0xe08] sm:$0xff] }
 0x1aa   :  { %3646 = vmatpush1.bf16.msra.mxu0 %v6651_v7  ;;  %3565 = vmatprep.subr.bf16.mxu1 %v6914_v8  ;;  %v615_v7 = vld [vmem:[#allocation5 + $0xe28] sm:$0xff]  ;;  %v356_v8 = vld [vmem:[#allocation5 + $0x610] sm:$0xff] }
 0x1ab   :  { %3647 = vmatprep.subr.bf16.mxu0 %v6660_v9  ;;  %3595 = vmatprep.mubr.bf16.mxu1 %v8419_v43  ;;  %v360_v9 = vld [vmem:[#allocation5 + $0x630] sm:$0xff]  ;;  %v6970_v12 = vcombine.high %v611_v6, %v615_v7  ;;  %v6969_v19 = vcombine.low %v611_v6, %v615_v7 }
 0x1ac   :  { %3677 = vmatprep.mubr.bf16.mxu0 %v8403_v61  ;;  %v6716_v13 = vcombine.high %v356_v8, %v360_v9  ;;  %v6715_v20 = vcombine.low %v356_v8, %v360_v9  ;;  %v667_v8 = vld [vmem:[#allocation5 + $0xfc8] sm:$0xff] }
 0x1ad   :  { %3566 = vmatpush1.bf16.msra.mxu1 %v6913_v14  ;;  %v619_v14 = vld [vmem:[#allocation5 + $0xe48] sm:$0xff] }
 0x1ae   :  { %3648 = vmatpush1.bf16.msra.mxu0 %v6659_v15  ;;  %3567 = vmatprep.subr.bf16.mxu1 %v6922_v17  ;;  %v623_v15 = vld [vmem:[#allocation5 + $0xe68] sm:$0xff]  ;;  %v364_v17 = vld [vmem:[#allocation5 + $0x650] sm:$0xff] }
 0x1af   :  { %3649 = vmatprep.subr.bf16.mxu0 %v6668_v18  ;;  %v368_v18 = vld [vmem:[#allocation5 + $0x670] sm:$0xff]  ;;  %v6978_v22 = vcombine.high %v619_v14, %v623_v15  ;;  %v6977_v29 = vcombine.low %v619_v14, %v623_v15  ;;  %v671_v9 = vld [vmem:[#allocation5 + $0xfe8] sm:$0xff] }
 0x1b0   :  { %v6724_v23 = vcombine.high %v364_v17, %v368_v18  ;;  %v6723_v30 = vcombine.low %v364_v17, %v368_v18  ;;  %v7026_v14 = vcombine.high %v667_v8, %v671_v9  ;;  %v165_v17 = vld [vmem:[#allocation5 + $0x18] sm:$0xff] }
 0x1b1   :  { %3568 = vmatpush1.bf16.msra.mxu1 %v6921_v24  ;;  %v627_v24 = vld [vmem:[#allocation5 + $0xe88] sm:$0xff]  ;;  %v169_v18 = vld [vmem:[#allocation5 + $0x38] sm:$0xff] }
 0x1b2   :  { %3650 = vmatpush1.bf16.msra.mxu0 %v6667_v25  ;;  %3569 = vmatprep.subr.bf16.mxu1 %v6930_v26  ;;  %v631_v25 = vld [vmem:[#allocation5 + $0xea8] sm:$0xff]  ;;  %v372_v26 = vld [vmem:[#allocation5 + $0x690] sm:$0xff] }
 0x1b3   :  { %3651 = vmatprep.subr.bf16.mxu0 %v6676_v28  ;;  %v376_v28 = vld [vmem:[#allocation5 + $0x6b0] sm:$0xff]  ;;  %v6986_v31 = vcombine.high %v627_v24, %v631_v25  ;;  %v6985_v38 = vcombine.low %v627_v24, %v631_v25  ;;  %v6526_v24 = vcombine.high %v165_v17, %v169_v18 }
 0x1b4   :  { %v6732_v32 = vcombine.high %v372_v26, %v376_v28  ;;  %v6731_v39 = vcombine.low %v372_v26, %v376_v28  ;;  %v173_v26 = vld [vmem:[#allocation5 + $0x58] sm:$0xff] }
 0x1b5   :  { %3570 = vmatpush1.bf16.msra.mxu1 %v6929_v33  ;;  %v635_v33 = vld [vmem:[#allocation5 + $0xec8] sm:$0xff]  ;;  %v177_v28 = vld [vmem:[#allocation5 + $0x78] sm:$0xff] }
 0x1b6   :  { %3652 = vmatpush1.bf16.msra.mxu0 %v6675_v34  ;;  %3571 = vmatprep.subr.bf16.mxu1 %v6938_v36  ;;  %v639_v34 = vld [vmem:[#allocation5 + $0xee8] sm:$0xff]  ;;  %v380_v36 = vld [vmem:[#allocation5 + $0x6d0] sm:$0xff] }
 0x1b7   :  { %3653 = vmatprep.subr.bf16.mxu0 %v6684_v37  ;;  %v384_v37 = vld [vmem:[#allocation5 + $0x6f0] sm:$0xff]  ;;  %v6994_v40 = vcombine.high %v635_v33, %v639_v34  ;;  %v6993_v47 = vcombine.low %v635_v33, %v639_v34  ;;  %v6534_v33 = vcombine.high %v173_v26, %v177_v28 }
 0x1b8   :  { %v6740_v41 = vcombine.high %v380_v36, %v384_v37  ;;  %v6739_v48 = vcombine.low %v380_v36, %v384_v37  ;;  %v181_v36 = vld [vmem:[#allocation5 + $0x98] sm:$0xff] }
 0x1b9   :  { %3572 = vmatpush1.bf16.msra.mxu1 %v6937_v42  ;;  %v643_v42 = vld [vmem:[#allocation5 + $0xf08] sm:$0xff]  ;;  %v185_v37 = vld [vmem:[#allocation5 + $0xb8] sm:$0xff] }
 0x1ba   :  { %3654 = vmatpush1.bf16.msra.mxu0 %v6683_v44  ;;  %3573 = vmatprep.subr.bf16.mxu1 %v6946_v45  ;;  %v647_v44 = vld [vmem:[#allocation5 + $0xf28] sm:$0xff]  ;;  %v388_v45 = vld [vmem:[#allocation5 + $0x710] sm:$0xff] }
 0x1bb   :  { %v8435_v55 = vpop.f32.mrb[0].mxu1  ;;  %3655 = vmatprep.subr.bf16.mxu0 %v6692_v46  ;;  %v392_v46 = vld [vmem:[#allocation5 + $0x730] sm:$0xff]  ;;  %v7002_v49 = vcombine.high %v643_v42, %v647_v44  ;;  %v7001_v58 = vcombine.low %v643_v42, %v647_v44  ;;  %v6542_v42 = vcombine.high %v181_v36, %v185_v37 }
 0x1bc   :  { %v8437_v60 = vpop.f32.mrb[1].mxu1  ;;  %v6748_v50 = vcombine.high %v388_v45, %v392_v46  ;;  %v6747_v59 = vcombine.low %v388_v45, %v392_v46  ;;  %v189_v45 = vld [vmem:[#allocation5 + $0xd8] sm:$0xff] }
 0x1bd   :  { %v3314_v0 = vpop.f32.mrb[2].mxu1  ;;  %3574 = vmatpush1.bf16.msra.mxu1 %v6945_v52  ;;  %v651_v52 = vld [vmem:[#allocation5 + $0xf48] sm:$0xff]  ;;  %v193_v46 = vld [vmem:[#allocation5 + $0xf8] sm:$0xff] }
 0x1be   :  { %3656 = vmatpush1.bf16.msra.mxu0 %v6691_v53  ;;  %v3315_v2 = vpop.f32.mrb[3].mxu1  ;;  %3575 = vmatprep.subr.bf16.mxu1 %v6954_v54  ;;  %v655_v53 = vld [vmem:[#allocation5 + $0xf68] sm:$0xff]  ;;  %v396_v54 = vld [vmem:[#allocation5 + $0x750] sm:$0xff] }
 0x1bf   :  { %3657 = vmatprep.subr.bf16.mxu0 %v6700_v56  ;;  %v400_v56 = vld [vmem:[#allocation5 + $0x770] sm:$0xff]  ;;  %v7010_v62 = vcombine.high %v651_v52, %v655_v53  ;;  %v659_v0 = vld [vmem:[#allocation5 + $0xf88] sm:$0xff] }
 0x1c0   :  { %v6756_v63 = vcombine.high %v396_v54, %v400_v56  ;;  %v404_v2 = vld [vmem:[#allocation5 + $0x790] sm:$0xff] }
 0x1c1   :  { %3576 = vmatpush1.bf16.msra.mxu1 %v6953_v1  ;;  %v663_v1 = vld [vmem:[#allocation5 + $0xfa8] sm:$0xff] }
 0x1c2   :  { %3658 = vmatpush1.bf16.msra.mxu0 %v6699_v3  ;;  %3577 = vmatprep.subr.bf16.mxu1 %v6962_v4  ;;  %v408_v3 = vld [vmem:[#allocation5 + $0x7b0] sm:$0xff]  ;;  %v7009_v4 = vcombine.low %v651_v52, %v655_v53  ;;  %v7018_v6 = vcombine.high %v659_v0, %v663_v1  ;;  %v6550_v52 = vcombine.high %v189_v45, %v193_v46 }
 0x1c3   :  { %3659 = vmatprep.subr.bf16.mxu0 %v6708_v5  ;;  %v6755_v5 = vcombine.low %v396_v54, %v400_v56  ;;  %v6764_v7 = vcombine.high %v404_v2, %v408_v3  ;;  %v197_v54 = vld [vmem:[#allocation5 + $0x118] sm:$0xff] }
 0x1c4   :  { %v201_v56 = vld [vmem:[#allocation5 + $0x138] sm:$0xff] }
 0x1c5   :  { %3578 = vmatpush1.bf16.msra.mxu1 %v6961_v10  ;;  %v412_v10 = vld [vmem:[#allocation5 + $0x7d0] sm:$0xff] }
 0x1c6   :  { %3660 = vmatpush1.bf16.msra.mxu0 %v6707_v11  ;;  %3579 = vmatprep.subr.bf16.mxu1 %v6970_v12  ;;  %v416_v11 = vld [vmem:[#allocation5 + $0x7f0] sm:$0xff]  ;;  %v7017_v12 = vcombine.low %v659_v0, %v663_v1  ;;  %v6558_v0 = vcombine.high %v197_v54, %v201_v56  ;;  %v205_v1 = vld [vmem:[#allocation5 + $0x158] sm:$0xff] }
 0x1c7   :  { %3661 = vmatprep.subr.bf16.mxu0 %v6716_v13  ;;  %v6763_v13 = vcombine.low %v404_v2, %v408_v3  ;;  %v6772_v15 = vcombine.high %v412_v10, %v416_v11  ;;  %v209_v2 = vld [vmem:[#allocation5 + $0x178] sm:$0xff]  ;;  %v460_v3 = vld [vmem:[#allocation5 + $0x950] sm:$0xff] }
 0x1c9   :  { %3580 = vmatpush1.bf16.msra.mxu1 %v6969_v19  ;;  %v420_v19 = vld [vmem:[#allocation5 + $0x810] sm:$0xff] }
 0x1ca   :  { %3662 = vmatpush1.bf16.msra.mxu0 %v6715_v20  ;;  %3581 = vmatprep.subr.bf16.mxu1 %v6978_v22  ;;  %v424_v20 = vld [vmem:[#allocation5 + $0x830] sm:$0xff]  ;;  %v7025_v22 = vcombine.low %v667_v8, %v671_v9  ;;  %v213_v9 = vld [vmem:[#allocation5 + $0x198] sm:$0xff] }
 0x1cb   :  { %3663 = vmatprep.subr.bf16.mxu0 %v6724_v23  ;;  %v6771_v23 = vcombine.low %v412_v10, %v416_v11  ;;  %v6780_v25 = vcombine.high %v420_v19, %v424_v20  ;;  %v217_v10 = vld [vmem:[#allocation5 + $0x1b8] sm:$0xff]  ;;  %v468_v11 = vld [vmem:[#allocation5 + $0x990] sm:$0xff] }
 0x1cd   :  { %3582 = vmatpush1.bf16.msra.mxu1 %v6977_v29  ;;  %v428_v29 = vld [vmem:[#allocation5 + $0x850] sm:$0xff] }
 0x1ce   :  { %3664 = vmatpush1.bf16.msra.mxu0 %v6723_v30  ;;  %3583 = vmatprep.subr.bf16.mxu1 %v6986_v31  ;;  %v432_v30 = vld [vmem:[#allocation5 + $0x870] sm:$0xff]  ;;  %v6525_v31 = vcombine.low %v165_v17, %v169_v18  ;;  %v221_v18 = vld [vmem:[#allocation5 + $0x1d8] sm:$0xff] }
 0x1cf   :  { %3665 = vmatprep.subr.bf16.mxu0 %v6732_v32  ;;  %v6779_v32 = vcombine.low %v420_v19, %v424_v20  ;;  %v6788_v34 = vcombine.high %v428_v29, %v432_v30  ;;  %v225_v19 = vld [vmem:[#allocation5 + $0x1f8] sm:$0xff]  ;;  %v476_v20 = vld [vmem:[#allocation5 + $0x9d0] sm:$0xff] }
 0x1d1   :  { %3584 = vmatpush1.bf16.msra.mxu1 %v6985_v38  ;;  %v436_v38 = vld [vmem:[#allocation5 + $0x890] sm:$0xff] }
 0x1d2   :  { %3666 = vmatpush1.bf16.msra.mxu0 %v6731_v39  ;;  %3585 = vmatprep.subr.bf16.mxu1 %v6994_v40  ;;  %v440_v39 = vld [vmem:[#allocation5 + $0x8b0] sm:$0xff]  ;;  %v6533_v40 = vcombine.low %v173_v26, %v177_v28  ;;  %v229_v28 = vld [vmem:[#allocation5 + $0x218] sm:$0xff] }
 0x1d3   :  { %3667 = vmatprep.subr.bf16.mxu0 %v6740_v41  ;;  %v6787_v41 = vcombine.low %v428_v29, %v432_v30  ;;  %v6796_v44 = vcombine.high %v436_v38, %v440_v39  ;;  %v233_v29 = vld [vmem:[#allocation5 + $0x238] sm:$0xff]  ;;  %v484_v30 = vld [vmem:[#allocation5 + $0xa10] sm:$0xff] }
 0x1d5   :  { %3586 = vmatpush1.bf16.msra.mxu1 %v6993_v47  ;;  %v444_v47 = vld [vmem:[#allocation5 + $0x8d0] sm:$0xff] }
 0x1d6   :  { %3668 = vmatpush1.bf16.msra.mxu0 %v6739_v48  ;;  %3587 = vmatprep.subr.bf16.mxu1 %v7002_v49  ;;  %v448_v48 = vld [vmem:[#allocation5 + $0x8f0] sm:$0xff]  ;;  %v6541_v49 = vcombine.low %v181_v36, %v185_v37  ;;  %v237_v37 = vld [vmem:[#allocation5 + $0x258] sm:$0xff] }
 0x1d7   :  { %3669 = vmatprep.subr.bf16.mxu0 %v6748_v50  ;;  %v6795_v50 = vcombine.low %v436_v38, %v440_v39  ;;  %v6804_v53 = vcombine.high %v444_v47, %v448_v48  ;;  %v241_v38 = vld [vmem:[#allocation5 + $0x278] sm:$0xff]  ;;  %v492_v39 = vld [vmem:[#allocation5 + $0xa50] sm:$0xff] }
 0x1d9   :  { %3588 = vmatpush1.bf16.msra.mxu1 %v7001_v58  ;;  %v452_v58 = vld [vmem:[#allocation5 + $0x910] sm:$0xff] }
 0x1da   :  { %3670 = vmatpush1.bf16.msra.mxu0 %v6747_v59  ;;  %3589 = vmatprep.subr.bf16.mxu1 %v7010_v62  ;;  %v456_v59 = vld [vmem:[#allocation5 + $0x930] sm:$0xff]  ;;  %v6549_v62 = vcombine.low %v189_v45, %v193_v46  ;;  %v245_v46 = vld [vmem:[#allocation5 + $0x298] sm:$0xff] }
 0x1db   :  { %3671 = vmatprep.subr.bf16.mxu0 %v6756_v63  ;;  %v6803_v63 = vcombine.low %v444_v47, %v448_v48  ;;  %v249_v47 = vld [vmem:[#allocation5 + $0x2b8] sm:$0xff]  ;;  %v500_v48 = vld [vmem:[#allocation5 + $0xa90] sm:$0xff] }
 0x1dd   :  { %3590 = vmatpush1.bf16.msra.mxu1 %v7009_v4  ;;  %v464_v4 = vld [vmem:[#allocation5 + $0x970] sm:$0xff] }
 0x1de   :  { %3672 = vmatpush1.bf16.msra.mxu0 %v6755_v5  ;;  %3591 = vmatprep.subr.bf16.mxu1 %v7018_v6  ;;  %v6557_v5 = vcombine.low %v197_v54, %v201_v56  ;;  %v6811_v6 = vcombine.low %v452_v58, %v456_v59  ;;  %v6820_v8 = vcombine.high %v460_v3, %v464_v4  ;;  %v253_v56 = vld [vmem:[#allocation5 + $0x2d8] sm:$0xff] }
 0x1df   :  { %3673 = vmatprep.subr.bf16.mxu0 %v6764_v7  ;;  %v6566_v7 = vcombine.high %v205_v1, %v209_v2 }
 0x1e1   :  { %3592 = vmatpush1.bf16.msra.mxu1 %v7017_v12  ;;  %v472_v12 = vld [vmem:[#allocation5 + $0x9b0] sm:$0xff] }
 0x1e2   :  { %3674 = vmatpush1.bf16.msra.mxu0 %v6763_v13  ;;  %3593 = vmatprep.subr.bf16.mxu1 %v7026_v14  ;;  %v6565_v13 = vcombine.low %v205_v1, %v209_v2  ;;  %v6819_v14 = vcombine.low %v460_v3, %v464_v4  ;;  %v6828_v17 = vcombine.high %v468_v11, %v472_v12  ;;  %v261_v2 = vld [vmem:[#allocation5 + $0x318] sm:$0xff]  ;;  %v516_v4 = vld [vmem:[#allocation5 + $0xb10] sm:$0xff] }
 0x1e3   :  { %3675 = vmatprep.subr.bf16.mxu0 %v6772_v15  ;;  %v6574_v15 = vcombine.high %v213_v9, %v217_v10  ;;  %v265_v3 = vld [vmem:[#allocation5 + $0x338] sm:$0xff] }
 0x1e5   :  { %3594 = vmatpush1.bf16.msra.mxu1 %v7025_v22  ;;  %v480_v22 = vld [vmem:[#allocation5 + $0x9f0] sm:$0xff] }
 0x1e6   :  { %3676 = vmatpush1.bf16.msra.mxu0 %v6771_v23  ;;  %3768 = vmatprep.subr.bf16.mxu1 %v6526_v24  ;;  %v6573_v23 = vcombine.low %v213_v9, %v217_v10  ;;  %v6827_v24 = vcombine.low %v468_v11, %v472_v12  ;;  %v6836_v26 = vcombine.high %v476_v20, %v480_v22  ;;  %v269_v10 = vld [vmem:[#allocation5 + $0x358] sm:$0xff]  ;;  %v524_v12 = vld [vmem:[#allocation5 + $0xb50] sm:$0xff] }
 0x1e7   :  { %3686 = vmatprep.subr.bf16.mxu0 %v6780_v25  ;;  %v6582_v25 = vcombine.high %v221_v18, %v225_v19  ;;  %v273_v11 = vld [vmem:[#allocation5 + $0x378] sm:$0xff] }
 0x1e8   :  { %3596 = vmatmul.mubr.bf16.vlgmr.msra.gmra.mrb[4].mxu1 %v8425_v51 }
 0x1e9   :  { %3678 = vmatmul.mubr.bf16.vlgmr.msra.gmra.mrb[4].mxu0 %v8409_v21  ;;  %3769 = vmatpush1.bf16.msra.mxu1 %v6525_v31  ;;  %v488_v31 = vld [vmem:[#allocation5 + $0xa30] sm:$0xff] }
 0x1ea   :  { %3687 = vmatpush1.bf16.msra.mxu0 %v6779_v32  ;;  %3770 = vmatprep.subr.bf16.mxu1 %v6534_v33  ;;  %v6581_v32 = vcombine.low %v221_v18, %v225_v19  ;;  %v6835_v33 = vcombine.low %v476_v20, %v480_v22  ;;  %v6844_v36 = vcombine.high %v484_v30, %v488_v31  ;;  %v277_v19 = vld [vmem:[#allocation5 + $0x398] sm:$0xff]  ;;  %v532_v22 = vld [vmem:[#allocation5 + $0xb90] sm:$0xff] }
 0x1eb   :  { %3688 = vmatprep.subr.bf16.mxu0 %v6788_v34  ;;  %3718 = vmatprep.mubr.bf16.mxu0 %v8411_v27  ;;  %v6590_v34 = vcombine.high %v229_v28, %v233_v29  ;;  %v281_v20 = vld [vmem:[#allocation5 + $0x3b8] sm:$0xff] }
 0x1ec   :  { %3800 = vmatprep.mubr.bf16.mxu1 %v8401_v57  ;;  %v6812_v57 = vcombine.high %v452_v58, %v456_v59  ;;  %v257_v58 = vld [vmem:[#allocation5 + $0x2f8] sm:$0xff]  ;;  %v508_v59 = vld [vmem:[#allocation5 + $0xad0] sm:$0xff] }
 0x1ed   :  { %3771 = vmatpush1.bf16.msra.mxu1 %v6533_v40  ;;  %v496_v40 = vld [vmem:[#allocation5 + $0xa70] sm:$0xff] }
 0x1ee   :  { %3689 = vmatpush1.bf16.msra.mxu0 %v6787_v41  ;;  %3772 = vmatprep.subr.bf16.mxu1 %v6542_v42  ;;  %v6589_v41 = vcombine.low %v229_v28, %v233_v29  ;;  %v6843_v42 = vcombine.low %v484_v30, %v488_v31  ;;  %v6852_v45 = vcombine.high %v492_v39, %v496_v40  ;;  %v285_v29 = vld [vmem:[#allocation5 + $0x3d8] sm:$0xff]  ;;  %v540_v31 = vld [vmem:[#allocation5 + $0xbd0] sm:$0xff] }
 0x1ef   :  { %3690 = vmatprep.subr.bf16.mxu0 %v6796_v44  ;;  %v6598_v44 = vcombine.high %v237_v37, %v241_v38  ;;  %v289_v30 = vld [vmem:[#allocation5 + $0x3f8] sm:$0xff] }
 0x1f1   :  { %3773 = vmatpush1.bf16.msra.mxu1 %v6541_v49  ;;  %v504_v49 = vld [vmem:[#allocation5 + $0xab0] sm:$0xff] }
 0x1f2   :  { %3691 = vmatpush1.bf16.msra.mxu0 %v6795_v50  ;;  %3774 = vmatprep.subr.bf16.mxu1 %v6550_v52  ;;  %v6597_v50 = vcombine.low %v237_v37, %v241_v38  ;;  %v6851_v52 = vcombine.low %v492_v39, %v496_v40  ;;  %v6860_v54 = vcombine.high %v500_v48, %v504_v49  ;;  %v293_v38 = vld [vmem:[#allocation5 + $0x418] sm:$0xff]  ;;  %v548_v40 = vld [vmem:[#allocation5 + $0xc10] sm:$0xff] }
 0x1f3   :  { %3692 = vmatprep.subr.bf16.mxu0 %v6804_v53  ;;  %v6606_v53 = vcombine.high %v245_v46, %v249_v47  ;;  %v297_v39 = vld [vmem:[#allocation5 + $0x438] sm:$0xff] }
 0x1f5   :  { %3775 = vmatpush1.bf16.msra.mxu1 %v6549_v62  ;;  %v512_v62 = vld [vmem:[#allocation5 + $0xaf0] sm:$0xff] }
 0x1f6   :  { %3693 = vmatpush1.bf16.msra.mxu0 %v6803_v63  ;;  %3776 = vmatprep.subr.bf16.mxu1 %v6558_v0  ;;  %v6605_v63 = vcombine.low %v245_v46, %v249_v47  ;;  %v6859_v0 = vcombine.low %v500_v48, %v504_v49  ;;  %v6868_v1 = vcombine.high %v508_v59, %v512_v62  ;;  %v301_v47 = vld [vmem:[#allocation5 + $0x458] sm:$0xff]  ;;  %v556_v49 = vld [vmem:[#allocation5 + $0xc50] sm:$0xff] }
 0x1f7   :  { %3694 = vmatprep.subr.bf16.mxu0 %v6812_v57  ;;  %v6614_v57 = vcombine.high %v253_v56, %v257_v58  ;;  %v305_v48 = vld [vmem:[#allocation5 + $0x478] sm:$0xff] }
 0x1f9   :  { %3777 = vmatpush1.bf16.msra.mxu1 %v6557_v5  ;;  %v520_v5 = vld [vmem:[#allocation5 + $0xb30] sm:$0xff] }
 0x1fa   :  { %3695 = vmatpush1.bf16.msra.mxu0 %v6811_v6  ;;  %3778 = vmatprep.subr.bf16.mxu1 %v6566_v7  ;;  %v6613_v6 = vcombine.low %v253_v56, %v257_v58  ;;  %v6867_v7 = vcombine.low %v508_v59, %v512_v62  ;;  %v6876_v9 = vcombine.high %v516_v4, %v520_v5  ;;  %v309_v58 = vld [vmem:[#allocation5 + $0x498] sm:$0xff]  ;;  %v564_v62 = vld [vmem:[#allocation5 + $0xc90] sm:$0xff] }
 0x1fb   :  { %3696 = vmatprep.subr.bf16.mxu0 %v6820_v8  ;;  %v6622_v8 = vcombine.high %v261_v2, %v265_v3  ;;  %v313_v59 = vld [vmem:[#allocation5 + $0x4b8] sm:$0xff] }
 0x1fd   :  { %3779 = vmatpush1.bf16.msra.mxu1 %v6565_v13  ;;  %v528_v13 = vld [vmem:[#allocation5 + $0xb70] sm:$0xff] }
 0x1fe   :  { %3697 = vmatpush1.bf16.msra.mxu0 %v6819_v14  ;;  %3780 = vmatprep.subr.bf16.mxu1 %v6574_v15  ;;  %v6621_v14 = vcombine.low %v261_v2, %v265_v3  ;;  %v6875_v15 = vcombine.low %v516_v4, %v520_v5  ;;  %v6884_v18 = vcombine.high %v524_v12, %v528_v13  ;;  %v676_v2 = vlaneseq  ;;  %v317_v4 = vld [vmem:[#allocation5 + $0x4d8] sm:$0xff] }
 0x1ff   :  { %3698 = vmatprep.subr.bf16.mxu0 %v6828_v17  ;;  %v6630_v17 = vcombine.high %v269_v10, %v273_v11  ;;  %v321_v5 = vld [vmem:[#allocation5 + $0x4f8] sm:$0xff] }
 0x201   :  { %3781 = vmatpush1.bf16.msra.mxu1 %v6573_v23  ;;  %v536_v23 = vld [vmem:[#allocation5 + $0xbb0] sm:$0xff] }
 0x202   :  { %3699 = vmatpush1.bf16.msra.mxu0 %v6827_v24  ;;  %3782 = vmatprep.subr.bf16.mxu1 %v6582_v25  ;;  %v6629_v24 = vcombine.low %v269_v10, %v273_v11  ;;  %v6883_v25 = vcombine.low %v524_v12, %v528_v13  ;;  %v6892_v28 = vcombine.high %v532_v22, %v536_v23  ;;  %v8447_v10 = vshrl.u32 %v676_v2, 7  ;;  %v325_v12 = vld [vmem:[#allocation5 + $0x518] sm:$0xff]  ;;  %v616_v2 = vld [vmem:[#allocation5 + $0xe30] sm:$0xff] }
 0x203   :  { %3700 = vmatprep.subr.bf16.mxu0 %v6836_v26  ;;  %v6638_v26 = vcombine.high %v277_v19, %v281_v20  ;;  %v329_v13 = vld [vmem:[#allocation5 + $0x538] sm:$0xff] }
 0x205   :  { %3783 = vmatpush1.bf16.msra.mxu1 %v6581_v32  ;;  %v544_v32 = vld [vmem:[#allocation5 + $0xbf0] sm:$0xff] }
 0x206   :  { %3701 = vmatpush1.bf16.msra.mxu0 %v6835_v33  ;;  %3784 = vmatprep.subr.bf16.mxu1 %v6590_v34  ;;  %v6637_v33 = vcombine.low %v277_v19, %v281_v20  ;;  %v6891_v34 = vcombine.low %v532_v22, %v536_v23  ;;  %v6900_v37 = vcombine.high %v540_v31, %v544_v32  ;;  %v8450_v19 = vsub.s32 0, %v8447_v10  ;;  %v333_v22 = vld [vmem:[#allocation5 + $0x558] sm:$0xff] }
 0x207   :  { %3702 = vmatprep.subr.bf16.mxu0 %v6844_v36  ;;  %v6646_v36 = vcombine.high %v285_v29, %v289_v30  ;;  %v337_v23 = vld [vmem:[#allocation5 + $0x578] sm:$0xff] }
 0x209   :  { %3785 = vmatpush1.bf16.msra.mxu1 %v6589_v41  ;;  %v552_v41 = vld [vmem:[#allocation5 + $0xc30] sm:$0xff] }
 0x20a   :  { %3703 = vmatpush1.bf16.msra.mxu0 %v6843_v42  ;;  %3786 = vmatprep.subr.bf16.mxu1 %v6598_v44  ;;  %v6645_v42 = vcombine.low %v285_v29, %v289_v30  ;;  %v6899_v44 = vcombine.low %v540_v31, %v544_v32  ;;  %v6908_v46 = vcombine.high %v548_v40, %v552_v41 }
 0x20b   :  { %3704 = vmatprep.subr.bf16.mxu0 %v6852_v45  ;;  %v6654_v45 = vcombine.high %v293_v38, %v297_v39  ;;  %v6685_v29 = vcombine.low %v325_v12, %v329_v13  ;;  %v6694_v31 = vcombine.high %v333_v22, %v337_v23 }
 0x20d   :  { %3787 = vmatpush1.bf16.msra.mxu1 %v6597_v50  ;;  %v560_v50 = vld [vmem:[#allocation5 + $0xc70] sm:$0xff] }
 0x20e   :  { %3705 = vmatpush1.bf16.msra.mxu0 %v6851_v52  ;;  %3788 = vmatprep.subr.bf16.mxu1 %v6606_v53  ;;  %v6653_v52 = vcombine.low %v293_v38, %v297_v39  ;;  %v6907_v53 = vcombine.low %v548_v40, %v552_v41  ;;  %v6916_v56 = vcombine.high %v556_v49, %v560_v50  ;;  %v596_v38 = vld [vmem:[#allocation5 + $0xd90] sm:$0xff] }
 0x20f   :  { %3706 = vmatprep.subr.bf16.mxu0 %v6860_v54  ;;  %v6662_v54 = vcombine.high %v301_v47, %v305_v48  ;;  %v600_v39 = vld [vmem:[#allocation5 + $0xdb0] sm:$0xff]  ;;  %v6693_v40 = vcombine.low %v333_v22, %v337_v23 }
 0x211   :  { %3789 = vmatpush1.bf16.msra.mxu1 %v6605_v63  ;;  %v568_v63 = vld [vmem:[#allocation5 + $0xcb0] sm:$0xff] }
 0x212   :  { %3707 = vmatpush1.bf16.msra.mxu0 %v6859_v0  ;;  %3790 = vmatprep.subr.bf16.mxu1 %v6614_v57  ;;  %v6661_v0 = vcombine.low %v301_v47, %v305_v48  ;;  %v6915_v57 = vcombine.low %v556_v49, %v560_v50  ;;  %v6924_v3 = vcombine.high %v564_v62, %v568_v63  ;;  %v353_v47 = vld [vmem:[#allocation5 + $0x5f8] sm:$0xff]  ;;  %v604_v50 = vld [vmem:[#allocation5 + $0xdd0] sm:$0xff] }
 0x213   :  { %3708 = vmatprep.subr.bf16.mxu0 %v6868_v1  ;;  %v6670_v1 = vcombine.high %v309_v58, %v313_v59 }
 0x215   :  { %3791 = vmatpush1.bf16.msra.mxu1 %v6613_v6  ;;  %v572_v6 = vld [vmem:[#allocation5 + $0xcd0] sm:$0xff] }
 0x216   :  { %3709 = vmatpush1.bf16.msra.mxu0 %v6867_v7  ;;  %3792 = vmatprep.subr.bf16.mxu1 %v6622_v8  ;;  %v576_v7 = vld [vmem:[#allocation5 + $0xcf0] sm:$0xff]  ;;  %v6923_v8 = vcombine.low %v564_v62, %v568_v63  ;;  %v6955_v62 = vcombine.low %v596_v38, %v600_v39 }
 0x217   :  { %3710 = vmatprep.subr.bf16.mxu0 %v6876_v9  ;;  %v6678_v9 = vcombine.high %v317_v4, %v321_v5  ;;  %v6932_v11 = vcombine.high %v572_v6, %v576_v7 }
 0x219   :  { %3793 = vmatpush1.bf16.msra.mxu1 %v6621_v14  ;;  %v580_v14 = vld [vmem:[#allocation5 + $0xd10] sm:$0xff] }
 0x21a   :  { %3711 = vmatpush1.bf16.msra.mxu0 %v6875_v15  ;;  %3794 = vmatprep.subr.bf16.mxu1 %v6630_v17  ;;  %v584_v15 = vld [vmem:[#allocation5 + $0xd30] sm:$0xff]  ;;  %v6677_v17 = vcombine.low %v317_v4, %v321_v5 }
 0x21b   :  { %3712 = vmatprep.subr.bf16.mxu0 %v6884_v18  ;;  %v6931_v18 = vcombine.low %v572_v6, %v576_v7  ;;  %v6940_v20 = vcombine.high %v580_v14, %v584_v15  ;;  %v6939_v30 = vcombine.low %v580_v14, %v584_v15  ;;  %v365_v7 = vld [vmem:[#allocation5 + $0x658] sm:$0xff] }
 0x21c   :  { %v373_v15 = vld [vmem:[#allocation5 + $0x698] sm:$0xff] }
 0x21d   :  { %3795 = vmatpush1.bf16.msra.mxu1 %v6629_v24  ;;  %v8452_v24 = vld [vmem:[#allocation7] sm:$0xff] }
 0x21e   :  { %3713 = vmatpush1.bf16.msra.mxu0 %v6883_v25  ;;  %3796 = vmatprep.subr.bf16.mxu1 %v6638_v26  ;;  %v8455_v25 = vsub.s32 1, %v8447_v10  ;;  %v588_v26 = vld [vmem:[#allocation5 + $0xd50] sm:$0xff]  ;;  %v679_v32 = vrot.slane %v8452_v24, %v8450_v19 }
 0x21f   :  { %3714 = vmatprep.subr.bf16.mxu0 %v6892_v28  ;;  %v592_v28 = vld [vmem:[#allocation5 + $0xd70] sm:$0xff] }
 0x220   :  { %v6947_v41 = vcombine.low %v588_v26, %v592_v28 }
 0x221   :  { %3797 = vmatpush1.bf16.msra.mxu1 %v6637_v33  ;;  %v6948_v33 = vcombine.high %v588_v26, %v592_v28  ;;  %v381_v28 = vld [vmem:[#allocation5 + $0x6d8] sm:$0xff] }
 0x222   :  { %3715 = vmatpush1.bf16.msra.mxu0 %v6891_v34  ;;  %3798 = vmatprep.subr.bf16.mxu1 %v6646_v36  ;;  %v341_v34 = vld [vmem:[#allocation5 + $0x598] sm:$0xff] }
 0x223   :  { %3716 = vmatprep.subr.bf16.mxu0 %v6900_v37  ;;  %v345_v36 = vld [vmem:[#allocation5 + $0x5b8] sm:$0xff]  ;;  %v683_v37 = vrot.slane %v8452_v24, %v8455_v25 }
 0x225   :  { %3799 = vmatpush1.bf16.msra.mxu1 %v6645_v42  ;;  %v6702_v42 = vcombine.high %v341_v34, %v345_v36  ;;  %v3313_v48 = vadd.f32 %v8437_v60, %v683_v37  ;;  %v361_v60 = vld [vmem:[#allocation5 + $0x638] sm:$0xff] }
 0x226   :  { %3717 = vmatpush1.bf16.msra.mxu0 %v6899_v44  ;;  %3809 = vmatprep.subr.bf16.mxu1 %v6654_v45  ;;  %v3311_v44 = vadd.f32 %v8435_v55, %v679_v32  ;;  %v6956_v45 = vcombine.high %v596_v38, %v600_v39  ;;  %v389_v37 = vld [vmem:[#allocation5 + $0x718] sm:$0xff]  ;;  %v644_v39 = vld [vmem:[#allocation5 + $0xf10] sm:$0xff] }
 0x227   :  { %3727 = vmatprep.subr.bf16.mxu0 %v6908_v46  ;;  %v349_v46 = vld [vmem:[#allocation5 + $0x5d8] sm:$0xff] }
 0x228   :  { %3801 = vmatmul.mubr.bf16.vlgmr.msra.gmra.mrb[8].mxu1 %v8407_v16  ;;  %v6669_v16 = vcombine.low %v309_v58, %v313_v59  ;;  %v6710_v55 = vcombine.high %v349_v46, %v353_v47  ;;  %v393_v38 = vld [vmem:[#allocation5 + $0x738] sm:$0xff] }
 0x229   :  { %3719 = vmatmul.mubr.bf16.vlgmr.msra.gmra.mrb[4].mxu0 %v8417_v35  ;;  %3810 = vmatpush1.bf16.msra.mxu1 %v6653_v52  ;;  %v608_v52 = vld [vmem:[#allocation5 + $0xdf0] sm:$0xff] }
 0x22a   :  { %3728 = vmatpush1.bf16.msra.mxu0 %v6907_v53  ;;  %3811 = vmatprep.subr.bf16.mxu1 %v6662_v54  ;;  %v6963_v4 = vcombine.low %v604_v50, %v608_v52 }
 0x22b   :  { %3729 = vmatprep.subr.bf16.mxu0 %v6916_v56  ;;  %3759 = vmatprep.mubr.bf16.mxu0 %v8419_v43  ;;  %v6701_v56 = vcombine.low %v341_v34, %v345_v36 }
 0x22c   :  { %3841 = vmatprep.mubr.bf16.mxu1 %v8403_v61  ;;  %v6686_v61 = vcombine.high %v325_v12, %v329_v13 }
 0x22d   :  { %3812 = vmatpush1.bf16.msra.mxu1 %v6661_v0  ;;  %v6964_v0 = vcombine.high %v604_v50, %v608_v52  ;;  %v6749_v50 = vcombine.low %v389_v37, %v393_v38 }
 0x22e   :  { %3730 = vmatpush1.bf16.msra.mxu0 %v6915_v57  ;;  %3813 = vmatprep.subr.bf16.mxu1 %v6670_v1  ;;  %v357_v57 = vld [vmem:[#allocation5 + $0x618] sm:$0xff]  ;;  %v612_v1 = vld [vmem:[#allocation5 + $0xe10] sm:$0xff] }
 0x22f   :  { %3731 = vmatprep.subr.bf16.mxu0 %v6924_v3  ;;  %v6709_v3 = vcombine.low %v349_v46, %v353_v47  ;;  %v6718_v5 = vcombine.high %v357_v57, %v361_v60  ;;  %v6972_v6 = vcombine.high %v612_v1, %v616_v2  ;;  %v6971_v12 = vcombine.low %v612_v1, %v616_v2  ;;  %v397_v46 = vld [vmem:[#allocation5 + $0x758] sm:$0xff] }
 0x230   :  { %v401_v47 = vld [vmem:[#allocation5 + $0x778] sm:$0xff] }
 0x231   :  { %3814 = vmatpush1.bf16.msra.mxu1 %v6669_v16  ;;  %v369_v16 = vld [vmem:[#allocation5 + $0x678] sm:$0xff] }
 0x232   :  { %3732 = vmatpush1.bf16.msra.mxu0 %v6923_v8  ;;  %3815 = vmatprep.subr.bf16.mxu1 %v6678_v9  ;;  %v620_v8 = vld [vmem:[#allocation5 + $0xe50] sm:$0xff]  ;;  %v6726_v13 = vcombine.high %v365_v7, %v369_v16  ;;  %v413_v2 = vld [vmem:[#allocation5 + $0x7d8] sm:$0xff] }
 0x233   :  { %3733 = vmatprep.subr.bf16.mxu0 %v6932_v11  ;;  %v624_v9 = vld [vmem:[#allocation5 + $0xe70] sm:$0xff]  ;;  %v6717_v11 = vcombine.low %v357_v57, %v361_v60 }
 0x234   :  { %v6980_v14 = vcombine.high %v620_v8, %v624_v9  ;;  %v6979_v22 = vcombine.low %v620_v8, %v624_v9  ;;  %v421_v9 = vld [vmem:[#allocation5 + $0x818] sm:$0xff] }
 0x235   :  { %3816 = vmatpush1.bf16.msra.mxu1 %v6677_v17  ;;  %v377_v17 = vld [vmem:[#allocation5 + $0x6b8] sm:$0xff] }
 0x236   :  { %3734 = vmatpush1.bf16.msra.mxu0 %v6931_v18  ;;  %3817 = vmatprep.subr.bf16.mxu1 %v6686_v61  ;;  %v628_v18 = vld [vmem:[#allocation5 + $0xe90] sm:$0xff]  ;;  %v6734_v23 = vcombine.high %v373_v15, %v377_v17  ;;  %v6733_v32 = vcombine.low %v373_v15, %v377_v17  ;;  %v7498_v15 = vld [vmem:[#allocation8 + $0x4] ss:$16 sps:$4 sm:$0xff]  }
 0x237   :  { %3735 = vmatprep.subr.bf16.mxu0 %v6940_v20  ;;  %v632_v61 = vld [vmem:[#allocation5 + $0xeb0] sm:$0xff]  ;;  %v6725_v20 = vcombine.low %v365_v7, %v369_v16 }
 0x238   :  { %v6988_v26 = vcombine.high %v628_v18, %v632_v61 }
 0x239   :  { %3818 = vmatpush1.bf16.msra.mxu1 %v6685_v29  ;;  %v385_v29 = vld [vmem:[#allocation5 + $0x6f8] sm:$0xff] }
 0x23a   :  { %3736 = vmatpush1.bf16.msra.mxu0 %v6939_v30  ;;  %3819 = vmatprep.subr.bf16.mxu1 %v6694_v31  ;;  %v636_v30 = vld [vmem:[#allocation5 + $0xed0] sm:$0xff]  ;;  %v6742_v34 = vcombine.high %v381_v28, %v385_v29 }
 0x23b   :  { %3737 = vmatprep.subr.bf16.mxu0 %v6948_v33  ;;  %v640_v31 = vld [vmem:[#allocation5 + $0xef0] sm:$0xff]  ;;  %v6987_v33 = vcombine.low %v628_v18, %v632_v61  ;;  %v429_v18 = vld [vmem:[#allocation5 + $0x858] sm:$0xff] }
 0x23c   :  { %v3433_v49 = vpop.f32.mrb[0].mxu0  ;;  %v6996_v36 = vcombine.high %v636_v30, %v640_v31  ;;  %v433_v61 = vld [vmem:[#allocation5 + $0x878] sm:$0xff] }
 0x23d   :  { %v8463_v53 = vadd.f32 %v3433_v49, %v3311_v44  ;;  %v3435_v54 = vpop.f32.mrb[1].mxu0  ;;  %3820 = vmatpush1.bf16.msra.mxu1 %v6693_v40  ;;  %v648_v40 = vld [vmem:[#allocation5 + $0xf30] sm:$0xff]  ;;  %v6750_v44 = vcombine.high %v389_v37, %v393_v38 }
 0x23e   :  { %v8465_v58 = vadd.f32 %v3435_v54, %v3313_v48  ;;  %v3437_v59 = vpop.f32.mrb[2].mxu0  ;;  %3738 = vmatpush1.bf16.msra.mxu0 %v6947_v41  ;;  %3821 = vmatprep.subr.bf16.mxu1 %v6702_v42  ;;  %v6741_v41 = vcombine.low %v381_v28, %v385_v29  ;;  %v6995_v42 = vcombine.low %v636_v30, %v640_v31  ;;  %v652_v48 = vld [vmem:[#allocation5 + $0xf50] sm:$0xff]  ;;  %v437_v28 = vld [vmem:[#allocation5 + $0x898] sm:$0xff] }
 0x23f   :  { %v3438_v63 = vpop.f32.mrb[3].mxu0  ;;  %3739 = vmatprep.subr.bf16.mxu0 %v6956_v45  ;;  %v7004_v45 = vcombine.high %v644_v39, %v648_v40  ;;  %v656_v49 = vld [vmem:[#allocation5 + $0xf70] sm:$0xff]  ;;  %v7003_v52 = vcombine.low %v644_v39, %v648_v40  ;;  %v6758_v54 = vcombine.high %v397_v46, %v401_v47  ;;  %v405_v59 = vld [vmem:[#allocation5 + $0x798] sm:$0xff] }
 0x240   :  { %v664_v63 = vld [vmem:[#allocation5 + $0xfb0] sm:$0xff]  ;;  %v7011_v57 = vcombine.low %v652_v48, %v656_v49  ;;  %v3933_v17 = vmax.f32 %v8465_v58, 0.0  ;;  %v441_v29 = vld [vmem:[#allocation5 + $0x8b8] sm:$0xff]  ;;  %v6789_v58 = vcombine.low %v429_v18, %v433_v61 }
 0x241   :  { %3822 = vmatpush1.bf16.msra.mxu1 %v6701_v56  ;;  %v7012_v56 = vcombine.high %v652_v48, %v656_v49  ;;  %v7499_v31 = vld [vmem:[#allocation8 + $0x20] ss:$16 sps:$4 sm:$0xff]   ;;  %v6797_v37 = vcombine.low %v437_v28, %v441_v29  ;;  %v7507_v39 = vld [vmem:[#allocation8 + $0x64] ss:$16 sps:$4 sm:$0xff]  }
 0x242   :  { %3740 = vmatpush1.bf16.msra.mxu0 %v6955_v62  ;;  %3823 = vmatprep.subr.bf16.mxu1 %v6710_v55  ;;  %v409_v62 = vld [vmem:[#allocation5 + $0x7b8] sm:$0xff]  ;;  %v660_v55 = vld [vmem:[#allocation5 + $0xf90] sm:$0xff]  ;;  %v8468_v30 = vpack.c.bf16 %v3933_v17, %v3933_v17 }
 0x243   :  { %3741 = vmatprep.subr.bf16.mxu0 %v6964_v0  ;;  %v6757_v0 = vcombine.low %v397_v46, %v401_v47  ;;  %v6766_v60 = vcombine.high %v405_v59, %v409_v62  ;;  %v7020_v1 = vcombine.high %v660_v55, %v664_v63  ;;  %v7019_v7 = vcombine.low %v660_v55, %v664_v63  ;;  %v453_v40 = vld [vmem:[#allocation5 + $0x918] sm:$0xff] }
 0x244   :  { %v7510_v46 = vld [vmem:[#allocation8 + $0x84] ss:$16 sps:$4 sm:$0xff]   ;;  %v7508_v49 = vld [vmem:[#allocation8 + $0x80] ss:$16 sps:$4 sm:$0xff]  }
 0x245   :  { %3824 = vmatpush1.bf16.msra.mxu1 %v6709_v3  ;;  %v417_v3 = vld [vmem:[#allocation5 + $0x7f8] sm:$0xff] }
 0x246   :  { %3742 = vmatpush1.bf16.msra.mxu0 %v6963_v4  ;;  %3825 = vmatprep.subr.bf16.mxu1 %v6718_v5  ;;  %v668_v4 = vld [vmem:[#allocation5 + $0xfd0] sm:$0xff]  ;;  %v6774_v16 = vcombine.high %v413_v2, %v417_v3  ;;  %v461_v47 = vld [vmem:[#allocation5 + $0x958] sm:$0xff] }
 0x247   :  { %3743 = vmatprep.subr.bf16.mxu0 %v6972_v6  ;;  %v672_v5 = vld [vmem:[#allocation5 + $0xff0] sm:$0xff]  ;;  %v6765_v6 = vcombine.low %v405_v59, %v409_v62  ;;  %v7511_v62 = vld [vmem:[#allocation8 + $0xa0] ss:$16 sps:$4 sm:$0xff]   ;;  %v7516_v63 = vld [vmem:[#allocation8 + $0xc4] ss:$16 sps:$4 sm:$0xff]  }
 0x248   :  { %v7028_v8 = vcombine.high %v668_v4, %v672_v5  ;;  %v501_v17 = vld [vmem:[#allocation5 + $0xa98] sm:$0xff] }
 0x249   :  { %3826 = vmatpush1.bf16.msra.mxu1 %v6717_v11  ;;  %v425_v11 = vld [vmem:[#allocation5 + $0x838] sm:$0xff] }
 0x24a   :  { %3744 = vmatpush1.bf16.msra.mxu0 %v6971_v12  ;;  %3827 = vmatprep.subr.bf16.mxu1 %v6726_v13  ;;  %v6773_v12 = vcombine.low %v413_v2, %v417_v3  ;;  %v7027_v13 = vcombine.low %v668_v4, %v672_v5  ;;  %v7519_v3 = vld [vmem:[#allocation8 + $0xe4] ss:$16 sps:$4 sm:$0xff]  }
 0x24b   :  { %3745 = vmatprep.subr.bf16.mxu0 %v6980_v14  ;;  %v6782_v14 = vcombine.high %v421_v9, %v425_v11  ;;  %v485_v4 = vld [vmem:[#allocation5 + $0xa18] sm:$0xff] }
 0x24c   :  { %v489_v5 = vld [vmem:[#allocation5 + $0xa38] sm:$0xff] }
 0x24d   :  { %3828 = vmatpush1.bf16.msra.mxu1 %v6725_v20  ;;  %v6781_v20 = vcombine.low %v421_v9, %v425_v11  ;;  %v493_v9 = vld [vmem:[#allocation5 + $0xa58] sm:$0xff] }
 0x24e   :  { %3746 = vmatpush1.bf16.msra.mxu0 %v6979_v22  ;;  %3829 = vmatprep.subr.bf16.mxu1 %v6734_v23  ;;  %v7496_v22 = vld [vmem:[#allocation8] ss:$16 sps:$4 sm:$0xff]   ;;  %v6790_v23 = vcombine.high %v429_v18, %v433_v61 }
 0x24f   :  { %3747 = vmatprep.subr.bf16.mxu0 %v6988_v26  ;;  %v7501_v26 = vld [vmem:[#allocation8 + $0x24] ss:$16 sps:$4 sm:$0xff]  }
 0x250   :  { %v497_v11 = vld [vmem:[#allocation5 + $0xa78] sm:$0xff] }
 0x251   :  { %3830 = vmatpush1.bf16.msra.mxu1 %v6733_v32  ;;  %v6798_v32 = vcombine.high %v437_v28, %v441_v29  ;;  %v505_v18 = vld [vmem:[#allocation5 + $0xab8] sm:$0xff]  ;;  %v6853_v61 = vcombine.low %v493_v9, %v497_v11 }
 0x252   :  { %3748 = vmatpush1.bf16.msra.mxu0 %v6987_v33  ;;  %3831 = vmatprep.subr.bf16.mxu1 %v6742_v34  ;;  %v7504_v33 = vld [vmem:[#allocation8 + $0x44] ss:$16 sps:$4 sm:$0xff]   ;;  %v6861_v29 = vcombine.low %v501_v17, %v505_v18 }
 0x253   :  { %3749 = vmatprep.subr.bf16.mxu0 %v6996_v36  ;;  %v445_v34 = vld [vmem:[#allocation5 + $0x8d8] sm:$0xff] }
 0x254   :  { %v449_v36 = vld [vmem:[#allocation5 + $0x8f8] sm:$0xff] }
 0x255   :  { %3832 = vmatpush1.bf16.msra.mxu1 %v6741_v41  ;;  %v6806_v38 = vcombine.high %v445_v34, %v449_v36  ;;  %v457_v41 = vld [vmem:[#allocation5 + $0x938] sm:$0xff] }
 0x256   :  { %3750 = vmatpush1.bf16.msra.mxu0 %v6995_v42  ;;  %3833 = vmatprep.subr.bf16.mxu1 %v6750_v44  ;;  %v6805_v42 = vcombine.low %v445_v34, %v449_v36  ;;  %v7505_v44 = vld [vmem:[#allocation8 + $0x60] ss:$16 sps:$4 sm:$0xff]   ;;  %v6813_v48 = vcombine.low %v453_v40, %v457_v41 }
 0x257   :  { %3751 = vmatprep.subr.bf16.mxu0 %v7004_v45  ;;  %v6814_v45 = vcombine.high %v453_v40, %v457_v41  ;;  %v513_v28 = vld [vmem:[#allocation5 + $0xaf8] sm:$0xff] }
 0x258   :  { %v521_v34 = vld [vmem:[#allocation5 + $0xb38] sm:$0xff] }
 0x259   :  { %3834 = vmatpush1.bf16.msra.mxu1 %v6749_v50  ;;  %v529_v40 = vld [vmem:[#allocation5 + $0xb78] sm:$0xff] }
 0x25a   :  { %3752 = vmatpush1.bf16.msra.mxu0 %v7003_v52  ;;  %3835 = vmatprep.subr.bf16.mxu1 %v6758_v54  ;;  %v7513_v52 = vld [vmem:[#allocation8 + $0xa4] ss:$16 sps:$4 sm:$0xff]  }
 0x25b   :  { %3753 = vmatprep.subr.bf16.mxu0 %v7012_v56  ;;  %v469_v54 = vld [vmem:[#allocation5 + $0x998] sm:$0xff] }
 0x25c   :  { %v473_v56 = vld [vmem:[#allocation5 + $0x9b8] sm:$0xff] }
 0x25d   :  { %3836 = vmatpush1.bf16.msra.mxu1 %v6757_v0  ;;  %v6830_v55 = vcombine.high %v469_v54, %v473_v56  ;;  %v477_v0 = vld [vmem:[#allocation5 + $0x9d8] sm:$0xff] }
 0x25e   :  { %3754 = vmatpush1.bf16.msra.mxu0 %v7011_v57  ;;  %3837 = vmatprep.subr.bf16.mxu1 %v6766_v60  ;;  %v481_v57 = vld [vmem:[#allocation5 + $0x9f8] sm:$0xff]  ;;  %v6829_v60 = vcombine.low %v469_v54, %v473_v56 }
 0x25f   :  { %3755 = vmatprep.subr.bf16.mxu0 %v7020_v1  ;;  %v7514_v1 = vld [vmem:[#allocation8 + $0xc0] ss:$16 sps:$4 sm:$0xff]   ;;  %v6838_v2 = vcombine.high %v477_v0, %v481_v57 }
 0x260   :  { %v545_v54 = vld [vmem:[#allocation5 + $0xbf8] sm:$0xff] }
 0x261   :  { %3838 = vmatpush1.bf16.msra.mxu1 %v6765_v6  ;;  %v6837_v6 = vcombine.low %v477_v0, %v481_v57  ;;  %v553_v0 = vld [vmem:[#allocation5 + $0xc38] sm:$0xff] }
 0x262   :  { %3756 = vmatpush1.bf16.msra.mxu0 %v7019_v7  ;;  %3839 = vmatprep.subr.bf16.mxu1 %v6774_v16  ;;  %v7517_v7 = vld [vmem:[#allocation8 + $0xe0] ss:$16 sps:$4 sm:$0xff]   ;;  %v6846_v16 = vcombine.high %v485_v4, %v489_v5 }
 0x263   :  { %3757 = vmatprep.subr.bf16.mxu0 %v7028_v8  ;;  %v7522_v8 = vld [vmem:[#allocation8 + $0x104] ss:$16 sps:$4 sm:$0xff]  }
 0x265   :  { %3840 = vmatpush1.bf16.msra.mxu1 %v6773_v12  ;;  %v6845_v12 = vcombine.low %v485_v4, %v489_v5  ;;  %v557_v4 = vld [vmem:[#allocation5 + $0xc58] sm:$0xff] }
 0x266   :  { %3758 = vmatpush1.bf16.msra.mxu0 %v7027_v13  ;;  %3850 = vmatprep.subr.bf16.mxu1 %v6782_v14  ;;  %v7520_v13 = vld [vmem:[#allocation8 + $0x100] ss:$16 sps:$4 sm:$0xff]   ;;  %v6854_v14 = vcombine.high %v493_v9, %v497_v11  ;;  %v7549_v9 = vld [vmem:[#allocation8 + $0x224] ss:$16 sps:$4 sm:$0xff]  }
 0x267   :  { %5506 = vmatprep.subr.bf16.mxu0 %v7498_v15  ;;  %v7525_v15 = vld [vmem:[#allocation8 + $0x124] ss:$16 sps:$4 sm:$0xff]  }
 0x268   :  { %3842 = vmatmul.mubr.bf16.vlgmr.msra.gmra.mrb[8].mxu1 %v8409_v21  ;;  %v7502_v21 = vld [vmem:[#allocation8 + $0x40] ss:$16 sps:$4 sm:$0xff]  }
 0x269   :  { %3760 = vmatmul.mubr.bf16.vlgmr.msra.gmra.mrb[4].mxu0 %v8425_v51  ;;  %3851 = vmatpush1.bf16.msra.mxu1 %v6781_v20  ;;  %v7523_v20 = vld [vmem:[#allocation8 + $0x120] ss:$16 sps:$4 sm:$0xff]  }
 0x26a   :  { %5507 = vmatpush1.bf16.msra.mxu0 %v7496_v22  ;;  %5538 = vmatprep.mubr.bf16.mxu0 %v8468_v30  ;;  %v6862_v22 = vcombine.high %v501_v17, %v505_v18  ;;  %v561_v5 = vld [vmem:[#allocation5 + $0xc78] sm:$0xff] }
 0x26b   :  { %3852 = vmatprep.subr.bf16.mxu1 %v6790_v23  ;;  %5508 = vmatprep.subr.bf16.mxu0 %v7501_v26  ;;  %v7528_v23 = vld [vmem:[#allocation8 + $0x144] ss:$16 sps:$4 sm:$0xff]  }
 0x26c   :  { %3882 = vmatprep.mubr.bf16.mxu1 %v8411_v27  ;;  %v465_v27 = vld [vmem:[#allocation5 + $0x978] sm:$0xff] }
 0x26d   :  { %3853 = vmatpush1.bf16.msra.mxu1 %v6789_v58  ;;  %v6822_v50 = vcombine.high %v461_v47, %v465_v27  ;;  %v6821_v59 = vcombine.low %v461_v47, %v465_v27  ;;  %v509_v26 = vld [vmem:[#allocation5 + $0xad8] sm:$0xff] }
 0x26e   :  { %5509 = vmatpush1.bf16.msra.mxu0 %v7499_v31  ;;  %3854 = vmatprep.subr.bf16.mxu1 %v6798_v32  ;;  %v7526_v58 = vld [vmem:[#allocation8 + $0x140] ss:$16 sps:$4 sm:$0xff]   ;;  %v6870_v31 = vcombine.high %v509_v26, %v513_v28  ;;  %v7531_v32 = vld [vmem:[#allocation8 + $0x164] ss:$16 sps:$4 sm:$0xff]   ;;  %v6869_v36 = vcombine.low %v509_v26, %v513_v28 }
 0x26f   :  { %5510 = vmatprep.subr.bf16.mxu0 %v7504_v33  ;;  %v517_v33 = vld [vmem:[#allocation5 + $0xb18] sm:$0xff] }
 0x270   :  { %v6877_v41 = vcombine.low %v517_v33, %v521_v34  ;;  %v537_v47 = vld [vmem:[#allocation5 + $0xbb8] sm:$0xff] }
 0x271   :  { %3855 = vmatpush1.bf16.msra.mxu1 %v6797_v37  ;;  %v7529_v37 = vld [vmem:[#allocation8 + $0x160] ss:$16 sps:$4 sm:$0xff]  }
 0x272   :  { %5511 = vmatpush1.bf16.msra.mxu0 %v7502_v21  ;;  %3856 = vmatprep.subr.bf16.mxu1 %v6806_v38  ;;  %v6878_v21 = vcombine.high %v517_v33, %v521_v34  ;;  %v7534_v38 = vld [vmem:[#allocation8 + $0x184] ss:$16 sps:$4 sm:$0xff]   ;;  %v690_v34 = vsub.s32 3, %v8447_v10 }
 0x273   :  { %5512 = vmatprep.subr.bf16.mxu0 %v7507_v39  ;;  %v525_v39 = vld [vmem:[#allocation5 + $0xb58] sm:$0xff] }
 0x274   :  { %v6885_v27 = vcombine.low %v525_v39, %v529_v40  ;;  %v565_v11 = vld [vmem:[#allocation5 + $0xc98] sm:$0xff] }
 0x275   :  { %3857 = vmatpush1.bf16.msra.mxu1 %v6805_v42  ;;  %v7532_v42 = vld [vmem:[#allocation8 + $0x180] ss:$16 sps:$4 sm:$0xff]  }
 0x276   :  { %5513 = vmatpush1.bf16.msra.mxu0 %v7505_v44  ;;  %3858 = vmatprep.subr.bf16.mxu1 %v6814_v45  ;;  %v6886_v44 = vcombine.high %v525_v39, %v529_v40  ;;  %v7537_v45 = vld [vmem:[#allocation8 + $0x1a4] ss:$16 sps:$4 sm:$0xff]   ;;  %v691_v40 = vrot.slane %v8452_v24, %v690_v34 }
 0x277   :  { %5514 = vmatprep.subr.bf16.mxu0 %v7510_v46  ;;  %v533_v46 = vld [vmem:[#allocation5 + $0xb98] sm:$0xff] }
 0x278   :  { %v6893_v56 = vcombine.low %v533_v46, %v537_v47  ;;  %v573_v17 = vld [vmem:[#allocation5 + $0xcd8] sm:$0xff] }
 0x279   :  { %3859 = vmatpush1.bf16.msra.mxu1 %v6813_v48  ;;  %v7535_v48 = vld [vmem:[#allocation8 + $0x1a0] ss:$16 sps:$4 sm:$0xff]  }
 0x27a   :  { %5515 = vmatpush1.bf16.msra.mxu0 %v7508_v49  ;;  %3860 = vmatprep.subr.bf16.mxu1 %v6822_v50  ;;  %v6894_v49 = vcombine.high %v533_v46, %v537_v47  ;;  %v7540_v50 = vld [vmem:[#allocation8 + $0x1c4] ss:$16 sps:$4 sm:$0xff]  }
 0x27b   :  { %5516 = vmatprep.subr.bf16.mxu0 %v7513_v52  ;;  %v541_v52 = vld [vmem:[#allocation5 + $0xbd8] sm:$0xff] }
 0x27c   :  { %v6901_v57 = vcombine.low %v541_v52, %v545_v54  ;;  %v577_v18 = vld [vmem:[#allocation5 + $0xcf8] sm:$0xff] }
 0x27d   :  { %3861 = vmatpush1.bf16.msra.mxu1 %v6821_v59  ;;  %v7538_v59 = vld [vmem:[#allocation8 + $0x1c0] ss:$16 sps:$4 sm:$0xff]   ;;  %v6933_v28 = vcombine.low %v573_v17, %v577_v18  ;;  %v7564_v46 = vld [vmem:[#allocation8 + $0x2c4] ss:$16 sps:$4 sm:$0xff]  }
 0x27e   :  { %5517 = vmatpush1.bf16.msra.mxu0 %v7511_v62  ;;  %3862 = vmatprep.subr.bf16.mxu1 %v6830_v55  ;;  %v6902_v62 = vcombine.high %v541_v52, %v545_v54  ;;  %v7543_v55 = vld [vmem:[#allocation8 + $0x1e4] ss:$16 sps:$4 sm:$0xff]  }
 0x27f   :  { %5518 = vmatprep.subr.bf16.mxu0 %v7516_v63  ;;  %v549_v63 = vld [vmem:[#allocation5 + $0xc18] sm:$0xff] }
 0x280   :  { %v585_v26 = vld [vmem:[#allocation5 + $0xd38] sm:$0xff] }
 0x281   :  { %3863 = vmatpush1.bf16.msra.mxu1 %v6829_v60  ;;  %v7541_v60 = vld [vmem:[#allocation8 + $0x1e0] ss:$16 sps:$4 sm:$0xff]  }
 0x282   :  { %5519 = vmatpush1.bf16.msra.mxu0 %v7514_v1  ;;  %3864 = vmatprep.subr.bf16.mxu1 %v6838_v2  ;;  %v6910_v1 = vcombine.high %v549_v63, %v553_v0  ;;  %v3932_v2 = vmax.f32 %v8463_v53, 0.0  ;;  %v6917_v53 = vcombine.low %v557_v4, %v561_v5  ;;  %v601_v39 = vld [vmem:[#allocation5 + $0xdb8] sm:$0xff] }
 0x283   :  { %5520 = vmatprep.subr.bf16.mxu0 %v7519_v3  ;;  %v7546_v3 = vld [vmem:[#allocation8 + $0x204] ss:$16 sps:$4 sm:$0xff]  }
 0x284   :  { %v605_v47 = vld [vmem:[#allocation5 + $0xdd8] sm:$0xff] }
 0x285   :  { %3865 = vmatpush1.bf16.msra.mxu1 %v6837_v6  ;;  %v6909_v6 = vcombine.low %v549_v63, %v553_v0  ;;  %v613_v63 = vld [vmem:[#allocation5 + $0xe18] sm:$0xff] }
 0x286   :  { %5521 = vmatpush1.bf16.msra.mxu0 %v7517_v7  ;;  %3866 = vmatprep.subr.bf16.mxu1 %v6846_v16  ;;  %v7544_v7 = vld [vmem:[#allocation8 + $0x200] ss:$16 sps:$4 sm:$0xff]   ;;  %v6918_v16 = vcombine.high %v557_v4, %v561_v5 }
 0x287   :  { %5522 = vmatprep.subr.bf16.mxu0 %v7522_v8  ;;  %v8475_v8 = vpack.c.bf16 %v3932_v2, %v3932_v2  ;;  %v617_v0 = vld [vmem:[#allocation5 + $0xe38] sm:$0xff] }
 0x288   :  { %v6974_v2 = vcombine.high %v613_v63, %v617_v0  ;;  %v621_v4 = vld [vmem:[#allocation5 + $0xe58] sm:$0xff] }
 0x289   :  { %3867 = vmatpush1.bf16.msra.mxu1 %v6845_v12  ;;  %v569_v12 = vld [vmem:[#allocation5 + $0xcb8] sm:$0xff] }
 0x28a   :  { %5523 = vmatpush1.bf16.msra.mxu0 %v7520_v13  ;;  %3868 = vmatprep.subr.bf16.mxu1 %v6854_v14  ;;  %v7547_v13 = vld [vmem:[#allocation8 + $0x220] ss:$16 sps:$4 sm:$0xff]   ;;  %v6926_v14 = vcombine.high %v565_v11, %v569_v12 }
 0x28b   :  { %5524 = vmatprep.subr.bf16.mxu0 %v7525_v15  ;;  %v7552_v15 = vld [vmem:[#allocation8 + $0x244] ss:$16 sps:$4 sm:$0xff]  }
 0x28c   :  { %v625_v5 = vld [vmem:[#allocation5 + $0xe78] sm:$0xff] }
 0x28d   :  { %3869 = vmatpush1.bf16.msra.mxu1 %v6853_v61  ;;  %v6925_v61 = vcombine.low %v565_v11, %v569_v12  ;;  %v629_v11 = vld [vmem:[#allocation5 + $0xe98] sm:$0xff] }
 0x28e   :  { %5525 = vmatpush1.bf16.msra.mxu0 %v7523_v20  ;;  %3870 = vmatprep.subr.bf16.mxu1 %v6862_v22  ;;  %v7550_v20 = vld [vmem:[#allocation8 + $0x240] ss:$16 sps:$4 sm:$0xff]   ;;  %v7555_v22 = vld [vmem:[#allocation8 + $0x264] ss:$16 sps:$4 sm:$0xff]  }
 0x28f   :  { %5526 = vmatprep.subr.bf16.mxu0 %v7528_v23  ;;  %v581_v23 = vld [vmem:[#allocation5 + $0xd18] sm:$0xff] }
 0x290   :  { %v6941_v33 = vcombine.low %v581_v23, %v585_v26  ;;  %v633_v12 = vld [vmem:[#allocation5 + $0xeb8] sm:$0xff] }
 0x291   :  { %3871 = vmatpush1.bf16.msra.mxu1 %v6861_v29  ;;  %v7553_v29 = vld [vmem:[#allocation8 + $0x260] ss:$16 sps:$4 sm:$0xff]  }
 0x292   :  { %5527 = vmatpush1.bf16.msra.mxu0 %v7526_v58  ;;  %3872 = vmatprep.subr.bf16.mxu1 %v6870_v31  ;;  %v6942_v58 = vcombine.high %v581_v23, %v585_v26  ;;  %v7558_v31 = vld [vmem:[#allocation8 + $0x284] ss:$16 sps:$4 sm:$0xff]  }
 0x293   :  { %5528 = vmatprep.subr.bf16.mxu0 %v7531_v32  ;;  %v589_v32 = vld [vmem:[#allocation5 + $0xd58] sm:$0xff] }
 0x294   :  { %v645_v23 = vld [vmem:[#allocation5 + $0xf18] sm:$0xff] }
 0x295   :  { %3873 = vmatpush1.bf16.msra.mxu1 %v6869_v36  ;;  %v7556_v36 = vld [vmem:[#allocation8 + $0x280] ss:$16 sps:$4 sm:$0xff]  }
 0x296   :  { %5529 = vmatpush1.bf16.msra.mxu0 %v7529_v37  ;;  %3874 = vmatprep.subr.bf16.mxu1 %v6878_v21  ;;  %v7561_v21 = vld [vmem:[#allocation8 + $0x2a4] ss:$16 sps:$4 sm:$0xff]  }
 0x297   :  { %5530 = vmatprep.subr.bf16.mxu0 %v7534_v38  ;;  %v597_v38 = vld [vmem:[#allocation5 + $0xd98] sm:$0xff] }
 0x298   :  { %v6957_v52 = vcombine.low %v597_v38, %v601_v39  ;;  %v649_v26 = vld [vmem:[#allocation5 + $0xf38] sm:$0xff] }
 0x299   :  { %3875 = vmatpush1.bf16.msra.mxu1 %v6877_v41 }
 0x29a   :  { %5531 = vmatpush1.bf16.msra.mxu0 %v7532_v42  ;;  %3876 = vmatprep.subr.bf16.mxu1 %v6886_v44  ;;  %v7559_v42 = vld [vmem:[#allocation8 + $0x2a0] ss:$16 sps:$4 sm:$0xff]   ;;  %v6958_v44 = vcombine.high %v597_v38, %v601_v39  ;;  %v7585_v38 = vld [vmem:[#allocation8 + $0x3a4] ss:$16 sps:$4 sm:$0xff]  }
 0x29b   :  { %5532 = vmatprep.subr.bf16.mxu0 %v7537_v45  ;;  %v661_v39 = vld [vmem:[#allocation5 + $0xf98] sm:$0xff] }
 0x29d   :  { %3877 = vmatpush1.bf16.msra.mxu1 %v6885_v27  ;;  %v609_v27 = vld [vmem:[#allocation5 + $0xdf8] sm:$0xff] }
 0x29e   :  { %5533 = vmatpush1.bf16.msra.mxu0 %v7535_v48  ;;  %3878 = vmatprep.subr.bf16.mxu1 %v6894_v49 }
 0x29f   :  { %5534 = vmatprep.subr.bf16.mxu0 %v7540_v50 }
 0x2a1   :  { %3879 = vmatpush1.bf16.msra.mxu1 %v6893_v56  ;;  %v7562_v56 = vld [vmem:[#allocation8 + $0x2c0] ss:$16 sps:$4 sm:$0xff]  }
 0x2a2   :  { %5535 = vmatpush1.bf16.msra.mxu0 %v7538_v59  ;;  %3880 = vmatprep.subr.bf16.mxu1 %v6902_v62  ;;  %v6966_v59 = vcombine.high %v605_v47, %v609_v27 }
 0x2a3   :  { %5536 = vmatprep.subr.bf16.mxu0 %v7543_v55  ;;  %v7567_v55 = vld [vmem:[#allocation8 + $0x2e4] ss:$16 sps:$4 sm:$0xff]  }
 0x2a5   :  { %3881 = vmatpush1.bf16.msra.mxu1 %v6901_v57 }
 0x2a6   :  { %5537 = vmatpush1.bf16.msra.mxu0 %v7541_v60  ;;  %3891 = vmatprep.subr.bf16.mxu1 %v6910_v1  ;;  %v6965_v60 = vcombine.low %v605_v47, %v609_v27  ;;  %v7565_v1 = vld [vmem:[#allocation8 + $0x2e0] ss:$16 sps:$4 sm:$0xff]   ;;  %v7588_v47 = vld [vmem:[#allocation8 + $0x3c4] ss:$16 sps:$4 sm:$0xff]  }
 0x2a7   :  { %5547 = vmatprep.subr.bf16.mxu0 %v7546_v3  ;;  %v7570_v3 = vld [vmem:[#allocation8 + $0x304] ss:$16 sps:$4 sm:$0xff]  }
 0x2a8   :  { %3883 = vmatmul.mubr.bf16.vlgmr.msra.gmra.mrb[8].mxu1 %v8417_v35  ;;  %v6934_v35 = vcombine.high %v573_v17, %v577_v18  ;;  %v637_v17 = vld [vmem:[#allocation5 + $0xed8] sm:$0xff] }
 0x2a9   :  { %5539 = vmatmul.mubr.bf16.vlgmr.msra.gmra.mrb[8].mxu0 %v8475_v8  ;;  %3892 = vmatpush1.bf16.msra.mxu1 %v6909_v6  ;;  %v6973_v6 = vcombine.low %v613_v63, %v617_v0  ;;  %v641_v18 = vld [vmem:[#allocation5 + $0xef8] sm:$0xff]  ;;  %v7592_v0 = vld [vmem:[#allocation8 + $0x8] ss:$16 sps:$4 sm:$0xff]  }
 0x2aa   :  { %5548 = vmatpush1.bf16.msra.mxu0 %v7544_v7  ;;  %3893 = vmatprep.subr.bf16.mxu1 %v6918_v16  ;;  %v7568_v7 = vld [vmem:[#allocation8 + $0x300] ss:$16 sps:$4 sm:$0xff]   ;;  %v6982_v16 = vcombine.high %v621_v4, %v625_v5  ;;  %v7615_v63 = vld [vmem:[#allocation8 + $0x404] ss:$16 sps:$4 sm:$0xff]  }
 0x2ab   :  { %5549 = vmatprep.subr.bf16.mxu0 %v7549_v9  ;;  %3923 = vmatprep.mubr.bf16.mxu1 %v8419_v43  ;;  %v593_v43 = vld [vmem:[#allocation5 + $0xd78] sm:$0xff] }
 0x2ac   :  { %v6950_v37 = vcombine.high %v589_v32, %v593_v43  ;;  %v6949_v41 = vcombine.low %v589_v32, %v593_v43  ;;  %v7573_v9 = vld [vmem:[#allocation8 + $0x324] ss:$16 sps:$4 sm:$0xff]  }
 0x2ad   :  { %3894 = vmatpush1.bf16.msra.mxu1 %v6917_v53  ;;  %v6981_v53 = vcombine.low %v621_v4, %v625_v5  ;;  %v653_v32 = vld [vmem:[#allocation5 + $0xf58] sm:$0xff]  ;;  %v7600_v4 = vld [vmem:[#allocation8 + $0x4c] ss:$16 sps:$4 sm:$0xff]  }
 0x2ae   :  { %5550 = vmatpush1.bf16.msra.mxu0 %v7547_v13  ;;  %3895 = vmatprep.subr.bf16.mxu1 %v6926_v14  ;;  %v7571_v13 = vld [vmem:[#allocation8 + $0x320] ss:$16 sps:$4 sm:$0xff]   ;;  %v6990_v14 = vcombine.high %v629_v11, %v633_v12 }
 0x2af   :  { %5551 = vmatprep.subr.bf16.mxu0 %v7552_v15  ;;  %v7576_v15 = vld [vmem:[#allocation8 + $0x344] ss:$16 sps:$4 sm:$0xff]   ;;  %v7619_v5 = vld [vmem:[#allocation8 + $0x420] ss:$16 sps:$4 sm:$0xff]  }
 0x2b0   :  { %v657_v43 = vld [vmem:[#allocation5 + $0xf78] sm:$0xff] }
 0x2b1   :  { %3896 = vmatpush1.bf16.msra.mxu1 %v6925_v61  ;;  %v6989_v61 = vcombine.low %v629_v11, %v633_v12  ;;  %v669_v27 = vld [vmem:[#allocation5 + $0xfd8] sm:$0xff]  ;;  %v7601_v11 = vld [vmem:[#allocation8 + $0x68] ss:$16 sps:$4 sm:$0xff]   ;;  %v7606_v12 = vld [vmem:[#allocation8 + $0x8c] ss:$16 sps:$4 sm:$0xff]  }
 0x2b2   :  { %5552 = vmatpush1.bf16.msra.mxu0 %v7550_v20  ;;  %3897 = vmatprep.subr.bf16.mxu1 %v6934_v35  ;;  %v7574_v20 = vld [vmem:[#allocation8 + $0x340] ss:$16 sps:$4 sm:$0xff]   ;;  %v6998_v35 = vcombine.high %v637_v17, %v641_v18 }
 0x2b3   :  { %5553 = vmatprep.subr.bf16.mxu0 %v7555_v22  ;;  %v7579_v22 = vld [vmem:[#allocation8 + $0x364] ss:$16 sps:$4 sm:$0xff]  }
 0x2b5   :  { %3898 = vmatpush1.bf16.msra.mxu1 %v6933_v28  ;;  %v6997_v28 = vcombine.low %v637_v17, %v641_v18  ;;  %v7645_v17 = vld [vmem:[#allocation8 + $0x4a4] ss:$16 sps:$4 sm:$0xff]   ;;  %v7607_v18 = vld [vmem:[#allocation8 + $0xa8] ss:$16 sps:$4 sm:$0xff]  }
 0x2b6   :  { %5554 = vmatpush1.bf16.msra.mxu0 %v7553_v29  ;;  %3899 = vmatprep.subr.bf16.mxu1 %v6942_v58  ;;  %v7577_v29 = vld [vmem:[#allocation8 + $0x360] ss:$16 sps:$4 sm:$0xff]   ;;  %v7006_v58 = vcombine.high %v645_v23, %v649_v26 }
 0x2b7   :  { %5555 = vmatprep.subr.bf16.mxu0 %v7558_v31  ;;  %v7582_v31 = vld [vmem:[#allocation8 + $0x384] ss:$16 sps:$4 sm:$0xff]  }
 0x2b9   :  { %3900 = vmatpush1.bf16.msra.mxu1 %v6941_v33  ;;  %v7005_v33 = vcombine.low %v645_v23, %v649_v26  ;;  %v7618_v23 = vld [vmem:[#allocation8 + $0xec] ss:$16 sps:$4 sm:$0xff]   ;;  %v7649_v26 = vld [vmem:[#allocation8 + $0x4c0] ss:$16 sps:$4 sm:$0xff]  }
 0x2ba   :  { %5556 = vmatpush1.bf16.msra.mxu0 %v7556_v36  ;;  %3901 = vmatprep.subr.bf16.mxu1 %v6950_v37  ;;  %v7580_v36 = vld [vmem:[#allocation8 + $0x380] ss:$16 sps:$4 sm:$0xff]   ;;  %v7014_v37 = vcombine.high %v653_v32, %v657_v43 }
 0x2bb   :  { %v8484_v45 = vpop.f32.mrb[4].mxu1  ;;  %5557 = vmatprep.subr.bf16.mxu0 %v7561_v21  ;;  %v686_v21 = vsub.s32 2, %v8447_v10 }
 0x2bc   :  { %v3599_v48 = vpop.f32.mrb[5].mxu1 }
 0x2bd   :  { %v7395_v49 = vadd.f32 %v3599_v48, %v691_v40  ;;  %v3601_v50 = vpop.f32.mrb[6].mxu1  ;;  %3902 = vmatpush1.bf16.msra.mxu1 %v6949_v41  ;;  %v665_v40 = vld [vmem:[#allocation5 + $0xfb8] sm:$0xff]  ;;  %v7013_v41 = vcombine.low %v653_v32, %v657_v43  ;;  %v7622_v43 = vld [vmem:[#allocation8 + $0x108] ss:$16 sps:$4 sm:$0xff]  }
 0x2be   :  { %5558 = vmatpush1.bf16.msra.mxu0 %v7559_v42  ;;  %v3602_v54 = vpop.f32.mrb[7].mxu1  ;;  %3903 = vmatprep.subr.bf16.mxu1 %v6958_v44  ;;  %v7583_v42 = vld [vmem:[#allocation8 + $0x3a0] ss:$16 sps:$4 sm:$0xff]   ;;  %v7022_v44 = vcombine.high %v661_v39, %v665_v40  ;;  %v7663_v32 = vld [vmem:[#allocation8 + $0x504] ss:$16 sps:$4 sm:$0xff]  }
 0x2bf   :  { %v3935_v62 = vmax.f32 %v7395_v49, 0.0  ;;  %5559 = vmatprep.subr.bf16.mxu0 %v7564_v46  ;;  %v687_v46 = vrot.slane %v8452_v24, %v686_v21  ;;  %v673_v48 = vld [vmem:[#allocation5 + $0xff8] sm:$0xff]  ;;  %v7021_v49 = vcombine.low %v661_v39, %v665_v40  ;;  %v7594_v24 = vld [vmem:[#allocation8 + $0xc] ss:$16 sps:$4 sm:$0xff]  }
 0x2c0   :  { %v7586_v50 = vld [vmem:[#allocation8 + $0x3c0] ss:$16 sps:$4 sm:$0xff]   ;;  %v7636_v39 = vld [vmem:[#allocation8 + $0x14c] ss:$16 sps:$4 sm:$0xff]  }
 0x2c1   :  { %v8486_v57 = vpack.c.bf16 %v3935_v62, %v3935_v62  ;;  %3904 = vmatpush1.bf16.msra.mxu1 %v6957_v52  ;;  %v7030_v52 = vcombine.high %v669_v27, %v673_v48  ;;  %v7394_v54 = vadd.f32 %v8484_v45, %v687_v46  ;;  %v7589_v62 = vld [vmem:[#allocation8 + $0x3e0] ss:$16 sps:$4 sm:$0xff]   ;;  %v7621_v45 = vld [vmem:[#allocation8 + $0x424] ss:$16 sps:$4 sm:$0xff]  }
 0x2c2   :  { %5560 = vmatpush1.bf16.msra.mxu0 %v7562_v56  ;;  %3905 = vmatprep.subr.bf16.mxu1 %v6966_v59  ;;  %v7591_v56 = vld [vmem:[#allocation8 + $0x3e4] ss:$16 sps:$4 sm:$0xff]   ;;  %v7029_v59 = vcombine.low %v669_v27, %v673_v48  ;;  %v7667_v40 = vld [vmem:[#allocation8 + $0x520] ss:$16 sps:$4 sm:$0xff]   ;;  %v7640_v27 = vld [vmem:[#allocation8 + $0x168] ss:$16 sps:$4 sm:$0xff]  }
 0x2c3   :  { %5579 = vmatprep.mubr.bf16.mxu0 %v8486_v57  ;;  %5561 = vmatprep.subr.bf16.mxu0 %v7567_v55  ;;  %v3934_v55 = vmax.f32 %v7394_v54, 0.0  ;;  %v7673_v46 = vld [vmem:[#allocation8 + $0x540] ss:$16 sps:$4 sm:$0xff]   ;;  %v7648_v48 = vld [vmem:[#allocation8 + $0x18c] ss:$16 sps:$4 sm:$0xff]  }
 0x2c4   :  { %v7654_v54 = vld [vmem:[#allocation8 + $0x1ac] ss:$16 sps:$4 sm:$0xff]  }
 0x2c5   :  { %3906 = vmatpush1.bf16.msra.mxu1 %v6965_v60  ;;  %v7597_v60 = vld [vmem:[#allocation8 + $0x2c] ss:$16 sps:$4 sm:$0xff]  }
 0x2c6   :  { %5562 = vmatpush1.bf16.msra.mxu0 %v7565_v1  ;;  %3907 = vmatprep.subr.bf16.mxu1 %v6974_v2  ;;  %v8494_v1 = vpack.c.bf16 %v3934_v55, %v3934_v55  ;;  %v7613_v2 = vld [vmem:[#allocation8 + $0x400] ss:$16 sps:$4 sm:$0xff]  }
 0x2c7   :  { %5563 = vmatprep.subr.bf16.mxu0 %v7570_v3  ;;  %v7595_v3 = vld [vmem:[#allocation8 + $0x28] ss:$16 sps:$4 sm:$0xff]   ;;  %v7691_v55 = vld [vmem:[#allocation8 + $0x5a0] ss:$16 sps:$4 sm:$0xff]  }
 0x2c9   :  { %3908 = vmatpush1.bf16.msra.mxu1 %v6973_v6  ;;  %v7627_v6 = vld [vmem:[#allocation8 + $0x444] ss:$16 sps:$4 sm:$0xff]  }
 0x2ca   :  { %5564 = vmatpush1.bf16.msra.mxu0 %v7568_v7  ;;  %3909 = vmatprep.subr.bf16.mxu1 %v6982_v16  ;;  %v7598_v7 = vld [vmem:[#allocation8 + $0x48] ss:$16 sps:$4 sm:$0xff]   ;;  %v7603_v16 = vld [vmem:[#allocation8 + $0x6c] ss:$16 sps:$4 sm:$0xff]  }
 0x2cb   :  { %5565 = vmatprep.subr.bf16.mxu0 %v7573_v9  ;;  %v7625_v9 = vld [vmem:[#allocation8 + $0x440] ss:$16 sps:$4 sm:$0xff]  }
 0x2cd   :  { %3910 = vmatpush1.bf16.msra.mxu1 %v6981_v53  ;;  %v7639_v53 = vld [vmem:[#allocation8 + $0x484] ss:$16 sps:$4 sm:$0xff]  }
 0x2ce   :  { %5566 = vmatpush1.bf16.msra.mxu0 %v7571_v13  ;;  %3911 = vmatprep.subr.bf16.mxu1 %v6990_v14  ;;  %v7604_v13 = vld [vmem:[#allocation8 + $0x88] ss:$16 sps:$4 sm:$0xff]   ;;  %v7609_v14 = vld [vmem:[#allocation8 + $0xac] ss:$16 sps:$4 sm:$0xff]  }
 0x2cf   :  { %5567 = vmatprep.subr.bf16.mxu0 %v7576_v15  ;;  %v7637_v15 = vld [vmem:[#allocation8 + $0x480] ss:$16 sps:$4 sm:$0xff]  }
 0x2d1   :  { %3912 = vmatpush1.bf16.msra.mxu1 %v6989_v61  ;;  %v7612_v61 = vld [vmem:[#allocation8 + $0xcc] ss:$16 sps:$4 sm:$0xff]  }
 0x2d2   :  { %5568 = vmatpush1.bf16.msra.mxu0 %v7574_v20  ;;  %3913 = vmatprep.subr.bf16.mxu1 %v6998_v35  ;;  %v7643_v20 = vld [vmem:[#allocation8 + $0x4a0] ss:$16 sps:$4 sm:$0xff]   ;;  %v7651_v35 = vld [vmem:[#allocation8 + $0x4c4] ss:$16 sps:$4 sm:$0xff]  }
 0x2d3   :  { %5569 = vmatprep.subr.bf16.mxu0 %v7579_v22  ;;  %v7610_v22 = vld [vmem:[#allocation8 + $0xc8] ss:$16 sps:$4 sm:$0xff]  }
 0x2d5   :  { %3914 = vmatpush1.bf16.msra.mxu1 %v6997_v28  ;;  %v7657_v28 = vld [vmem:[#allocation8 + $0x4e4] ss:$16 sps:$4 sm:$0xff]  }
 0x2d6   :  { %5570 = vmatpush1.bf16.msra.mxu0 %v7577_v29  ;;  %3915 = vmatprep.subr.bf16.mxu1 %v7006_v58  ;;  %v7616_v29 = vld [vmem:[#allocation8 + $0xe8] ss:$16 sps:$4 sm:$0xff]   ;;  %v7624_v58 = vld [vmem:[#allocation8 + $0x10c] ss:$16 sps:$4 sm:$0xff]  }
 0x2d7   :  { %5571 = vmatprep.subr.bf16.mxu0 %v7582_v31  ;;  %v7655_v31 = vld [vmem:[#allocation8 + $0x4e0] ss:$16 sps:$4 sm:$0xff]  }
 0x2d9   :  { %3916 = vmatpush1.bf16.msra.mxu1 %v7005_v33  ;;  %v7630_v33 = vld [vmem:[#allocation8 + $0x12c] ss:$16 sps:$4 sm:$0xff]  }
 0x2da   :  { %5572 = vmatpush1.bf16.msra.mxu0 %v7580_v36  ;;  %3917 = vmatprep.subr.bf16.mxu1 %v7014_v37  ;;  %v7661_v36 = vld [vmem:[#allocation8 + $0x500] ss:$16 sps:$4 sm:$0xff]   ;;  %v7669_v37 = vld [vmem:[#allocation8 + $0x524] ss:$16 sps:$4 sm:$0xff]  }
 0x2db   :  { %5573 = vmatprep.subr.bf16.mxu0 %v7585_v38  ;;  %v7628_v38 = vld [vmem:[#allocation8 + $0x128] ss:$16 sps:$4 sm:$0xff]  }
 0x2dd   :  { %3918 = vmatpush1.bf16.msra.mxu1 %v7013_v41  ;;  %v7675_v41 = vld [vmem:[#allocation8 + $0x544] ss:$16 sps:$4 sm:$0xff]  }
 0x2de   :  { %5574 = vmatpush1.bf16.msra.mxu0 %v7583_v42  ;;  %3919 = vmatprep.subr.bf16.mxu1 %v7022_v44  ;;  %v7634_v42 = vld [vmem:[#allocation8 + $0x148] ss:$16 sps:$4 sm:$0xff]   ;;  %v7642_v44 = vld [vmem:[#allocation8 + $0x16c] ss:$16 sps:$4 sm:$0xff]  }
 0x2df   :  { %5575 = vmatprep.subr.bf16.mxu0 %v7588_v47  ;;  %v7681_v47 = vld [vmem:[#allocation8 + $0x564] ss:$16 sps:$4 sm:$0xff]  }
 0x2e1   :  { %3920 = vmatpush1.bf16.msra.mxu1 %v7021_v49  ;;  %v7679_v49 = vld [vmem:[#allocation8 + $0x560] ss:$16 sps:$4 sm:$0xff]  }
 0x2e2   :  { %5576 = vmatpush1.bf16.msra.mxu0 %v7586_v50  ;;  %3921 = vmatprep.subr.bf16.mxu1 %v7030_v52  ;;  %v7687_v50 = vld [vmem:[#allocation8 + $0x584] ss:$16 sps:$4 sm:$0xff]   ;;  %v7646_v52 = vld [vmem:[#allocation8 + $0x188] ss:$16 sps:$4 sm:$0xff]  }
 0x2e3   :  { %5577 = vmatprep.subr.bf16.mxu0 %v7591_v56  ;;  %v7685_v56 = vld [vmem:[#allocation8 + $0x580] ss:$16 sps:$4 sm:$0xff]  }
 0x2e5   :  { %3922 = vmatpush1.bf16.msra.mxu1 %v7029_v59  ;;  %v7693_v59 = vld [vmem:[#allocation8 + $0x5a4] ss:$16 sps:$4 sm:$0xff]  }
 0x2e6   :  { %5578 = vmatpush1.bf16.msra.mxu0 %v7589_v62  ;;  %5670 = vmatprep.subr.bf16.mxu1 %v7594_v24  ;;  %v7652_v62 = vld [vmem:[#allocation8 + $0x1a8] ss:$16 sps:$4 sm:$0xff]   ;;  %v7660_v24 = vld [vmem:[#allocation8 + $0x1cc] ss:$16 sps:$4 sm:$0xff]  }
 0x2e7   :  { %5588 = vmatprep.subr.bf16.mxu0 %v7615_v63  ;;  %v7699_v63 = vld [vmem:[#allocation8 + $0x5c4] ss:$16 sps:$4 sm:$0xff]  }
 0x2e8   :  { %3924 = vmatmul.mubr.bf16.vlgmr.msra.gmra.mrb[8].mxu1 %v8425_v51  ;;  %v7633_v51 = vld [vmem:[#allocation8 + $0x464] ss:$16 sps:$4 sm:$0xff]  }
 0x2e9   :  { %5580 = vmatmul.mubr.bf16.vlgmr.msra.gmra.mrb[8].mxu0 %v8494_v1  ;;  %5671 = vmatpush1.bf16.msra.mxu1 %v7592_v0  ;;  %v7658_v0 = vld [vmem:[#allocation8 + $0x1c8] ss:$16 sps:$4 sm:$0xff]  }
 0x2ea   :  { %5702 = vmatprep.mubr.bf16.mxu1 %v8468_v30  ;;  %5672 = vmatprep.subr.bf16.mxu1 %v7597_v60  ;;  %v7631_v30 = vld [vmem:[#allocation8 + $0x460] ss:$16 sps:$4 sm:$0xff]   ;;  %v7666_v60 = vld [vmem:[#allocation8 + $0x1ec] ss:$16 sps:$4 sm:$0xff]  }
 0x2eb   :  { %5589 = vmatpush1.bf16.msra.mxu0 %v7613_v2  ;;  %v7697_v2 = vld [vmem:[#allocation8 + $0x5c0] ss:$16 sps:$4 sm:$0xff]  }
 0x2ec   :  { %5590 = vmatprep.subr.bf16.mxu0 %v7621_v45  ;;  %v7705_v45 = vld [vmem:[#allocation8 + $0x5e4] ss:$16 sps:$4 sm:$0xff]  }
 0x2ed   :  { %5673 = vmatpush1.bf16.msra.mxu1 %v7595_v3  ;;  %v7664_v3 = vld [vmem:[#allocation8 + $0x1e8] ss:$16 sps:$4 sm:$0xff]  }
 0x2ee   :  { %5674 = vmatprep.subr.bf16.mxu1 %v7600_v4  ;;  %v7672_v4 = vld [vmem:[#allocation8 + $0x20c] ss:$16 sps:$4 sm:$0xff]  }
 0x2ef   :  { %5591 = vmatpush1.bf16.msra.mxu0 %v7619_v5  ;;  %v7703_v5 = vld [vmem:[#allocation8 + $0x5e0] ss:$16 sps:$4 sm:$0xff]  }
 0x2f0   :  { %5592 = vmatprep.subr.bf16.mxu0 %v7627_v6  ;;  %v7759_v6 = vld [vmem:[#allocation8 + $0x604] ss:$16 sps:$4 sm:$0xff]  }
 0x2f1   :  { %5675 = vmatpush1.bf16.msra.mxu1 %v7598_v7  ;;  %v7670_v7 = vld [vmem:[#allocation8 + $0x208] ss:$16 sps:$4 sm:$0xff]  }
 0x2f2   :  { %5676 = vmatprep.subr.bf16.mxu1 %v7603_v16  ;;  %v7678_v16 = vld [vmem:[#allocation8 + $0x22c] ss:$16 sps:$4 sm:$0xff]  }
 0x2f3   :  { %5593 = vmatpush1.bf16.msra.mxu0 %v7625_v9  ;;  %v7676_v9 = vld [vmem:[#allocation8 + $0x228] ss:$16 sps:$4 sm:$0xff]  }
 0x2f4   :  { %5594 = vmatprep.subr.bf16.mxu0 %v7633_v51  ;;  %v7684_v51 = vld [vmem:[#allocation8 + $0x24c] ss:$16 sps:$4 sm:$0xff]  }
 0x2f5   :  { %5677 = vmatpush1.bf16.msra.mxu1 %v7601_v11  ;;  %v7682_v11 = vld [vmem:[#allocation8 + $0x248] ss:$16 sps:$4 sm:$0xff]  }
 0x2f6   :  { %5678 = vmatprep.subr.bf16.mxu1 %v7606_v12  ;;  %v7690_v12 = vld [vmem:[#allocation8 + $0x26c] ss:$16 sps:$4 sm:$0xff]  }
 0x2f7   :  { %5595 = vmatpush1.bf16.msra.mxu0 %v7631_v30  ;;  %v7688_v30 = vld [vmem:[#allocation8 + $0x268] ss:$16 sps:$4 sm:$0xff]  }
 0x2f8   :  { %5596 = vmatprep.subr.bf16.mxu0 %v7639_v53  ;;  %v7696_v53 = vld [vmem:[#allocation8 + $0x28c] ss:$16 sps:$4 sm:$0xff]  }
 0x2f9   :  { %5679 = vmatpush1.bf16.msra.mxu1 %v7604_v13  ;;  %v7694_v13 = vld [vmem:[#allocation8 + $0x288] ss:$16 sps:$4 sm:$0xff]  }
 0x2fa   :  { %5680 = vmatprep.subr.bf16.mxu1 %v7609_v14  ;;  %v694_v14 = vsub.s32 4, %v8447_v10 }
 0x2fb   :  { %5597 = vmatpush1.bf16.msra.mxu0 %v7637_v15  ;;  %v7702_v15 = vld [vmem:[#allocation8 + $0x2ac] ss:$16 sps:$4 sm:$0xff]  }
 0x2fc   :  { %5598 = vmatprep.subr.bf16.mxu0 %v7645_v17 }
 0x2fd   :  { %5681 = vmatpush1.bf16.msra.mxu1 %v7607_v18  ;;  %v7700_v18 = vld [vmem:[#allocation8 + $0x2a8] ss:$16 sps:$4 sm:$0xff]  }
 0x2fe   :  { %5682 = vmatprep.subr.bf16.mxu1 %v7612_v61 }
 0x2ff   :  { %5599 = vmatpush1.bf16.msra.mxu0 %v7643_v20  ;;  %v7708_v20 = vld [vmem:[#allocation8 + $0x2cc] ss:$16 sps:$4 sm:$0xff]  }
 0x300   :  { %5600 = vmatprep.subr.bf16.mxu0 %v7651_v35 }
 0x301   :  { %5683 = vmatpush1.bf16.msra.mxu1 %v7610_v22 }
 0x302   :  { %5684 = vmatprep.subr.bf16.mxu1 %v7618_v23 }
 0x303   :  { %5601 = vmatpush1.bf16.msra.mxu0 %v7649_v26  ;;  %v7706_v26 = vld [vmem:[#allocation8 + $0x2c8] ss:$16 sps:$4 sm:$0xff]  }
 0x304   :  { %5602 = vmatprep.subr.bf16.mxu0 %v7657_v28 }
 0x305   :  { %5685 = vmatpush1.bf16.msra.mxu1 %v7616_v29 }
 0x306   :  { %5686 = vmatprep.subr.bf16.mxu1 %v7624_v58  ;;  %v7711_v58 = vld [vmem:[#allocation8 + $0x2ec] ss:$16 sps:$4 sm:$0xff]  }
 0x307   :  { %5603 = vmatpush1.bf16.msra.mxu0 %v7655_v31 }
 0x308   :  { %5604 = vmatprep.subr.bf16.mxu0 %v7663_v32 }
 0x309   :  { %5687 = vmatpush1.bf16.msra.mxu1 %v7622_v43 }
 0x30a   :  { %5688 = vmatprep.subr.bf16.mxu1 %v7630_v33  ;;  %v7709_v33 = vld [vmem:[#allocation8 + $0x2e8] ss:$16 sps:$4 sm:$0xff]  }
 0x30b   :  { %5605 = vmatpush1.bf16.msra.mxu0 %v7661_v36 }
 0x30c   :  { %5606 = vmatprep.subr.bf16.mxu0 %v7669_v37  ;;  %v7714_v37 = vld [vmem:[#allocation8 + $0x30c] ss:$16 sps:$4 sm:$0xff]  }
 0x30d   :  { %5689 = vmatpush1.bf16.msra.mxu1 %v7628_v38  ;;  %v7757_v38 = vld [vmem:[#allocation8 + $0x600] ss:$16 sps:$4 sm:$0xff]  }
 0x30e   :  { %5690 = vmatprep.subr.bf16.mxu1 %v7636_v39 }
 0x30f   :  { %5607 = vmatpush1.bf16.msra.mxu0 %v7667_v40  ;;  %v7765_v40 = vld [vmem:[#allocation8 + $0x624] ss:$16 sps:$4 sm:$0xff]  }
 0x310   :  { %5608 = vmatprep.subr.bf16.mxu0 %v7675_v41  ;;  %v7712_v41 = vld [vmem:[#allocation8 + $0x308] ss:$16 sps:$4 sm:$0xff]  }
 0x311   :  { %5691 = vmatpush1.bf16.msra.mxu1 %v7634_v42  ;;  %v7717_v42 = vld [vmem:[#allocation8 + $0x32c] ss:$16 sps:$4 sm:$0xff]  }
 0x312   :  { %5692 = vmatprep.subr.bf16.mxu1 %v7642_v44  ;;  %v7763_v44 = vld [vmem:[#allocation8 + $0x620] ss:$16 sps:$4 sm:$0xff]  }
 0x313   :  { %5609 = vmatpush1.bf16.msra.mxu0 %v7673_v46  ;;  %v7771_v46 = vld [vmem:[#allocation8 + $0x644] ss:$16 sps:$4 sm:$0xff]  }
 0x314   :  { %5610 = vmatprep.subr.bf16.mxu0 %v7681_v47  ;;  %v7715_v47 = vld [vmem:[#allocation8 + $0x328] ss:$16 sps:$4 sm:$0xff]  }
 0x315   :  { %5693 = vmatpush1.bf16.msra.mxu1 %v7640_v27  ;;  %v7720_v27 = vld [vmem:[#allocation8 + $0x34c] ss:$16 sps:$4 sm:$0xff]  }
 0x316   :  { %5694 = vmatprep.subr.bf16.mxu1 %v7648_v48  ;;  %v7769_v48 = vld [vmem:[#allocation8 + $0x640] ss:$16 sps:$4 sm:$0xff]  }
 0x317   :  { %5611 = vmatpush1.bf16.msra.mxu0 %v7679_v49  ;;  %v7777_v49 = vld [vmem:[#allocation8 + $0x664] ss:$16 sps:$4 sm:$0xff]  }
 0x318   :  { %5612 = vmatprep.subr.bf16.mxu0 %v7687_v50  ;;  %v7718_v50 = vld [vmem:[#allocation8 + $0x348] ss:$16 sps:$4 sm:$0xff]  }
 0x319   :  { %5695 = vmatpush1.bf16.msra.mxu1 %v7646_v52  ;;  %v7723_v52 = vld [vmem:[#allocation8 + $0x36c] ss:$16 sps:$4 sm:$0xff]  }
 0x31a   :  { %5696 = vmatprep.subr.bf16.mxu1 %v7654_v54  ;;  %v7775_v54 = vld [vmem:[#allocation8 + $0x660] ss:$16 sps:$4 sm:$0xff]  }
 0x31b   :  { %5613 = vmatpush1.bf16.msra.mxu0 %v7685_v56  ;;  %v7783_v56 = vld [vmem:[#allocation8 + $0x684] ss:$16 sps:$4 sm:$0xff]  }
 0x31c   :  { %5614 = vmatprep.subr.bf16.mxu0 %v7693_v59  ;;  %v7721_v59 = vld [vmem:[#allocation8 + $0x368] ss:$16 sps:$4 sm:$0xff]  }
 0x31d   :  { %5697 = vmatpush1.bf16.msra.mxu1 %v7652_v62  ;;  %v7726_v62 = vld [vmem:[#allocation8 + $0x38c] ss:$16 sps:$4 sm:$0xff]  }
 0x31e   :  { %5698 = vmatprep.subr.bf16.mxu1 %v7660_v24  ;;  %v7781_v24 = vld [vmem:[#allocation8 + $0x680] ss:$16 sps:$4 sm:$0xff]  }
 0x31f   :  { %5615 = vmatpush1.bf16.msra.mxu0 %v7691_v55  ;;  %v7789_v55 = vld [vmem:[#allocation8 + $0x6a4] ss:$16 sps:$4 sm:$0xff]  }
 0x320   :  { %5616 = vmatprep.subr.bf16.mxu0 %v7699_v63  ;;  %v7724_v63 = vld [vmem:[#allocation8 + $0x388] ss:$16 sps:$4 sm:$0xff]  }
 0x321   :  { %5699 = vmatpush1.bf16.msra.mxu1 %v7658_v0  ;;  %v7729_v0 = vld [vmem:[#allocation8 + $0x3ac] ss:$16 sps:$4 sm:$0xff]  }
 0x322   :  { %5700 = vmatprep.subr.bf16.mxu1 %v7666_v60  ;;  %v7787_v60 = vld [vmem:[#allocation8 + $0x6a0] ss:$16 sps:$4 sm:$0xff]  }
 0x323   :  { %5617 = vmatpush1.bf16.msra.mxu0 %v7697_v2  ;;  %v7795_v2 = vld [vmem:[#allocation8 + $0x6c4] ss:$16 sps:$4 sm:$0xff]  }
 0x324   :  { %5618 = vmatprep.subr.bf16.mxu0 %v7705_v45  ;;  %v7727_v45 = vld [vmem:[#allocation8 + $0x3a8] ss:$16 sps:$4 sm:$0xff]  }
 0x325   :  { %5701 = vmatpush1.bf16.msra.mxu1 %v7664_v3  ;;  %v7732_v3 = vld [vmem:[#allocation8 + $0x3cc] ss:$16 sps:$4 sm:$0xff]  }
 0x326   :  { %5711 = vmatprep.subr.bf16.mxu1 %v7672_v4  ;;  %v7793_v4 = vld [vmem:[#allocation8 + $0x6c0] ss:$16 sps:$4 sm:$0xff]  }
 0x327   :  { %5619 = vmatpush1.bf16.msra.mxu0 %v7703_v5  ;;  %v7801_v5 = vld [vmem:[#allocation8 + $0x6e4] ss:$16 sps:$4 sm:$0xff]  }
 0x328   :  { %5703 = vmatmul.mubr.bf16.vlgmr.msra.gmra.mrb[12].mxu1 %v8475_v8  ;;  %5629 = vmatprep.subr.bf16.mxu0 %v7759_v6  ;;  %v698_v8 = vsub.s32 5, %v8447_v10  ;;  %v7730_v6 = vld [vmem:[#allocation8 + $0x3c8] ss:$16 sps:$4 sm:$0xff]  }
 0x329   :  { %5712 = vmatpush1.bf16.msra.mxu1 %v7670_v7  ;;  %5743 = vmatprep.mubr.bf16.mxu1 %v8486_v57  ;;  %v8503_v57 = vld [vmem:[#allocation7] sm:$0xff] }
 0x32a   :  { %5713 = vmatprep.subr.bf16.mxu1 %v7678_v16  ;;  %v695_v17 = vrot.slane %v8503_v57, %v694_v14  ;;  %v699_v61 = vrot.slane %v8503_v57, %v698_v8  ;;  %v7735_v7 = vld [vmem:[#allocation8 + $0x3ec] ss:$16 sps:$4 sm:$0xff]   ;;  %v7799_v16 = vld [vmem:[#allocation8 + $0x6e0] ss:$16 sps:$4 sm:$0xff]   ;;  %v7819_v8 = vld [vmem:[#allocation8 + $0x744] ss:$16 sps:$4 sm:$0xff]  }
 0x32b   :  { %v7811_v14 = vld [vmem:[#allocation8 + $0x720] ss:$16 sps:$4 sm:$0xff]  }
 0x32d   :  { %5714 = vmatpush1.bf16.msra.mxu1 %v7676_v9  ;;  %v7807_v9 = vld [vmem:[#allocation8 + $0x704] ss:$16 sps:$4 sm:$0xff]  }
 0x32e   :  { %5715 = vmatprep.subr.bf16.mxu1 %v7684_v51  ;;  %v7733_v51 = vld [vmem:[#allocation8 + $0x3e8] ss:$16 sps:$4 sm:$0xff]  }
 0x331   :  { %5716 = vmatpush1.bf16.msra.mxu1 %v7682_v11  ;;  %v7738_v11 = vld [vmem:[#allocation8 + $0x40c] ss:$16 sps:$4 sm:$0xff]  }
 0x332   :  { %5717 = vmatprep.subr.bf16.mxu1 %v7690_v12  ;;  %v7805_v12 = vld [vmem:[#allocation8 + $0x700] ss:$16 sps:$4 sm:$0xff]  }
 0x335   :  { %5718 = vmatpush1.bf16.msra.mxu1 %v7688_v30  ;;  %v7813_v30 = vld [vmem:[#allocation8 + $0x724] ss:$16 sps:$4 sm:$0xff]  }
 0x336   :  { %5719 = vmatprep.subr.bf16.mxu1 %v7696_v53  ;;  %v7736_v53 = vld [vmem:[#allocation8 + $0x408] ss:$16 sps:$4 sm:$0xff]  }
 0x339   :  { %5720 = vmatpush1.bf16.msra.mxu1 %v7694_v13  ;;  %v7741_v13 = vld [vmem:[#allocation8 + $0x42c] ss:$16 sps:$4 sm:$0xff]  }
 0x33a   :  { %5721 = vmatprep.subr.bf16.mxu1 %v7702_v15  ;;  %v7739_v15 = vld [vmem:[#allocation8 + $0x428] ss:$16 sps:$4 sm:$0xff]  }
 0x33c   :  { %v3761_v35 = vpop.f32.mrb[4].mxu0 }
 0x33d   :  { %v7396_v22 = vadd.f32 %v3761_v35, %v695_v17  ;;  %v3763_v23 = vpop.f32.mrb[5].mxu0  ;;  %5722 = vmatpush1.bf16.msra.mxu1 %v7700_v18  ;;  %v7744_v17 = vld [vmem:[#allocation8 + $0x44c] ss:$16 sps:$4 sm:$0xff]   ;;  %v7817_v18 = vld [vmem:[#allocation8 + $0x740] ss:$16 sps:$4 sm:$0xff]  }
 0x33e   :  { %v7397_v28 = vadd.f32 %v3763_v23, %v699_v61  ;;  %v3765_v29 = vpop.f32.mrb[6].mxu0  ;;  %5723 = vmatprep.subr.bf16.mxu1 %v7708_v20  ;;  %v7825_v61 = vld [vmem:[#allocation8 + $0x764] ss:$16 sps:$4 sm:$0xff]   ;;  %v7742_v20 = vld [vmem:[#allocation8 + $0x448] ss:$16 sps:$4 sm:$0xff]  }
 0x33f   :  { %v3936_v31 = vmax.f32 %v7396_v22, 0.0  ;;  %v3766_v32 = vpop.f32.mrb[7].mxu0  ;;  %v7747_v35 = vld [vmem:[#allocation8 + $0x46c] ss:$16 sps:$4 sm:$0xff]   ;;  %v7823_v22 = vld [vmem:[#allocation8 + $0x760] ss:$16 sps:$4 sm:$0xff]  }
 0x340   :  { %v3937_v43 = vmax.f32 %v7397_v28, 0.0  ;;  %v7831_v23 = vld [vmem:[#allocation8 + $0x784] ss:$16 sps:$4 sm:$0xff]   ;;  %v7829_v28 = vld [vmem:[#allocation8 + $0x780] ss:$16 sps:$4 sm:$0xff]  }
 0x341   :  { %5724 = vmatpush1.bf16.msra.mxu1 %v7706_v26  ;;  %v8509_v39 = vpack.c.bf16 %v3936_v31, %v3936_v31  ;;  %v7750_v26 = vld [vmem:[#allocation8 + $0x48c] ss:$16 sps:$4 sm:$0xff]   ;;  %v7837_v29 = vld [vmem:[#allocation8 + $0x7a4] ss:$16 sps:$4 sm:$0xff]   ;;  %v7835_v32 = vld [vmem:[#allocation8 + $0x7a0] ss:$16 sps:$4 sm:$0xff]  }
 0x342   :  { %v8507_v36 = vpack.c.bf16 %v3937_v43, %v3937_v43  ;;  %5725 = vmatprep.subr.bf16.mxu1 %v7711_v58  ;;  %v7748_v58 = vld [vmem:[#allocation8 + $0x488] ss:$16 sps:$4 sm:$0xff]   ;;  %v7753_v31 = vld [vmem:[#allocation8 + $0x4ac] ss:$16 sps:$4 sm:$0xff]   ;;  %v7843_v43 = vld [vmem:[#allocation8 + $0x7c4] ss:$16 sps:$4 sm:$0xff]  }
 0x344   :  { %5620 = vmatprep.mubr.bf16.mxu0 %v8507_v36 }
 0x345   :  { %5621 = vmatmul.mubr.bf16.vlgmr.msra.gmra.mrb[8].mxu0 %v8509_v39  ;;  %5726 = vmatpush1.bf16.msra.mxu1 %v7709_v33  ;;  %v7751_v33 = vld [vmem:[#allocation8 + $0x4a8] ss:$16 sps:$4 sm:$0xff]  }
 0x346   :  { %5727 = vmatprep.subr.bf16.mxu1 %v7714_v37  ;;  %5630 = vmatpush1.bf16.msra.mxu0 %v7757_v38  ;;  %v7841_v37 = vld [vmem:[#allocation8 + $0x7c0] ss:$16 sps:$4 sm:$0xff]   ;;  %v7849_v38 = vld [vmem:[#allocation8 + $0x7e4] ss:$16 sps:$4 sm:$0xff]  }
 0x347   :  { %5631 = vmatprep.subr.bf16.mxu0 %v7765_v40  ;;  %v7754_v40 = vld [vmem:[#allocation8 + $0x4c8] ss:$16 sps:$4 sm:$0xff]  }
 0x349   :  { %5728 = vmatpush1.bf16.msra.mxu1 %v7712_v41  ;;  %v7762_v41 = vld [vmem:[#allocation8 + $0x4ec] ss:$16 sps:$4 sm:$0xff]  }
 0x34a   :  { %5729 = vmatprep.subr.bf16.mxu1 %v7717_v42  ;;  %5632 = vmatpush1.bf16.msra.mxu0 %v7763_v44  ;;  %v7847_v42 = vld [vmem:[#allocation8 + $0x7e0] ss:$16 sps:$4 sm:$0xff]  }
 0x34b   :  { %5633 = vmatprep.subr.bf16.mxu0 %v7771_v46  ;;  %v7882_v44 = vld [vmem:[#allocation11 + $0x4] ss:$8 sps:$4 sm:$0xff]  }
 0x34c   :  { %v7760_v46 = vld [vmem:[#allocation8 + $0x4e8] ss:$16 sps:$4 sm:$0xff]  }
 0x34d   :  { %5730 = vmatpush1.bf16.msra.mxu1 %v7715_v47  ;;  %v7768_v47 = vld [vmem:[#allocation8 + $0x50c] ss:$16 sps:$4 sm:$0xff]  }
 0x34e   :  { %5731 = vmatprep.subr.bf16.mxu1 %v7720_v27  ;;  %5634 = vmatpush1.bf16.msra.mxu0 %v7769_v48  ;;  %v7766_v27 = vld [vmem:[#allocation8 + $0x508] ss:$16 sps:$4 sm:$0xff]   ;;  %v7774_v48 = vld [vmem:[#allocation8 + $0x52c] ss:$16 sps:$4 sm:$0xff]  }
 0x34f   :  { %5635 = vmatprep.subr.bf16.mxu0 %v7777_v49  ;;  %v7772_v49 = vld [vmem:[#allocation8 + $0x528] ss:$16 sps:$4 sm:$0xff]  }
 0x351   :  { %5732 = vmatpush1.bf16.msra.mxu1 %v7718_v50  ;;  %v7780_v50 = vld [vmem:[#allocation8 + $0x54c] ss:$16 sps:$4 sm:$0xff]  }
 0x352   :  { %5733 = vmatprep.subr.bf16.mxu1 %v7723_v52  ;;  %5636 = vmatpush1.bf16.msra.mxu0 %v7775_v54  ;;  %v7778_v52 = vld [vmem:[#allocation8 + $0x548] ss:$16 sps:$4 sm:$0xff]   ;;  %v7786_v54 = vld [vmem:[#allocation8 + $0x56c] ss:$16 sps:$4 sm:$0xff]  }
 0x353   :  { %5637 = vmatprep.subr.bf16.mxu0 %v7783_v56  ;;  %v7784_v56 = vld [vmem:[#allocation8 + $0x568] ss:$16 sps:$4 sm:$0xff]  }
 0x355   :  { %5734 = vmatpush1.bf16.msra.mxu1 %v7721_v59  ;;  %v7792_v59 = vld [vmem:[#allocation8 + $0x58c] ss:$16 sps:$4 sm:$0xff]  }
 0x356   :  { %5735 = vmatprep.subr.bf16.mxu1 %v7726_v62  ;;  %5638 = vmatpush1.bf16.msra.mxu0 %v7781_v24  ;;  %v7790_v62 = vld [vmem:[#allocation8 + $0x588] ss:$16 sps:$4 sm:$0xff]   ;;  %v7798_v24 = vld [vmem:[#allocation8 + $0x5ac] ss:$16 sps:$4 sm:$0xff]  }
 0x357   :  { %5639 = vmatprep.subr.bf16.mxu0 %v7789_v55  ;;  %v7796_v55 = vld [vmem:[#allocation8 + $0x5a8] ss:$16 sps:$4 sm:$0xff]  }
 0x359   :  { %5736 = vmatpush1.bf16.msra.mxu1 %v7724_v63  ;;  %v7804_v63 = vld [vmem:[#allocation8 + $0x5cc] ss:$16 sps:$4 sm:$0xff]  }
 0x35a   :  { %5737 = vmatprep.subr.bf16.mxu1 %v7729_v0  ;;  %5640 = vmatpush1.bf16.msra.mxu0 %v7787_v60  ;;  %v7802_v0 = vld [vmem:[#allocation8 + $0x5c8] ss:$16 sps:$4 sm:$0xff]   ;;  %v7810_v60 = vld [vmem:[#allocation8 + $0x5ec] ss:$16 sps:$4 sm:$0xff]  }
 0x35b   :  { %5641 = vmatprep.subr.bf16.mxu0 %v7795_v2  ;;  %v7808_v2 = vld [vmem:[#allocation8 + $0x5e8] ss:$16 sps:$4 sm:$0xff]  }
 0x35d   :  { %5738 = vmatpush1.bf16.msra.mxu1 %v7727_v45  ;;  %v7816_v45 = vld [vmem:[#allocation8 + $0x60c] ss:$16 sps:$4 sm:$0xff]  }
 0x35e   :  { %5739 = vmatprep.subr.bf16.mxu1 %v7732_v3  ;;  %5642 = vmatpush1.bf16.msra.mxu0 %v7793_v4  ;;  %v7814_v3 = vld [vmem:[#allocation8 + $0x608] ss:$16 sps:$4 sm:$0xff]   ;;  %v7822_v4 = vld [vmem:[#allocation8 + $0x62c] ss:$16 sps:$4 sm:$0xff]  }
 0x35f   :  { %5643 = vmatprep.subr.bf16.mxu0 %v7801_v5  ;;  %v7820_v5 = vld [vmem:[#allocation8 + $0x628] ss:$16 sps:$4 sm:$0xff]  }
 0x361   :  { %5740 = vmatpush1.bf16.msra.mxu1 %v7730_v6  ;;  %v7828_v6 = vld [vmem:[#allocation8 + $0x64c] ss:$16 sps:$4 sm:$0xff]  }
 0x362   :  { %5741 = vmatprep.subr.bf16.mxu1 %v7735_v7  ;;  %5644 = vmatpush1.bf16.msra.mxu0 %v7799_v16  ;;  %v7826_v7 = vld [vmem:[#allocation8 + $0x648] ss:$16 sps:$4 sm:$0xff]   ;;  %v7834_v16 = vld [vmem:[#allocation8 + $0x66c] ss:$16 sps:$4 sm:$0xff]  }
 0x363   :  { %5645 = vmatprep.subr.bf16.mxu0 %v7807_v9  ;;  %v7832_v9 = vld [vmem:[#allocation8 + $0x668] ss:$16 sps:$4 sm:$0xff]  }
 0x365   :  { %5742 = vmatpush1.bf16.msra.mxu1 %v7733_v51  ;;  %v7840_v51 = vld [vmem:[#allocation8 + $0x68c] ss:$16 sps:$4 sm:$0xff]  }
 0x366   :  { %5752 = vmatprep.subr.bf16.mxu1 %v7738_v11  ;;  %5646 = vmatpush1.bf16.msra.mxu0 %v7805_v12  ;;  %v702_v11 = vsub.s32 6, %v8447_v10  ;;  %v7838_v12 = vld [vmem:[#allocation8 + $0x688] ss:$16 sps:$4 sm:$0xff]  }
 0x367   :  { %5647 = vmatprep.subr.bf16.mxu0 %v7813_v30  ;;  %v706_v30 = vsub.s32 7, %v8447_v10  ;;  %v7990_v10 = vld [vmem:[#allocation14 + $0x78] sm:$0xff]  }
 0x368   :  { %5744 = vmatmul.mubr.bf16.vlgmr.msra.gmra.mrb[12].mxu1 %v8494_v1  ;;  %v7745_v1 = vld [vmem:[#allocation8 + $0x468] ss:$16 sps:$4 sm:$0xff]  }
 0x369   :  { %5753 = vmatpush1.bf16.msra.mxu1 %v7736_v53  ;;  %5784 = vmatprep.mubr.bf16.mxu1 %v8507_v36  ;;  %v7756_v36 = vld [vmem:[#allocation8 + $0x4cc] ss:$16 sps:$4 sm:$0xff]   ;;  %v703_v53 = vrot.slane %v8503_v57, %v702_v11 }
 0x36a   :  { %5754 = vmatprep.subr.bf16.mxu1 %v7741_v13  ;;  %5648 = vmatpush1.bf16.msra.mxu0 %v7811_v14  ;;  %v707_v13 = vrot.slane %v8503_v57, %v706_v30  ;;  %v7844_v14 = vld [vmem:[#allocation8 + $0x6a8] ss:$16 sps:$4 sm:$0xff]   ;;  %v7913_v11 = vld [vmem:[#allocation11 + $0xb0] ss:$8 sps:$4 sm:$0xff]   ;;  %v7916_v30 = vld [vmem:[#allocation11 + $0xc0] ss:$8 sps:$4 sm:$0xff]  }
 0x36b   :  { %5649 = vmatprep.subr.bf16.mxu0 %v7819_v8  ;;  %v7852_v8 = vld [vmem:[#allocation8 + $0x6cc] ss:$16 sps:$4 sm:$0xff]  }
 0x36d   :  { %5755 = vmatpush1.bf16.msra.mxu1 %v7739_v15 }
 0x36e   :  { %5756 = vmatprep.subr.bf16.mxu1 %v7744_v17  ;;  %5650 = vmatpush1.bf16.msra.mxu0 %v7817_v18 }
 0x36f   :  { %5651 = vmatprep.subr.bf16.mxu0 %v7825_v61 }
 0x371   :  { %5757 = vmatpush1.bf16.msra.mxu1 %v7742_v20 }
 0x372   :  { %5758 = vmatprep.subr.bf16.mxu1 %v7747_v35  ;;  %5652 = vmatpush1.bf16.msra.mxu0 %v7823_v22  ;;  %v7850_v35 = vld [vmem:[#allocation8 + $0x6c8] ss:$16 sps:$4 sm:$0xff]  }
 0x373   :  { %5653 = vmatprep.subr.bf16.mxu0 %v7831_v23 }
 0x375   :  { %5759 = vmatpush1.bf16.msra.mxu1 %v7745_v1  ;;  %v7855_v1 = vld [vmem:[#allocation8 + $0x6ec] ss:$16 sps:$4 sm:$0xff]  }
 0x376   :  { %5760 = vmatprep.subr.bf16.mxu1 %v7750_v26  ;;  %5654 = vmatpush1.bf16.msra.mxu0 %v7829_v28 }
 0x377   :  { %5655 = vmatprep.subr.bf16.mxu0 %v7837_v29  ;;  %v7853_v29 = vld [vmem:[#allocation8 + $0x6e8] ss:$16 sps:$4 sm:$0xff]  }
 0x379   :  { %5761 = vmatpush1.bf16.msra.mxu1 %v7748_v58  ;;  %v7880_v58 = vld [vmem:[#allocation11] ss:$8 sps:$4 sm:$0xff]  }
 0x37a   :  { %5762 = vmatprep.subr.bf16.mxu1 %v7753_v31  ;;  %5656 = vmatpush1.bf16.msra.mxu0 %v7835_v32  ;;  %v7858_v31 = vld [vmem:[#allocation8 + $0x70c] ss:$16 sps:$4 sm:$0xff]   ;;  %v7885_v32 = vld [vmem:[#allocation11 + $0x14] ss:$8 sps:$4 sm:$0xff]  }
 0x37b   :  { %5657 = vmatprep.subr.bf16.mxu0 %v7843_v43  ;;  %v7856_v43 = vld [vmem:[#allocation8 + $0x708] ss:$16 sps:$4 sm:$0xff]  }
 0x37d   :  { %5763 = vmatpush1.bf16.msra.mxu1 %v7751_v33  ;;  %v7883_v33 = vld [vmem:[#allocation11 + $0x10] ss:$8 sps:$4 sm:$0xff]  }
 0x37e   :  { %5764 = vmatprep.subr.bf16.mxu1 %v7756_v36  ;;  %5658 = vmatpush1.bf16.msra.mxu0 %v7841_v37  ;;  %v7861_v36 = vld [vmem:[#allocation8 + $0x72c] ss:$16 sps:$4 sm:$0xff]   ;;  %v7888_v37 = vld [vmem:[#allocation11 + $0x24] ss:$8 sps:$4 sm:$0xff]  }
 0x37f   :  { %5659 = vmatprep.subr.bf16.mxu0 %v7849_v38  ;;  %v7859_v38 = vld [vmem:[#allocation8 + $0x728] ss:$16 sps:$4 sm:$0xff]  }
 0x381   :  { %5765 = vmatpush1.bf16.msra.mxu1 %v7754_v40  ;;  %v7886_v40 = vld [vmem:[#allocation11 + $0x20] ss:$8 sps:$4 sm:$0xff]  }
 0x382   :  { %5766 = vmatprep.subr.bf16.mxu1 %v7762_v41  ;;  %5660 = vmatpush1.bf16.msra.mxu0 %v7847_v42  ;;  %v7864_v41 = vld [vmem:[#allocation8 + $0x74c] ss:$16 sps:$4 sm:$0xff]   ;;  %v7891_v42 = vld [vmem:[#allocation11 + $0x34] ss:$8 sps:$4 sm:$0xff]  }
 0x383   :  { %6238 = vmatprep.subr.bf16.mxu0 %v7882_v44  ;;  %v7862_v44 = vld [vmem:[#allocation8 + $0x748] ss:$16 sps:$4 sm:$0xff]  }
 0x385   :  { %5767 = vmatpush1.bf16.msra.mxu1 %v7760_v46  ;;  %v7889_v46 = vld [vmem:[#allocation11 + $0x30] ss:$8 sps:$4 sm:$0xff]  }
 0x386   :  { %5768 = vmatprep.subr.bf16.mxu1 %v7768_v47  ;;  %v7867_v47 = vld [vmem:[#allocation8 + $0x76c] ss:$16 sps:$4 sm:$0xff]  }
 0x389   :  { %5769 = vmatpush1.bf16.msra.mxu1 %v7766_v27  ;;  %v7894_v27 = vld [vmem:[#allocation11 + $0x44] ss:$8 sps:$4 sm:$0xff]  }
 0x38a   :  { %5770 = vmatprep.subr.bf16.mxu1 %v7774_v48  ;;  %v7865_v48 = vld [vmem:[#allocation8 + $0x768] ss:$16 sps:$4 sm:$0xff]  }
 0x38d   :  { %5771 = vmatpush1.bf16.msra.mxu1 %v7772_v49  ;;  %v7892_v49 = vld [vmem:[#allocation11 + $0x40] ss:$8 sps:$4 sm:$0xff]  }
 0x38e   :  { %5772 = vmatprep.subr.bf16.mxu1 %v7780_v50  ;;  %v7870_v50 = vld [vmem:[#allocation8 + $0x78c] ss:$16 sps:$4 sm:$0xff]  }
 0x391   :  { %5773 = vmatpush1.bf16.msra.mxu1 %v7778_v52  ;;  %v7897_v52 = vld [vmem:[#allocation11 + $0x54] ss:$8 sps:$4 sm:$0xff]  }
 0x392   :  { %5774 = vmatprep.subr.bf16.mxu1 %v7786_v54  ;;  %v7868_v54 = vld [vmem:[#allocation8 + $0x788] ss:$16 sps:$4 sm:$0xff]  }
 0x395   :  { %5775 = vmatpush1.bf16.msra.mxu1 %v7784_v56  ;;  %v7895_v56 = vld [vmem:[#allocation11 + $0x50] ss:$8 sps:$4 sm:$0xff]  }
 0x396   :  { %5776 = vmatprep.subr.bf16.mxu1 %v7792_v59  ;;  %v7873_v59 = vld [vmem:[#allocation8 + $0x7ac] ss:$16 sps:$4 sm:$0xff]  }
 0x399   :  { %5777 = vmatpush1.bf16.msra.mxu1 %v7790_v62  ;;  %v7900_v62 = vld [vmem:[#allocation11 + $0x64] ss:$8 sps:$4 sm:$0xff]  }
 0x39a   :  { %5778 = vmatprep.subr.bf16.mxu1 %v7798_v24  ;;  %v7871_v24 = vld [vmem:[#allocation8 + $0x7a8] ss:$16 sps:$4 sm:$0xff]  }
 0x39d   :  { %5779 = vmatpush1.bf16.msra.mxu1 %v7796_v55  ;;  %v7898_v55 = vld [vmem:[#allocation11 + $0x60] ss:$8 sps:$4 sm:$0xff]  }
 0x39e   :  { %5780 = vmatprep.subr.bf16.mxu1 %v7804_v63  ;;  %v7876_v63 = vld [vmem:[#allocation8 + $0x7cc] ss:$16 sps:$4 sm:$0xff]  }
 0x3a1   :  { %5781 = vmatpush1.bf16.msra.mxu1 %v7802_v0  ;;  %v7903_v0 = vld [vmem:[#allocation11 + $0x74] ss:$8 sps:$4 sm:$0xff]  }
 0x3a2   :  { %5782 = vmatprep.subr.bf16.mxu1 %v7810_v60  ;;  %v7874_v60 = vld [vmem:[#allocation8 + $0x7c8] ss:$16 sps:$4 sm:$0xff]  }
 0x3a5   :  { %5783 = vmatpush1.bf16.msra.mxu1 %v7808_v2  ;;  %v7901_v2 = vld [vmem:[#allocation11 + $0x70] ss:$8 sps:$4 sm:$0xff]  }
 0x3a6   :  { %5793 = vmatprep.subr.bf16.mxu1 %v7816_v45  ;;  %v7879_v45 = vld [vmem:[#allocation8 + $0x7ec] ss:$16 sps:$4 sm:$0xff]  }
 0x3a8   :  { %5785 = vmatmul.mubr.bf16.vlgmr.msra.gmra.mrb[12].mxu1 %v8509_v39  ;;  %v7846_v39 = vld [vmem:[#allocation8 + $0x6ac] ss:$16 sps:$4 sm:$0xff]  }
 0x3a9   :  { %5794 = vmatpush1.bf16.msra.mxu1 %v7814_v3  ;;  %v7906_v3 = vld [vmem:[#allocation11 + $0x84] ss:$8 sps:$4 sm:$0xff]  }
 0x3aa   :  { %5795 = vmatprep.subr.bf16.mxu1 %v7822_v4  ;;  %v7877_v4 = vld [vmem:[#allocation8 + $0x7e8] ss:$16 sps:$4 sm:$0xff]  }
 0x3ad   :  { %5796 = vmatpush1.bf16.msra.mxu1 %v7820_v5  ;;  %v7904_v5 = vld [vmem:[#allocation11 + $0x80] ss:$8 sps:$4 sm:$0xff]  }
 0x3ae   :  { %5797 = vmatprep.subr.bf16.mxu1 %v7828_v6  ;;  %v7909_v6 = vld [vmem:[#allocation11 + $0x94] ss:$8 sps:$4 sm:$0xff]  }
 0x3b1   :  { %5798 = vmatpush1.bf16.msra.mxu1 %v7826_v7  ;;  %v7907_v7 = vld [vmem:[#allocation11 + $0x90] ss:$8 sps:$4 sm:$0xff]  }
 0x3b2   :  { %5799 = vmatprep.subr.bf16.mxu1 %v7834_v16  ;;  %v7912_v16 = vld [vmem:[#allocation11 + $0xa4] ss:$8 sps:$4 sm:$0xff]  }
 0x3b5   :  { %5800 = vmatpush1.bf16.msra.mxu1 %v7832_v9  ;;  %v7910_v9 = vld [vmem:[#allocation11 + $0xa0] ss:$8 sps:$4 sm:$0xff]  }
 0x3b6   :  { %5801 = vmatprep.subr.bf16.mxu1 %v7840_v51  ;;  %v7915_v51 = vld [vmem:[#allocation11 + $0xb4] ss:$8 sps:$4 sm:$0xff]  }
 0x3b9   :  { %5802 = vmatpush1.bf16.msra.mxu1 %v7838_v12  ;;  %v7918_v12 = vld [vmem:[#allocation11 + $0xc4] ss:$8 sps:$4 sm:$0xff]  }
 0x3ba   :  { %5803 = vmatprep.subr.bf16.mxu1 %v7846_v39  ;;  %v7921_v39 = vld [vmem:[#allocation11 + $0xd4] ss:$8 sps:$4 sm:$0xff]  }
 0x3bb   :  { %v3925_v15 = vpop.f32.mrb[8].mxu1 }
 0x3bc   :  { %v7398_v17 = vadd.f32 %v3925_v15, %v703_v53  ;;  %v3927_v18 = vpop.f32.mrb[9].mxu1  ;;  %v7919_v53 = vld [vmem:[#allocation11 + $0xd0] ss:$8 sps:$4 sm:$0xff]  }
 0x3bd   :  { %v7399_v61 = vadd.f32 %v3927_v18, %v707_v13  ;;  %v3929_v20 = vpop.f32.mrb[10].mxu1  ;;  %5804 = vmatpush1.bf16.msra.mxu1 %v7844_v14  ;;  %v7924_v13 = vld [vmem:[#allocation11 + $0xe4] ss:$8 sps:$4 sm:$0xff]   ;;  %v7922_v14 = vld [vmem:[#allocation11 + $0xe0] ss:$8 sps:$4 sm:$0xff]  }
 0x3be   :  { %v3938_v22 = vmax.f32 %v7398_v17, 0.0  ;;  %v3930_v23 = vpop.f32.mrb[11].mxu1  ;;  %5805 = vmatprep.subr.bf16.mxu1 %v7852_v8  ;;  %v7927_v8 = vld [vmem:[#allocation11 + $0xf4] ss:$8 sps:$4 sm:$0xff]   ;;  %v7925_v15 = vld [vmem:[#allocation11 + $0xf0] ss:$8 sps:$4 sm:$0xff]  }
 0x3bf   :  { %v3939_v26 = vmax.f32 %v7399_v61, 0.0  ;;  %v7930_v17 = vld [vmem:[#allocation11 + $0x104] ss:$8 sps:$4 sm:$0xff]   ;;  %v7981_v23 = vld [vmem:[#allocation14 + $0x10] sm:$0xff]  }
 0x3c0   :  { %v8520_v57 = vpack.c.bf16 %v3938_v22, %v3938_v22  ;;  %v7976_v18 = vld [vmem:[#allocation14 + $0x40] sm:$0xff]   ;;  %v7978_v20 = vld [vmem:[#allocation14 + $0x48] sm:$0xff]   ;;  %v7980_v22 = vld [vmem:[#allocation14 + $0x50] sm:$0xff]  }
 0x3c1   :  { %v3947_v28 = vpack.c.bf16 %v3939_v26, %v3939_v26  ;;  %5806 = vmatpush1.bf16.msra.mxu1 %v7850_v35  ;;  %v7977_v61 = vld [vmem:[#allocation14] sm:$0xff]   ;;  %v7979_v35 = vld [vmem:[#allocation14 + $0x8] sm:$0xff]   ;;  %v7983_v26 = vld [vmem:[#allocation14 + $0x18] sm:$0xff]  }
 0x3c2   :  { %5807 = vmatprep.subr.bf16.mxu1 %v7855_v1  ;;  %v7982_v1 = vld [vmem:[#allocation14 + $0x58] sm:$0xff]  }
 0x3c3   :  { %5661 = vmatprep.mubr.bf16.mxu0 %v3947_v28  ;;  %5825 = vmatprep.mubr.bf16.mxu1 %v3947_v28  ;;  %v7984_v28 = vld [vmem:[#allocation14 + $0x60] sm:$0xff]  }
 0x3c4   :  { %5662 = vmatmul.mubr.bf16.vlgmr.msra.gmra.mrb[8].mxu0 %v8520_v57 }
 0x3c5   :  { %5808 = vmatpush1.bf16.msra.mxu1 %v7853_v29  ;;  %6239 = vmatpush1.bf16.msra.mxu0 %v7880_v58  ;;  %v7985_v29 = vld [vmem:[#allocation14 + $0x20] sm:$0xff]   ;;  %v7986_v58 = vld [vmem:[#allocation14 + $0x68] sm:$0xff]  }
 0x3c6   :  { %5809 = vmatprep.subr.bf16.mxu1 %v7858_v31  ;;  %6240 = vmatprep.subr.bf16.mxu0 %v7885_v32  ;;  %v8524_v31 = vld [vmem:[#allocation10] sm:$0xf] }
 0x3c7   :  { %v4209_v32 = vrot.slane %v8524_v31, %v8450_v19 }
 0x3c9   :  { %5810 = vmatpush1.bf16.msra.mxu1 %v7856_v43  ;;  %6241 = vmatpush1.bf16.msra.mxu0 %v7883_v33  ;;  %v4213_v43 = vrot.slane %v8524_v31, %v8455_v25 }
 0x3ca   :  { %5811 = vmatprep.subr.bf16.mxu1 %v7861_v36  ;;  %6242 = vmatprep.subr.bf16.mxu0 %v7888_v37 }
 0x3cd   :  { %5812 = vmatpush1.bf16.msra.mxu1 %v7859_v38  ;;  %6243 = vmatpush1.bf16.msra.mxu0 %v7886_v40 }
 0x3ce   :  { %5813 = vmatprep.subr.bf16.mxu1 %v7864_v41  ;;  %6244 = vmatprep.subr.bf16.mxu0 %v7891_v42 }
 0x3d1   :  { %5814 = vmatpush1.bf16.msra.mxu1 %v7862_v44  ;;  %6245 = vmatpush1.bf16.msra.mxu0 %v7889_v46 }
 0x3d2   :  { %5815 = vmatprep.subr.bf16.mxu1 %v7867_v47  ;;  %6246 = vmatprep.subr.bf16.mxu0 %v7894_v27  ;;  %v7928_v47 = vld [vmem:[#allocation11 + $0x100] ss:$8 sps:$4 sm:$0xff]  }
 0x3d5   :  { %5816 = vmatpush1.bf16.msra.mxu1 %v7865_v48  ;;  %6247 = vmatpush1.bf16.msra.mxu0 %v7892_v49  ;;  %v7933_v48 = vld [vmem:[#allocation11 + $0x114] ss:$8 sps:$4 sm:$0xff]   ;;  %v7931_v49 = vld [vmem:[#allocation11 + $0x110] ss:$8 sps:$4 sm:$0xff]  }
 0x3d6   :  { %5817 = vmatprep.subr.bf16.mxu1 %v7870_v50  ;;  %6248 = vmatprep.subr.bf16.mxu0 %v7897_v52  ;;  %v7936_v50 = vld [vmem:[#allocation11 + $0x124] ss:$8 sps:$4 sm:$0xff]   ;;  %v7934_v52 = vld [vmem:[#allocation11 + $0x120] ss:$8 sps:$4 sm:$0xff]  }
 0x3d9   :  { %5818 = vmatpush1.bf16.msra.mxu1 %v7868_v54  ;;  %6249 = vmatpush1.bf16.msra.mxu0 %v7895_v56  ;;  %v7939_v54 = vld [vmem:[#allocation11 + $0x134] ss:$8 sps:$4 sm:$0xff]   ;;  %v7937_v56 = vld [vmem:[#allocation11 + $0x130] ss:$8 sps:$4 sm:$0xff]  }
 0x3da   :  { %5819 = vmatprep.subr.bf16.mxu1 %v7873_v59  ;;  %6250 = vmatprep.subr.bf16.mxu0 %v7900_v62  ;;  %v7942_v59 = vld [vmem:[#allocation11 + $0x144] ss:$8 sps:$4 sm:$0xff]   ;;  %v7940_v62 = vld [vmem:[#allocation11 + $0x140] ss:$8 sps:$4 sm:$0xff]  }
 0x3dd   :  { %5820 = vmatpush1.bf16.msra.mxu1 %v7871_v24  ;;  %6251 = vmatpush1.bf16.msra.mxu0 %v7898_v55  ;;  %v7945_v24 = vld [vmem:[#allocation11 + $0x154] ss:$8 sps:$4 sm:$0xff]   ;;  %v7943_v55 = vld [vmem:[#allocation11 + $0x150] ss:$8 sps:$4 sm:$0xff]  }
 0x3de   :  { %5821 = vmatprep.subr.bf16.mxu1 %v7876_v63  ;;  %6252 = vmatprep.subr.bf16.mxu0 %v7903_v0  ;;  %v7948_v63 = vld [vmem:[#allocation11 + $0x164] ss:$8 sps:$4 sm:$0xff]   ;;  %v7946_v0 = vld [vmem:[#allocation11 + $0x160] ss:$8 sps:$4 sm:$0xff]  }
 0x3e1   :  { %5822 = vmatpush1.bf16.msra.mxu1 %v7874_v60  ;;  %6253 = vmatpush1.bf16.msra.mxu0 %v7901_v2  ;;  %v7951_v60 = vld [vmem:[#allocation11 + $0x174] ss:$8 sps:$4 sm:$0xff]   ;;  %v7949_v2 = vld [vmem:[#allocation11 + $0x170] ss:$8 sps:$4 sm:$0xff]  }
 0x3e2   :  { %5823 = vmatprep.subr.bf16.mxu1 %v7879_v45  ;;  %6254 = vmatprep.subr.bf16.mxu0 %v7906_v3  ;;  %v4221_v45 = vrot.slane %v8524_v31, %v690_v34  ;;  %v7954_v3 = vld [vmem:[#allocation11 + $0x184] ss:$8 sps:$4 sm:$0xff]   ;;  %v7958_v34 = vld [vmem:[#allocation11 + $0x1a0] ss:$8 sps:$4 sm:$0xff]  }
 0x3e5   :  { %5824 = vmatpush1.bf16.msra.mxu1 %v7877_v4  ;;  %6255 = vmatpush1.bf16.msra.mxu0 %v7904_v5 }
 0x3e6   :  { %6256 = vmatprep.subr.bf16.mxu0 %v7909_v6  ;;  %7368 = vmatprep.subr.bf16.mxu1 %v7976_v18  ;;  %v4217_v18 = vrot.slane %v8524_v31, %v686_v21  ;;  %v7991_v21 = vld [vmem:[#allocation14 + $0x38] sm:$0xff]  }
 0x3e8   :  { %5826 = vmatmul.mubr.bf16.vlgmr.msra.gmra.mrb[12].mxu1 %v8520_v57  ;;  %v7987_v57 = vld [vmem:[#allocation14 + $0x28] sm:$0xff]  }
 0x3e9   :  { %6257 = vmatpush1.bf16.msra.mxu0 %v7907_v7  ;;  %7369 = vmatpush3.bf16.msra.mxu1 %v7977_v61  ;;  %v7972_v61 = vld [vmem:[#allocation11 + $0x1e4] ss:$8 sps:$4 sm:$0xff]  }
 0x3ea   :  { %6258 = vmatprep.subr.bf16.mxu0 %v7912_v16  ;;  %7370 = vmatprep.subr.bf16.mxu1 %v7978_v20  ;;  %v7952_v16 = vld [vmem:[#allocation11 + $0x180] ss:$8 sps:$4 sm:$0xff]  }
 0x3eb   :  { %v7970_v20 = vld [vmem:[#allocation11 + $0x1e0] ss:$8 sps:$4 sm:$0xff]  }
 0x3ed   :  { %6259 = vmatpush1.bf16.msra.mxu0 %v7910_v9  ;;  %7371 = vmatpush3.bf16.msra.mxu1 %v7979_v35 }
 0x3ee   :  { %6260 = vmatprep.subr.bf16.mxu0 %v7915_v51  ;;  %7372 = vmatprep.subr.bf16.mxu1 %v7980_v22  ;;  %v7957_v51 = vld [vmem:[#allocation11 + $0x194] ss:$8 sps:$4 sm:$0xff]  }
 0x3ef   :  { %v7975_v22 = vld [vmem:[#allocation11 + $0x1f4] ss:$8 sps:$4 sm:$0xff]  }
 0x3f1   :  { %6261 = vmatpush1.bf16.msra.mxu0 %v7913_v11  ;;  %7373 = vmatpush3.bf16.msra.mxu1 %v7981_v23  ;;  %v7973_v23 = vld [vmem:[#allocation11 + $0x1f0] ss:$8 sps:$4 sm:$0xff]  }
 0x3f2   :  { %6262 = vmatprep.subr.bf16.mxu0 %v7918_v12  ;;  %7374 = vmatprep.subr.bf16.mxu1 %v7982_v1 }
 0x3f5   :  { %6263 = vmatpush1.bf16.msra.mxu0 %v7916_v30  ;;  %7375 = vmatpush3.bf16.msra.mxu1 %v7983_v26  ;;  %v7955_v30 = vld [vmem:[#allocation11 + $0x190] ss:$8 sps:$4 sm:$0xff]  }
 0x3f6   :  { %6264 = vmatprep.subr.bf16.mxu0 %v7921_v39  ;;  %7376 = vmatprep.subr.bf16.mxu1 %v7984_v28  ;;  %v7960_v39 = vld [vmem:[#allocation11 + $0x1a4] ss:$8 sps:$4 sm:$0xff]   ;;  %v7988_v28 = vld [vmem:[#allocation14 + $0x70] sm:$0xff]  }
 0x3f9   :  { %6265 = vmatpush1.bf16.msra.mxu0 %v7919_v53  ;;  %7377 = vmatpush3.bf16.msra.mxu1 %v7985_v29  ;;  %v7963_v53 = vld [vmem:[#allocation11 + $0x1b4] ss:$8 sps:$4 sm:$0xff]  }
 0x3fa   :  { %6266 = vmatprep.subr.bf16.mxu0 %v7924_v13  ;;  %7378 = vmatprep.subr.bf16.mxu1 %v7986_v58  ;;  %v7961_v13 = vld [vmem:[#allocation11 + $0x1b0] ss:$8 sps:$4 sm:$0xff]   ;;  %v5906_v58 = vld [vmem:[#allocation13] sm:$0x3] }
 0x3fb   :  { %v7989_v29 = vld [vmem:[#allocation14 + $0x30] sm:$0xff]   ;;  %v5915_v31 = vrot.slane %v5906_v58, %v8455_v25 }
 0x3fd   :  { %6267 = vmatpush1.bf16.msra.mxu0 %v7922_v14  ;;  %7379 = vmatpush3.bf16.msra.mxu1 %v7987_v57  ;;  %v7966_v14 = vld [vmem:[#allocation11 + $0x1c4] ss:$8 sps:$4 sm:$0xff]   ;;  %v5911_v57 = vrot.slane %v5906_v58, %v8450_v19 }
 0x3fe   :  { %6268 = vmatprep.subr.bf16.mxu0 %v7927_v8  ;;  %v7964_v8 = vld [vmem:[#allocation11 + $0x1c0] ss:$8 sps:$4 sm:$0xff]   ;;  %7380 = vmatprep.subr.bf16.mxu1 %v7988_v28 }
 0x401   :  { %6269 = vmatpush1.bf16.msra.mxu0 %v7925_v15  ;;  %v7969_v15 = vld [vmem:[#allocation11 + $0x1d4] ss:$8 sps:$4 sm:$0xff]   ;;  %7381 = vmatpush3.bf16.msra.mxu1 %v7989_v29 }
 0x402   :  { %6279 = vmatprep.subr.bf16.mxu0 %v7930_v17  ;;  %v7967_v17 = vld [vmem:[#allocation11 + $0x1d0] ss:$8 sps:$4 sm:$0xff]   ;;  %7382 = vmatprep.subr.bf16.mxu1 %v7990_v10 }
 0x405   :  { %7383 = vmatpush3.bf16.msra.mxu1 %v7991_v21 }
 0x497   :  { %v5663_v33 = vpop.f32.mrb[8].mxu0 }
 0x498   :  { %v7400_v36 = vadd.f32 %v5663_v33, %v4209_v32  ;;  %v5665_v37 = vpop.f32.mrb[9].mxu0 }
 0x499   :  { %v7401_v38 = vadd.f32 %v5665_v37, %v4213_v43  ;;  %v5667_v40 = vpop.f32.mrb[10].mxu0 }
 0x49a   :  { %v5834_v41 = vmax.f32 %v7400_v36, 0.0  ;;  %v5668_v42 = vpop.f32.mrb[11].mxu0 }
 0x49b   :  { %v5835_v44 = vmax.f32 %v7401_v38, 0.0 }
 0x49c   :  { %v5838_v27 = vpack.c.bf16 %v5834_v41, %v5834_v41 }
 0x49d   :  { %v5839_v46 = vpack.c.bf16 %v5835_v44, %v5835_v44 }
 0x49f   :  { %6270 = vmatprep.mubr.bf16.mxu0 %v5839_v46 }
 0x4a0   :  { %6271 = vmatmul.mubr.bf16.vlgmr.msra.gmra.mrb[12].mxu0 %v5838_v27 }
 0x4a1   :  { %6280 = vmatpush1.bf16.msra.mxu0 %v7928_v47  ;;  %v7351_v47 = vld [vmem:[#allocation16] ss:$0 sm:$0xff] }
 0x4a2   :  { %6281 = vmatprep.subr.bf16.mxu0 %v7933_v48 }
 0x4a5   :  { %6282 = vmatpush1.bf16.msra.mxu0 %v7931_v49 }
 0x4a6   :  { %6283 = vmatprep.subr.bf16.mxu0 %v7936_v50 }
 0x4a9   :  { %6284 = vmatpush1.bf16.msra.mxu0 %v7934_v52 }
 0x4aa   :  { %6285 = vmatprep.subr.bf16.mxu0 %v7939_v54 }
 0x4ad   :  { %6286 = vmatpush1.bf16.msra.mxu0 %v7937_v56 }
 0x4ae   :  { %6287 = vmatprep.subr.bf16.mxu0 %v7942_v59 }
 0x4b1   :  { %6288 = vmatpush1.bf16.msra.mxu0 %v7940_v62 }
 0x4b2   :  { %6289 = vmatprep.subr.bf16.mxu0 %v7945_v24 }
 0x4b5   :  { %6290 = vmatpush1.bf16.msra.mxu0 %v7943_v55 }
 0x4b6   :  { %6291 = vmatprep.subr.bf16.mxu0 %v7948_v63 }
 0x4b9   :  { %6292 = vmatpush1.bf16.msra.mxu0 %v7946_v0 }
 0x4ba   :  { %6293 = vmatprep.subr.bf16.mxu0 %v7951_v60 }
 0x4bb   :  { %v5827_v4 = vpop.f32.mrb[12].mxu1 }
 0x4bc   :  { %v5829_v5 = vpop.f32.mrb[13].mxu1  ;;  %v7402_v35 = vadd.f32 %v5827_v4, %v4217_v18 }
 0x4bd   :  { %v7403_v6 = vadd.f32 %v5829_v5, %v4221_v45  ;;  %6294 = vmatpush1.bf16.msra.mxu0 %v7949_v2  ;;  %v5831_v7 = vpop.f32.mrb[14].mxu1 }
 0x4be   :  { %v5832_v9 = vpop.f32.mrb[15].mxu1  ;;  %6295 = vmatprep.subr.bf16.mxu0 %v7954_v3  ;;  %v5836_v1 = vmax.f32 %v7402_v35, 0.0 }
 0x4bf   :  { %v5837_v11 = vmax.f32 %v7403_v6, 0.0 }
 0x4c0   :  { %v5840_v26 = vpack.c.bf16 %v5836_v1, %v5836_v1 }
 0x4c1   :  { %v5841_v12 = vpack.c.bf16 %v5837_v11, %v5837_v11  ;;  %6296 = vmatpush1.bf16.msra.mxu0 %v7952_v16 }
 0x4c2   :  { %6297 = vmatprep.subr.bf16.mxu0 %v7957_v51 }
 0x4c3   :  { %6311 = vmatprep.mubr.bf16.mxu0 %v5841_v12 }
 0x4c5   :  { %6298 = vmatpush1.bf16.msra.mxu0 %v7955_v30 }
 0x4c6   :  { %6299 = vmatprep.subr.bf16.mxu0 %v7960_v39 }
 0x4c9   :  { %6300 = vmatpush1.bf16.msra.mxu0 %v7958_v34 }
 0x4ca   :  { %6301 = vmatprep.subr.bf16.mxu0 %v7963_v53 }
 0x4cd   :  { %6302 = vmatpush1.bf16.msra.mxu0 %v7961_v13 }
 0x4ce   :  { %6303 = vmatprep.subr.bf16.mxu0 %v7966_v14 }
 0x4d1   :  { %6304 = vmatpush1.bf16.msra.mxu0 %v7964_v8 }
 0x4d2   :  { %6305 = vmatprep.subr.bf16.mxu0 %v7969_v15 }
 0x4d5   :  { %6306 = vmatpush1.bf16.msra.mxu0 %v7967_v17 }
 0x4d6   :  { %6307 = vmatprep.subr.bf16.mxu0 %v7972_v61 }
 0x4d9   :  { %6308 = vmatpush1.bf16.msra.mxu0 %v7970_v20 }
 0x4da   :  { %6309 = vmatprep.subr.bf16.mxu0 %v7975_v22 }
 0x4dd   :  { %6310 = vmatpush1.bf16.msra.mxu0 %v7973_v23 }
 0x4e0   :  { %6312 = vmatmul.mubr.bf16.vlgmr.msra.gmra.mrb[12].mxu0 %v5840_v26 }
 0x5b3   :  { %v6313_v32 = vpop.f32.mrb[12].mxu0 }
 0x5b4   :  { %v7404_v43 = vadd.f32 %v6313_v32, %v5911_v57  ;;  %v6315_v33 = vpop.f32.mrb[13].mxu0 }
 0x5b5   :  { %v7405_v36 = vadd.f32 %v6315_v33, %v5915_v31  ;;  %v6317_v37 = vpop.f32.mrb[14].mxu0 }
 0x5b6   :  { %v6320_v38 = vmax.f32 %v7404_v43, 0.0  ;;  %v6318_v40 = vpop.f32.mrb[15].mxu0 }
 0x5b7   :  { %v6321_v41 = vmax.f32 %v7405_v36, 0.0 }
 0x5b8   :  { %v6322_v44 = vpack.c.bf16 %v6320_v38, %v6320_v38 }
 0x5b9   :  { %v6323_v42 = vpack.c.bf16 %v6321_v41, %v6321_v41 }
 0x5bb   :  { %6491 = vmatprep.mubr.bf16.mxu1 %v6323_v42 }
 0x5bc   :  { %6492 = vmatmul.mubr.bf16.vlgmr.msra.gmra.mrb[16].mxu1 %v6322_v44 }
 0x68f   :  { %v7384_v46 = vpop.f32.mrb[16].mxu1 }
 0x690   :  { %v7385_v27 = vpop.f32.mrb[17].mxu1 }
 0x691   :  { %v7386_v19 = vadd.f32 %v7385_v27, %v7384_v46  ;;  %v7387_v48 = vpop.f32.mrb[18].mxu1 }
 0x692   :  { %v7388_v25 = vpop.f32.mrb[19].mxu1 }
 0x693   :  { %v6494_v49 = vadd.f32 %v7386_v19, %v7351_v47 }
 0x695   :  { %6499 = vst [vmem:[#allocation17] sm:$0xff] %v6494_v49 }
 0x696   :  { %8202 = shalt.err (!%p8199_p6)
}
 0x697   :  { %s8203_s22 = scalar_lea.hbm %s8559_s9, 128 }
 0x698   :  { %p8204_p7 = scmp.ne.s32.totalorder %s8559_s9, %s8203_s22  ;;  %p8207_p8 = scmp.lt.u32.totalorder %s8203_s22, %s8559_s9 }
 0x69a   :  { %p8209_p9 = pnand %p8207_p8, %p8204_p7 }
 0x69c   :  { %8212 = shalt.err (!%p8209_p9)
}
 0x69d   :  { %6509 = dma.vmem_to_hbm [thread:$0]  %s6507_s24, 128, %s8559_s9, [#allocation4]  }
 0x69e   :  { %8223 = dma.done.wait [#allocation4], 128  }
 0x69f   :  { %8224 = vsyncadd [#allocation4], 4294967168 }
 0x6a0   :  { %6513 = vsyncpa [#allocation3], 1 }
 0x6a1   :  { %6514 = vsyncpa [#allocation6], 1 }
 0x6a2   :  { %6515 = vsyncpa [#allocation9], 1 }
 0x6a3   :  { %6516 = vsyncpa [#allocation12], 1 }
 0x6a4   :  { %6517 = vsyncpa [#allocation15], 1 }
 0x6a5   :  { %6518 = vsyncpa [#allocation4], 1 }

// kernel: tpu_custom_call.1
= control target key start
LH: loop header
LB: loop body
LE: loop exit
PB: predicated region body
PF: predicated region fallthrough
CT: control target
= control target key end

     0   :  { %14 = vsyncpa [#allocation3], 0  ;;  %s8550_s0 = inlined_call_operand.hbm [shape: f32[8,1024], index: 0, kind: input, shape index: {}]   ;;  %s8551_s1 = inlined_call_operand.hbm [shape: bf16[1024,1024], index: 1, kind: input, shape index: {}]   ;;  %s8552_s2 = inlined_call_operand.hbm [shape: f32[1,1024], index: 2, kind: input, shape index: {}]   ;;  %s8553_s3 = inlined_call_operand.hbm [shape: bf16[1024,512], index: 3, kind: input, shape index: {}]   ;;  %s8554_s4 = inlined_call_operand.hbm [shape: f32[1,512], index: 4, kind: input, shape index: {}]   ;;  %s8555_s5 = inlined_call_operand.hbm [shape: bf16[512,256], index: 5, kind: input, shape index: {}]   ;;  %s8556_s6 = inlined_call_operand.hbm [shape: f32[1,256], index: 6, kind: input, shape index: {}]   ;;  %s8557_s7 = inlined_call_operand.hbm [shape: bf16[256,128], index: 7, kind: input, shape index: {}]   ;;  %s8558_s8 = inlined_call_operand.hbm [shape: f32[1,128], index: 8, kind: input, shape index: {}]   ;;  %s8559_s9 = inlined_call_operand.hbm [shape: f32[8,128], index: 9, kind: output, shape index: {}]  }
   0x1   :  { %15 = vsyncpa [#allocation6], 0 }
   0x2   :  { %16 = vsyncpa [#allocation9], 0 }
   0x3   :  { %17 = vsyncpa [#allocation12], 0 }
   0x4   :  { %18 = vsyncpa [#allocation15], 0 }
   0x5   :  { %19 = vsyncpa [#allocation4], 0  ;;  %s8225_s30 = smov [#allocation5]   ;;  %s7993_s13 = scalar_lea.hbm %s8551_s1, 65536 }
   0x6   :  { %s35_s10 = sshll.u32 %s8225_s30, 4  ;;  %p7994_p0 = scmp.ne.s32.totalorder %s8551_s1, %s7993_s13  ;;  %s36_s10 = int_to_ptr.vmem [resolvable:$true] %s35_s10 }
   0x7   :  { %p7997_p1 = scmp.lt.u32.totalorder %s7993_s13, %s8551_s1 }
   0x9   :  { %p7999_p2 = pnand %p7997_p1, %p7994_p0 }
   0xb   :  { %8002 = shalt.err (!%p7999_p2)
}
   0xc   :  { %s8003_s18 = scalar_lea.vmem %s36_s10, 65536  ;;  %p8008_p4 = scmp.lt.s32.totalorder %s36_s10, %s36_s10 }
   0xd   :  { %p8004_p3 = scmp.ne.s32.totalorder %s36_s10, %s8003_s18  ;;  %p8009_p5 = scmp.lt.s32.totalorder %s8003_s18, %s8003_s18 }
   0xf   :  { %p8010_p6 = por %p8009_p5, %p8008_p4 }
  0x11   :  { %p8011_p7 = pnand %p8010_p6, %p8004_p3 }
  0x13   :  { %8014 = shalt.err (!%p8011_p7)
}
  0x14   :  { %s8226_s19 = smov 512   ;;  %s8227_s20 = smov 32  }
  0x15   :  { %41 = dma.hbm_to_vmem [thread:$0]  %s8551_s1, 65536, %s36_s10, [#allocation6], %s8226_s19, %s8226_s19, %s8227_s20  }
  0x16   :  { %s8228_s23 = smov [#allocation8]   ;;  %s8015_s27 = scalar_lea.hbm %s8553_s3, 32768 }
  0x17   :  { %s57_s24 = sshll.u32 %s8228_s23, 4  ;;  %p8016_p8 = scmp.ne.s32.totalorder %s8553_s3, %s8015_s27  ;;  %s58_s24 = int_to_ptr.vmem [resolvable:$true] %s57_s24 }
  0x18   :  { %p8019_p9 = scmp.lt.u32.totalorder %s8015_s27, %s8553_s3 }
  0x1a   :  { %p8021_p10 = pnand %p8019_p9, %p8016_p8 }
  0x1c   :  { %8024 = shalt.err (!%p8021_p10)
}
  0x1d   :  { %s8025_s12 = scalar_lea.vmem %s58_s24, 32768  ;;  %p8030_p12 = scmp.lt.s32.totalorder %s58_s24, %s58_s24 }
  0x1e   :  { %p8026_p11 = scmp.ne.s32.totalorder %s58_s24, %s8025_s12  ;;  %p8031_p13 = scmp.lt.s32.totalorder %s8025_s12, %s8025_s12 }
  0x20   :  { %p8032_p0 = por %p8031_p13, %p8030_p12 }
  0x22   :  { %p8033_p1 = pnand %p8032_p0, %p8026_p11 }
  0x24   :  { %8036 = shalt.err (!%p8033_p1)
}
  0x25   :  { %s8229_s1 = smov 256   ;;  %s8230_s10 = smov 16  }
  0x26   :  { %63 = dma.hbm_to_vmem [thread:$0]  %s8553_s3, 32768, %s58_s24, [#allocation9], %s8229_s1, %s8229_s1, %s8230_s10  }
  0x27   :  { %s8231_s15 = smov [#allocation11]   ;;  %s8037_s19 = scalar_lea.hbm %s8555_s5, 8192 }
  0x28   :  { %s79_s16 = sshll.u32 %s8231_s15, 4  ;;  %p8038_p2 = scmp.ne.s32.totalorder %s8555_s5, %s8037_s19  ;;  %s80_s16 = int_to_ptr.vmem [resolvable:$true] %s79_s16 }
  0x29   :  { %p8041_p3 = scmp.lt.u32.totalorder %s8037_s19, %s8555_s5 }
  0x2b   :  { %p8043_p4 = pnand %p8041_p3, %p8038_p2 }
  0x2d   :  { %8046 = shalt.err (!%p8043_p4)
}
  0x2e   :  { %s8047_s25 = scalar_lea.vmem %s80_s16, 8192  ;;  %p8052_p6 = scmp.lt.s32.totalorder %s80_s16, %s80_s16 }
  0x2f   :  { %p8048_p5 = scmp.ne.s32.totalorder %s80_s16, %s8047_s25  ;;  %p8053_p7 = scmp.lt.s32.totalorder %s8047_s25, %s8047_s25 }
  0x31   :  { %p8054_p8 = por %p8053_p7, %p8052_p6 }
  0x33   :  { %p8055_p9 = pnand %p8054_p8, %p8048_p5 }
  0x35   :  { %8058 = shalt.err (!%p8055_p9)
}
  0x36   :  { %s8232_s3 = smov 128   ;;  %s8233_s24 = smov 8  }
  0x37   :  { %85 = dma.hbm_to_vmem [thread:$0]  %s8555_s5, 8192, %s80_s16, [#allocation12], %s8232_s3, %s8232_s3, %s8233_s24  }
  0x38   :  { %s8234_s28 = smov [#allocation14]   ;;  %s8059_s12 = scalar_lea.hbm %s8557_s7, 2048 }
  0x39   :  { %s101_s29 = sshll.u32 %s8234_s28, 4  ;;  %p8060_p10 = scmp.ne.s32.totalorder %s8557_s7, %s8059_s12  ;;  %s102_s29 = int_to_ptr.vmem [resolvable:$true] %s101_s29 }
  0x3a   :  { %p8063_p11 = scmp.lt.u32.totalorder %s8059_s12, %s8557_s7 }
  0x3c   :  { %p8065_p12 = pnand %p8063_p11, %p8060_p10 }
  0x3e   :  { %8068 = shalt.err (!%p8065_p12)
}
  0x3f   :  { %s8069_s15 = scalar_lea.vmem %s102_s29, 2048  ;;  %p8074_p0 = scmp.lt.s32.totalorder %s102_s29, %s102_s29 }
  0x40   :  { %p8070_p13 = scmp.ne.s32.totalorder %s102_s29, %s8069_s15  ;;  %p8075_p1 = scmp.lt.s32.totalorder %s8069_s15, %s8069_s15 }
  0x42   :  { %p8076_p2 = por %p8075_p1, %p8074_p0 }
  0x44   :  { %p8077_p3 = pnand %p8076_p2, %p8070_p13 }
  0x46   :  { %8080 = shalt.err (!%p8077_p3)
}
  0x47   :  { %s8235_s5 = smov 64   ;;  %s8236_s16 = smov 4  }
  0x48   :  { %107 = dma.hbm_to_vmem [thread:$0]  %s8557_s7, 2048, %s102_s29, [#allocation15], %s8235_s5, %s8235_s5, %s8236_s16  }
  0x49   :  { %s8237_s19 = smov [#allocation2]   ;;  %s8238_s21 = smov [#allocation7]  }
  0x4a   :  { %s26_s20 = sshll.u32 %s8237_s19, 4  ;;  %s48_s22 = sshll.u32 %s8238_s21, 4  ;;  %s27_s20 = int_to_ptr.vmem [resolvable:$true] %s26_s20  ;;  %s49_s22 = int_to_ptr.vmem [resolvable:$true] %s48_s22 }
  0x4b   :  { %s8081_s3 = scalar_lea.hbm %s8550_s0, 1024 }
  0x4c   :  { %p8082_p4 = scmp.ne.s32.totalorder %s8550_s0, %s8081_s3  ;;  %p8085_p5 = scmp.lt.u32.totalorder %s8081_s3, %s8550_s0 }
  0x4e   :  { %p8087_p6 = pnand %p8085_p5, %p8082_p4 }
  0x50   :  { %8090 = shalt.err (!%p8087_p6)
}
  0x51   :  { %s8091_s7 = scalar_lea.vmem %s27_s20, 1024  ;;  %p8096_p8 = scmp.lt.s32.totalorder %s27_s20, %s27_s20 }
  0x52   :  { %p8092_p7 = scmp.ne.s32.totalorder %s27_s20, %s8091_s7  ;;  %p8097_p9 = scmp.lt.s32.totalorder %s8091_s7, %s8091_s7 }
  0x54   :  { %p8098_p10 = por %p8097_p9, %p8096_p8 }
  0x56   :  { %p8099_p11 = pnand %p8098_p10, %p8092_p7 }
  0x58   :  { %8102 = shalt.err (!%p8099_p11)
}
  0x59   :  { %29 = dma.hbm_to_vmem [thread:$0]  %s8550_s0, 1024, %s27_s20, [#allocation3]  }
  0x5a   :  { %s8103_s1 = scalar_lea.hbm %s8552_s2, 128 }
  0x5b   :  { %p8104_p12 = scmp.ne.s32.totalorder %s8552_s2, %s8103_s1  ;;  %p8107_p13 = scmp.lt.u32.totalorder %s8103_s1, %s8552_s2 }
  0x5d   :  { %p8109_p0 = pnand %p8107_p13, %p8104_p12 }
  0x5f   :  { %8112 = shalt.err (!%p8109_p0)
}
  0x60   :  { %s8113_s5 = scalar_lea.vmem %s49_s22, 128  ;;  %p8118_p2 = scmp.lt.s32.totalorder %s49_s22, %s49_s22 }
  0x61   :  { %p8114_p1 = scmp.ne.s32.totalorder %s49_s22, %s8113_s5  ;;  %p8119_p3 = scmp.lt.s32.totalorder %s8113_s5, %s8113_s5 }
  0x63   :  { %p8120_p4 = por %p8119_p3, %p8118_p2 }
  0x65   :  { %p8121_p5 = pnand %p8120_p4, %p8114_p1 }
  0x67   :  { %8124 = shalt.err (!%p8121_p5)
}
  0x68   :  { %51 = dma.hbm_to_vmem [thread:$0]  %s8552_s2, 128, %s49_s22, [#allocation6]  }
  0x69   :  { %s8239_s17 = smov [#allocation10]   ;;  %s8240_s19 = smov [#allocation13]  }
  0x6a   :  { %s70_s18 = sshll.u32 %s8239_s17, 4  ;;  %s92_s20 = sshll.u32 %s8240_s19, 4  ;;  %s71_s18 = int_to_ptr.vmem [resolvable:$true] %s70_s18  ;;  %s93_s20 = int_to_ptr.vmem [resolvable:$true] %s92_s20 }
  0x6b   :  { %s8125_s25 = scalar_lea.hbm %s8554_s4, 64 }
  0x6c   :  { %p8126_p6 = scmp.ne.s32.totalorder %s8554_s4, %s8125_s25  ;;  %p8129_p7 = scmp.lt.u32.totalorder %s8125_s25, %s8554_s4 }
  0x6e   :  { %p8131_p8 = pnand %p8129_p7, %p8126_p6 }
  0x70   :  { %8134 = shalt.err (!%p8131_p8)
}
  0x71   :  { %s8135_s2 = scalar_lea.vmem %s71_s18, 64  ;;  %p8140_p10 = scmp.lt.s32.totalorder %s71_s18, %s71_s18 }
  0x72   :  { %p8136_p9 = scmp.ne.s32.totalorder %s71_s18, %s8135_s2  ;;  %p8141_p11 = scmp.lt.s32.totalorder %s8135_s2, %s8135_s2 }
  0x74   :  { %p8142_p12 = por %p8141_p11, %p8140_p10 }
  0x76   :  { %p8143_p13 = pnand %p8142_p12, %p8136_p9 }
  0x78   :  { %8146 = shalt.err (!%p8143_p13)
}
  0x79   :  { %73 = dma.hbm_to_vmem [thread:$0]  %s8554_s4, 64, %s71_s18, [#allocation9]  }
  0x7a   :  { %s8147_s30 = scalar_lea.hbm %s8556_s6, 32 }
  0x7b   :  { %p8148_p0 = scmp.ne.s32.totalorder %s8556_s6, %s8147_s30  ;;  %p8151_p1 = scmp.lt.u32.totalorder %s8147_s30, %s8556_s6 }
  0x7d   :  { %p8153_p2 = pnand %p8151_p1, %p8148_p0 }
  0x7f   :  { %8156 = shalt.err (!%p8153_p2)
}
  0x80   :  { %s8157_s13 = scalar_lea.vmem %s93_s20, 32  ;;  %p8162_p4 = scmp.lt.s32.totalorder %s93_s20, %s93_s20 }
  0x81   :  { %p8158_p3 = scmp.ne.s32.totalorder %s93_s20, %s8157_s13  ;;  %p8163_p5 = scmp.lt.s32.totalorder %s8157_s13, %s8157_s13 }
  0x83   :  { %p8164_p6 = por %p8163_p5, %p8162_p4 }
  0x85   :  { %p8165_p7 = pnand %p8164_p6, %p8158_p3 }
  0x87   :  { %8168 = shalt.err (!%p8165_p7)
}
  0x88   :  { %95 = dma.hbm_to_vmem [thread:$0]  %s8556_s6, 32, %s93_s20, [#allocation12]  }
  0x89   :  { %s8241_s15 = smov [#allocation16]   ;;  %s8169_s17 = scalar_lea.hbm %s8558_s8, 16 }
  0x8a   :  { %s114_s5 = sshll.u32 %s8241_s15, 4  ;;  %p8170_p8 = scmp.ne.s32.totalorder %s8558_s8, %s8169_s17  ;;  %s115_s5 = int_to_ptr.vmem [resolvable:$true] %s114_s5 }
  0x8b   :  { %p8173_p9 = scmp.lt.u32.totalorder %s8169_s17, %s8558_s8 }
  0x8d   :  { %p8175_p10 = pnand %p8173_p9, %p8170_p8 }
  0x8f   :  { %8178 = shalt.err (!%p8175_p10)
}
  0x90   :  { %s8179_s25 = scalar_lea.vmem %s115_s5, 16  ;;  %s8183_s6 = scalar_lea.vmem %s115_s5, 32 }
  0x91   :  { %p8180_p11 = scmp.ne.s32.totalorder %s115_s5, %s8179_s25  ;;  %p8184_p12 = scmp.lt.s32.totalorder %s115_s5, %s115_s5 }
  0x92   :  { %p8185_p13 = scmp.lt.s32.totalorder %s8183_s6, %s8179_s25 }
  0x94   :  { %p8186_p0 = por %p8185_p13, %p8184_p12 }
  0x96   :  { %p8187_p1 = pnand %p8186_p0, %p8180_p11 }
  0x98   :  { %8190 = shalt.err (!%p8187_p1)
}
  0x99   :  { %117 = dma.hbm_to_vmem [thread:$0]  %s8558_s8, 16, %s115_s5, [#allocation15]  }
  0x9a   :  { %8213 = dma.done.wait [#allocation3], 1024  }
  0x9b   :  { %8214 = vsyncadd [#allocation3], 4294966272 }
  0x9c   :  { %8215 = dma.done.wait [#allocation6], 65664  }
  0x9d   :  { %8216 = vsyncadd [#allocation6], 4294901632 }
  0x9e   :  { %8217 = dma.done.wait [#allocation9], 32832  }
  0x9f   :  { %8218 = vsyncadd [#allocation9], 4294934464 }
  0xa0   :  { %8219 = dma.done.wait [#allocation12], 8224  }
  0xa1   :  { %8220 = vsyncadd [#allocation12], 4294959072 }
  0xa2   :  { %8221 = dma.done.wait [#allocation15], 2064  }
  0xa3   :  { %8222 = vsyncadd [#allocation15], 4294965232  ;;  %v162_v0 = vld [vmem:[#allocation5] sm:$0xff]  ;;  %v147_v53 = vld [vmem:[#allocation2 + $0x8] sm:$0xff]  ;;  %s8242_s8 = smov [#allocation17]  }
  0xa4   :  { %v166_v1 = vld [vmem:[#allocation5 + $0x20] sm:$0xff]  ;;  %v8401_v57 = vpack.c.bf16 %v147_v53, %v147_v53  ;;  %v149_v58 = vld [vmem:[#allocation2 + $0x18] sm:$0xff]  ;;  %s6506_s24 = sshll.u32 %s8242_s8, 4  ;;  %s6507_s24 = int_to_ptr.vmem [resolvable:$true] %s6506_s24 }
  0xa5   :  { %v290_v2 = vld [vmem:[#allocation5 + $0x400] sm:$0xff]  ;;  %v6520_v3 = vcombine.high %v162_v0, %v166_v1  ;;  %v6519_v5 = vcombine.low %v162_v0, %v166_v1  ;;  %v8403_v61 = vpack.c.bf16 %v149_v58, %v149_v58  ;;  %s8191_s26 = scalar_lea.vmem %s6507_s24, 128  ;;  %p8196_p3 = scmp.lt.s32.totalorder %s6507_s24, %s6507_s24 }
  0xa6   :  { %v294_v4 = vld [vmem:[#allocation5 + $0x420] sm:$0xff]  ;;  %3308 = vmatprep.mubr.bf16.mxu1 %v8401_v57  ;;  %p8192_p2 = scmp.ne.s32.totalorder %s6507_s24, %s8191_s26  ;;  %p8197_p4 = scmp.lt.s32.totalorder %s8191_s26, %s8191_s26 }
  0xa7   :  { %v170_v6 = vld [vmem:[#allocation5 + $0x40] sm:$0xff]  ;;  %v6648_v8 = vcombine.high %v290_v2, %v294_v4  ;;  %v6647_v9 = vcombine.low %v290_v2, %v294_v4  ;;  %3276 = vmatprep.subr.bf16.mxu1 %v6520_v3  ;;  %3349 = vmatprep.mubr.bf16.mxu0 %v8403_v61 }
  0xa8   :  { %v174_v7 = vld [vmem:[#allocation5 + $0x60] sm:$0xff]  ;;  %3277 = vmatpush1.bf16.msra.mxu1 %v6519_v5  ;;  %p8198_p5 = por %p8197_p4, %p8196_p3 }
  0xa9   :  { %v6528_v10 = vcombine.high %v170_v6, %v174_v7  ;;  %v298_v11 = vld [vmem:[#allocation5 + $0x440] sm:$0xff]  ;;  %3317 = vmatprep.subr.bf16.mxu0 %v6648_v8  ;;  %v6527_v18 = vcombine.low %v170_v6, %v174_v7 }
  0xaa   :  { %v302_v12 = vld [vmem:[#allocation5 + $0x460] sm:$0xff]  ;;  %3318 = vmatpush1.bf16.msra.mxu0 %v6647_v9  ;;  %p8199_p6 = pnand %p8198_p5, %p8192_p2 }
  0xab   :  { %v178_v13 = vld [vmem:[#allocation5 + $0x80] sm:$0xff]  ;;  %v6656_v14 = vcombine.high %v298_v11, %v302_v12  ;;  %3278 = vmatprep.subr.bf16.mxu1 %v6528_v10  ;;  %v6655_v19 = vcombine.low %v298_v11, %v302_v12 }
  0xac   :  { %v182_v15 = vld [vmem:[#allocation5 + $0xa0] sm:$0xff]  ;;  %3279 = vmatpush1.bf16.msra.mxu1 %v6527_v18 }
  0xad   :  { %v306_v16 = vld [vmem:[#allocation5 + $0x480] sm:$0xff]  ;;  %v6536_v20 = vcombine.high %v178_v13, %v182_v15  ;;  %3319 = vmatprep.subr.bf16.mxu0 %v6656_v14  ;;  %v6535_v26 = vcombine.low %v178_v13, %v182_v15 }
  0xae   :  { %v310_v17 = vld [vmem:[#allocation5 + $0x4a0] sm:$0xff]  ;;  %3320 = vmatpush1.bf16.msra.mxu0 %v6655_v19 }
  0xaf   :  { %v6664_v21 = vcombine.high %v306_v16, %v310_v17  ;;  %v186_v22 = vld [vmem:[#allocation5 + $0xc0] sm:$0xff]  ;;  %3280 = vmatprep.subr.bf16.mxu1 %v6536_v20  ;;  %v6663_v27 = vcombine.low %v306_v16, %v310_v17 }
  0xb0   :  { %v190_v23 = vld [vmem:[#allocation5 + $0xe0] sm:$0xff]  ;;  %3281 = vmatpush1.bf16.msra.mxu1 %v6535_v26 }
  0xb1   :  { %v314_v24 = vld [vmem:[#allocation5 + $0x4c0] sm:$0xff]  ;;  %v6544_v28 = vcombine.high %v186_v22, %v190_v23  ;;  %3321 = vmatprep.subr.bf16.mxu0 %v6664_v21  ;;  %v6543_v34 = vcombine.low %v186_v22, %v190_v23 }
  0xb2   :  { %v318_v25 = vld [vmem:[#allocation5 + $0x4e0] sm:$0xff]  ;;  %3322 = vmatpush1.bf16.msra.mxu0 %v6663_v27 }
  0xb3   :  { %v6672_v29 = vcombine.high %v314_v24, %v318_v25  ;;  %v194_v30 = vld [vmem:[#allocation5 + $0x100] sm:$0xff]  ;;  %3282 = vmatprep.subr.bf16.mxu1 %v6544_v28  ;;  %v6671_v35 = vcombine.low %v314_v24, %v318_v25 }
  0xb4   :  { %v198_v31 = vld [vmem:[#allocation5 + $0x120] sm:$0xff]  ;;  %3283 = vmatpush1.bf16.msra.mxu1 %v6543_v34 }
  0xb5   :  { %v322_v32 = vld [vmem:[#allocation5 + $0x500] sm:$0xff]  ;;  %v6552_v36 = vcombine.high %v194_v30, %v198_v31  ;;  %3323 = vmatprep.subr.bf16.mxu0 %v6672_v29  ;;  %v6551_v42 = vcombine.low %v194_v30, %v198_v31 }
  0xb6   :  { %v326_v33 = vld [vmem:[#allocation5 + $0x520] sm:$0xff]  ;;  %3324 = vmatpush1.bf16.msra.mxu0 %v6671_v35 }
  0xb7   :  { %v6680_v37 = vcombine.high %v322_v32, %v326_v33  ;;  %v202_v38 = vld [vmem:[#allocation5 + $0x140] sm:$0xff]  ;;  %3284 = vmatprep.subr.bf16.mxu1 %v6552_v36  ;;  %v6679_v43 = vcombine.low %v322_v32, %v326_v33 }
  0xb8   :  { %v206_v39 = vld [vmem:[#allocation5 + $0x160] sm:$0xff]  ;;  %3285 = vmatpush1.bf16.msra.mxu1 %v6551_v42 }
  0xb9   :  { %v330_v40 = vld [vmem:[#allocation5 + $0x540] sm:$0xff]  ;;  %v6560_v44 = vcombine.high %v202_v38, %v206_v39  ;;  %3325 = vmatprep.subr.bf16.mxu0 %v6680_v37  ;;  %v6559_v50 = vcombine.low %v202_v38, %v206_v39 }
  0xba   :  { %v334_v41 = vld [vmem:[#allocation5 + $0x560] sm:$0xff]  ;;  %3326 = vmatpush1.bf16.msra.mxu0 %v6679_v43 }
  0xbb   :  { %v6688_v45 = vcombine.high %v330_v40, %v334_v41  ;;  %v210_v46 = vld [vmem:[#allocation5 + $0x180] sm:$0xff]  ;;  %3286 = vmatprep.subr.bf16.mxu1 %v6560_v44  ;;  %v6687_v51 = vcombine.low %v330_v40, %v334_v41 }
  0xbc   :  { %v214_v47 = vld [vmem:[#allocation5 + $0x1a0] sm:$0xff]  ;;  %3287 = vmatpush1.bf16.msra.mxu1 %v6559_v50 }
  0xbd   :  { %v338_v48 = vld [vmem:[#allocation5 + $0x580] sm:$0xff]  ;;  %v6568_v52 = vcombine.high %v210_v46, %v214_v47  ;;  %3327 = vmatprep.subr.bf16.mxu0 %v6688_v45  ;;  %v6567_v62 = vcombine.low %v210_v46, %v214_v47 }
  0xbe   :  { %v342_v49 = vld [vmem:[#allocation5 + $0x5a0] sm:$0xff]  ;;  %3328 = vmatpush1.bf16.msra.mxu0 %v6687_v51 }
  0xbf   :  { %v6696_v54 = vcombine.high %v338_v48, %v342_v49  ;;  %v218_v55 = vld [vmem:[#allocation5 + $0x1c0] sm:$0xff]  ;;  %3288 = vmatprep.subr.bf16.mxu1 %v6568_v52  ;;  %v6695_v63 = vcombine.low %v338_v48, %v342_v49 }
  0xc0   :  { %v222_v56 = vld [vmem:[#allocation5 + $0x1e0] sm:$0xff]  ;;  %3289 = vmatpush1.bf16.msra.mxu1 %v6567_v62 }
  0xc1   :  { %v346_v59 = vld [vmem:[#allocation5 + $0x5c0] sm:$0xff]  ;;  %v6576_v0 = vcombine.high %v218_v55, %v222_v56  ;;  %3329 = vmatprep.subr.bf16.mxu0 %v6696_v54  ;;  %v6575_v6 = vcombine.low %v218_v55, %v222_v56 }
  0xc2   :  { %v350_v60 = vld [vmem:[#allocation5 + $0x5e0] sm:$0xff]  ;;  %3330 = vmatpush1.bf16.msra.mxu0 %v6695_v63 }
  0xc3   :  { %v6704_v1 = vcombine.high %v346_v59, %v350_v60  ;;  %v226_v2 = vld [vmem:[#allocation5 + $0x200] sm:$0xff]  ;;  %3290 = vmatprep.subr.bf16.mxu1 %v6576_v0  ;;  %v6703_v7 = vcombine.low %v346_v59, %v350_v60 }
  0xc4   :  { %v230_v3 = vld [vmem:[#allocation5 + $0x220] sm:$0xff]  ;;  %3291 = vmatpush1.bf16.msra.mxu1 %v6575_v6 }
  0xc5   :  { %v354_v4 = vld [vmem:[#allocation5 + $0x600] sm:$0xff]  ;;  %v6584_v8 = vcombine.high %v226_v2, %v230_v3  ;;  %3331 = vmatprep.subr.bf16.mxu0 %v6704_v1  ;;  %v6583_v14 = vcombine.low %v226_v2, %v230_v3 }
  0xc6   :  { %v358_v5 = vld [vmem:[#allocation5 + $0x620] sm:$0xff]  ;;  %3332 = vmatpush1.bf16.msra.mxu0 %v6703_v7 }
  0xc7   :  { %v6712_v9 = vcombine.high %v354_v4, %v358_v5  ;;  %v234_v10 = vld [vmem:[#allocation5 + $0x240] sm:$0xff]  ;;  %3292 = vmatprep.subr.bf16.mxu1 %v6584_v8  ;;  %v6711_v15 = vcombine.low %v354_v4, %v358_v5  ;;  %v163_v4 = vld [vmem:[#allocation5 + $0x8] sm:$0xff] }
  0xc8   :  { %v238_v11 = vld [vmem:[#allocation5 + $0x260] sm:$0xff]  ;;  %3293 = vmatpush1.bf16.msra.mxu1 %v6583_v14  ;;  %v167_v5 = vld [vmem:[#allocation5 + $0x28] sm:$0xff] }
  0xc9   :  { %v362_v12 = vld [vmem:[#allocation5 + $0x640] sm:$0xff]  ;;  %v6592_v16 = vcombine.high %v234_v10, %v238_v11  ;;  %3333 = vmatprep.subr.bf16.mxu0 %v6712_v9  ;;  %v6591_v22 = vcombine.low %v234_v10, %v238_v11  ;;  %v6522_v11 = vcombine.high %v163_v4, %v167_v5  ;;  %v171_v14 = vld [vmem:[#allocation5 + $0x48] sm:$0xff] }
  0xca   :  { %v366_v13 = vld [vmem:[#allocation5 + $0x660] sm:$0xff]  ;;  %3334 = vmatpush1.bf16.msra.mxu0 %v6711_v15  ;;  %v175_v15 = vld [vmem:[#allocation5 + $0x68] sm:$0xff] }
  0xcb   :  { %v6720_v17 = vcombine.high %v362_v12, %v366_v13  ;;  %v242_v18 = vld [vmem:[#allocation5 + $0x280] sm:$0xff]  ;;  %3294 = vmatprep.subr.bf16.mxu1 %v6592_v16  ;;  %v6719_v23 = vcombine.low %v362_v12, %v366_v13  ;;  %v148_v12 = vld [vmem:[#allocation2 + $0x10] sm:$0xff] }
  0xcc   :  { %v246_v19 = vld [vmem:[#allocation5 + $0x2a0] sm:$0xff]  ;;  %3295 = vmatpush1.bf16.msra.mxu1 %v6591_v22 }
  0xcd   :  { %v370_v20 = vld [vmem:[#allocation5 + $0x680] sm:$0xff]  ;;  %v6600_v24 = vcombine.high %v242_v18, %v246_v19  ;;  %3335 = vmatprep.subr.bf16.mxu0 %v6720_v17  ;;  %v6599_v30 = vcombine.low %v242_v18, %v246_v19  ;;  %v151_v19 = vld [vmem:[#allocation2 + $0x28] sm:$0xff] }
  0xce   :  { %v374_v21 = vld [vmem:[#allocation5 + $0x6a0] sm:$0xff]  ;;  %3336 = vmatpush1.bf16.msra.mxu0 %v6719_v23  ;;  %v6530_v23 = vcombine.high %v171_v14, %v175_v15 }
  0xcf   :  { %v6728_v25 = vcombine.high %v370_v20, %v374_v21  ;;  %v250_v26 = vld [vmem:[#allocation5 + $0x2c0] sm:$0xff]  ;;  %3296 = vmatprep.subr.bf16.mxu1 %v6600_v24  ;;  %v6727_v31 = vcombine.low %v370_v20, %v374_v21  ;;  %v6521_v20 = vcombine.low %v163_v4, %v167_v5  ;;  %v8409_v21 = vpack.c.bf16 %v148_v12, %v148_v12  ;;  %v219_v5 = vld [vmem:[#allocation5 + $0x1c8] sm:$0xff] }
  0xd0   :  { %v254_v27 = vld [vmem:[#allocation5 + $0x2e0] sm:$0xff]  ;;  %3297 = vmatpush1.bf16.msra.mxu1 %v6599_v30  ;;  %v6529_v30 = vcombine.low %v171_v14, %v175_v15  ;;  %v231_v15 = vld [vmem:[#allocation5 + $0x228] sm:$0xff] }
  0xd1   :  { %v378_v28 = vld [vmem:[#allocation5 + $0x6c0] sm:$0xff]  ;;  %v6608_v32 = vcombine.high %v250_v26, %v254_v27  ;;  %3337 = vmatprep.subr.bf16.mxu0 %v6728_v25  ;;  %v6607_v38 = vcombine.low %v250_v26, %v254_v27  ;;  %v179_v25 = vld [vmem:[#allocation5 + $0x88] sm:$0xff]  ;;  %v8411_v27 = vpack.c.bf16 %v151_v19, %v151_v19 }
  0xd2   :  { %v382_v29 = vld [vmem:[#allocation5 + $0x6e0] sm:$0xff]  ;;  %3338 = vmatpush1.bf16.msra.mxu0 %v6727_v31  ;;  %v183_v26 = vld [vmem:[#allocation5 + $0xa8] sm:$0xff] }
  0xd3   :  { %v6736_v33 = vcombine.high %v378_v28, %v382_v29  ;;  %v258_v34 = vld [vmem:[#allocation5 + $0x300] sm:$0xff]  ;;  %3298 = vmatprep.subr.bf16.mxu1 %v6608_v32  ;;  %v6735_v39 = vcombine.low %v378_v28, %v382_v29  ;;  %v6538_v32 = vcombine.high %v179_v25, %v183_v26 }
  0xd4   :  { %v262_v35 = vld [vmem:[#allocation5 + $0x320] sm:$0xff]  ;;  %3299 = vmatpush1.bf16.msra.mxu1 %v6607_v38  ;;  %v6537_v38 = vcombine.low %v179_v25, %v183_v26  ;;  %v239_v25 = vld [vmem:[#allocation5 + $0x268] sm:$0xff] }
  0xd5   :  { %v386_v36 = vld [vmem:[#allocation5 + $0x700] sm:$0xff]  ;;  %v6616_v40 = vcombine.high %v258_v34, %v262_v35  ;;  %3339 = vmatprep.subr.bf16.mxu0 %v6736_v33  ;;  %v6615_v46 = vcombine.low %v258_v34, %v262_v35  ;;  %v187_v35 = vld [vmem:[#allocation5 + $0xc8] sm:$0xff] }
  0xd6   :  { %v390_v37 = vld [vmem:[#allocation5 + $0x720] sm:$0xff]  ;;  %3340 = vmatpush1.bf16.msra.mxu0 %v6735_v39 }
  0xd7   :  { %v6744_v41 = vcombine.high %v386_v36, %v390_v37  ;;  %v266_v42 = vld [vmem:[#allocation5 + $0x340] sm:$0xff]  ;;  %3300 = vmatprep.subr.bf16.mxu1 %v6616_v40  ;;  %v6743_v47 = vcombine.low %v386_v36, %v390_v37  ;;  %v191_v37 = vld [vmem:[#allocation5 + $0xe8] sm:$0xff] }
  0xd8   :  { %v270_v43 = vld [vmem:[#allocation5 + $0x360] sm:$0xff]  ;;  %3301 = vmatpush1.bf16.msra.mxu1 %v6615_v46  ;;  %v6546_v40 = vcombine.high %v187_v35, %v191_v37  ;;  %v6545_v46 = vcombine.low %v187_v35, %v191_v37 }
  0xd9   :  { %v394_v44 = vld [vmem:[#allocation5 + $0x740] sm:$0xff]  ;;  %v6624_v48 = vcombine.high %v266_v42, %v270_v43  ;;  %3341 = vmatprep.subr.bf16.mxu0 %v6744_v41  ;;  %v6623_v54 = vcombine.low %v266_v42, %v270_v43  ;;  %v195_v43 = vld [vmem:[#allocation5 + $0x108] sm:$0xff] }
  0xda   :  { %v398_v45 = vld [vmem:[#allocation5 + $0x760] sm:$0xff]  ;;  %3342 = vmatpush1.bf16.msra.mxu0 %v6743_v47 }
  0xdb   :  { %v6752_v49 = vcombine.high %v394_v44, %v398_v45  ;;  %v274_v50 = vld [vmem:[#allocation5 + $0x380] sm:$0xff]  ;;  %3302 = vmatprep.subr.bf16.mxu1 %v6624_v48  ;;  %v6751_v55 = vcombine.low %v394_v44, %v398_v45  ;;  %v199_v45 = vld [vmem:[#allocation5 + $0x128] sm:$0xff] }
  0xdc   :  { %v278_v51 = vld [vmem:[#allocation5 + $0x3a0] sm:$0xff]  ;;  %3303 = vmatpush1.bf16.msra.mxu1 %v6623_v54  ;;  %v6554_v48 = vcombine.high %v195_v43, %v199_v45  ;;  %v6553_v54 = vcombine.low %v195_v43, %v199_v45 }
  0xdd   :  { %v402_v52 = vld [vmem:[#allocation5 + $0x780] sm:$0xff]  ;;  %v6632_v56 = vcombine.high %v274_v50, %v278_v51  ;;  %3343 = vmatprep.subr.bf16.mxu0 %v6752_v49  ;;  %v6631_v0 = vcombine.low %v274_v50, %v278_v51  ;;  %v203_v51 = vld [vmem:[#allocation5 + $0x148] sm:$0xff] }
  0xde   :  { %v406_v53 = vld [vmem:[#allocation5 + $0x7a0] sm:$0xff]  ;;  %3344 = vmatpush1.bf16.msra.mxu0 %v6751_v55 }
  0xdf   :  { %v6760_v58 = vcombine.high %v402_v52, %v406_v53  ;;  %v282_v59 = vld [vmem:[#allocation5 + $0x3c0] sm:$0xff]  ;;  %3304 = vmatprep.subr.bf16.mxu1 %v6632_v56  ;;  %v6759_v1 = vcombine.low %v402_v52, %v406_v53  ;;  %v207_v53 = vld [vmem:[#allocation5 + $0x168] sm:$0xff] }
  0xe0   :  { %v286_v60 = vld [vmem:[#allocation5 + $0x3e0] sm:$0xff]  ;;  %3305 = vmatpush1.bf16.msra.mxu1 %v6631_v0  ;;  %v6562_v56 = vcombine.high %v203_v51, %v207_v53  ;;  %v6561_v0 = vcombine.low %v203_v51, %v207_v53 }
  0xe1   :  { %v410_v62 = vld [vmem:[#allocation5 + $0x7c0] sm:$0xff]  ;;  %v6640_v2 = vcombine.high %v282_v59, %v286_v60  ;;  %3345 = vmatprep.subr.bf16.mxu0 %v6760_v58  ;;  %v6639_v8 = vcombine.low %v282_v59, %v286_v60  ;;  %v211_v60 = vld [vmem:[#allocation5 + $0x188] sm:$0xff] }
  0xe2   :  { %v414_v63 = vld [vmem:[#allocation5 + $0x7e0] sm:$0xff]  ;;  %3346 = vmatpush1.bf16.msra.mxu0 %v6759_v1 }
  0xe3   :  { %v6768_v3 = vcombine.high %v410_v62, %v414_v63  ;;  %v418_v6 = vld [vmem:[#allocation5 + $0x800] sm:$0xff]  ;;  %3306 = vmatprep.subr.bf16.mxu1 %v6640_v2  ;;  %v6767_v10 = vcombine.low %v410_v62, %v414_v63  ;;  %v215_v63 = vld [vmem:[#allocation5 + $0x1a8] sm:$0xff] }
  0xe4   :  { %v422_v7 = vld [vmem:[#allocation5 + $0x820] sm:$0xff]  ;;  %3307 = vmatpush1.bf16.msra.mxu1 %v6639_v8  ;;  %v6570_v2 = vcombine.high %v211_v60, %v215_v63  ;;  %v6569_v8 = vcombine.low %v211_v60, %v215_v63 }
  0xe5   :  { %v146_v9 = vld [vmem:[#allocation2] sm:$0xff]  ;;  %3347 = vmatprep.subr.bf16.mxu0 %v6768_v3  ;;  %v6776_v13 = vcombine.high %v418_v6, %v422_v7  ;;  %v6775_v22 = vcombine.low %v418_v6, %v422_v7  ;;  %3440 = vmatprep.subr.bf16.mxu1 %v6522_v11  ;;  %v223_v7 = vld [vmem:[#allocation5 + $0x1e8] sm:$0xff] }
  0xe6   :  { %v8407_v16 = vpack.c.bf16 %v146_v9, %v146_v9  ;;  %v426_v17 = vld [vmem:[#allocation5 + $0x840] sm:$0xff]  ;;  %3348 = vmatpush1.bf16.msra.mxu0 %v6767_v10  ;;  %v6578_v10 = vcombine.high %v219_v5, %v223_v7 }
  0xe7   :  { %v430_v18 = vld [vmem:[#allocation5 + $0x860] sm:$0xff]  ;;  %3358 = vmatprep.subr.bf16.mxu0 %v6776_v13  ;;  %v227_v13 = vld [vmem:[#allocation5 + $0x208] sm:$0xff] }
  0xe8   :  { %v6784_v24 = vcombine.high %v426_v17, %v430_v18  ;;  %3309 = vmatmul.mubr.bf16.vlgmr.msra.gmra.mrb[0].mxu1 %v8407_v16  ;;  %v434_v28 = vld [vmem:[#allocation5 + $0x880] sm:$0xff]  ;;  %v6783_v31 = vcombine.low %v426_v17, %v430_v18  ;;  %v6577_v17 = vcombine.low %v219_v5, %v223_v7  ;;  %v6586_v19 = vcombine.high %v227_v13, %v231_v15 }
  0xe9   :  { %v438_v29 = vld [vmem:[#allocation5 + $0x8a0] sm:$0xff]  ;;  %3350 = vmatmul.mubr.bf16.vlgmr.msra.gmra.mrb[0].mxu0 %v8409_v21  ;;  %3441 = vmatpush1.bf16.msra.mxu1 %v6521_v20  ;;  %v6585_v26 = vcombine.low %v227_v13, %v231_v15 }
  0xea   :  { %3359 = vmatpush1.bf16.msra.mxu0 %v6775_v22  ;;  %3442 = vmatprep.subr.bf16.mxu1 %v6530_v23  ;;  %v442_v33 = vld [vmem:[#allocation5 + $0x8c0] sm:$0xff]  ;;  %v6792_v36 = vcombine.high %v434_v28, %v438_v29  ;;  %v6791_v39 = vcombine.low %v434_v28, %v438_v29  ;;  %v235_v23 = vld [vmem:[#allocation5 + $0x248] sm:$0xff] }
  0xeb   :  { %v446_v34 = vld [vmem:[#allocation5 + $0x8e0] sm:$0xff]  ;;  %3360 = vmatprep.subr.bf16.mxu0 %v6784_v24  ;;  %3390 = vmatprep.mubr.bf16.mxu0 %v8411_v27  ;;  %v6594_v29 = vcombine.high %v235_v23, %v239_v25  ;;  %v6593_v35 = vcombine.low %v235_v23, %v239_v25 }
  0xec   :  { %3472 = vmatprep.mubr.bf16.mxu1 %v8401_v57  ;;  %v450_v41 = vld [vmem:[#allocation5 + $0x900] sm:$0xff]  ;;  %v6800_v44 = vcombine.high %v442_v33, %v446_v34  ;;  %v6799_v47 = vcombine.low %v442_v33, %v446_v34  ;;  %v247_v34 = vld [vmem:[#allocation5 + $0x2a8] sm:$0xff] }
  0xed   :  { %3443 = vmatpush1.bf16.msra.mxu1 %v6529_v30  ;;  %v454_v42 = vld [vmem:[#allocation5 + $0x920] sm:$0xff] }
  0xee   :  { %3361 = vmatpush1.bf16.msra.mxu0 %v6783_v31  ;;  %3444 = vmatprep.subr.bf16.mxu1 %v6538_v32  ;;  %v458_v49 = vld [vmem:[#allocation5 + $0x940] sm:$0xff]  ;;  %v6808_v52 = vcombine.high %v450_v41, %v454_v42  ;;  %v6807_v55 = vcombine.low %v450_v41, %v454_v42  ;;  %v243_v32 = vld [vmem:[#allocation5 + $0x288] sm:$0xff] }
  0xef   :  { %3362 = vmatprep.subr.bf16.mxu0 %v6792_v36  ;;  %v462_v50 = vld [vmem:[#allocation5 + $0x960] sm:$0xff]  ;;  %v6602_v37 = vcombine.high %v243_v32, %v247_v34  ;;  %v255_v42 = vld [vmem:[#allocation5 + $0x2e8] sm:$0xff]  ;;  %v6601_v43 = vcombine.low %v243_v32, %v247_v34 }
  0xf0   :  { %v466_v58 = vld [vmem:[#allocation5 + $0x980] sm:$0xff]  ;;  %v6816_v62 = vcombine.high %v458_v49, %v462_v50  ;;  %v6815_v1 = vcombine.low %v458_v49, %v462_v50  ;;  %v263_v50 = vld [vmem:[#allocation5 + $0x328] sm:$0xff] }
  0xf1   :  { %3445 = vmatpush1.bf16.msra.mxu1 %v6537_v38  ;;  %v470_v59 = vld [vmem:[#allocation5 + $0x9a0] sm:$0xff] }
  0xf2   :  { %3363 = vmatpush1.bf16.msra.mxu0 %v6791_v39  ;;  %3446 = vmatprep.subr.bf16.mxu1 %v6546_v40  ;;  %v474_v3 = vld [vmem:[#allocation5 + $0x9c0] sm:$0xff]  ;;  %v6824_v6 = vcombine.high %v466_v58, %v470_v59  ;;  %v6823_v9 = vcombine.low %v466_v58, %v470_v59  ;;  %v251_v40 = vld [vmem:[#allocation5 + $0x2c8] sm:$0xff] }
  0xf3   :  { %3364 = vmatprep.subr.bf16.mxu0 %v6800_v44  ;;  %v478_v4 = vld [vmem:[#allocation5 + $0x9e0] sm:$0xff]  ;;  %v6610_v45 = vcombine.high %v251_v40, %v255_v42  ;;  %v6609_v51 = vcombine.low %v251_v40, %v255_v42  ;;  %v271_v59 = vld [vmem:[#allocation5 + $0x368] sm:$0xff] }
  0xf4   :  { %v482_v11 = vld [vmem:[#allocation5 + $0xa00] sm:$0xff]  ;;  %v6832_v14 = vcombine.high %v474_v3, %v478_v4  ;;  %v6831_v18 = vcombine.low %v474_v3, %v478_v4  ;;  %v279_v4 = vld [vmem:[#allocation5 + $0x3a8] sm:$0xff] }
  0xf5   :  { %3447 = vmatpush1.bf16.msra.mxu1 %v6545_v46  ;;  %v486_v12 = vld [vmem:[#allocation5 + $0xa20] sm:$0xff]  ;;  %v307_v40 = vld [vmem:[#allocation5 + $0x488] sm:$0xff] }
  0xf6   :  { %3365 = vmatpush1.bf16.msra.mxu0 %v6799_v47  ;;  %3448 = vmatprep.subr.bf16.mxu1 %v6554_v48  ;;  %v490_v20 = vld [vmem:[#allocation5 + $0xa40] sm:$0xff]  ;;  %v6840_v24 = vcombine.high %v482_v11, %v486_v12  ;;  %v6839_v28 = vcombine.low %v482_v11, %v486_v12  ;;  %v259_v48 = vld [vmem:[#allocation5 + $0x308] sm:$0xff] }
  0xf7   :  { %3366 = vmatprep.subr.bf16.mxu0 %v6808_v52  ;;  %v494_v22 = vld [vmem:[#allocation5 + $0xa60] sm:$0xff]  ;;  %v6618_v53 = vcombine.high %v259_v48, %v263_v50  ;;  %v6617_v60 = vcombine.low %v259_v48, %v263_v50  ;;  %v287_v12 = vld [vmem:[#allocation5 + $0x3e8] sm:$0xff] }
  0xf8   :  { %v498_v30 = vld [vmem:[#allocation5 + $0xa80] sm:$0xff]  ;;  %v6848_v33 = vcombine.high %v490_v20, %v494_v22  ;;  %v6847_v36 = vcombine.low %v490_v20, %v494_v22  ;;  %v295_v22 = vld [vmem:[#allocation5 + $0x428] sm:$0xff] }
  0xf9   :  { %3449 = vmatpush1.bf16.msra.mxu1 %v6553_v54  ;;  %v502_v31 = vld [vmem:[#allocation5 + $0xaa0] sm:$0xff]  ;;  %v311_v42 = vld [vmem:[#allocation5 + $0x4a8] sm:$0xff] }
  0xfa   :  { %3367 = vmatpush1.bf16.msra.mxu0 %v6807_v55  ;;  %3450 = vmatprep.subr.bf16.mxu1 %v6562_v56  ;;  %v506_v38 = vld [vmem:[#allocation5 + $0xac0] sm:$0xff]  ;;  %v6856_v41 = vcombine.high %v498_v30, %v502_v31  ;;  %v6855_v44 = vcombine.low %v498_v30, %v502_v31  ;;  %v267_v56 = vld [vmem:[#allocation5 + $0x348] sm:$0xff] }
  0xfb   :  { %3368 = vmatprep.subr.bf16.mxu0 %v6816_v62  ;;  %v510_v39 = vld [vmem:[#allocation5 + $0xae0] sm:$0xff]  ;;  %v6626_v63 = vcombine.high %v267_v56, %v271_v59  ;;  %v6625_v5 = vcombine.low %v267_v56, %v271_v59  ;;  %v299_v30 = vld [vmem:[#allocation5 + $0x448] sm:$0xff] }
  0xfc   :  { %v514_v46 = vld [vmem:[#allocation5 + $0xb00] sm:$0xff]  ;;  %v6864_v49 = vcombine.high %v506_v38, %v510_v39  ;;  %v6863_v52 = vcombine.low %v506_v38, %v510_v39  ;;  %v303_v31 = vld [vmem:[#allocation5 + $0x468] sm:$0xff] }
  0xfd   :  { %3451 = vmatpush1.bf16.msra.mxu1 %v6561_v0  ;;  %v518_v47 = vld [vmem:[#allocation5 + $0xb20] sm:$0xff] }
  0xfe   :  { %3369 = vmatpush1.bf16.msra.mxu0 %v6815_v1  ;;  %3452 = vmatprep.subr.bf16.mxu1 %v6570_v2  ;;  %v522_v54 = vld [vmem:[#allocation5 + $0xb40] sm:$0xff]  ;;  %v6872_v58 = vcombine.high %v514_v46, %v518_v47  ;;  %v6871_v62 = vcombine.low %v514_v46, %v518_v47  ;;  %v275_v2 = vld [vmem:[#allocation5 + $0x388] sm:$0xff]  ;;  %v6666_v46 = vcombine.high %v307_v40, %v311_v42 }
  0xff   :  { %3370 = vmatprep.subr.bf16.mxu0 %v6824_v6  ;;  %v526_v55 = vld [vmem:[#allocation5 + $0xb60] sm:$0xff]  ;;  %v6634_v7 = vcombine.high %v275_v2, %v279_v4  ;;  %v6633_v13 = vcombine.low %v275_v2, %v279_v4 }
 0x100   :  { %v530_v0 = vld [vmem:[#allocation5 + $0xb80] sm:$0xff]  ;;  %v6880_v3 = vcombine.high %v522_v54, %v526_v55  ;;  %v6879_v6 = vcombine.low %v522_v54, %v526_v55 }
 0x101   :  { %3453 = vmatpush1.bf16.msra.mxu1 %v6569_v8  ;;  %v534_v1 = vld [vmem:[#allocation5 + $0xba0] sm:$0xff] }
 0x102   :  { %3371 = vmatpush1.bf16.msra.mxu0 %v6823_v9  ;;  %3454 = vmatprep.subr.bf16.mxu1 %v6578_v10  ;;  %v538_v8 = vld [vmem:[#allocation5 + $0xbc0] sm:$0xff]  ;;  %v283_v10 = vld [vmem:[#allocation5 + $0x3c8] sm:$0xff]  ;;  %v6888_v11 = vcombine.high %v530_v0, %v534_v1 }
 0x103   :  { %3372 = vmatprep.subr.bf16.mxu0 %v6832_v14  ;;  %v542_v9 = vld [vmem:[#allocation5 + $0xbe0] sm:$0xff]  ;;  %v6887_v14 = vcombine.low %v530_v0, %v534_v1  ;;  %v6642_v15 = vcombine.high %v283_v10, %v287_v12 }
 0x104   :  { %v6896_v20 = vcombine.high %v538_v8, %v542_v9  ;;  %v150_v23 = vld [vmem:[#allocation2 + $0x20] sm:$0xff]  ;;  %v6895_v25 = vcombine.low %v538_v8, %v542_v9 }
 0x105   :  { %3455 = vmatpush1.bf16.msra.mxu1 %v6577_v17  ;;  %v546_v17 = vld [vmem:[#allocation5 + $0xc00] sm:$0xff] }
 0x106   :  { %3373 = vmatpush1.bf16.msra.mxu0 %v6831_v18  ;;  %3456 = vmatprep.subr.bf16.mxu1 %v6586_v19  ;;  %v550_v18 = vld [vmem:[#allocation5 + $0xc20] sm:$0xff]  ;;  %v291_v19 = vld [vmem:[#allocation5 + $0x408] sm:$0xff] }
 0x107   :  { %3374 = vmatprep.subr.bf16.mxu0 %v6840_v24  ;;  %v6641_v24 = vcombine.low %v283_v10, %v287_v12  ;;  %v6904_v32 = vcombine.high %v546_v17, %v550_v18  ;;  %v6649_v34 = vcombine.low %v291_v19, %v295_v22  ;;  %v562_v38 = vld [vmem:[#allocation5 + $0xc80] sm:$0xff] }
 0x108   :  { %v566_v39 = vld [vmem:[#allocation5 + $0xca0] sm:$0xff] }
 0x109   :  { %3457 = vmatpush1.bf16.msra.mxu1 %v6585_v26  ;;  %v6650_v26 = vcombine.high %v291_v19, %v295_v22  ;;  %v570_v47 = vld [vmem:[#allocation5 + $0xcc0] sm:$0xff]  ;;  %v6920_v50 = vcombine.high %v562_v38, %v566_v39  ;;  %v347_v22 = vld [vmem:[#allocation5 + $0x5c8] sm:$0xff] }
 0x10a   :  { %3375 = vmatpush1.bf16.msra.mxu0 %v6839_v28  ;;  %3458 = vmatprep.subr.bf16.mxu1 %v6594_v29  ;;  %v554_v28 = vld [vmem:[#allocation5 + $0xc40] sm:$0xff] }
 0x10b   :  { %3376 = vmatprep.subr.bf16.mxu0 %v6848_v33  ;;  %v558_v29 = vld [vmem:[#allocation5 + $0xc60] sm:$0xff]  ;;  %v153_v33 = vld [vmem:[#allocation2 + $0x38] sm:$0xff] }
 0x10c   :  { %v574_v48 = vld [vmem:[#allocation5 + $0xce0] sm:$0xff] }
 0x10d   :  { %3459 = vmatpush1.bf16.msra.mxu1 %v6593_v35  ;;  %v8417_v35 = vpack.c.bf16 %v150_v23, %v150_v23  ;;  %v578_v55 = vld [vmem:[#allocation5 + $0xd00] sm:$0xff]  ;;  %v6928_v59 = vcombine.high %v570_v47, %v574_v48  ;;  %v351_v23 = vld [vmem:[#allocation5 + $0x5e8] sm:$0xff] }
 0x10e   :  { %3377 = vmatpush1.bf16.msra.mxu0 %v6847_v36  ;;  %3460 = vmatprep.subr.bf16.mxu1 %v6602_v37  ;;  %v6903_v36 = vcombine.low %v546_v17, %v550_v18  ;;  %v6658_v37 = vcombine.high %v299_v30, %v303_v31  ;;  %v582_v56 = vld [vmem:[#allocation5 + $0xd20] sm:$0xff] }
 0x10f   :  { %3378 = vmatprep.subr.bf16.mxu0 %v6856_v41  ;;  %v6912_v41 = vcombine.high %v554_v28, %v558_v29  ;;  %v586_v1 = vld [vmem:[#allocation5 + $0xd40] sm:$0xff]  ;;  %v6936_v4 = vcombine.high %v578_v55, %v582_v56 }
 0x110   :  { %v590_v2 = vld [vmem:[#allocation5 + $0xd60] sm:$0xff] }
 0x111   :  { %3461 = vmatpush1.bf16.msra.mxu1 %v6601_v43  ;;  %v8419_v43 = vpack.c.bf16 %v153_v33, %v153_v33  ;;  %v594_v9 = vld [vmem:[#allocation5 + $0xd80] sm:$0xff]  ;;  %v6944_v12 = vcombine.high %v586_v1, %v590_v2  ;;  %v6705_v33 = vcombine.low %v347_v22, %v351_v23 }
 0x112   :  { %3379 = vmatpush1.bf16.msra.mxu0 %v6855_v44  ;;  %3462 = vmatprep.subr.bf16.mxu1 %v6610_v45  ;;  %v6657_v44 = vcombine.low %v299_v30, %v303_v31  ;;  %v6911_v45 = vcombine.low %v554_v28, %v558_v29  ;;  %v598_v10 = vld [vmem:[#allocation5 + $0xda0] sm:$0xff]  ;;  %v355_v30 = vld [vmem:[#allocation5 + $0x608] sm:$0xff] }
 0x113   :  { %3380 = vmatprep.subr.bf16.mxu0 %v6864_v49  ;;  %v315_v49 = vld [vmem:[#allocation5 + $0x4c8] sm:$0xff]  ;;  %v602_v18 = vld [vmem:[#allocation5 + $0xdc0] sm:$0xff] }
 0x114   :  { %v606_v19 = vld [vmem:[#allocation5 + $0xde0] sm:$0xff] }
 0x115   :  { %3463 = vmatpush1.bf16.msra.mxu1 %v6609_v51  ;;  %v319_v51 = vld [vmem:[#allocation5 + $0x4e8] sm:$0xff]  ;;  %v610_v28 = vld [vmem:[#allocation5 + $0xe00] sm:$0xff]  ;;  %v6960_v31 = vcombine.high %v602_v18, %v606_v19 }
 0x116   :  { %3381 = vmatpush1.bf16.msra.mxu0 %v6863_v52  ;;  %3464 = vmatprep.subr.bf16.mxu1 %v6618_v53  ;;  %v6665_v52 = vcombine.low %v307_v40, %v311_v42  ;;  %v6919_v53 = vcombine.low %v562_v38, %v566_v39  ;;  %v6674_v54 = vcombine.high %v315_v49, %v319_v51  ;;  %v614_v29 = vld [vmem:[#allocation5 + $0xe20] sm:$0xff]  ;;  %v363_v39 = vld [vmem:[#allocation5 + $0x648] sm:$0xff] }
 0x117   :  { %3382 = vmatprep.subr.bf16.mxu0 %v6872_v58  ;;  %v323_v58 = vld [vmem:[#allocation5 + $0x508] sm:$0xff]  ;;  %v622_v38 = vld [vmem:[#allocation5 + $0xe60] sm:$0xff]  ;;  %v6968_v40 = vcombine.high %v610_v28, %v614_v29 }
 0x119   :  { %3465 = vmatpush1.bf16.msra.mxu1 %v6617_v60  ;;  %v327_v60 = vld [vmem:[#allocation5 + $0x528] sm:$0xff] }
 0x11a   :  { %3383 = vmatpush1.bf16.msra.mxu0 %v6871_v62  ;;  %3466 = vmatprep.subr.bf16.mxu1 %v6626_v63  ;;  %v6673_v62 = vcombine.low %v315_v49, %v319_v51  ;;  %v6927_v63 = vcombine.low %v570_v47, %v574_v48  ;;  %v6682_v0 = vcombine.high %v323_v58, %v327_v60  ;;  %v630_v47 = vld [vmem:[#allocation5 + $0xea0] sm:$0xff]  ;;  %v371_v48 = vld [vmem:[#allocation5 + $0x688] sm:$0xff] }
 0x11b   :  { %3384 = vmatprep.subr.bf16.mxu0 %v6880_v3  ;;  %v331_v3 = vld [vmem:[#allocation5 + $0x548] sm:$0xff] }
 0x11d   :  { %3467 = vmatpush1.bf16.msra.mxu1 %v6625_v5  ;;  %v335_v5 = vld [vmem:[#allocation5 + $0x568] sm:$0xff] }
 0x11e   :  { %3385 = vmatpush1.bf16.msra.mxu0 %v6879_v6  ;;  %3468 = vmatprep.subr.bf16.mxu1 %v6634_v7  ;;  %v6681_v6 = vcombine.low %v323_v58, %v327_v60  ;;  %v6935_v7 = vcombine.low %v578_v55, %v582_v56  ;;  %v6690_v8 = vcombine.high %v331_v3, %v335_v5  ;;  %v638_v55 = vld [vmem:[#allocation5 + $0xee0] sm:$0xff]  ;;  %v379_v56 = vld [vmem:[#allocation5 + $0x6c8] sm:$0xff] }
 0x11f   :  { %3386 = vmatprep.subr.bf16.mxu0 %v6888_v11  ;;  %v339_v11 = vld [vmem:[#allocation5 + $0x588] sm:$0xff] }
 0x121   :  { %3469 = vmatpush1.bf16.msra.mxu1 %v6633_v13  ;;  %v343_v13 = vld [vmem:[#allocation5 + $0x5a8] sm:$0xff] }
 0x122   :  { %3387 = vmatpush1.bf16.msra.mxu0 %v6887_v14  ;;  %3470 = vmatprep.subr.bf16.mxu1 %v6642_v15  ;;  %v6689_v14 = vcombine.low %v331_v3, %v335_v5  ;;  %v6943_v15 = vcombine.low %v586_v1, %v590_v2  ;;  %v6698_v17 = vcombine.high %v339_v11, %v343_v13  ;;  %v646_v1 = vld [vmem:[#allocation5 + $0xf20] sm:$0xff]  ;;  %v387_v2 = vld [vmem:[#allocation5 + $0x708] sm:$0xff] }
 0x123   :  { %3388 = vmatprep.subr.bf16.mxu0 %v6896_v20  ;;  %v6952_v20 = vcombine.high %v594_v9, %v598_v10 }
 0x125   :  { %3471 = vmatpush1.bf16.msra.mxu1 %v6641_v24  ;;  %v6697_v24 = vcombine.low %v339_v11, %v343_v13 }
 0x126   :  { %3389 = vmatpush1.bf16.msra.mxu0 %v6895_v25  ;;  %3481 = vmatprep.subr.bf16.mxu1 %v6650_v26  ;;  %v6951_v25 = vcombine.low %v594_v9, %v598_v10  ;;  %v6706_v26 = vcombine.high %v347_v22, %v351_v23  ;;  %v654_v9 = vld [vmem:[#allocation5 + $0xf60] sm:$0xff]  ;;  %v395_v10 = vld [vmem:[#allocation5 + $0x748] sm:$0xff] }
 0x127   :  { %3399 = vmatprep.subr.bf16.mxu0 %v6904_v32  ;;  %v359_v32 = vld [vmem:[#allocation5 + $0x628] sm:$0xff] }
 0x128   :  { %3473 = vmatmul.mubr.bf16.vlgmr.msra.gmra.mrb[4].mxu1 %v8407_v16  ;;  %v6713_v42 = vcombine.low %v355_v30, %v359_v32  ;;  %v407_v22 = vld [vmem:[#allocation5 + $0x7a8] sm:$0xff] }
 0x129   :  { %3391 = vmatmul.mubr.bf16.vlgmr.msra.gmra.mrb[0].mxu0 %v8417_v35  ;;  %3482 = vmatpush1.bf16.msra.mxu1 %v6649_v34  ;;  %v6959_v34 = vcombine.low %v602_v18, %v606_v19  ;;  %v662_v18 = vld [vmem:[#allocation5 + $0xfa0] sm:$0xff]  ;;  %v403_v19 = vld [vmem:[#allocation5 + $0x788] sm:$0xff] }
 0x12a   :  { %3400 = vmatpush1.bf16.msra.mxu0 %v6903_v36  ;;  %3483 = vmatprep.subr.bf16.mxu1 %v6658_v37  ;;  %v6714_v36 = vcombine.high %v355_v30, %v359_v32  ;;  %v618_v37 = vld [vmem:[#allocation5 + $0xe40] sm:$0xff]  ;;  %v6761_v32 = vcombine.low %v403_v19, %v407_v22 }
 0x12b   :  { %3401 = vmatprep.subr.bf16.mxu0 %v6912_v41  ;;  %3431 = vmatprep.mubr.bf16.mxu0 %v8419_v43  ;;  %v367_v41 = vld [vmem:[#allocation5 + $0x668] sm:$0xff]  ;;  %v6976_v49 = vcombine.high %v618_v37, %v622_v38 }
 0x12c   :  { %3513 = vmatprep.mubr.bf16.mxu1 %v8403_v61  ;;  %v6721_v51 = vcombine.low %v363_v39, %v367_v41 }
 0x12d   :  { %3484 = vmatpush1.bf16.msra.mxu1 %v6657_v44  ;;  %v6967_v44 = vcombine.low %v610_v28, %v614_v29  ;;  %v670_v28 = vld [vmem:[#allocation5 + $0xfe0] sm:$0xff]  ;;  %v411_v29 = vld [vmem:[#allocation5 + $0x7c8] sm:$0xff] }
 0x12e   :  { %3402 = vmatpush1.bf16.msra.mxu0 %v6911_v45  ;;  %3485 = vmatprep.subr.bf16.mxu1 %v6666_v46  ;;  %v6722_v45 = vcombine.high %v363_v39, %v367_v41  ;;  %v626_v46 = vld [vmem:[#allocation5 + $0xe80] sm:$0xff]  ;;  %v152_v41 = vld [vmem:[#allocation2 + $0x30] sm:$0xff] }
 0x12f   :  { %3403 = vmatprep.subr.bf16.mxu0 %v6920_v50  ;;  %v375_v50 = vld [vmem:[#allocation5 + $0x6a8] sm:$0xff]  ;;  %v6984_v58 = vcombine.high %v626_v46, %v630_v47 }
 0x130   :  { %v6729_v60 = vcombine.low %v371_v48, %v375_v50 }
 0x131   :  { %3486 = vmatpush1.bf16.msra.mxu1 %v6665_v52  ;;  %v6975_v52 = vcombine.low %v618_v37, %v622_v38  ;;  %v423_v37 = vld [vmem:[#allocation5 + $0x828] sm:$0xff]  ;;  %v164_v38 = vld [vmem:[#allocation5 + $0x10] sm:$0xff] }
 0x132   :  { %3404 = vmatpush1.bf16.msra.mxu0 %v6919_v53  ;;  %3487 = vmatprep.subr.bf16.mxu1 %v6674_v54  ;;  %v6730_v53 = vcombine.high %v371_v48, %v375_v50  ;;  %v634_v54 = vld [vmem:[#allocation5 + $0xec0] sm:$0xff]  ;;  %v172_v48 = vld [vmem:[#allocation5 + $0x50] sm:$0xff] }
 0x133   :  { %3405 = vmatprep.subr.bf16.mxu0 %v6928_v59  ;;  %v383_v59 = vld [vmem:[#allocation5 + $0x6e8] sm:$0xff]  ;;  %v6992_v3 = vcombine.high %v634_v54, %v638_v55  ;;  %v176_v50 = vld [vmem:[#allocation5 + $0x70] sm:$0xff] }
 0x134   :  { %v6737_v5 = vcombine.low %v379_v56, %v383_v59 }
 0x135   :  { %3488 = vmatpush1.bf16.msra.mxu1 %v6673_v62  ;;  %v6983_v62 = vcombine.low %v626_v46, %v630_v47  ;;  %v427_v46 = vld [vmem:[#allocation5 + $0x848] sm:$0xff] }
 0x136   :  { %3406 = vmatpush1.bf16.msra.mxu0 %v6927_v63  ;;  %3489 = vmatprep.subr.bf16.mxu1 %v6682_v0  ;;  %v6738_v63 = vcombine.high %v379_v56, %v383_v59  ;;  %v642_v0 = vld [vmem:[#allocation5 + $0xf00] sm:$0xff]  ;;  %v431_v47 = vld [vmem:[#allocation5 + $0x868] sm:$0xff]  ;;  %v6532_v59 = vcombine.high %v172_v48, %v176_v50 }
 0x137   :  { %3407 = vmatprep.subr.bf16.mxu0 %v6936_v4  ;;  %v391_v4 = vld [vmem:[#allocation5 + $0x728] sm:$0xff]  ;;  %v7000_v11 = vcombine.high %v642_v0, %v646_v1 }
 0x138   :  { %v6745_v13 = vcombine.low %v387_v2, %v391_v4  ;;  %v439_v56 = vld [vmem:[#allocation5 + $0x8a8] sm:$0xff] }
 0x139   :  { %3490 = vmatpush1.bf16.msra.mxu1 %v6681_v6  ;;  %v6991_v6 = vcombine.low %v634_v54, %v638_v55  ;;  %v6786_v54 = vcombine.high %v427_v46, %v431_v47  ;;  %v435_v55 = vld [vmem:[#allocation5 + $0x888] sm:$0xff] }
 0x13a   :  { %3408 = vmatpush1.bf16.msra.mxu0 %v6935_v7  ;;  %3491 = vmatprep.subr.bf16.mxu1 %v6690_v8  ;;  %v6746_v7 = vcombine.high %v387_v2, %v391_v4  ;;  %v650_v8 = vld [vmem:[#allocation5 + $0xf40] sm:$0xff]  ;;  %v447_v2 = vld [vmem:[#allocation5 + $0x8e8] sm:$0xff] }
 0x13b   :  { %3409 = vmatprep.subr.bf16.mxu0 %v6944_v12  ;;  %v399_v12 = vld [vmem:[#allocation5 + $0x768] sm:$0xff] }
 0x13c   :  { %v6753_v23 = vcombine.low %v395_v10, %v399_v12 }
 0x13d   :  { %3492 = vmatpush1.bf16.msra.mxu1 %v6689_v14  ;;  %v6999_v14 = vcombine.low %v642_v0, %v646_v1  ;;  %v6794_v0 = vcombine.high %v435_v55, %v439_v56  ;;  %v443_v1 = vld [vmem:[#allocation5 + $0x8c8] sm:$0xff] }
 0x13e   :  { %3410 = vmatpush1.bf16.msra.mxu0 %v6943_v15  ;;  %3493 = vmatprep.subr.bf16.mxu1 %v6698_v17  ;;  %v6754_v15 = vcombine.high %v395_v10, %v399_v12  ;;  %v658_v17 = vld [vmem:[#allocation5 + $0xf80] sm:$0xff]  ;;  %v455_v10 = vld [vmem:[#allocation5 + $0x928] sm:$0xff] }
 0x13f   :  { %3411 = vmatprep.subr.bf16.mxu0 %v6952_v20  ;;  %v7008_v20 = vcombine.high %v650_v8, %v654_v9  ;;  %v7016_v30 = vcombine.high %v658_v17, %v662_v18 }
 0x141   :  { %3494 = vmatpush1.bf16.msra.mxu1 %v6697_v24  ;;  %v7007_v24 = vcombine.low %v650_v8, %v654_v9  ;;  %v6802_v8 = vcombine.high %v443_v1, %v447_v2  ;;  %v451_v9 = vld [vmem:[#allocation5 + $0x908] sm:$0xff] }
 0x142   :  { %3412 = vmatpush1.bf16.msra.mxu0 %v6951_v25  ;;  %3495 = vmatprep.subr.bf16.mxu1 %v6706_v26  ;;  %v6762_v25 = vcombine.high %v403_v19, %v407_v22  ;;  %v666_v26 = vld [vmem:[#allocation5 + $0xfc0] sm:$0xff]  ;;  %v463_v19 = vld [vmem:[#allocation5 + $0x968] sm:$0xff] }
 0x143   :  { %3413 = vmatprep.subr.bf16.mxu0 %v6960_v31  ;;  %v415_v31 = vld [vmem:[#allocation5 + $0x7e8] sm:$0xff]  ;;  %v7024_v39 = vcombine.high %v666_v26, %v670_v28 }
 0x145   :  { %3496 = vmatpush1.bf16.msra.mxu1 %v6705_v33  ;;  %v7015_v33 = vcombine.low %v658_v17, %v662_v18  ;;  %v6810_v17 = vcombine.high %v451_v9, %v455_v10  ;;  %v459_v18 = vld [vmem:[#allocation5 + $0x948] sm:$0xff] }
 0x146   :  { %3414 = vmatpush1.bf16.msra.mxu0 %v6959_v34  ;;  %3497 = vmatprep.subr.bf16.mxu1 %v6714_v36  ;;  %v6770_v34 = vcombine.high %v411_v29, %v415_v31  ;;  %v419_v36 = vld [vmem:[#allocation5 + $0x808] sm:$0xff] }
 0x147   :  { %3415 = vmatprep.subr.bf16.mxu0 %v6968_v40  ;;  %v168_v40 = vld [vmem:[#allocation5 + $0x30] sm:$0xff] }
 0x149   :  { %3498 = vmatpush1.bf16.msra.mxu1 %v6713_v42  ;;  %v6769_v42 = vcombine.low %v411_v29, %v415_v31  ;;  %v471_v29 = vld [vmem:[#allocation5 + $0x9a8] sm:$0xff] }
 0x14a   :  { %3416 = vmatpush1.bf16.msra.mxu0 %v6967_v44  ;;  %3499 = vmatprep.subr.bf16.mxu1 %v6722_v45  ;;  %v7023_v44 = vcombine.low %v666_v26, %v670_v28  ;;  %v6778_v45 = vcombine.high %v419_v36, %v423_v37  ;;  %v6818_v26 = vcombine.high %v459_v18, %v463_v19  ;;  %v467_v28 = vld [vmem:[#allocation5 + $0x988] sm:$0xff] }
 0x14b   :  { %3417 = vmatprep.subr.bf16.mxu0 %v6976_v49  ;;  %v6524_v49 = vcombine.high %v164_v38, %v168_v40 }
 0x14d   :  { %3500 = vmatpush1.bf16.msra.mxu1 %v6721_v51  ;;  %v8425_v51 = vpack.c.bf16 %v152_v41, %v152_v41  ;;  %v224_v41 = vld [vmem:[#allocation5 + $0x1f0] sm:$0xff] }
 0x14e   :  { %3418 = vmatpush1.bf16.msra.mxu0 %v6975_v52  ;;  %3501 = vmatprep.subr.bf16.mxu1 %v6730_v53  ;;  %v6777_v52 = vcombine.low %v419_v36, %v423_v37  ;;  %v6523_v53 = vcombine.low %v164_v38, %v168_v40  ;;  %v6826_v36 = vcombine.high %v467_v28, %v471_v29  ;;  %v475_v37 = vld [vmem:[#allocation5 + $0x9c8] sm:$0xff] }
 0x14f   :  { %3419 = vmatprep.subr.bf16.mxu0 %v6984_v58  ;;  %v180_v58 = vld [vmem:[#allocation5 + $0x90] sm:$0xff]  ;;  %v479_v38 = vld [vmem:[#allocation5 + $0x9e8] sm:$0xff] }
 0x151   :  { %3502 = vmatpush1.bf16.msra.mxu1 %v6729_v60  ;;  %v184_v60 = vld [vmem:[#allocation5 + $0xb0] sm:$0xff] }
 0x152   :  { %3420 = vmatpush1.bf16.msra.mxu0 %v6983_v62  ;;  %3503 = vmatprep.subr.bf16.mxu1 %v6738_v63  ;;  %v6785_v62 = vcombine.low %v427_v46, %v431_v47  ;;  %v6531_v63 = vcombine.low %v172_v48, %v176_v50  ;;  %v6540_v4 = vcombine.high %v180_v58, %v184_v60  ;;  %v483_v46 = vld [vmem:[#allocation5 + $0xa08] sm:$0xff]  ;;  %v228_v48 = vld [vmem:[#allocation5 + $0x210] sm:$0xff] }
 0x153   :  { %3421 = vmatprep.subr.bf16.mxu0 %v6992_v3  ;;  %v188_v3 = vld [vmem:[#allocation5 + $0xd0] sm:$0xff]  ;;  %v487_v47 = vld [vmem:[#allocation5 + $0xa28] sm:$0xff] }
 0x154   :  { %v232_v50 = vld [vmem:[#allocation5 + $0x230] sm:$0xff] }
 0x155   :  { %3504 = vmatpush1.bf16.msra.mxu1 %v6737_v5  ;;  %v192_v5 = vld [vmem:[#allocation5 + $0xf0] sm:$0xff] }
 0x156   :  { %3422 = vmatpush1.bf16.msra.mxu0 %v6991_v6  ;;  %3505 = vmatprep.subr.bf16.mxu1 %v6746_v7  ;;  %v6793_v6 = vcombine.low %v435_v55, %v439_v56  ;;  %v6539_v7 = vcombine.low %v180_v58, %v184_v60  ;;  %v6548_v12 = vcombine.high %v188_v3, %v192_v5  ;;  %v491_v55 = vld [vmem:[#allocation5 + $0xa48] sm:$0xff]  ;;  %v236_v58 = vld [vmem:[#allocation5 + $0x250] sm:$0xff] }
 0x157   :  { %3423 = vmatprep.subr.bf16.mxu0 %v7000_v11  ;;  %v196_v11 = vld [vmem:[#allocation5 + $0x110] sm:$0xff]  ;;  %v495_v56 = vld [vmem:[#allocation5 + $0xa68] sm:$0xff] }
 0x158   :  { %v240_v60 = vld [vmem:[#allocation5 + $0x270] sm:$0xff] }
 0x159   :  { %3506 = vmatpush1.bf16.msra.mxu1 %v6745_v13  ;;  %v200_v13 = vld [vmem:[#allocation5 + $0x130] sm:$0xff] }
 0x15a   :  { %3424 = vmatpush1.bf16.msra.mxu0 %v6999_v14  ;;  %3507 = vmatprep.subr.bf16.mxu1 %v6754_v15  ;;  %v6801_v14 = vcombine.low %v443_v1, %v447_v2  ;;  %v6547_v15 = vcombine.low %v188_v3, %v192_v5  ;;  %v6556_v22 = vcombine.high %v196_v11, %v200_v13  ;;  %v499_v1 = vld [vmem:[#allocation5 + $0xa88] sm:$0xff]  ;;  %v244_v3 = vld [vmem:[#allocation5 + $0x290] sm:$0xff] }
 0x15b   :  { %3425 = vmatprep.subr.bf16.mxu0 %v7008_v20  ;;  %v204_v20 = vld [vmem:[#allocation5 + $0x150] sm:$0xff]  ;;  %v503_v2 = vld [vmem:[#allocation5 + $0xaa8] sm:$0xff] }
 0x15c   :  { %v248_v5 = vld [vmem:[#allocation5 + $0x2b0] sm:$0xff] }
 0x15d   :  { %3508 = vmatpush1.bf16.msra.mxu1 %v6753_v23  ;;  %v208_v23 = vld [vmem:[#allocation5 + $0x170] sm:$0xff] }
 0x15e   :  { %3426 = vmatpush1.bf16.msra.mxu0 %v7007_v24  ;;  %3509 = vmatprep.subr.bf16.mxu1 %v6762_v25  ;;  %v6809_v24 = vcombine.low %v451_v9, %v455_v10  ;;  %v6555_v25 = vcombine.low %v196_v11, %v200_v13  ;;  %v6564_v31 = vcombine.high %v204_v20, %v208_v23  ;;  %v507_v9 = vld [vmem:[#allocation5 + $0xac8] sm:$0xff]  ;;  %v252_v11 = vld [vmem:[#allocation5 + $0x2d0] sm:$0xff] }
 0x15f   :  { %3427 = vmatprep.subr.bf16.mxu0 %v7016_v30  ;;  %v212_v30 = vld [vmem:[#allocation5 + $0x190] sm:$0xff]  ;;  %v511_v10 = vld [vmem:[#allocation5 + $0xae8] sm:$0xff] }
 0x160   :  { %v256_v13 = vld [vmem:[#allocation5 + $0x2f0] sm:$0xff] }
 0x161   :  { %3510 = vmatpush1.bf16.msra.mxu1 %v6761_v32  ;;  %v216_v32 = vld [vmem:[#allocation5 + $0x1b0] sm:$0xff] }
 0x162   :  { %3428 = vmatpush1.bf16.msra.mxu0 %v7015_v33  ;;  %3511 = vmatprep.subr.bf16.mxu1 %v6770_v34  ;;  %v6817_v33 = vcombine.low %v459_v18, %v463_v19  ;;  %v6563_v34 = vcombine.low %v204_v20, %v208_v23  ;;  %v6572_v40 = vcombine.high %v212_v30, %v216_v32  ;;  %v515_v18 = vld [vmem:[#allocation5 + $0xb08] sm:$0xff]  ;;  %v260_v20 = vld [vmem:[#allocation5 + $0x310] sm:$0xff] }
 0x163   :  { %3429 = vmatprep.subr.bf16.mxu0 %v7024_v39  ;;  %v220_v39 = vld [vmem:[#allocation5 + $0x1d0] sm:$0xff]  ;;  %v519_v19 = vld [vmem:[#allocation5 + $0xb28] sm:$0xff] }
 0x164   :  { %v264_v23 = vld [vmem:[#allocation5 + $0x330] sm:$0xff] }
 0x165   :  { %3512 = vmatpush1.bf16.msra.mxu1 %v6769_v42  ;;  %v6825_v42 = vcombine.low %v467_v28, %v471_v29  ;;  %v523_v28 = vld [vmem:[#allocation5 + $0xb48] sm:$0xff] }
 0x166   :  { %3430 = vmatpush1.bf16.msra.mxu0 %v7023_v44  ;;  %3522 = vmatprep.subr.bf16.mxu1 %v6778_v45  ;;  %v6571_v44 = vcombine.low %v212_v30, %v216_v32  ;;  %v6834_v45 = vcombine.high %v475_v37, %v479_v38  ;;  %v527_v29 = vld [vmem:[#allocation5 + $0xb68] sm:$0xff]  ;;  %v268_v30 = vld [vmem:[#allocation5 + $0x350] sm:$0xff] }
 0x167   :  { %3604 = vmatprep.subr.bf16.mxu0 %v6524_v49  ;;  %v6580_v49 = vcombine.high %v220_v39, %v224_v41  ;;  %v272_v32 = vld [vmem:[#allocation5 + $0x370] sm:$0xff] }
 0x168   :  { %3514 = vmatmul.mubr.bf16.vlgmr.msra.gmra.mrb[4].mxu1 %v8409_v21 }
 0x169   :  { %3432 = vmatmul.mubr.bf16.vlgmr.msra.gmra.mrb[0].mxu0 %v8425_v51  ;;  %3523 = vmatpush1.bf16.msra.mxu1 %v6777_v52  ;;  %v6833_v52 = vcombine.low %v475_v37, %v479_v38  ;;  %v531_v37 = vld [vmem:[#allocation5 + $0xb88] sm:$0xff] }
 0x16a   :  { %3605 = vmatpush1.bf16.msra.mxu0 %v6523_v53  ;;  %3524 = vmatprep.subr.bf16.mxu1 %v6786_v54  ;;  %v6579_v53 = vcombine.low %v220_v39, %v224_v41  ;;  %v6842_v54 = vcombine.high %v483_v46, %v487_v47  ;;  %v535_v38 = vld [vmem:[#allocation5 + $0xba8] sm:$0xff]  ;;  %v276_v39 = vld [vmem:[#allocation5 + $0x390] sm:$0xff] }
 0x16b   :  { %3606 = vmatprep.subr.bf16.mxu0 %v6532_v59  ;;  %3554 = vmatprep.mubr.bf16.mxu1 %v8411_v27  ;;  %v6588_v59 = vcombine.high %v228_v48, %v232_v50  ;;  %v280_v41 = vld [vmem:[#allocation5 + $0x3b0] sm:$0xff] }
 0x16c   :  { %3636 = vmatprep.mubr.bf16.mxu0 %v8401_v57 }
 0x16d   :  { %3525 = vmatpush1.bf16.msra.mxu1 %v6785_v62  ;;  %v6841_v62 = vcombine.low %v483_v46, %v487_v47  ;;  %v6636_v46 = vcombine.high %v276_v39, %v280_v41  ;;  %v539_v47 = vld [vmem:[#allocation5 + $0xbc8] sm:$0xff] }
 0x16e   :  { %3607 = vmatpush1.bf16.msra.mxu0 %v6531_v63  ;;  %3526 = vmatprep.subr.bf16.mxu1 %v6794_v0  ;;  %v6587_v63 = vcombine.low %v228_v48, %v232_v50  ;;  %v6850_v0 = vcombine.high %v491_v55, %v495_v56  ;;  %v543_v48 = vld [vmem:[#allocation5 + $0xbe8] sm:$0xff]  ;;  %v288_v50 = vld [vmem:[#allocation5 + $0x3f0] sm:$0xff] }
 0x16f   :  { %3608 = vmatprep.subr.bf16.mxu0 %v6540_v4  ;;  %v6596_v4 = vcombine.high %v236_v58, %v240_v60 }
 0x171   :  { %3527 = vmatpush1.bf16.msra.mxu1 %v6793_v6  ;;  %v6849_v6 = vcombine.low %v491_v55, %v495_v56  ;;  %v547_v56 = vld [vmem:[#allocation5 + $0xc08] sm:$0xff] }
 0x172   :  { %3609 = vmatpush1.bf16.msra.mxu0 %v6539_v7  ;;  %3528 = vmatprep.subr.bf16.mxu1 %v6802_v8  ;;  %v6595_v7 = vcombine.low %v236_v58, %v240_v60  ;;  %v6858_v8 = vcombine.high %v499_v1, %v503_v2  ;;  %v551_v58 = vld [vmem:[#allocation5 + $0xc28] sm:$0xff]  ;;  %v296_v60 = vld [vmem:[#allocation5 + $0x430] sm:$0xff] }
 0x173   :  { %3610 = vmatprep.subr.bf16.mxu0 %v6548_v12  ;;  %v6604_v12 = vcombine.high %v244_v3, %v248_v5 }
 0x175   :  { %3529 = vmatpush1.bf16.msra.mxu1 %v6801_v14  ;;  %v6857_v14 = vcombine.low %v499_v1, %v503_v2  ;;  %v555_v2 = vld [vmem:[#allocation5 + $0xc48] sm:$0xff] }
 0x176   :  { %3611 = vmatpush1.bf16.msra.mxu0 %v6547_v15  ;;  %3530 = vmatprep.subr.bf16.mxu1 %v6810_v17  ;;  %v6603_v15 = vcombine.low %v244_v3, %v248_v5  ;;  %v6866_v17 = vcombine.high %v507_v9, %v511_v10  ;;  %v559_v3 = vld [vmem:[#allocation5 + $0xc68] sm:$0xff]  ;;  %v304_v5 = vld [vmem:[#allocation5 + $0x470] sm:$0xff] }
 0x177   :  { %3612 = vmatprep.subr.bf16.mxu0 %v6556_v22  ;;  %v6612_v22 = vcombine.high %v252_v11, %v256_v13 }
 0x179   :  { %3531 = vmatpush1.bf16.msra.mxu1 %v6809_v24  ;;  %v6865_v24 = vcombine.low %v507_v9, %v511_v10  ;;  %v563_v10 = vld [vmem:[#allocation5 + $0xc88] sm:$0xff] }
 0x17a   :  { %3613 = vmatpush1.bf16.msra.mxu0 %v6555_v25  ;;  %3532 = vmatprep.subr.bf16.mxu1 %v6818_v26  ;;  %v6611_v25 = vcombine.low %v252_v11, %v256_v13  ;;  %v6874_v26 = vcombine.high %v515_v18, %v519_v19  ;;  %v567_v11 = vld [vmem:[#allocation5 + $0xca8] sm:$0xff]  ;;  %v312_v13 = vld [vmem:[#allocation5 + $0x4b0] sm:$0xff] }
 0x17b   :  { %3614 = vmatprep.subr.bf16.mxu0 %v6564_v31  ;;  %v6620_v31 = vcombine.high %v260_v20, %v264_v23 }
 0x17d   :  { %3533 = vmatpush1.bf16.msra.mxu1 %v6817_v33  ;;  %v6873_v33 = vcombine.low %v515_v18, %v519_v19  ;;  %v571_v19 = vld [vmem:[#allocation5 + $0xcc8] sm:$0xff] }
 0x17e   :  { %3615 = vmatpush1.bf16.msra.mxu0 %v6563_v34  ;;  %3534 = vmatprep.subr.bf16.mxu1 %v6826_v36  ;;  %v6619_v34 = vcombine.low %v260_v20, %v264_v23  ;;  %v6882_v36 = vcombine.high %v523_v28, %v527_v29  ;;  %v575_v20 = vld [vmem:[#allocation5 + $0xce8] sm:$0xff]  ;;  %v320_v23 = vld [vmem:[#allocation5 + $0x4f0] sm:$0xff] }
 0x17f   :  { %3616 = vmatprep.subr.bf16.mxu0 %v6572_v40  ;;  %v6628_v40 = vcombine.high %v268_v30, %v272_v32 }
 0x181   :  { %3535 = vmatpush1.bf16.msra.mxu1 %v6825_v42  ;;  %v6881_v42 = vcombine.low %v523_v28, %v527_v29  ;;  %v579_v29 = vld [vmem:[#allocation5 + $0xd08] sm:$0xff] }
 0x182   :  { %3617 = vmatpush1.bf16.msra.mxu0 %v6571_v44  ;;  %3536 = vmatprep.subr.bf16.mxu1 %v6834_v45  ;;  %v6627_v44 = vcombine.low %v268_v30, %v272_v32  ;;  %v6890_v45 = vcombine.high %v531_v37, %v535_v38  ;;  %v583_v30 = vld [vmem:[#allocation5 + $0xd28] sm:$0xff]  ;;  %v328_v32 = vld [vmem:[#allocation5 + $0x530] sm:$0xff] }
 0x183   :  { %3618 = vmatprep.subr.bf16.mxu0 %v6580_v49  ;;  %v284_v49 = vld [vmem:[#allocation5 + $0x3d0] sm:$0xff] }
 0x184   :  { %v6644_v55 = vcombine.high %v284_v49, %v288_v50 }
 0x185   :  { %3537 = vmatpush1.bf16.msra.mxu1 %v6833_v52  ;;  %v6889_v52 = vcombine.low %v531_v37, %v535_v38  ;;  %v587_v38 = vld [vmem:[#allocation5 + $0xd48] sm:$0xff] }
 0x186   :  { %3619 = vmatpush1.bf16.msra.mxu0 %v6579_v53  ;;  %3538 = vmatprep.subr.bf16.mxu1 %v6842_v54  ;;  %v6635_v53 = vcombine.low %v276_v39, %v280_v41  ;;  %v6898_v54 = vcombine.high %v539_v47, %v543_v48  ;;  %v591_v39 = vld [vmem:[#allocation5 + $0xd68] sm:$0xff]  ;;  %v336_v41 = vld [vmem:[#allocation5 + $0x570] sm:$0xff] }
 0x187   :  { %3620 = vmatprep.subr.bf16.mxu0 %v6588_v59  ;;  %v292_v59 = vld [vmem:[#allocation5 + $0x410] sm:$0xff] }
 0x188   :  { %v6652_v1 = vcombine.high %v292_v59, %v296_v60 }
 0x189   :  { %3539 = vmatpush1.bf16.msra.mxu1 %v6841_v62  ;;  %v6897_v62 = vcombine.low %v539_v47, %v543_v48  ;;  %v595_v47 = vld [vmem:[#allocation5 + $0xd88] sm:$0xff] }
 0x18a   :  { %3621 = vmatpush1.bf16.msra.mxu0 %v6587_v63  ;;  %3540 = vmatprep.subr.bf16.mxu1 %v6850_v0  ;;  %v6643_v63 = vcombine.low %v284_v49, %v288_v50  ;;  %v6906_v0 = vcombine.high %v547_v56, %v551_v58  ;;  %v599_v48 = vld [vmem:[#allocation5 + $0xda8] sm:$0xff]  ;;  %v340_v49 = vld [vmem:[#allocation5 + $0x590] sm:$0xff] }
 0x18b   :  { %3622 = vmatprep.subr.bf16.mxu0 %v6596_v4  ;;  %v300_v4 = vld [vmem:[#allocation5 + $0x450] sm:$0xff] }
 0x18c   :  { %v6660_v9 = vcombine.high %v300_v4, %v304_v5  ;;  %v344_v50 = vld [vmem:[#allocation5 + $0x5b0] sm:$0xff] }
 0x18d   :  { %3541 = vmatpush1.bf16.msra.mxu1 %v6849_v6  ;;  %v6905_v6 = vcombine.low %v547_v56, %v551_v58  ;;  %v6700_v56 = vcombine.high %v340_v49, %v344_v50  ;;  %v603_v58 = vld [vmem:[#allocation5 + $0xdc8] sm:$0xff] }
 0x18e   :  { %3623 = vmatpush1.bf16.msra.mxu0 %v6595_v7  ;;  %3542 = vmatprep.subr.bf16.mxu1 %v6858_v8  ;;  %v6651_v7 = vcombine.low %v292_v59, %v296_v60  ;;  %v6914_v8 = vcombine.high %v555_v2, %v559_v3  ;;  %v607_v59 = vld [vmem:[#allocation5 + $0xde8] sm:$0xff] }
 0x18f   :  { %3624 = vmatprep.subr.bf16.mxu0 %v6604_v12  ;;  %v308_v12 = vld [vmem:[#allocation5 + $0x490] sm:$0xff] }
 0x190   :  { %v6668_v18 = vcombine.high %v308_v12, %v312_v13 }
 0x191   :  { %3543 = vmatpush1.bf16.msra.mxu1 %v6857_v14  ;;  %v6913_v14 = vcombine.low %v555_v2, %v559_v3  ;;  %v6699_v3 = vcombine.low %v340_v49, %v344_v50 }
 0x192   :  { %3625 = vmatpush1.bf16.msra.mxu0 %v6603_v15  ;;  %3544 = vmatprep.subr.bf16.mxu1 %v6866_v17  ;;  %v6659_v15 = vcombine.low %v300_v4, %v304_v5  ;;  %v6922_v17 = vcombine.high %v563_v10, %v567_v11  ;;  %v6962_v4 = vcombine.high %v603_v58, %v607_v59 }
 0x193   :  { %3626 = vmatprep.subr.bf16.mxu0 %v6612_v22  ;;  %v316_v22 = vld [vmem:[#allocation5 + $0x4d0] sm:$0xff] }
 0x194   :  { %v6676_v28 = vcombine.high %v316_v22, %v320_v23 }
 0x195   :  { %3545 = vmatpush1.bf16.msra.mxu1 %v6865_v24  ;;  %v6921_v24 = vcombine.low %v563_v10, %v567_v11  ;;  %v6961_v10 = vcombine.low %v603_v58, %v607_v59 }
 0x196   :  { %3627 = vmatpush1.bf16.msra.mxu0 %v6611_v25  ;;  %3546 = vmatprep.subr.bf16.mxu1 %v6874_v26  ;;  %v6667_v25 = vcombine.low %v308_v12, %v312_v13  ;;  %v6930_v26 = vcombine.high %v571_v19, %v575_v20 }
 0x197   :  { %3628 = vmatprep.subr.bf16.mxu0 %v6620_v31  ;;  %v324_v31 = vld [vmem:[#allocation5 + $0x510] sm:$0xff] }
 0x198   :  { %v6684_v37 = vcombine.high %v324_v31, %v328_v32 }
 0x199   :  { %3547 = vmatpush1.bf16.msra.mxu1 %v6873_v33  ;;  %v6929_v33 = vcombine.low %v571_v19, %v575_v20 }
 0x19a   :  { %3629 = vmatpush1.bf16.msra.mxu0 %v6619_v34  ;;  %3548 = vmatprep.subr.bf16.mxu1 %v6882_v36  ;;  %v6675_v34 = vcombine.low %v316_v22, %v320_v23  ;;  %v6938_v36 = vcombine.high %v579_v29, %v583_v30 }
 0x19b   :  { %3630 = vmatprep.subr.bf16.mxu0 %v6628_v40  ;;  %v332_v40 = vld [vmem:[#allocation5 + $0x550] sm:$0xff] }
 0x19d   :  { %3549 = vmatpush1.bf16.msra.mxu1 %v6881_v42  ;;  %v6937_v42 = vcombine.low %v579_v29, %v583_v30 }
 0x19e   :  { %3631 = vmatpush1.bf16.msra.mxu0 %v6627_v44  ;;  %3550 = vmatprep.subr.bf16.mxu1 %v6890_v45  ;;  %v6683_v44 = vcombine.low %v324_v31, %v328_v32  ;;  %v6946_v45 = vcombine.high %v587_v38, %v591_v39 }
 0x19f   :  { %3632 = vmatprep.subr.bf16.mxu0 %v6636_v46  ;;  %v6692_v46 = vcombine.high %v332_v40, %v336_v41 }
 0x1a1   :  { %3551 = vmatpush1.bf16.msra.mxu1 %v6889_v52  ;;  %v6945_v52 = vcombine.low %v587_v38, %v591_v39 }
 0x1a2   :  { %3633 = vmatpush1.bf16.msra.mxu0 %v6635_v53  ;;  %3552 = vmatprep.subr.bf16.mxu1 %v6898_v54  ;;  %v6691_v53 = vcombine.low %v332_v40, %v336_v41  ;;  %v6954_v54 = vcombine.high %v595_v47, %v599_v48 }
 0x1a3   :  { %3634 = vmatprep.subr.bf16.mxu0 %v6644_v55 }
 0x1a5   :  { %3553 = vmatpush1.bf16.msra.mxu1 %v6897_v62  ;;  %v348_v62 = vld [vmem:[#allocation5 + $0x5d0] sm:$0xff] }
 0x1a6   :  { %3635 = vmatpush1.bf16.msra.mxu0 %v6643_v63  ;;  %3563 = vmatprep.subr.bf16.mxu1 %v6906_v0  ;;  %v352_v63 = vld [vmem:[#allocation5 + $0x5f0] sm:$0xff] }
 0x1a7   :  { %3645 = vmatprep.subr.bf16.mxu0 %v6652_v1  ;;  %v6953_v1 = vcombine.low %v595_v47, %v599_v48  ;;  %v6708_v5 = vcombine.high %v348_v62, %v352_v63  ;;  %v6707_v11 = vcombine.low %v348_v62, %v352_v63 }
 0x1a8   :  { %3555 = vmatmul.mubr.bf16.vlgmr.msra.gmra.mrb[4].mxu1 %v8417_v35 }
 0x1a9   :  { %3564 = vmatpush1.bf16.msra.mxu1 %v6905_v6  ;;  %3637 = vmatmul.mubr.bf16.vlgmr.msra.gmra.mrb[4].mxu0 %v8407_v16  ;;  %v611_v6 = vld [vmem:[#allocation5 + $0xe08] sm:$0xff] }
 0x1aa   :  { %3646 = vmatpush1.bf16.msra.mxu0 %v6651_v7  ;;  %3565 = vmatprep.subr.bf16.mxu1 %v6914_v8  ;;  %v615_v7 = vld [vmem:[#allocation5 + $0xe28] sm:$0xff]  ;;  %v356_v8 = vld [vmem:[#allocation5 + $0x610] sm:$0xff] }
 0x1ab   :  { %3647 = vmatprep.subr.bf16.mxu0 %v6660_v9  ;;  %3595 = vmatprep.mubr.bf16.mxu1 %v8419_v43  ;;  %v360_v9 = vld [vmem:[#allocation5 + $0x630] sm:$0xff]  ;;  %v6970_v12 = vcombine.high %v611_v6, %v615_v7  ;;  %v6969_v19 = vcombine.low %v611_v6, %v615_v7 }
 0x1ac   :  { %3677 = vmatprep.mubr.bf16.mxu0 %v8403_v61  ;;  %v6716_v13 = vcombine.high %v356_v8, %v360_v9  ;;  %v6715_v20 = vcombine.low %v356_v8, %v360_v9  ;;  %v667_v8 = vld [vmem:[#allocation5 + $0xfc8] sm:$0xff] }
 0x1ad   :  { %3566 = vmatpush1.bf16.msra.mxu1 %v6913_v14  ;;  %v619_v14 = vld [vmem:[#allocation5 + $0xe48] sm:$0xff] }
 0x1ae   :  { %3648 = vmatpush1.bf16.msra.mxu0 %v6659_v15  ;;  %3567 = vmatprep.subr.bf16.mxu1 %v6922_v17  ;;  %v623_v15 = vld [vmem:[#allocation5 + $0xe68] sm:$0xff]  ;;  %v364_v17 = vld [vmem:[#allocation5 + $0x650] sm:$0xff] }
 0x1af   :  { %3649 = vmatprep.subr.bf16.mxu0 %v6668_v18  ;;  %v368_v18 = vld [vmem:[#allocation5 + $0x670] sm:$0xff]  ;;  %v6978_v22 = vcombine.high %v619_v14, %v623_v15  ;;  %v6977_v29 = vcombine.low %v619_v14, %v623_v15  ;;  %v671_v9 = vld [vmem:[#allocation5 + $0xfe8] sm:$0xff] }
 0x1b0   :  { %v6724_v23 = vcombine.high %v364_v17, %v368_v18  ;;  %v6723_v30 = vcombine.low %v364_v17, %v368_v18  ;;  %v7026_v14 = vcombine.high %v667_v8, %v671_v9  ;;  %v165_v17 = vld [vmem:[#allocation5 + $0x18] sm:$0xff] }
 0x1b1   :  { %3568 = vmatpush1.bf16.msra.mxu1 %v6921_v24  ;;  %v627_v24 = vld [vmem:[#allocation5 + $0xe88] sm:$0xff]  ;;  %v169_v18 = vld [vmem:[#allocation5 + $0x38] sm:$0xff] }
 0x1b2   :  { %3650 = vmatpush1.bf16.msra.mxu0 %v6667_v25  ;;  %3569 = vmatprep.subr.bf16.mxu1 %v6930_v26  ;;  %v631_v25 = vld [vmem:[#allocation5 + $0xea8] sm:$0xff]  ;;  %v372_v26 = vld [vmem:[#allocation5 + $0x690] sm:$0xff] }
 0x1b3   :  { %3651 = vmatprep.subr.bf16.mxu0 %v6676_v28  ;;  %v376_v28 = vld [vmem:[#allocation5 + $0x6b0] sm:$0xff]  ;;  %v6986_v31 = vcombine.high %v627_v24, %v631_v25  ;;  %v6985_v38 = vcombine.low %v627_v24, %v631_v25  ;;  %v6526_v24 = vcombine.high %v165_v17, %v169_v18 }
 0x1b4   :  { %v6732_v32 = vcombine.high %v372_v26, %v376_v28  ;;  %v6731_v39 = vcombine.low %v372_v26, %v376_v28  ;;  %v173_v26 = vld [vmem:[#allocation5 + $0x58] sm:$0xff] }
 0x1b5   :  { %3570 = vmatpush1.bf16.msra.mxu1 %v6929_v33  ;;  %v635_v33 = vld [vmem:[#allocation5 + $0xec8] sm:$0xff]  ;;  %v177_v28 = vld [vmem:[#allocation5 + $0x78] sm:$0xff] }
 0x1b6   :  { %3652 = vmatpush1.bf16.msra.mxu0 %v6675_v34  ;;  %3571 = vmatprep.subr.bf16.mxu1 %v6938_v36  ;;  %v639_v34 = vld [vmem:[#allocation5 + $0xee8] sm:$0xff]  ;;  %v380_v36 = vld [vmem:[#allocation5 + $0x6d0] sm:$0xff] }
 0x1b7   :  { %3653 = vmatprep.subr.bf16.mxu0 %v6684_v37  ;;  %v384_v37 = vld [vmem:[#allocation5 + $0x6f0] sm:$0xff]  ;;  %v6994_v40 = vcombine.high %v635_v33, %v639_v34  ;;  %v6993_v47 = vcombine.low %v635_v33, %v639_v34  ;;  %v6534_v33 = vcombine.high %v173_v26, %v177_v28 }
 0x1b8   :  { %v6740_v41 = vcombine.high %v380_v36, %v384_v37  ;;  %v6739_v48 = vcombine.low %v380_v36, %v384_v37  ;;  %v181_v36 = vld [vmem:[#allocation5 + $0x98] sm:$0xff] }
 0x1b9   :  { %3572 = vmatpush1.bf16.msra.mxu1 %v6937_v42  ;;  %v643_v42 = vld [vmem:[#allocation5 + $0xf08] sm:$0xff]  ;;  %v185_v37 = vld [vmem:[#allocation5 + $0xb8] sm:$0xff] }
 0x1ba   :  { %3654 = vmatpush1.bf16.msra.mxu0 %v6683_v44  ;;  %3573 = vmatprep.subr.bf16.mxu1 %v6946_v45  ;;  %v647_v44 = vld [vmem:[#allocation5 + $0xf28] sm:$0xff]  ;;  %v388_v45 = vld [vmem:[#allocation5 + $0x710] sm:$0xff] }
 0x1bb   :  { %v8435_v55 = vpop.f32.mrb[0].mxu1  ;;  %3655 = vmatprep.subr.bf16.mxu0 %v6692_v46  ;;  %v392_v46 = vld [vmem:[#allocation5 + $0x730] sm:$0xff]  ;;  %v7002_v49 = vcombine.high %v643_v42, %v647_v44  ;;  %v7001_v58 = vcombine.low %v643_v42, %v647_v44  ;;  %v6542_v42 = vcombine.high %v181_v36, %v185_v37 }
 0x1bc   :  { %v8437_v60 = vpop.f32.mrb[1].mxu1  ;;  %v6748_v50 = vcombine.high %v388_v45, %v392_v46  ;;  %v6747_v59 = vcombine.low %v388_v45, %v392_v46  ;;  %v189_v45 = vld [vmem:[#allocation5 + $0xd8] sm:$0xff] }
 0x1bd   :  { %v3314_v0 = vpop.f32.mrb[2].mxu1  ;;  %3574 = vmatpush1.bf16.msra.mxu1 %v6945_v52  ;;  %v651_v52 = vld [vmem:[#allocation5 + $0xf48] sm:$0xff]  ;;  %v193_v46 = vld [vmem:[#allocation5 + $0xf8] sm:$0xff] }
 0x1be   :  { %3656 = vmatpush1.bf16.msra.mxu0 %v6691_v53  ;;  %v3315_v2 = vpop.f32.mrb[3].mxu1  ;;  %3575 = vmatprep.subr.bf16.mxu1 %v6954_v54  ;;  %v655_v53 = vld [vmem:[#allocation5 + $0xf68] sm:$0xff]  ;;  %v396_v54 = vld [vmem:[#allocation5 + $0x750] sm:$0xff] }
 0x1bf   :  { %3657 = vmatprep.subr.bf16.mxu0 %v6700_v56  ;;  %v400_v56 = vld [vmem:[#allocation5 + $0x770] sm:$0xff]  ;;  %v7010_v62 = vcombine.high %v651_v52, %v655_v53  ;;  %v659_v0 = vld [vmem:[#allocation5 + $0xf88] sm:$0xff] }
 0x1c0   :  { %v6756_v63 = vcombine.high %v396_v54, %v400_v56  ;;  %v404_v2 = vld [vmem:[#allocation5 + $0x790] sm:$0xff] }
 0x1c1   :  { %3576 = vmatpush1.bf16.msra.mxu1 %v6953_v1  ;;  %v663_v1 = vld [vmem:[#allocation5 + $0xfa8] sm:$0xff] }
 0x1c2   :  { %3658 = vmatpush1.bf16.msra.mxu0 %v6699_v3  ;;  %3577 = vmatprep.subr.bf16.mxu1 %v6962_v4  ;;  %v408_v3 = vld [vmem:[#allocation5 + $0x7b0] sm:$0xff]  ;;  %v7009_v4 = vcombine.low %v651_v52, %v655_v53  ;;  %v7018_v6 = vcombine.high %v659_v0, %v663_v1  ;;  %v6550_v52 = vcombine.high %v189_v45, %v193_v46 }
 0x1c3   :  { %3659 = vmatprep.subr.bf16.mxu0 %v6708_v5  ;;  %v6755_v5 = vcombine.low %v396_v54, %v400_v56  ;;  %v6764_v7 = vcombine.high %v404_v2, %v408_v3  ;;  %v197_v54 = vld [vmem:[#allocation5 + $0x118] sm:$0xff] }
 0x1c4   :  { %v201_v56 = vld [vmem:[#allocation5 + $0x138] sm:$0xff] }
 0x1c5   :  { %3578 = vmatpush1.bf16.msra.mxu1 %v6961_v10  ;;  %v412_v10 = vld [vmem:[#allocation5 + $0x7d0] sm:$0xff] }
 0x1c6   :  { %3660 = vmatpush1.bf16.msra.mxu0 %v6707_v11  ;;  %3579 = vmatprep.subr.bf16.mxu1 %v6970_v12  ;;  %v416_v11 = vld [vmem:[#allocation5 + $0x7f0] sm:$0xff]  ;;  %v7017_v12 = vcombine.low %v659_v0, %v663_v1  ;;  %v6558_v0 = vcombine.high %v197_v54, %v201_v56  ;;  %v205_v1 = vld [vmem:[#allocation5 + $0x158] sm:$0xff] }
 0x1c7   :  { %3661 = vmatprep.subr.bf16.mxu0 %v6716_v13  ;;  %v6763_v13 = vcombine.low %v404_v2, %v408_v3  ;;  %v6772_v15 = vcombine.high %v412_v10, %v416_v11  ;;  %v209_v2 = vld [vmem:[#allocation5 + $0x178] sm:$0xff]  ;;  %v460_v3 = vld [vmem:[#allocation5 + $0x950] sm:$0xff] }
 0x1c9   :  { %3580 = vmatpush1.bf16.msra.mxu1 %v6969_v19  ;;  %v420_v19 = vld [vmem:[#allocation5 + $0x810] sm:$0xff] }
 0x1ca   :  { %3662 = vmatpush1.bf16.msra.mxu0 %v6715_v20  ;;  %3581 = vmatprep.subr.bf16.mxu1 %v6978_v22  ;;  %v424_v20 = vld [vmem:[#allocation5 + $0x830] sm:$0xff]  ;;  %v7025_v22 = vcombine.low %v667_v8, %v671_v9  ;;  %v213_v9 = vld [vmem:[#allocation5 + $0x198] sm:$0xff] }
 0x1cb   :  { %3663 = vmatprep.subr.bf16.mxu0 %v6724_v23  ;;  %v6771_v23 = vcombine.low %v412_v10, %v416_v11  ;;  %v6780_v25 = vcombine.high %v420_v19, %v424_v20  ;;  %v217_v10 = vld [vmem:[#allocation5 + $0x1b8] sm:$0xff]  ;;  %v468_v11 = vld [vmem:[#allocation5 + $0x990] sm:$0xff] }
 0x1cd   :  { %3582 = vmatpush1.bf16.msra.mxu1 %v6977_v29  ;;  %v428_v29 = vld [vmem:[#allocation5 + $0x850] sm:$0xff] }
 0x1ce   :  { %3664 = vmatpush1.bf16.msra.mxu0 %v6723_v30  ;;  %3583 = vmatprep.subr.bf16.mxu1 %v6986_v31  ;;  %v432_v30 = vld [vmem:[#allocation5 + $0x870] sm:$0xff]  ;;  %v6525_v31 = vcombine.low %v165_v17, %v169_v18  ;;  %v221_v18 = vld [vmem:[#allocation5 + $0x1d8] sm:$0xff] }
 0x1cf   :  { %3665 = vmatprep.subr.bf16.mxu0 %v6732_v32  ;;  %v6779_v32 = vcombine.low %v420_v19, %v424_v20  ;;  %v6788_v34 = vcombine.high %v428_v29, %v432_v30  ;;  %v225_v19 = vld [vmem:[#allocation5 + $0x1f8] sm:$0xff]  ;;  %v476_v20 = vld [vmem:[#allocation5 + $0x9d0] sm:$0xff] }
 0x1d1   :  { %3584 = vmatpush1.bf16.msra.mxu1 %v6985_v38  ;;  %v436_v38 = vld [vmem:[#allocation5 + $0x890] sm:$0xff] }
 0x1d2   :  { %3666 = vmatpush1.bf16.msra.mxu0 %v6731_v39  ;;  %3585 = vmatprep.subr.bf16.mxu1 %v6994_v40  ;;  %v440_v39 = vld [vmem:[#allocation5 + $0x8b0] sm:$0xff]  ;;  %v6533_v40 = vcombine.low %v173_v26, %v177_v28  ;;  %v229_v28 = vld [vmem:[#allocation5 + $0x218] sm:$0xff] }
 0x1d3   :  { %3667 = vmatprep.subr.bf16.mxu0 %v6740_v41  ;;  %v6787_v41 = vcombine.low %v428_v29, %v432_v30  ;;  %v6796_v44 = vcombine.high %v436_v38, %v440_v39  ;;  %v233_v29 = vld [vmem:[#allocation5 + $0x238] sm:$0xff]  ;;  %v484_v30 = vld [vmem:[#allocation5 + $0xa10] sm:$0xff] }
 0x1d5   :  { %3586 = vmatpush1.bf16.msra.mxu1 %v6993_v47  ;;  %v444_v47 = vld [vmem:[#allocation5 + $0x8d0] sm:$0xff] }
 0x1d6   :  { %3668 = vmatpush1.bf16.msra.mxu0 %v6739_v48  ;;  %3587 = vmatprep.subr.bf16.mxu1 %v7002_v49  ;;  %v448_v48 = vld [vmem:[#allocation5 + $0x8f0] sm:$0xff]  ;;  %v6541_v49 = vcombine.low %v181_v36, %v185_v37  ;;  %v237_v37 = vld [vmem:[#allocation5 + $0x258] sm:$0xff] }
 0x1d7   :  { %3669 = vmatprep.subr.bf16.mxu0 %v6748_v50  ;;  %v6795_v50 = vcombine.low %v436_v38, %v440_v39  ;;  %v6804_v53 = vcombine.high %v444_v47, %v448_v48  ;;  %v241_v38 = vld [vmem:[#allocation5 + $0x278] sm:$0xff]  ;;  %v492_v39 = vld [vmem:[#allocation5 + $0xa50] sm:$0xff] }
 0x1d9   :  { %3588 = vmatpush1.bf16.msra.mxu1 %v7001_v58  ;;  %v452_v58 = vld [vmem:[#allocation5 + $0x910] sm:$0xff] }
 0x1da   :  { %3670 = vmatpush1.bf16.msra.mxu0 %v6747_v59  ;;  %3589 = vmatprep.subr.bf16.mxu1 %v7010_v62  ;;  %v456_v59 = vld [vmem:[#allocation5 + $0x930] sm:$0xff]  ;;  %v6549_v62 = vcombine.low %v189_v45, %v193_v46  ;;  %v245_v46 = vld [vmem:[#allocation5 + $0x298] sm:$0xff] }
 0x1db   :  { %3671 = vmatprep.subr.bf16.mxu0 %v6756_v63  ;;  %v6803_v63 = vcombine.low %v444_v47, %v448_v48  ;;  %v249_v47 = vld [vmem:[#allocation5 + $0x2b8] sm:$0xff]  ;;  %v500_v48 = vld [vmem:[#allocation5 + $0xa90] sm:$0xff] }
 0x1dd   :  { %3590 = vmatpush1.bf16.msra.mxu1 %v7009_v4  ;;  %v464_v4 = vld [vmem:[#allocation5 + $0x970] sm:$0xff] }
 0x1de   :  { %3672 = vmatpush1.bf16.msra.mxu0 %v6755_v5  ;;  %3591 = vmatprep.subr.bf16.mxu1 %v7018_v6  ;;  %v6557_v5 = vcombine.low %v197_v54, %v201_v56  ;;  %v6811_v6 = vcombine.low %v452_v58, %v456_v59  ;;  %v6820_v8 = vcombine.high %v460_v3, %v464_v4  ;;  %v253_v56 = vld [vmem:[#allocation5 + $0x2d8] sm:$0xff] }
 0x1df   :  { %3673 = vmatprep.subr.bf16.mxu0 %v6764_v7  ;;  %v6566_v7 = vcombine.high %v205_v1, %v209_v2 }
 0x1e1   :  { %3592 = vmatpush1.bf16.msra.mxu1 %v7017_v12  ;;  %v472_v12 = vld [vmem:[#allocation5 + $0x9b0] sm:$0xff] }
 0x1e2   :  { %3674 = vmatpush1.bf16.msra.mxu0 %v6763_v13  ;;  %3593 = vmatprep.subr.bf16.mxu1 %v7026_v14  ;;  %v6565_v13 = vcombine.low %v205_v1, %v209_v2  ;;  %v6819_v14 = vcombine.low %v460_v3, %v464_v4  ;;  %v6828_v17 = vcombine.high %v468_v11, %v472_v12  ;;  %v261_v2 = vld [vmem:[#allocation5 + $0x318] sm:$0xff]  ;;  %v516_v4 = vld [vmem:[#allocation5 + $0xb10] sm:$0xff] }
 0x1e3   :  { %3675 = vmatprep.subr.bf16.mxu0 %v6772_v15  ;;  %v6574_v15 = vcombine.high %v213_v9, %v217_v10  ;;  %v265_v3 = vld [vmem:[#allocation5 + $0x338] sm:$0xff] }
 0x1e5   :  { %3594 = vmatpush1.bf16.msra.mxu1 %v7025_v22  ;;  %v480_v22 = vld [vmem:[#allocation5 + $0x9f0] sm:$0xff] }
 0x1e6   :  { %3676 = vmatpush1.bf16.msra.mxu0 %v6771_v23  ;;  %3768 = vmatprep.subr.bf16.mxu1 %v6526_v24  ;;  %v6573_v23 = vcombine.low %v213_v9, %v217_v10  ;;  %v6827_v24 = vcombine.low %v468_v11, %v472_v12  ;;  %v6836_v26 = vcombine.high %v476_v20, %v480_v22  ;;  %v269_v10 = vld [vmem:[#allocation5 + $0x358] sm:$0xff]  ;;  %v524_v12 = vld [vmem:[#allocation5 + $0xb50] sm:$0xff] }
 0x1e7   :  { %3686 = vmatprep.subr.bf16.mxu0 %v6780_v25  ;;  %v6582_v25 = vcombine.high %v221_v18, %v225_v19  ;;  %v273_v11 = vld [vmem:[#allocation5 + $0x378] sm:$0xff] }
 0x1e8   :  { %3596 = vmatmul.mubr.bf16.vlgmr.msra.gmra.mrb[4].mxu1 %v8425_v51 }
 0x1e9   :  { %3678 = vmatmul.mubr.bf16.vlgmr.msra.gmra.mrb[4].mxu0 %v8409_v21  ;;  %3769 = vmatpush1.bf16.msra.mxu1 %v6525_v31  ;;  %v488_v31 = vld [vmem:[#allocation5 + $0xa30] sm:$0xff] }
 0x1ea   :  { %3687 = vmatpush1.bf16.msra.mxu0 %v6779_v32  ;;  %3770 = vmatprep.subr.bf16.mxu1 %v6534_v33  ;;  %v6581_v32 = vcombine.low %v221_v18, %v225_v19  ;;  %v6835_v33 = vcombine.low %v476_v20, %v480_v22  ;;  %v6844_v36 = vcombine.high %v484_v30, %v488_v31  ;;  %v277_v19 = vld [vmem:[#allocation5 + $0x398] sm:$0xff]  ;;  %v532_v22 = vld [vmem:[#allocation5 + $0xb90] sm:$0xff] }
 0x1eb   :  { %3688 = vmatprep.subr.bf16.mxu0 %v6788_v34  ;;  %3718 = vmatprep.mubr.bf16.mxu0 %v8411_v27  ;;  %v6590_v34 = vcombine.high %v229_v28, %v233_v29  ;;  %v281_v20 = vld [vmem:[#allocation5 + $0x3b8] sm:$0xff] }
 0x1ec   :  { %3800 = vmatprep.mubr.bf16.mxu1 %v8401_v57  ;;  %v6812_v57 = vcombine.high %v452_v58, %v456_v59  ;;  %v257_v58 = vld [vmem:[#allocation5 + $0x2f8] sm:$0xff]  ;;  %v508_v59 = vld [vmem:[#allocation5 + $0xad0] sm:$0xff] }
 0x1ed   :  { %3771 = vmatpush1.bf16.msra.mxu1 %v6533_v40  ;;  %v496_v40 = vld [vmem:[#allocation5 + $0xa70] sm:$0xff] }
 0x1ee   :  { %3689 = vmatpush1.bf16.msra.mxu0 %v6787_v41  ;;  %3772 = vmatprep.subr.bf16.mxu1 %v6542_v42  ;;  %v6589_v41 = vcombine.low %v229_v28, %v233_v29  ;;  %v6843_v42 = vcombine.low %v484_v30, %v488_v31  ;;  %v6852_v45 = vcombine.high %v492_v39, %v496_v40  ;;  %v285_v29 = vld [vmem:[#allocation5 + $0x3d8] sm:$0xff]  ;;  %v540_v31 = vld [vmem:[#allocation5 + $0xbd0] sm:$0xff] }
 0x1ef   :  { %3690 = vmatprep.subr.bf16.mxu0 %v6796_v44  ;;  %v6598_v44 = vcombine.high %v237_v37, %v241_v38  ;;  %v289_v30 = vld [vmem:[#allocation5 + $0x3f8] sm:$0xff] }
 0x1f1   :  { %3773 = vmatpush1.bf16.msra.mxu1 %v6541_v49  ;;  %v504_v49 = vld [vmem:[#allocation5 + $0xab0] sm:$0xff] }
 0x1f2   :  { %3691 = vmatpush1.bf16.msra.mxu0 %v6795_v50  ;;  %3774 = vmatprep.subr.bf16.mxu1 %v6550_v52  ;;  %v6597_v50 = vcombine.low %v237_v37, %v241_v38  ;;  %v6851_v52 = vcombine.low %v492_v39, %v496_v40  ;;  %v6860_v54 = vcombine.high %v500_v48, %v504_v49  ;;  %v293_v38 = vld [vmem:[#allocation5 + $0x418] sm:$0xff]  ;;  %v548_v40 = vld [vmem:[#allocation5 + $0xc10] sm:$0xff] }
 0x1f3   :  { %3692 = vmatprep.subr.bf16.mxu0 %v6804_v53  ;;  %v6606_v53 = vcombine.high %v245_v46, %v249_v47  ;;  %v297_v39 = vld [vmem:[#allocation5 + $0x438] sm:$0xff] }
 0x1f5   :  { %3775 = vmatpush1.bf16.msra.mxu1 %v6549_v62  ;;  %v512_v62 = vld [vmem:[#allocation5 + $0xaf0] sm:$0xff] }
 0x1f6   :  { %3693 = vmatpush1.bf16.msra.mxu0 %v6803_v63  ;;  %3776 = vmatprep.subr.bf16.mxu1 %v6558_v0  ;;  %v6605_v63 = vcombine.low %v245_v46, %v249_v47  ;;  %v6859_v0 = vcombine.low %v500_v48, %v504_v49  ;;  %v6868_v1 = vcombine.high %v508_v59, %v512_v62  ;;  %v301_v47 = vld [vmem:[#allocation5 + $0x458] sm:$0xff]  ;;  %v556_v49 = vld [vmem:[#allocation5 + $0xc50] sm:$0xff] }
 0x1f7   :  { %3694 = vmatprep.subr.bf16.mxu0 %v6812_v57  ;;  %v6614_v57 = vcombine.high %v253_v56, %v257_v58  ;;  %v305_v48 = vld [vmem:[#allocation5 + $0x478] sm:$0xff] }
 0x1f9   :  { %3777 = vmatpush1.bf16.msra.mxu1 %v6557_v5  ;;  %v520_v5 = vld [vmem:[#allocation5 + $0xb30] sm:$0xff] }
 0x1fa   :  { %3695 = vmatpush1.bf16.msra.mxu0 %v6811_v6  ;;  %3778 = vmatprep.subr.bf16.mxu1 %v6566_v7  ;;  %v6613_v6 = vcombine.low %v253_v56, %v257_v58  ;;  %v6867_v7 = vcombine.low %v508_v59, %v512_v62  ;;  %v6876_v9 = vcombine.high %v516_v4, %v520_v5  ;;  %v309_v58 = vld [vmem:[#allocation5 + $0x498] sm:$0xff]  ;;  %v564_v62 = vld [vmem:[#allocation5 + $0xc90] sm:$0xff] }
 0x1fb   :  { %3696 = vmatprep.subr.bf16.mxu0 %v6820_v8  ;;  %v6622_v8 = vcombine.high %v261_v2, %v265_v3  ;;  %v313_v59 = vld [vmem:[#allocation5 + $0x4b8] sm:$0xff] }
 0x1fd   :  { %3779 = vmatpush1.bf16.msra.mxu1 %v6565_v13  ;;  %v528_v13 = vld [vmem:[#allocation5 + $0xb70] sm:$0xff] }
 0x1fe   :  { %3697 = vmatpush1.bf16.msra.mxu0 %v6819_v14  ;;  %3780 = vmatprep.subr.bf16.mxu1 %v6574_v15  ;;  %v6621_v14 = vcombine.low %v261_v2, %v265_v3  ;;  %v6875_v15 = vcombine.low %v516_v4, %v520_v5  ;;  %v6884_v18 = vcombine.high %v524_v12, %v528_v13  ;;  %v676_v2 = vlaneseq  ;;  %v317_v4 = vld [vmem:[#allocation5 + $0x4d8] sm:$0xff] }
 0x1ff   :  { %3698 = vmatprep.subr.bf16.mxu0 %v6828_v17  ;;  %v6630_v17 = vcombine.high %v269_v10, %v273_v11  ;;  %v321_v5 = vld [vmem:[#allocation5 + $0x4f8] sm:$0xff] }
 0x201   :  { %3781 = vmatpush1.bf16.msra.mxu1 %v6573_v23  ;;  %v536_v23 = vld [vmem:[#allocation5 + $0xbb0] sm:$0xff] }
 0x202   :  { %3699 = vmatpush1.bf16.msra.mxu0 %v6827_v24  ;;  %3782 = vmatprep.subr.bf16.mxu1 %v6582_v25  ;;  %v6629_v24 = vcombine.low %v269_v10, %v273_v11  ;;  %v6883_v25 = vcombine.low %v524_v12, %v528_v13  ;;  %v6892_v28 = vcombine.high %v532_v22, %v536_v23  ;;  %v8447_v10 = vshrl.u32 %v676_v2, 7  ;;  %v325_v12 = vld [vmem:[#allocation5 + $0x518] sm:$0xff]  ;;  %v616_v2 = vld [vmem:[#allocation5 + $0xe30] sm:$0xff] }
 0x203   :  { %3700 = vmatprep.subr.bf16.mxu0 %v6836_v26  ;;  %v6638_v26 = vcombine.high %v277_v19, %v281_v20  ;;  %v329_v13 = vld [vmem:[#allocation5 + $0x538] sm:$0xff] }
 0x205   :  { %3783 = vmatpush1.bf16.msra.mxu1 %v6581_v32  ;;  %v544_v32 = vld [vmem:[#allocation5 + $0xbf0] sm:$0xff] }
 0x206   :  { %3701 = vmatpush1.bf16.msra.mxu0 %v6835_v33  ;;  %3784 = vmatprep.subr.bf16.mxu1 %v6590_v34  ;;  %v6637_v33 = vcombine.low %v277_v19, %v281_v20  ;;  %v6891_v34 = vcombine.low %v532_v22, %v536_v23  ;;  %v6900_v37 = vcombine.high %v540_v31, %v544_v32  ;;  %v8450_v19 = vsub.s32 0, %v8447_v10  ;;  %v333_v22 = vld [vmem:[#allocation5 + $0x558] sm:$0xff] }
 0x207   :  { %3702 = vmatprep.subr.bf16.mxu0 %v6844_v36  ;;  %v6646_v36 = vcombine.high %v285_v29, %v289_v30  ;;  %v337_v23 = vld [vmem:[#allocation5 + $0x578] sm:$0xff] }
 0x209   :  { %3785 = vmatpush1.bf16.msra.mxu1 %v6589_v41  ;;  %v552_v41 = vld [vmem:[#allocation5 + $0xc30] sm:$0xff] }
 0x20a   :  { %3703 = vmatpush1.bf16.msra.mxu0 %v6843_v42  ;;  %3786 = vmatprep.subr.bf16.mxu1 %v6598_v44  ;;  %v6645_v42 = vcombine.low %v285_v29, %v289_v30  ;;  %v6899_v44 = vcombine.low %v540_v31, %v544_v32  ;;  %v6908_v46 = vcombine.high %v548_v40, %v552_v41 }
 0x20b   :  { %3704 = vmatprep.subr.bf16.mxu0 %v6852_v45  ;;  %v6654_v45 = vcombine.high %v293_v38, %v297_v39  ;;  %v6685_v29 = vcombine.low %v325_v12, %v329_v13  ;;  %v6694_v31 = vcombine.high %v333_v22, %v337_v23 }
 0x20d   :  { %3787 = vmatpush1.bf16.msra.mxu1 %v6597_v50  ;;  %v560_v50 = vld [vmem:[#allocation5 + $0xc70] sm:$0xff] }
 0x20e   :  { %3705 = vmatpush1.bf16.msra.mxu0 %v6851_v52  ;;  %3788 = vmatprep.subr.bf16.mxu1 %v6606_v53  ;;  %v6653_v52 = vcombine.low %v293_v38, %v297_v39  ;;  %v6907_v53 = vcombine.low %v548_v40, %v552_v41  ;;  %v6916_v56 = vcombine.high %v556_v49, %v560_v50  ;;  %v596_v38 = vld [vmem:[#allocation5 + $0xd90] sm:$0xff] }
 0x20f   :  { %3706 = vmatprep.subr.bf16.mxu0 %v6860_v54  ;;  %v6662_v54 = vcombine.high %v301_v47, %v305_v48  ;;  %v600_v39 = vld [vmem:[#allocation5 + $0xdb0] sm:$0xff]  ;;  %v6693_v40 = vcombine.low %v333_v22, %v337_v23 }
 0x211   :  { %3789 = vmatpush1.bf16.msra.mxu1 %v6605_v63  ;;  %v568_v63 = vld [vmem:[#allocation5 + $0xcb0] sm:$0xff] }
 0x212   :  { %3707 = vmatpush1.bf16.msra.mxu0 %v6859_v0  ;;  %3790 = vmatprep.subr.bf16.mxu1 %v6614_v57  ;;  %v6661_v0 = vcombine.low %v301_v47, %v305_v48  ;;  %v6915_v57 = vcombine.low %v556_v49, %v560_v50  ;;  %v6924_v3 = vcombine.high %v564_v62, %v568_v63  ;;  %v353_v47 = vld [vmem:[#allocation5 + $0x5f8] sm:$0xff]  ;;  %v604_v50 = vld [vmem:[#allocation5 + $0xdd0] sm:$0xff] }
 0x213   :  { %3708 = vmatprep.subr.bf16.mxu0 %v6868_v1  ;;  %v6670_v1 = vcombine.high %v309_v58, %v313_v59 }
 0x215   :  { %3791 = vmatpush1.bf16.msra.mxu1 %v6613_v6  ;;  %v572_v6 = vld [vmem:[#allocation5 + $0xcd0] sm:$0xff] }
 0x216   :  { %3709 = vmatpush1.bf16.msra.mxu0 %v6867_v7  ;;  %3792 = vmatprep.subr.bf16.mxu1 %v6622_v8  ;;  %v576_v7 = vld [vmem:[#allocation5 + $0xcf0] sm:$0xff]  ;;  %v6923_v8 = vcombine.low %v564_v62, %v568_v63  ;;  %v6955_v62 = vcombine.low %v596_v38, %v600_v39 }
 0x217   :  { %3710 = vmatprep.subr.bf16.mxu0 %v6876_v9  ;;  %v6678_v9 = vcombine.high %v317_v4, %v321_v5  ;;  %v6932_v11 = vcombine.high %v572_v6, %v576_v7 }
 0x219   :  { %3793 = vmatpush1.bf16.msra.mxu1 %v6621_v14  ;;  %v580_v14 = vld [vmem:[#allocation5 + $0xd10] sm:$0xff] }
 0x21a   :  { %3711 = vmatpush1.bf16.msra.mxu0 %v6875_v15  ;;  %3794 = vmatprep.subr.bf16.mxu1 %v6630_v17  ;;  %v584_v15 = vld [vmem:[#allocation5 + $0xd30] sm:$0xff]  ;;  %v6677_v17 = vcombine.low %v317_v4, %v321_v5 }
 0x21b   :  { %3712 = vmatprep.subr.bf16.mxu0 %v6884_v18  ;;  %v6931_v18 = vcombine.low %v572_v6, %v576_v7  ;;  %v6940_v20 = vcombine.high %v580_v14, %v584_v15  ;;  %v6939_v30 = vcombine.low %v580_v14, %v584_v15  ;;  %v365_v7 = vld [vmem:[#allocation5 + $0x658] sm:$0xff] }
 0x21c   :  { %v373_v15 = vld [vmem:[#allocation5 + $0x698] sm:$0xff] }
 0x21d   :  { %3795 = vmatpush1.bf16.msra.mxu1 %v6629_v24  ;;  %v8452_v24 = vld [vmem:[#allocation7] sm:$0xff] }
 0x21e   :  { %3713 = vmatpush1.bf16.msra.mxu0 %v6883_v25  ;;  %3796 = vmatprep.subr.bf16.mxu1 %v6638_v26  ;;  %v8455_v25 = vsub.s32 1, %v8447_v10  ;;  %v588_v26 = vld [vmem:[#allocation5 + $0xd50] sm:$0xff]  ;;  %v679_v32 = vrot.slane %v8452_v24, %v8450_v19 }
 0x21f   :  { %3714 = vmatprep.subr.bf16.mxu0 %v6892_v28  ;;  %v592_v28 = vld [vmem:[#allocation5 + $0xd70] sm:$0xff] }
 0x220   :  { %v6947_v41 = vcombine.low %v588_v26, %v592_v28 }
 0x221   :  { %3797 = vmatpush1.bf16.msra.mxu1 %v6637_v33  ;;  %v6948_v33 = vcombine.high %v588_v26, %v592_v28  ;;  %v381_v28 = vld [vmem:[#allocation5 + $0x6d8] sm:$0xff] }
 0x222   :  { %3715 = vmatpush1.bf16.msra.mxu0 %v6891_v34  ;;  %3798 = vmatprep.subr.bf16.mxu1 %v6646_v36  ;;  %v341_v34 = vld [vmem:[#allocation5 + $0x598] sm:$0xff] }
 0x223   :  { %3716 = vmatprep.subr.bf16.mxu0 %v6900_v37  ;;  %v345_v36 = vld [vmem:[#allocation5 + $0x5b8] sm:$0xff]  ;;  %v683_v37 = vrot.slane %v8452_v24, %v8455_v25 }
 0x225   :  { %3799 = vmatpush1.bf16.msra.mxu1 %v6645_v42  ;;  %v6702_v42 = vcombine.high %v341_v34, %v345_v36  ;;  %v3313_v48 = vadd.f32 %v8437_v60, %v683_v37  ;;  %v361_v60 = vld [vmem:[#allocation5 + $0x638] sm:$0xff] }
 0x226   :  { %3717 = vmatpush1.bf16.msra.mxu0 %v6899_v44  ;;  %3809 = vmatprep.subr.bf16.mxu1 %v6654_v45  ;;  %v3311_v44 = vadd.f32 %v8435_v55, %v679_v32  ;;  %v6956_v45 = vcombine.high %v596_v38, %v600_v39  ;;  %v389_v37 = vld [vmem:[#allocation5 + $0x718] sm:$0xff]  ;;  %v644_v39 = vld [vmem:[#allocation5 + $0xf10] sm:$0xff] }
 0x227   :  { %3727 = vmatprep.subr.bf16.mxu0 %v6908_v46  ;;  %v349_v46 = vld [vmem:[#allocation5 + $0x5d8] sm:$0xff] }
 0x228   :  { %3801 = vmatmul.mubr.bf16.vlgmr.msra.gmra.mrb[8].mxu1 %v8407_v16  ;;  %v6669_v16 = vcombine.low %v309_v58, %v313_v59  ;;  %v6710_v55 = vcombine.high %v349_v46, %v353_v47  ;;  %v393_v38 = vld [vmem:[#allocation5 + $0x738] sm:$0xff] }
 0x229   :  { %3719 = vmatmul.mubr.bf16.vlgmr.msra.gmra.mrb[4].mxu0 %v8417_v35  ;;  %3810 = vmatpush1.bf16.msra.mxu1 %v6653_v52  ;;  %v608_v52 = vld [vmem:[#allocation5 + $0xdf0] sm:$0xff] }
 0x22a   :  { %3728 = vmatpush1.bf16.msra.mxu0 %v6907_v53  ;;  %3811 = vmatprep.subr.bf16.mxu1 %v6662_v54  ;;  %v6963_v4 = vcombine.low %v604_v50, %v608_v52 }
 0x22b   :  { %3729 = vmatprep.subr.bf16.mxu0 %v6916_v56  ;;  %3759 = vmatprep.mubr.bf16.mxu0 %v8419_v43  ;;  %v6701_v56 = vcombine.low %v341_v34, %v345_v36 }
 0x22c   :  { %3841 = vmatprep.mubr.bf16.mxu1 %v8403_v61  ;;  %v6686_v61 = vcombine.high %v325_v12, %v329_v13 }
 0x22d   :  { %3812 = vmatpush1.bf16.msra.mxu1 %v6661_v0  ;;  %v6964_v0 = vcombine.high %v604_v50, %v608_v52  ;;  %v6749_v50 = vcombine.low %v389_v37, %v393_v38 }
 0x22e   :  { %3730 = vmatpush1.bf16.msra.mxu0 %v6915_v57  ;;  %3813 = vmatprep.subr.bf16.mxu1 %v6670_v1  ;;  %v357_v57 = vld [vmem:[#allocation5 + $0x618] sm:$0xff]  ;;  %v612_v1 = vld [vmem:[#allocation5 + $0xe10] sm:$0xff] }
 0x22f   :  { %3731 = vmatprep.subr.bf16.mxu0 %v6924_v3  ;;  %v6709_v3 = vcombine.low %v349_v46, %v353_v47  ;;  %v6718_v5 = vcombine.high %v357_v57, %v361_v60  ;;  %v6972_v6 = vcombine.high %v612_v1, %v616_v2  ;;  %v6971_v12 = vcombine.low %v612_v1, %v616_v2  ;;  %v397_v46 = vld [vmem:[#allocation5 + $0x758] sm:$0xff] }
 0x230   :  { %v401_v47 = vld [vmem:[#allocation5 + $0x778] sm:$0xff] }
 0x231   :  { %3814 = vmatpush1.bf16.msra.mxu1 %v6669_v16  ;;  %v369_v16 = vld [vmem:[#allocation5 + $0x678] sm:$0xff] }
 0x232   :  { %3732 = vmatpush1.bf16.msra.mxu0 %v6923_v8  ;;  %3815 = vmatprep.subr.bf16.mxu1 %v6678_v9  ;;  %v620_v8 = vld [vmem:[#allocation5 + $0xe50] sm:$0xff]  ;;  %v6726_v13 = vcombine.high %v365_v7, %v369_v16  ;;  %v413_v2 = vld [vmem:[#allocation5 + $0x7d8] sm:$0xff] }
 0x233   :  { %3733 = vmatprep.subr.bf16.mxu0 %v6932_v11  ;;  %v624_v9 = vld [vmem:[#allocation5 + $0xe70] sm:$0xff]  ;;  %v6717_v11 = vcombine.low %v357_v57, %v361_v60 }
 0x234   :  { %v6980_v14 = vcombine.high %v620_v8, %v624_v9  ;;  %v6979_v22 = vcombine.low %v620_v8, %v624_v9  ;;  %v421_v9 = vld [vmem:[#allocation5 + $0x818] sm:$0xff] }
 0x235   :  { %3816 = vmatpush1.bf16.msra.mxu1 %v6677_v17  ;;  %v377_v17 = vld [vmem:[#allocation5 + $0x6b8] sm:$0xff] }
 0x236   :  { %3734 = vmatpush1.bf16.msra.mxu0 %v6931_v18  ;;  %3817 = vmatprep.subr.bf16.mxu1 %v6686_v61  ;;  %v628_v18 = vld [vmem:[#allocation5 + $0xe90] sm:$0xff]  ;;  %v6734_v23 = vcombine.high %v373_v15, %v377_v17  ;;  %v6733_v32 = vcombine.low %v373_v15, %v377_v17  ;;  %v7498_v15 = vld [vmem:[#allocation8 + $0x4] ss:$16 sps:$4 sm:$0xff]  }
 0x237   :  { %3735 = vmatprep.subr.bf16.mxu0 %v6940_v20  ;;  %v632_v61 = vld [vmem:[#allocation5 + $0xeb0] sm:$0xff]  ;;  %v6725_v20 = vcombine.low %v365_v7, %v369_v16 }
 0x238   :  { %v6988_v26 = vcombine.high %v628_v18, %v632_v61 }
 0x239   :  { %3818 = vmatpush1.bf16.msra.mxu1 %v6685_v29  ;;  %v385_v29 = vld [vmem:[#allocation5 + $0x6f8] sm:$0xff] }
 0x23a   :  { %3736 = vmatpush1.bf16.msra.mxu0 %v6939_v30  ;;  %3819 = vmatprep.subr.bf16.mxu1 %v6694_v31  ;;  %v636_v30 = vld [vmem:[#allocation5 + $0xed0] sm:$0xff]  ;;  %v6742_v34 = vcombine.high %v381_v28, %v385_v29 }
 0x23b   :  { %3737 = vmatprep.subr.bf16.mxu0 %v6948_v33  ;;  %v640_v31 = vld [vmem:[#allocation5 + $0xef0] sm:$0xff]  ;;  %v6987_v33 = vcombine.low %v628_v18, %v632_v61  ;;  %v429_v18 = vld [vmem:[#allocation5 + $0x858] sm:$0xff] }
 0x23c   :  { %v3433_v49 = vpop.f32.mrb[0].mxu0  ;;  %v6996_v36 = vcombine.high %v636_v30, %v640_v31  ;;  %v433_v61 = vld [vmem:[#allocation5 + $0x878] sm:$0xff] }
 0x23d   :  { %v8463_v53 = vadd.f32 %v3433_v49, %v3311_v44  ;;  %v3435_v54 = vpop.f32.mrb[1].mxu0  ;;  %3820 = vmatpush1.bf16.msra.mxu1 %v6693_v40  ;;  %v648_v40 = vld [vmem:[#allocation5 + $0xf30] sm:$0xff]  ;;  %v6750_v44 = vcombine.high %v389_v37, %v393_v38 }
 0x23e   :  { %v8465_v58 = vadd.f32 %v3435_v54, %v3313_v48  ;;  %v3437_v59 = vpop.f32.mrb[2].mxu0  ;;  %3738 = vmatpush1.bf16.msra.mxu0 %v6947_v41  ;;  %3821 = vmatprep.subr.bf16.mxu1 %v6702_v42  ;;  %v6741_v41 = vcombine.low %v381_v28, %v385_v29  ;;  %v6995_v42 = vcombine.low %v636_v30, %v640_v31  ;;  %v652_v48 = vld [vmem:[#allocation5 + $0xf50] sm:$0xff]  ;;  %v437_v28 = vld [vmem:[#allocation5 + $0x898] sm:$0xff] }
 0x23f   :  { %v3438_v63 = vpop.f32.mrb[3].mxu0  ;;  %3739 = vmatprep.subr.bf16.mxu0 %v6956_v45  ;;  %v7004_v45 = vcombine.high %v644_v39, %v648_v40  ;;  %v656_v49 = vld [vmem:[#allocation5 + $0xf70] sm:$0xff]  ;;  %v7003_v52 = vcombine.low %v644_v39, %v648_v40  ;;  %v6758_v54 = vcombine.high %v397_v46, %v401_v47  ;;  %v405_v59 = vld [vmem:[#allocation5 + $0x798] sm:$0xff] }
 0x240   :  { %v664_v63 = vld [vmem:[#allocation5 + $0xfb0] sm:$0xff]  ;;  %v7011_v57 = vcombine.low %v652_v48, %v656_v49  ;;  %v3933_v17 = vmax.f32 %v8465_v58, 0.0  ;;  %v441_v29 = vld [vmem:[#allocation5 + $0x8b8] sm:$0xff]  ;;  %v6789_v58 = vcombine.low %v429_v18, %v433_v61 }
 0x241   :  { %3822 = vmatpush1.bf16.msra.mxu1 %v6701_v56  ;;  %v7012_v56 = vcombine.high %v652_v48, %v656_v49  ;;  %v7499_v31 = vld [vmem:[#allocation8 + $0x20] ss:$16 sps:$4 sm:$0xff]   ;;  %v6797_v37 = vcombine.low %v437_v28, %v441_v29  ;;  %v7507_v39 = vld [vmem:[#allocation8 + $0x64] ss:$16 sps:$4 sm:$0xff]  }
 0x242   :  { %3740 = vmatpush1.bf16.msra.mxu0 %v6955_v62  ;;  %3823 = vmatprep.subr.bf16.mxu1 %v6710_v55  ;;  %v409_v62 = vld [vmem:[#allocation5 + $0x7b8] sm:$0xff]  ;;  %v660_v55 = vld [vmem:[#allocation5 + $0xf90] sm:$0xff]  ;;  %v8468_v30 = vpack.c.bf16 %v3933_v17, %v3933_v17 }
 0x243   :  { %3741 = vmatprep.subr.bf16.mxu0 %v6964_v0  ;;  %v6757_v0 = vcombine.low %v397_v46, %v401_v47  ;;  %v6766_v60 = vcombine.high %v405_v59, %v409_v62  ;;  %v7020_v1 = vcombine.high %v660_v55, %v664_v63  ;;  %v7019_v7 = vcombine.low %v660_v55, %v664_v63  ;;  %v453_v40 = vld [vmem:[#allocation5 + $0x918] sm:$0xff] }
 0x244   :  { %v7510_v46 = vld [vmem:[#allocation8 + $0x84] ss:$16 sps:$4 sm:$0xff]   ;;  %v7508_v49 = vld [vmem:[#allocation8 + $0x80] ss:$16 sps:$4 sm:$0xff]  }
 0x245   :  { %3824 = vmatpush1.bf16.msra.mxu1 %v6709_v3  ;;  %v417_v3 = vld [vmem:[#allocation5 + $0x7f8] sm:$0xff] }
 0x246   :  { %3742 = vmatpush1.bf16.msra.mxu0 %v6963_v4  ;;  %3825 = vmatprep.subr.bf16.mxu1 %v6718_v5  ;;  %v668_v4 = vld [vmem:[#allocation5 + $0xfd0] sm:$0xff]  ;;  %v6774_v16 = vcombine.high %v413_v2, %v417_v3  ;;  %v461_v47 = vld [vmem:[#allocation5 + $0x958] sm:$0xff] }
 0x247   :  { %3743 = vmatprep.subr.bf16.mxu0 %v6972_v6  ;;  %v672_v5 = vld [vmem:[#allocation5 + $0xff0] sm:$0xff]  ;;  %v6765_v6 = vcombine.low %v405_v59, %v409_v62  ;;  %v7511_v62 = vld [vmem:[#allocation8 + $0xa0] ss:$16 sps:$4 sm:$0xff]   ;;  %v7516_v63 = vld [vmem:[#allocation8 + $0xc4] ss:$16 sps:$4 sm:$0xff]  }
 0x248   :  { %v7028_v8 = vcombine.high %v668_v4, %v672_v5  ;;  %v501_v17 = vld [vmem:[#allocation5 + $0xa98] sm:$0xff] }
 0x249   :  { %3826 = vmatpush1.bf16.msra.mxu1 %v6717_v11  ;;  %v425_v11 = vld [vmem:[#allocation5 + $0x838] sm:$0xff] }
 0x24a   :  { %3744 = vmatpush1.bf16.msra.mxu0 %v6971_v12  ;;  %3827 = vmatprep.subr.bf16.mxu1 %v6726_v13  ;;  %v6773_v12 = vcombine.low %v413_v2, %v417_v3  ;;  %v7027_v13 = vcombine.low %v668_v4, %v672_v5  ;;  %v7519_v3 = vld [vmem:[#allocation8 + $0xe4] ss:$16 sps:$4 sm:$0xff]  }
 0x24b   :  { %3745 = vmatprep.subr.bf16.mxu0 %v6980_v14  ;;  %v6782_v14 = vcombine.high %v421_v9, %v425_v11  ;;  %v485_v4 = vld [vmem:[#allocation5 + $0xa18] sm:$0xff] }
 0x24c   :  { %v489_v5 = vld [vmem:[#allocation5 + $0xa38] sm:$0xff] }
 0x24d   :  { %3828 = vmatpush1.bf16.msra.mxu1 %v6725_v20  ;;  %v6781_v20 = vcombine.low %v421_v9, %v425_v11  ;;  %v493_v9 = vld [vmem:[#allocation5 + $0xa58] sm:$0xff] }
 0x24e   :  { %3746 = vmatpush1.bf16.msra.mxu0 %v6979_v22  ;;  %3829 = vmatprep.subr.bf16.mxu1 %v6734_v23  ;;  %v7496_v22 = vld [vmem:[#allocation8] ss:$16 sps:$4 sm:$0xff]   ;;  %v6790_v23 = vcombine.high %v429_v18, %v433_v61 }
 0x24f   :  { %3747 = vmatprep.subr.bf16.mxu0 %v6988_v26  ;;  %v7501_v26 = vld [vmem:[#allocation8 + $0x24] ss:$16 sps:$4 sm:$0xff]  }
 0x250   :  { %v497_v11 = vld [vmem:[#allocation5 + $0xa78] sm:$0xff] }
 0x251   :  { %3830 = vmatpush1.bf16.msra.mxu1 %v6733_v32  ;;  %v6798_v32 = vcombine.high %v437_v28, %v441_v29  ;;  %v505_v18 = vld [vmem:[#allocation5 + $0xab8] sm:$0xff]  ;;  %v6853_v61 = vcombine.low %v493_v9, %v497_v11 }
 0x252   :  { %3748 = vmatpush1.bf16.msra.mxu0 %v6987_v33  ;;  %3831 = vmatprep.subr.bf16.mxu1 %v6742_v34  ;;  %v7504_v33 = vld [vmem:[#allocation8 + $0x44] ss:$16 sps:$4 sm:$0xff]   ;;  %v6861_v29 = vcombine.low %v501_v17, %v505_v18 }
 0x253   :  { %3749 = vmatprep.subr.bf16.mxu0 %v6996_v36  ;;  %v445_v34 = vld [vmem:[#allocation5 + $0x8d8] sm:$0xff] }
 0x254   :  { %v449_v36 = vld [vmem:[#allocation5 + $0x8f8] sm:$0xff] }
 0x255   :  { %3832 = vmatpush1.bf16.msra.mxu1 %v6741_v41  ;;  %v6806_v38 = vcombine.high %v445_v34, %v449_v36  ;;  %v457_v41 = vld [vmem:[#allocation5 + $0x938] sm:$0xff] }
 0x256   :  { %3750 = vmatpush1.bf16.msra.mxu0 %v6995_v42  ;;  %3833 = vmatprep.subr.bf16.mxu1 %v6750_v44  ;;  %v6805_v42 = vcombine.low %v445_v34, %v449_v36  ;;  %v7505_v44 = vld [vmem:[#allocation8 + $0x60] ss:$16 sps:$4 sm:$0xff]   ;;  %v6813_v48 = vcombine.low %v453_v40, %v457_v41 }
 0x257   :  { %3751 = vmatprep.subr.bf16.mxu0 %v7004_v45  ;;  %v6814_v45 = vcombine.high %v453_v40, %v457_v41  ;;  %v513_v28 = vld [vmem:[#allocation5 + $0xaf8] sm:$0xff] }
 0x258   :  { %v521_v34 = vld [vmem:[#allocation5 + $0xb38] sm:$0xff] }
 0x259   :  { %3834 = vmatpush1.bf16.msra.mxu1 %v6749_v50  ;;  %v529_v40 = vld [vmem:[#allocation5 + $0xb78] sm:$0xff] }
 0x25a   :  { %3752 = vmatpush1.bf16.msra.mxu0 %v7003_v52  ;;  %3835 = vmatprep.subr.bf16.mxu1 %v6758_v54  ;;  %v7513_v52 = vld [vmem:[#allocation8 + $0xa4] ss:$16 sps:$4 sm:$0xff]  }
 0x25b   :  { %3753 = vmatprep.subr.bf16.mxu0 %v7012_v56  ;;  %v469_v54 = vld [vmem:[#allocation5 + $0x998] sm:$0xff] }
 0x25c   :  { %v473_v56 = vld [vmem:[#allocation5 + $0x9b8] sm:$0xff] }
 0x25d   :  { %3836 = vmatpush1.bf16.msra.mxu1 %v6757_v0  ;;  %v6830_v55 = vcombine.high %v469_v54, %v473_v56  ;;  %v477_v0 = vld [vmem:[#allocation5 + $0x9d8] sm:$0xff] }
 0x25e   :  { %3754 = vmatpush1.bf16.msra.mxu0 %v7011_v57  ;;  %3837 = vmatprep.subr.bf16.mxu1 %v6766_v60  ;;  %v481_v57 = vld [vmem:[#allocation5 + $0x9f8] sm:$0xff]  ;;  %v6829_v60 = vcombine.low %v469_v54, %v473_v56 }
 0x25f   :  { %3755 = vmatprep.subr.bf16.mxu0 %v7020_v1  ;;  %v7514_v1 = vld [vmem:[#allocation8 + $0xc0] ss:$16 sps:$4 sm:$0xff]   ;;  %v6838_v2 = vcombine.high %v477_v0, %v481_v57 }
 0x260   :  { %v545_v54 = vld [vmem:[#allocation5 + $0xbf8] sm:$0xff] }
 0x261   :  { %3838 = vmatpush1.bf16.msra.mxu1 %v6765_v6  ;;  %v6837_v6 = vcombine.low %v477_v0, %v481_v57  ;;  %v553_v0 = vld [vmem:[#allocation5 + $0xc38] sm:$0xff] }
 0x262   :  { %3756 = vmatpush1.bf16.msra.mxu0 %v7019_v7  ;;  %3839 = vmatprep.subr.bf16.mxu1 %v6774_v16  ;;  %v7517_v7 = vld [vmem:[#allocation8 + $0xe0] ss:$16 sps:$4 sm:$0xff]   ;;  %v6846_v16 = vcombine.high %v485_v4, %v489_v5 }
 0x263   :  { %3757 = vmatprep.subr.bf16.mxu0 %v7028_v8  ;;  %v7522_v8 = vld [vmem:[#allocation8 + $0x104] ss:$16 sps:$4 sm:$0xff]  }
 0x265   :  { %3840 = vmatpush1.bf16.msra.mxu1 %v6773_v12  ;;  %v6845_v12 = vcombine.low %v485_v4, %v489_v5  ;;  %v557_v4 = vld [vmem:[#allocation5 + $0xc58] sm:$0xff] }
 0x266   :  { %3758 = vmatpush1.bf16.msra.mxu0 %v7027_v13  ;;  %3850 = vmatprep.subr.bf16.mxu1 %v6782_v14  ;;  %v7520_v13 = vld [vmem:[#allocation8 + $0x100] ss:$16 sps:$4 sm:$0xff]   ;;  %v6854_v14 = vcombine.high %v493_v9, %v497_v11  ;;  %v7549_v9 = vld [vmem:[#allocation8 + $0x224] ss:$16 sps:$4 sm:$0xff]  }
 0x267   :  { %5506 = vmatprep.subr.bf16.mxu0 %v7498_v15  ;;  %v7525_v15 = vld [vmem:[#allocation8 + $0x124] ss:$16 sps:$4 sm:$0xff]  }
 0x268   :  { %3842 = vmatmul.mubr.bf16.vlgmr.msra.gmra.mrb[8].mxu1 %v8409_v21  ;;  %v7502_v21 = vld [vmem:[#allocation8 + $0x40] ss:$16 sps:$4 sm:$0xff]  }
 0x269   :  { %3760 = vmatmul.mubr.bf16.vlgmr.msra.gmra.mrb[4].mxu0 %v8425_v51  ;;  %3851 = vmatpush1.bf16.msra.mxu1 %v6781_v20  ;;  %v7523_v20 = vld [vmem:[#allocation8 + $0x120] ss:$16 sps:$4 sm:$0xff]  }
 0x26a   :  { %5507 = vmatpush1.bf16.msra.mxu0 %v7496_v22  ;;  %5538 = vmatprep.mubr.bf16.mxu0 %v8468_v30  ;;  %v6862_v22 = vcombine.high %v501_v17, %v505_v18  ;;  %v561_v5 = vld [vmem:[#allocation5 + $0xc78] sm:$0xff] }
 0x26b   :  { %3852 = vmatprep.subr.bf16.mxu1 %v6790_v23  ;;  %5508 = vmatprep.subr.bf16.mxu0 %v7501_v26  ;;  %v7528_v23 = vld [vmem:[#allocation8 + $0x144] ss:$16 sps:$4 sm:$0xff]  }
 0x26c   :  { %3882 = vmatprep.mubr.bf16.mxu1 %v8411_v27  ;;  %v465_v27 = vld [vmem:[#allocation5 + $0x978] sm:$0xff] }
 0x26d   :  { %3853 = vmatpush1.bf16.msra.mxu1 %v6789_v58  ;;  %v6822_v50 = vcombine.high %v461_v47, %v465_v27  ;;  %v6821_v59 = vcombine.low %v461_v47, %v465_v27  ;;  %v509_v26 = vld [vmem:[#allocation5 + $0xad8] sm:$0xff] }
 0x26e   :  { %5509 = vmatpush1.bf16.msra.mxu0 %v7499_v31  ;;  %3854 = vmatprep.subr.bf16.mxu1 %v6798_v32  ;;  %v7526_v58 = vld [vmem:[#allocation8 + $0x140] ss:$16 sps:$4 sm:$0xff]   ;;  %v6870_v31 = vcombine.high %v509_v26, %v513_v28  ;;  %v7531_v32 = vld [vmem:[#allocation8 + $0x164] ss:$16 sps:$4 sm:$0xff]   ;;  %v6869_v36 = vcombine.low %v509_v26, %v513_v28 }
 0x26f   :  { %5510 = vmatprep.subr.bf16.mxu0 %v7504_v33  ;;  %v517_v33 = vld [vmem:[#allocation5 + $0xb18] sm:$0xff] }
 0x270   :  { %v6877_v41 = vcombine.low %v517_v33, %v521_v34  ;;  %v537_v47 = vld [vmem:[#allocation5 + $0xbb8] sm:$0xff] }
 0x271   :  { %3855 = vmatpush1.bf16.msra.mxu1 %v6797_v37  ;;  %v7529_v37 = vld [vmem:[#allocation8 + $0x160] ss:$16 sps:$4 sm:$0xff]  }
 0x272   :  { %5511 = vmatpush1.bf16.msra.mxu0 %v7502_v21  ;;  %3856 = vmatprep.subr.bf16.mxu1 %v6806_v38  ;;  %v6878_v21 = vcombine.high %v517_v33, %v521_v34  ;;  %v7534_v38 = vld [vmem:[#allocation8 + $0x184] ss:$16 sps:$4 sm:$0xff]   ;;  %v690_v34 = vsub.s32 3, %v8447_v10 }
 0x273   :  { %5512 = vmatprep.subr.bf16.mxu0 %v7507_v39  ;;  %v525_v39 = vld [vmem:[#allocation5 + $0xb58] sm:$0xff] }
 0x274   :  { %v6885_v27 = vcombine.low %v525_v39, %v529_v40  ;;  %v565_v11 = vld [vmem:[#allocation5 + $0xc98] sm:$0xff] }
 0x275   :  { %3857 = vmatpush1.bf16.msra.mxu1 %v6805_v42  ;;  %v7532_v42 = vld [vmem:[#allocation8 + $0x180] ss:$16 sps:$4 sm:$0xff]  }
 0x276   :  { %5513 = vmatpush1.bf16.msra.mxu0 %v7505_v44  ;;  %3858 = vmatprep.subr.bf16.mxu1 %v6814_v45  ;;  %v6886_v44 = vcombine.high %v525_v39, %v529_v40  ;;  %v7537_v45 = vld [vmem:[#allocation8 + $0x1a4] ss:$16 sps:$4 sm:$0xff]   ;;  %v691_v40 = vrot.slane %v8452_v24, %v690_v34 }
 0x277   :  { %5514 = vmatprep.subr.bf16.mxu0 %v7510_v46  ;;  %v533_v46 = vld [vmem:[#allocation5 + $0xb98] sm:$0xff] }
 0x278   :  { %v6893_v56 = vcombine.low %v533_v46, %v537_v47  ;;  %v573_v17 = vld [vmem:[#allocation5 + $0xcd8] sm:$0xff] }
 0x279   :  { %3859 = vmatpush1.bf16.msra.mxu1 %v6813_v48  ;;  %v7535_v48 = vld [vmem:[#allocation8 + $0x1a0] ss:$16 sps:$4 sm:$0xff]  }
 0x27a   :  { %5515 = vmatpush1.bf16.msra.mxu0 %v7508_v49  ;;  %3860 = vmatprep.subr.bf16.mxu1 %v6822_v50  ;;  %v6894_v49 = vcombine.high %v533_v46, %v537_v47  ;;  %v7540_v50 = vld [vmem:[#allocation8 + $0x1c4] ss:$16 sps:$4 sm:$0xff]  }
 0x27b   :  { %5516 = vmatprep.subr.bf16.mxu0 %v7513_v52  ;;  %v541_v52 = vld [vmem:[#allocation5 + $0xbd8] sm:$0xff] }
 0x27c   :  { %v6901_v57 = vcombine.low %v541_v52, %v545_v54  ;;  %v577_v18 = vld [vmem:[#allocation5 + $0xcf8] sm:$0xff] }
 0x27d   :  { %3861 = vmatpush1.bf16.msra.mxu1 %v6821_v59  ;;  %v7538_v59 = vld [vmem:[#allocation8 + $0x1c0] ss:$16 sps:$4 sm:$0xff]   ;;  %v6933_v28 = vcombine.low %v573_v17, %v577_v18  ;;  %v7564_v46 = vld [vmem:[#allocation8 + $0x2c4] ss:$16 sps:$4 sm:$0xff]  }
 0x27e   :  { %5517 = vmatpush1.bf16.msra.mxu0 %v7511_v62  ;;  %3862 = vmatprep.subr.bf16.mxu1 %v6830_v55  ;;  %v6902_v62 = vcombine.high %v541_v52, %v545_v54  ;;  %v7543_v55 = vld [vmem:[#allocation8 + $0x1e4] ss:$16 sps:$4 sm:$0xff]  }
 0x27f   :  { %5518 = vmatprep.subr.bf16.mxu0 %v7516_v63  ;;  %v549_v63 = vld [vmem:[#allocation5 + $0xc18] sm:$0xff] }
 0x280   :  { %v585_v26 = vld [vmem:[#allocation5 + $0xd38] sm:$0xff] }
 0x281   :  { %3863 = vmatpush1.bf16.msra.mxu1 %v6829_v60  ;;  %v7541_v60 = vld [vmem:[#allocation8 + $0x1e0] ss:$16 sps:$4 sm:$0xff]  }
 0x282   :  { %5519 = vmatpush1.bf16.msra.mxu0 %v7514_v1  ;;  %3864 = vmatprep.subr.bf16.mxu1 %v6838_v2  ;;  %v6910_v1 = vcombine.high %v549_v63, %v553_v0  ;;  %v3932_v2 = vmax.f32 %v8463_v53, 0.0  ;;  %v6917_v53 = vcombine.low %v557_v4, %v561_v5  ;;  %v601_v39 = vld [vmem:[#allocation5 + $0xdb8] sm:$0xff] }
 0x283   :  { %5520 = vmatprep.subr.bf16.mxu0 %v7519_v3  ;;  %v7546_v3 = vld [vmem:[#allocation8 + $0x204] ss:$16 sps:$4 sm:$0xff]  }
 0x284   :  { %v605_v47 = vld [vmem:[#allocation5 + $0xdd8] sm:$0xff] }
 0x285   :  { %3865 = vmatpush1.bf16.msra.mxu1 %v6837_v6  ;;  %v6909_v6 = vcombine.low %v549_v63, %v553_v0  ;;  %v613_v63 = vld [vmem:[#allocation5 + $0xe18] sm:$0xff] }
 0x286   :  { %5521 = vmatpush1.bf16.msra.mxu0 %v7517_v7  ;;  %3866 = vmatprep.subr.bf16.mxu1 %v6846_v16  ;;  %v7544_v7 = vld [vmem:[#allocation8 + $0x200] ss:$16 sps:$4 sm:$0xff]   ;;  %v6918_v16 = vcombine.high %v557_v4, %v561_v5 }
 0x287   :  { %5522 = vmatprep.subr.bf16.mxu0 %v7522_v8  ;;  %v8475_v8 = vpack.c.bf16 %v3932_v2, %v3932_v2  ;;  %v617_v0 = vld [vmem:[#allocation5 + $0xe38] sm:$0xff] }
 0x288   :  { %v6974_v2 = vcombine.high %v613_v63, %v617_v0  ;;  %v621_v4 = vld [vmem:[#allocation5 + $0xe58] sm:$0xff] }
 0x289   :  { %3867 = vmatpush1.bf16.msra.mxu1 %v6845_v12  ;;  %v569_v12 = vld [vmem:[#allocation5 + $0xcb8] sm:$0xff] }
 0x28a   :  { %5523 = vmatpush1.bf16.msra.mxu0 %v7520_v13  ;;  %3868 = vmatprep.subr.bf16.mxu1 %v6854_v14  ;;  %v7547_v13 = vld [vmem:[#allocation8 + $0x220] ss:$16 sps:$4 sm:$0xff]   ;;  %v6926_v14 = vcombine.high %v565_v11, %v569_v12 }
 0x28b   :  { %5524 = vmatprep.subr.bf16.mxu0 %v7525_v15  ;;  %v7552_v15 = vld [vmem:[#allocation8 + $0x244] ss:$16 sps:$4 sm:$0xff]  }
 0x28c   :  { %v625_v5 = vld [vmem:[#allocation5 + $0xe78] sm:$0xff] }
 0x28d   :  { %3869 = vmatpush1.bf16.msra.mxu1 %v6853_v61  ;;  %v6925_v61 = vcombine.low %v565_v11, %v569_v12  ;;  %v629_v11 = vld [vmem:[#allocation5 + $0xe98] sm:$0xff] }
 0x28e   :  { %5525 = vmatpush1.bf16.msra.mxu0 %v7523_v20  ;;  %3870 = vmatprep.subr.bf16.mxu1 %v6862_v22  ;;  %v7550_v20 = vld [vmem:[#allocation8 + $0x240] ss:$16 sps:$4 sm:$0xff]   ;;  %v7555_v22 = vld [vmem:[#allocation8 + $0x264] ss:$16 sps:$4 sm:$0xff]  }
 0x28f   :  { %5526 = vmatprep.subr.bf16.mxu0 %v7528_v23  ;;  %v581_v23 = vld [vmem:[#allocation5 + $0xd18] sm:$0xff] }
 0x290   :  { %v6941_v33 = vcombine.low %v581_v23, %v585_v26  ;;  %v633_v12 = vld [vmem:[#allocation5 + $0xeb8] sm:$0xff] }
 0x291   :  { %3871 = vmatpush1.bf16.msra.mxu1 %v6861_v29  ;;  %v7553_v29 = vld [vmem:[#allocation8 + $0x260] ss:$16 sps:$4 sm:$0xff]  }
 0x292   :  { %5527 = vmatpush1.bf16.msra.mxu0 %v7526_v58  ;;  %3872 = vmatprep.subr.bf16.mxu1 %v6870_v31  ;;  %v6942_v58 = vcombine.high %v581_v23, %v585_v26  ;;  %v7558_v31 = vld [vmem:[#allocation8 + $0x284] ss:$16 sps:$4 sm:$0xff]  }
 0x293   :  { %5528 = vmatprep.subr.bf16.mxu0 %v7531_v32  ;;  %v589_v32 = vld [vmem:[#allocation5 + $0xd58] sm:$0xff] }
 0x294   :  { %v645_v23 = vld [vmem:[#allocation5 + $0xf18] sm:$0xff] }
 0x295   :  { %3873 = vmatpush1.bf16.msra.mxu1 %v6869_v36  ;;  %v7556_v36 = vld [vmem:[#allocation8 + $0x280] ss:$16 sps:$4 sm:$0xff]  }
 0x296   :  { %5529 = vmatpush1.bf16.msra.mxu0 %v7529_v37  ;;  %3874 = vmatprep.subr.bf16.mxu1 %v6878_v21  ;;  %v7561_v21 = vld [vmem:[#allocation8 + $0x2a4] ss:$16 sps:$4 sm:$0xff]  }
 0x297   :  { %5530 = vmatprep.subr.bf16.mxu0 %v7534_v38  ;;  %v597_v38 = vld [vmem:[#allocation5 + $0xd98] sm:$0xff] }
 0x298   :  { %v6957_v52 = vcombine.low %v597_v38, %v601_v39  ;;  %v649_v26 = vld [vmem:[#allocation5 + $0xf38] sm:$0xff] }
 0x299   :  { %3875 = vmatpush1.bf16.msra.mxu1 %v6877_v41 }
 0x29a   :  { %5531 = vmatpush1.bf16.msra.mxu0 %v7532_v42  ;;  %3876 = vmatprep.subr.bf16.mxu1 %v6886_v44  ;;  %v7559_v42 = vld [vmem:[#allocation8 + $0x2a0] ss:$16 sps:$4 sm:$0xff]   ;;  %v6958_v44 = vcombine.high %v597_v38, %v601_v39  ;;  %v7585_v38 = vld [vmem:[#allocation8 + $0x3a4] ss:$16 sps:$4 sm:$0xff]  }
 0x29b   :  { %5532 = vmatprep.subr.bf16.mxu0 %v7537_v45  ;;  %v661_v39 = vld [vmem:[#allocation5 + $0xf98] sm:$0xff] }
 0x29d   :  { %3877 = vmatpush1.bf16.msra.mxu1 %v6885_v27  ;;  %v609_v27 = vld [vmem:[#allocation5 + $0xdf8] sm:$0xff] }
 0x29e   :  { %5533 = vmatpush1.bf16.msra.mxu0 %v7535_v48  ;;  %3878 = vmatprep.subr.bf16.mxu1 %v6894_v49 }
 0x29f   :  { %5534 = vmatprep.subr.bf16.mxu0 %v7540_v50 }
 0x2a1   :  { %3879 = vmatpush1.bf16.msra.mxu1 %v6893_v56  ;;  %v7562_v56 = vld [vmem:[#allocation8 + $0x2c0] ss:$16 sps:$4 sm:$0xff]  }
 0x2a2   :  { %5535 = vmatpush1.bf16.msra.mxu0 %v7538_v59  ;;  %3880 = vmatprep.subr.bf16.mxu1 %v6902_v62  ;;  %v6966_v59 = vcombine.high %v605_v47, %v609_v27 }
 0x2a3   :  { %5536 = vmatprep.subr.bf16.mxu0 %v7543_v55  ;;  %v7567_v55 = vld [vmem:[#allocation8 + $0x2e4] ss:$16 sps:$4 sm:$0xff]  }
 0x2a5   :  { %3881 = vmatpush1.bf16.msra.mxu1 %v6901_v57 }
 0x2a6   :  { %5537 = vmatpush1.bf16.msra.mxu0 %v7541_v60  ;;  %3891 = vmatprep.subr.bf16.mxu1 %v6910_v1  ;;  %v6965_v60 = vcombine.low %v605_v47, %v609_v27  ;;  %v7565_v1 = vld [vmem:[#allocation8 + $0x2e0] ss:$16 sps:$4 sm:$0xff]   ;;  %v7588_v47 = vld [vmem:[#allocation8 + $0x3c4] ss:$16 sps:$4 sm:$0xff]  }
 0x2a7   :  { %5547 = vmatprep.subr.bf16.mxu0 %v7546_v3  ;;  %v7570_v3 = vld [vmem:[#allocation8 + $0x304] ss:$16 sps:$4 sm:$0xff]  }
 0x2a8   :  { %3883 = vmatmul.mubr.bf16.vlgmr.msra.gmra.mrb[8].mxu1 %v8417_v35  ;;  %v6934_v35 = vcombine.high %v573_v17, %v577_v18  ;;  %v637_v17 = vld [vmem:[#allocation5 + $0xed8] sm:$0xff] }
 0x2a9   :  { %5539 = vmatmul.mubr.bf16.vlgmr.msra.gmra.mrb[8].mxu0 %v8475_v8  ;;  %3892 = vmatpush1.bf16.msra.mxu1 %v6909_v6  ;;  %v6973_v6 = vcombine.low %v613_v63, %v617_v0  ;;  %v641_v18 = vld [vmem:[#allocation5 + $0xef8] sm:$0xff]  ;;  %v7592_v0 = vld [vmem:[#allocation8 + $0x8] ss:$16 sps:$4 sm:$0xff]  }
 0x2aa   :  { %5548 = vmatpush1.bf16.msra.mxu0 %v7544_v7  ;;  %3893 = vmatprep.subr.bf16.mxu1 %v6918_v16  ;;  %v7568_v7 = vld [vmem:[#allocation8 + $0x300] ss:$16 sps:$4 sm:$0xff]   ;;  %v6982_v16 = vcombine.high %v621_v4, %v625_v5  ;;  %v7615_v63 = vld [vmem:[#allocation8 + $0x404] ss:$16 sps:$4 sm:$0xff]  }
 0x2ab   :  { %5549 = vmatprep.subr.bf16.mxu0 %v7549_v9  ;;  %3923 = vmatprep.mubr.bf16.mxu1 %v8419_v43  ;;  %v593_v43 = vld [vmem:[#allocation5 + $0xd78] sm:$0xff] }
 0x2ac   :  { %v6950_v37 = vcombine.high %v589_v32, %v593_v43  ;;  %v6949_v41 = vcombine.low %v589_v32, %v593_v43  ;;  %v7573_v9 = vld [vmem:[#allocation8 + $0x324] ss:$16 sps:$4 sm:$0xff]  }
 0x2ad   :  { %3894 = vmatpush1.bf16.msra.mxu1 %v6917_v53  ;;  %v6981_v53 = vcombine.low %v621_v4, %v625_v5  ;;  %v653_v32 = vld [vmem:[#allocation5 + $0xf58] sm:$0xff]  ;;  %v7600_v4 = vld [vmem:[#allocation8 + $0x4c] ss:$16 sps:$4 sm:$0xff]  }
 0x2ae   :  { %5550 = vmatpush1.bf16.msra.mxu0 %v7547_v13  ;;  %3895 = vmatprep.subr.bf16.mxu1 %v6926_v14  ;;  %v7571_v13 = vld [vmem:[#allocation8 + $0x320] ss:$16 sps:$4 sm:$0xff]   ;;  %v6990_v14 = vcombine.high %v629_v11, %v633_v12 }
 0x2af   :  { %5551 = vmatprep.subr.bf16.mxu0 %v7552_v15  ;;  %v7576_v15 = vld [vmem:[#allocation8 + $0x344] ss:$16 sps:$4 sm:$0xff]   ;;  %v7619_v5 = vld [vmem:[#allocation8 + $0x420] ss:$16 sps:$4 sm:$0xff]  }
 0x2b0   :  { %v657_v43 = vld [vmem:[#allocation5 + $0xf78] sm:$0xff] }
 0x2b1   :  { %3896 = vmatpush1.bf16.msra.mxu1 %v6925_v61  ;;  %v6989_v61 = vcombine.low %v629_v11, %v633_v12  ;;  %v669_v27 = vld [vmem:[#allocation5 + $0xfd8] sm:$0xff]  ;;  %v7601_v11 = vld [vmem:[#allocation8 + $0x68] ss:$16 sps:$4 sm:$0xff]   ;;  %v7606_v12 = vld [vmem:[#allocation8 + $0x8c] ss:$16 sps:$4 sm:$0xff]  }
 0x2b2   :  { %5552 = vmatpush1.bf16.msra.mxu0 %v7550_v20  ;;  %3897 = vmatprep.subr.bf16.mxu1 %v6934_v35  ;;  %v7574_v20 = vld [vmem:[#allocation8 + $0x340] ss:$16 sps:$4 sm:$0xff]   ;;  %v6998_v35 = vcombine.high %v637_v17, %v641_v18 }
 0x2b3   :  { %5553 = vmatprep.subr.bf16.mxu0 %v7555_v22  ;;  %v7579_v22 = vld [vmem:[#allocation8 + $0x364] ss:$16 sps:$4 sm:$0xff]  }
 0x2b5   :  { %3898 = vmatpush1.bf16.msra.mxu1 %v6933_v28  ;;  %v6997_v28 = vcombine.low %v637_v17, %v641_v18  ;;  %v7645_v17 = vld [vmem:[#allocation8 + $0x4a4] ss:$16 sps:$4 sm:$0xff]   ;;  %v7607_v18 = vld [vmem:[#allocation8 + $0xa8] ss:$16 sps:$4 sm:$0xff]  }
 0x2b6   :  { %5554 = vmatpush1.bf16.msra.mxu0 %v7553_v29  ;;  %3899 = vmatprep.subr.bf16.mxu1 %v6942_v58  ;;  %v7577_v29 = vld [vmem:[#allocation8 + $0x360] ss:$16 sps:$4 sm:$0xff]   ;;  %v7006_v58 = vcombine.high %v645_v23, %v649_v26 }
 0x2b7   :  { %5555 = vmatprep.subr.bf16.mxu0 %v7558_v31  ;;  %v7582_v31 = vld [vmem:[#allocation8 + $0x384] ss:$16 sps:$4 sm:$0xff]  }
 0x2b9   :  { %3900 = vmatpush1.bf16.msra.mxu1 %v6941_v33  ;;  %v7005_v33 = vcombine.low %v645_v23, %v649_v26  ;;  %v7618_v23 = vld [vmem:[#allocation8 + $0xec] ss:$16 sps:$4 sm:$0xff]   ;;  %v7649_v26 = vld [vmem:[#allocation8 + $0x4c0] ss:$16 sps:$4 sm:$0xff]  }
 0x2ba   :  { %5556 = vmatpush1.bf16.msra.mxu0 %v7556_v36  ;;  %3901 = vmatprep.subr.bf16.mxu1 %v6950_v37  ;;  %v7580_v36 = vld [vmem:[#allocation8 + $0x380] ss:$16 sps:$4 sm:$0xff]   ;;  %v7014_v37 = vcombine.high %v653_v32, %v657_v43 }
 0x2bb   :  { %v8484_v45 = vpop.f32.mrb[4].mxu1  ;;  %5557 = vmatprep.subr.bf16.mxu0 %v7561_v21  ;;  %v686_v21 = vsub.s32 2, %v8447_v10 }
 0x2bc   :  { %v3599_v48 = vpop.f32.mrb[5].mxu1 }
 0x2bd   :  { %v7395_v49 = vadd.f32 %v3599_v48, %v691_v40  ;;  %v3601_v50 = vpop.f32.mrb[6].mxu1  ;;  %3902 = vmatpush1.bf16.msra.mxu1 %v6949_v41  ;;  %v665_v40 = vld [vmem:[#allocation5 + $0xfb8] sm:$0xff]  ;;  %v7013_v41 = vcombine.low %v653_v32, %v657_v43  ;;  %v7622_v43 = vld [vmem:[#allocation8 + $0x108] ss:$16 sps:$4 sm:$0xff]  }
 0x2be   :  { %5558 = vmatpush1.bf16.msra.mxu0 %v7559_v42  ;;  %v3602_v54 = vpop.f32.mrb[7].mxu1  ;;  %3903 = vmatprep.subr.bf16.mxu1 %v6958_v44  ;;  %v7583_v42 = vld [vmem:[#allocation8 + $0x3a0] ss:$16 sps:$4 sm:$0xff]   ;;  %v7022_v44 = vcombine.high %v661_v39, %v665_v40  ;;  %v7663_v32 = vld [vmem:[#allocation8 + $0x504] ss:$16 sps:$4 sm:$0xff]  }
 0x2bf   :  { %v3935_v62 = vmax.f32 %v7395_v49, 0.0  ;;  %5559 = vmatprep.subr.bf16.mxu0 %v7564_v46  ;;  %v687_v46 = vrot.slane %v8452_v24, %v686_v21  ;;  %v673_v48 = vld [vmem:[#allocation5 + $0xff8] sm:$0xff]  ;;  %v7021_v49 = vcombine.low %v661_v39, %v665_v40  ;;  %v7594_v24 = vld [vmem:[#allocation8 + $0xc] ss:$16 sps:$4 sm:$0xff]  }
 0x2c0   :  { %v7586_v50 = vld [vmem:[#allocation8 + $0x3c0] ss:$16 sps:$4 sm:$0xff]   ;;  %v7636_v39 = vld [vmem:[#allocation8 + $0x14c] ss:$16 sps:$4 sm:$0xff]  }
 0x2c1   :  { %v8486_v57 = vpack.c.bf16 %v3935_v62, %v3935_v62  ;;  %3904 = vmatpush1.bf16.msra.mxu1 %v6957_v52  ;;  %v7030_v52 = vcombine.high %v669_v27, %v673_v48  ;;  %v7394_v54 = vadd.f32 %v8484_v45, %v687_v46  ;;  %v7589_v62 = vld [vmem:[#allocation8 + $0x3e0] ss:$16 sps:$4 sm:$0xff]   ;;  %v7621_v45 = vld [vmem:[#allocation8 + $0x424] ss:$16 sps:$4 sm:$0xff]  }
 0x2c2   :  { %5560 = vmatpush1.bf16.msra.mxu0 %v7562_v56  ;;  %3905 = vmatprep.subr.bf16.mxu1 %v6966_v59  ;;  %v7591_v56 = vld [vmem:[#allocation8 + $0x3e4] ss:$16 sps:$4 sm:$0xff]   ;;  %v7029_v59 = vcombine.low %v669_v27, %v673_v48  ;;  %v7667_v40 = vld [vmem:[#allocation8 + $0x520] ss:$16 sps:$4 sm:$0xff]   ;;  %v7640_v27 = vld [vmem:[#allocation8 + $0x168] ss:$16 sps:$4 sm:$0xff]  }
 0x2c3   :  { %5579 = vmatprep.mubr.bf16.mxu0 %v8486_v57  ;;  %5561 = vmatprep.subr.bf16.mxu0 %v7567_v55  ;;  %v3934_v55 = vmax.f32 %v7394_v54, 0.0  ;;  %v7673_v46 = vld [vmem:[#allocation8 + $0x540] ss:$16 sps:$4 sm:$0xff]   ;;  %v7648_v48 = vld [vmem:[#allocation8 + $0x18c] ss:$16 sps:$4 sm:$0xff]  }
 0x2c4   :  { %v7654_v54 = vld [vmem:[#allocation8 + $0x1ac] ss:$16 sps:$4 sm:$0xff]  }
 0x2c5   :  { %3906 = vmatpush1.bf16.msra.mxu1 %v6965_v60  ;;  %v7597_v60 = vld [vmem:[#allocation8 + $0x2c] ss:$16 sps:$4 sm:$0xff]  }
 0x2c6   :  { %5562 = vmatpush1.bf16.msra.mxu0 %v7565_v1  ;;  %3907 = vmatprep.subr.bf16.mxu1 %v6974_v2  ;;  %v8494_v1 = vpack.c.bf16 %v3934_v55, %v3934_v55  ;;  %v7613_v2 = vld [vmem:[#allocation8 + $0x400] ss:$16 sps:$4 sm:$0xff]  }
 0x2c7   :  { %5563 = vmatprep.subr.bf16.mxu0 %v7570_v3  ;;  %v7595_v3 = vld [vmem:[#allocation8 + $0x28] ss:$16 sps:$4 sm:$0xff]   ;;  %v7691_v55 = vld [vmem:[#allocation8 + $0x5a0] ss:$16 sps:$4 sm:$0xff]  }
 0x2c9   :  { %3908 = vmatpush1.bf16.msra.mxu1 %v6973_v6  ;;  %v7627_v6 = vld [vmem:[#allocation8 + $0x444] ss:$16 sps:$4 sm:$0xff]  }
 0x2ca   :  { %5564 = vmatpush1.bf16.msra.mxu0 %v7568_v7  ;;  %3909 = vmatprep.subr.bf16.mxu1 %v6982_v16  ;;  %v7598_v7 = vld [vmem:[#allocation8 + $0x48] ss:$16 sps:$4 sm:$0xff]   ;;  %v7603_v16 = vld [vmem:[#allocation8 + $0x6c] ss:$16 sps:$4 sm:$0xff]  }
 0x2cb   :  { %5565 = vmatprep.subr.bf16.mxu0 %v7573_v9  ;;  %v7625_v9 = vld [vmem:[#allocation8 + $0x440] ss:$16 sps:$4 sm:$0xff]  }
 0x2cd   :  { %3910 = vmatpush1.bf16.msra.mxu1 %v6981_v53  ;;  %v7639_v53 = vld [vmem:[#allocation8 + $0x484] ss:$16 sps:$4 sm:$0xff]  }
 0x2ce   :  { %5566 = vmatpush1.bf16.msra.mxu0 %v7571_v13  ;;  %3911 = vmatprep.subr.bf16.mxu1 %v6990_v14  ;;  %v7604_v13 = vld [vmem:[#allocation8 + $0x88] ss:$16 sps:$4 sm:$0xff]   ;;  %v7609_v14 = vld [vmem:[#allocation8 + $0xac] ss:$16 sps:$4 sm:$0xff]  }
 0x2cf   :  { %5567 = vmatprep.subr.bf16.mxu0 %v7576_v15  ;;  %v7637_v15 = vld [vmem:[#allocation8 + $0x480] ss:$16 sps:$4 sm:$0xff]  }
 0x2d1   :  { %3912 = vmatpush1.bf16.msra.mxu1 %v6989_v61  ;;  %v7612_v61 = vld [vmem:[#allocation8 + $0xcc] ss:$16 sps:$4 sm:$0xff]  }
 0x2d2   :  { %5568 = vmatpush1.bf16.msra.mxu0 %v7574_v20  ;;  %3913 = vmatprep.subr.bf16.mxu1 %v6998_v35  ;;  %v7643_v20 = vld [vmem:[#allocation8 + $0x4a0] ss:$16 sps:$4 sm:$0xff]   ;;  %v7651_v35 = vld [vmem:[#allocation8 + $0x4c4] ss:$16 sps:$4 sm:$0xff]  }
 0x2d3   :  { %5569 = vmatprep.subr.bf16.mxu0 %v7579_v22  ;;  %v7610_v22 = vld [vmem:[#allocation8 + $0xc8] ss:$16 sps:$4 sm:$0xff]  }
 0x2d5   :  { %3914 = vmatpush1.bf16.msra.mxu1 %v6997_v28  ;;  %v7657_v28 = vld [vmem:[#allocation8 + $0x4e4] ss:$16 sps:$4 sm:$0xff]  }
 0x2d6   :  { %5570 = vmatpush1.bf16.msra.mxu0 %v7577_v29  ;;  %3915 = vmatprep.subr.bf16.mxu1 %v7006_v58  ;;  %v7616_v29 = vld [vmem:[#allocation8 + $0xe8] ss:$16 sps:$4 sm:$0xff]   ;;  %v7624_v58 = vld [vmem:[#allocation8 + $0x10c] ss:$16 sps:$4 sm:$0xff]  }
 0x2d7   :  { %5571 = vmatprep.subr.bf16.mxu0 %v7582_v31  ;;  %v7655_v31 = vld [vmem:[#allocation8 + $0x4e0] ss:$16 sps:$4 sm:$0xff]  }
 0x2d9   :  { %3916 = vmatpush1.bf16.msra.mxu1 %v7005_v33  ;;  %v7630_v33 = vld [vmem:[#allocation8 + $0x12c] ss:$16 sps:$4 sm:$0xff]  }
 0x2da   :  { %5572 = vmatpush1.bf16.msra.mxu0 %v7580_v36  ;;  %3917 = vmatprep.subr.bf16.mxu1 %v7014_v37  ;;  %v7661_v36 = vld [vmem:[#allocation8 + $0x500] ss:$16 sps:$4 sm:$0xff]   ;;  %v7669_v37 = vld [vmem:[#allocation8 + $0x524] ss:$16 sps:$4 sm:$0xff]  }
 0x2db   :  { %5573 = vmatprep.subr.bf16.mxu0 %v7585_v38  ;;  %v7628_v38 = vld [vmem:[#allocation8 + $0x128] ss:$16 sps:$4 sm:$0xff]  }
 0x2dd   :  { %3918 = vmatpush1.bf16.msra.mxu1 %v7013_v41  ;;  %v7675_v41 = vld [vmem:[#allocation8 + $0x544] ss:$16 sps:$4 sm:$0xff]  }
 0x2de   :  { %5574 = vmatpush1.bf16.msra.mxu0 %v7583_v42  ;;  %3919 = vmatprep.subr.bf16.mxu1 %v7022_v44  ;;  %v7634_v42 = vld [vmem:[#allocation8 + $0x148] ss:$16 sps:$4 sm:$0xff]   ;;  %v7642_v44 = vld [vmem:[#allocation8 + $0x16c] ss:$16 sps:$4 sm:$0xff]  }
 0x2df   :  { %5575 = vmatprep.subr.bf16.mxu0 %v7588_v47  ;;  %v7681_v47 = vld [vmem:[#allocation8 + $0x564] ss:$16 sps:$4 sm:$0xff]  }
 0x2e1   :  { %3920 = vmatpush1.bf16.msra.mxu1 %v7021_v49  ;;  %v7679_v49 = vld [vmem:[#allocation8 + $0x560] ss:$16 sps:$4 sm:$0xff]  }
 0x2e2   :  { %5576 = vmatpush1.bf16.msra.mxu0 %v7586_v50  ;;  %3921 = vmatprep.subr.bf16.mxu1 %v7030_v52  ;;  %v7687_v50 = vld [vmem:[#allocation8 + $0x584] ss:$16 sps:$4 sm:$0xff]   ;;  %v7646_v52 = vld [vmem:[#allocation8 + $0x188] ss:$16 sps:$4 sm:$0xff]  }
 0x2e3   :  { %5577 = vmatprep.subr.bf16.mxu0 %v7591_v56  ;;  %v7685_v56 = vld [vmem:[#allocation8 + $0x580] ss:$16 sps:$4 sm:$0xff]  }
 0x2e5   :  { %3922 = vmatpush1.bf16.msra.mxu1 %v7029_v59  ;;  %v7693_v59 = vld [vmem:[#allocation8 + $0x5a4] ss:$16 sps:$4 sm:$0xff]  }
 0x2e6   :  { %5578 = vmatpush1.bf16.msra.mxu0 %v7589_v62  ;;  %5670 = vmatprep.subr.bf16.mxu1 %v7594_v24  ;;  %v7652_v62 = vld [vmem:[#allocation8 + $0x1a8] ss:$16 sps:$4 sm:$0xff]   ;;  %v7660_v24 = vld [vmem:[#allocation8 + $0x1cc] ss:$16 sps:$4 sm:$0xff]  }
 0x2e7   :  { %5588 = vmatprep.subr.bf16.mxu0 %v7615_v63  ;;  %v7699_v63 = vld [vmem:[#allocation8 + $0x5c4] ss:$16 sps:$4 sm:$0xff]  }
 0x2e8   :  { %3924 = vmatmul.mubr.bf16.vlgmr.msra.gmra.mrb[8].mxu1 %v8425_v51  ;;  %v7633_v51 = vld [vmem:[#allocation8 + $0x464] ss:$16 sps:$4 sm:$0xff]  }
 0x2e9   :  { %5580 = vmatmul.mubr.bf16.vlgmr.msra.gmra.mrb[8].mxu0 %v8494_v1  ;;  %5671 = vmatpush1.bf16.msra.mxu1 %v7592_v0  ;;  %v7658_v0 = vld [vmem:[#allocation8 + $0x1c8] ss:$16 sps:$4 sm:$0xff]  }
 0x2ea   :  { %5702 = vmatprep.mubr.bf16.mxu1 %v8468_v30  ;;  %5672 = vmatprep.subr.bf16.mxu1 %v7597_v60  ;;  %v7631_v30 = vld [vmem:[#allocation8 + $0x460] ss:$16 sps:$4 sm:$0xff]   ;;  %v7666_v60 = vld [vmem:[#allocation8 + $0x1ec] ss:$16 sps:$4 sm:$0xff]  }
 0x2eb   :  { %5589 = vmatpush1.bf16.msra.mxu0 %v7613_v2  ;;  %v7697_v2 = vld [vmem:[#allocation8 + $0x5c0] ss:$16 sps:$4 sm:$0xff]  }
 0x2ec   :  { %5590 = vmatprep.subr.bf16.mxu0 %v7621_v45  ;;  %v7705_v45 = vld [vmem:[#allocation8 + $0x5e4] ss:$16 sps:$4 sm:$0xff]  }
 0x2ed   :  { %5673 = vmatpush1.bf16.msra.mxu1 %v7595_v3  ;;  %v7664_v3 = vld [vmem:[#allocation8 + $0x1e8] ss:$16 sps:$4 sm:$0xff]  }
 0x2ee   :  { %5674 = vmatprep.subr.bf16.mxu1 %v7600_v4  ;;  %v7672_v4 = vld [vmem:[#allocation8 + $0x20c] ss:$16 sps:$4 sm:$0xff]  }
 0x2ef   :  { %5591 = vmatpush1.bf16.msra.mxu0 %v7619_v5  ;;  %v7703_v5 = vld [vmem:[#allocation8 + $0x5e0] ss:$16 sps:$4 sm:$0xff]  }
 0x2f0   :  { %5592 = vmatprep.subr.bf16.mxu0 %v7627_v6  ;;  %v7759_v6 = vld [vmem:[#allocation8 + $0x604] ss:$16 sps:$4 sm:$0xff]  }
 0x2f1   :  { %5675 = vmatpush1.bf16.msra.mxu1 %v7598_v7  ;;  %v7670_v7 = vld [vmem:[#allocation8 + $0x208] ss:$16 sps:$4 sm:$0xff]  }
 0x2f2   :  { %5676 = vmatprep.subr.bf16.mxu1 %v7603_v16  ;;  %v7678_v16 = vld [vmem:[#allocation8 + $0x22c] ss:$16 sps:$4 sm:$0xff]  }
 0x2f3   :  { %5593 = vmatpush1.bf16.msra.mxu0 %v7625_v9  ;;  %v7676_v9 = vld [vmem:[#allocation8 + $0x228] ss:$16 sps:$4 sm:$0xff]  }
 0x2f4   :  { %5594 = vmatprep.subr.bf16.mxu0 %v7633_v51  ;;  %v7684_v51 = vld [vmem:[#allocation8 + $0x24c] ss:$16 sps:$4 sm:$0xff]  }
 0x2f5   :  { %5677 = vmatpush1.bf16.msra.mxu1 %v7601_v11  ;;  %v7682_v11 = vld [vmem:[#allocation8 + $0x248] ss:$16 sps:$4 sm:$0xff]  }
 0x2f6   :  { %5678 = vmatprep.subr.bf16.mxu1 %v7606_v12  ;;  %v7690_v12 = vld [vmem:[#allocation8 + $0x26c] ss:$16 sps:$4 sm:$0xff]  }
 0x2f7   :  { %5595 = vmatpush1.bf16.msra.mxu0 %v7631_v30  ;;  %v7688_v30 = vld [vmem:[#allocation8 + $0x268] ss:$16 sps:$4 sm:$0xff]  }
 0x2f8   :  { %5596 = vmatprep.subr.bf16.mxu0 %v7639_v53  ;;  %v7696_v53 = vld [vmem:[#allocation8 + $0x28c] ss:$16 sps:$4 sm:$0xff]  }
 0x2f9   :  { %5679 = vmatpush1.bf16.msra.mxu1 %v7604_v13  ;;  %v7694_v13 = vld [vmem:[#allocation8 + $0x288] ss:$16 sps:$4 sm:$0xff]  }
 0x2fa   :  { %5680 = vmatprep.subr.bf16.mxu1 %v7609_v14  ;;  %v694_v14 = vsub.s32 4, %v8447_v10 }
 0x2fb   :  { %5597 = vmatpush1.bf16.msra.mxu0 %v7637_v15  ;;  %v7702_v15 = vld [vmem:[#allocation8 + $0x2ac] ss:$16 sps:$4 sm:$0xff]  }
 0x2fc   :  { %5598 = vmatprep.subr.bf16.mxu0 %v7645_v17 }
 0x2fd   :  { %5681 = vmatpush1.bf16.msra.mxu1 %v7607_v18  ;;  %v7700_v18 = vld [vmem:[#allocation8 + $0x2a8] ss:$16 sps:$4 sm:$0xff]  }
 0x2fe   :  { %5682 = vmatprep.subr.bf16.mxu1 %v7612_v61 }
 0x2ff   :  { %5599 = vmatpush1.bf16.msra.mxu0 %v7643_v20  ;;  %v7708_v20 = vld [vmem:[#allocation8 + $0x2cc] ss:$16 sps:$4 sm:$0xff]  }
 0x300   :  { %5600 = vmatprep.subr.bf16.mxu0 %v7651_v35 }
 0x301   :  { %5683 = vmatpush1.bf16.msra.mxu1 %v7610_v22 }
 0x302   :  { %5684 = vmatprep.subr.bf16.mxu1 %v7618_v23 }
 0x303   :  { %5601 = vmatpush1.bf16.msra.mxu0 %v7649_v26  ;;  %v7706_v26 = vld [vmem:[#allocation8 + $0x2c8] ss:$16 sps:$4 sm:$0xff]  }
 0x304   :  { %5602 = vmatprep.subr.bf16.mxu0 %v7657_v28 }
 0x305   :  { %5685 = vmatpush1.bf16.msra.mxu1 %v7616_v29 }
 0x306   :  { %5686 = vmatprep.subr.bf16.mxu1 %v7624_v58  ;;  %v7711_v58 = vld [vmem:[#allocation8 + $0x2ec] ss:$16 sps:$4 sm:$0xff]  }
 0x307   :  { %5603 = vmatpush1.bf16.msra.mxu0 %v7655_v31 }
 0x308   :  { %5604 = vmatprep.subr.bf16.mxu0 %v7663_v32 }
 0x309   :  { %5687 = vmatpush1.bf16.msra.mxu1 %v7622_v43 }
 0x30a   :  { %5688 = vmatprep.subr.bf16.mxu1 %v7630_v33  ;;  %v7709_v33 = vld [vmem:[#allocation8 + $0x2e8] ss:$16 sps:$4 sm:$0xff]  }
 0x30b   :  { %5605 = vmatpush1.bf16.msra.mxu0 %v7661_v36 }
 0x30c   :  { %5606 = vmatprep.subr.bf16.mxu0 %v7669_v37  ;;  %v7714_v37 = vld [vmem:[#allocation8 + $0x30c] ss:$16 sps:$4 sm:$0xff]  }
 0x30d   :  { %5689 = vmatpush1.bf16.msra.mxu1 %v7628_v38  ;;  %v7757_v38 = vld [vmem:[#allocation8 + $0x600] ss:$16 sps:$4 sm:$0xff]  }
 0x30e   :  { %5690 = vmatprep.subr.bf16.mxu1 %v7636_v39 }
 0x30f   :  { %5607 = vmatpush1.bf16.msra.mxu0 %v7667_v40  ;;  %v7765_v40 = vld [vmem:[#allocation8 + $0x624] ss:$16 sps:$4 sm:$0xff]  }
 0x310   :  { %5608 = vmatprep.subr.bf16.mxu0 %v7675_v41  ;;  %v7712_v41 = vld [vmem:[#allocation8 + $0x308] ss:$16 sps:$4 sm:$0xff]  }
 0x311   :  { %5691 = vmatpush1.bf16.msra.mxu1 %v7634_v42  ;;  %v7717_v42 = vld [vmem:[#allocation8 + $0x32c] ss:$16 sps:$4 sm:$0xff]  }
 0x312   :  { %5692 = vmatprep.subr.bf16.mxu1 %v7642_v44  ;;  %v7763_v44 = vld [vmem:[#allocation8 + $0x620] ss:$16 sps:$4 sm:$0xff]  }
 0x313   :  { %5609 = vmatpush1.bf16.msra.mxu0 %v7673_v46  ;;  %v7771_v46 = vld [vmem:[#allocation8 + $0x644] ss:$16 sps:$4 sm:$0xff]  }
 0x314   :  { %5610 = vmatprep.subr.bf16.mxu0 %v7681_v47  ;;  %v7715_v47 = vld [vmem:[#allocation8 + $0x328] ss:$16 sps:$4 sm:$0xff]  }
 0x315   :  { %5693 = vmatpush1.bf16.msra.mxu1 %v7640_v27  ;;  %v7720_v27 = vld [vmem:[#allocation8 + $0x34c] ss:$16 sps:$4 sm:$0xff]  }
 0x316   :  { %5694 = vmatprep.subr.bf16.mxu1 %v7648_v48  ;;  %v7769_v48 = vld [vmem:[#allocation8 + $0x640] ss:$16 sps:$4 sm:$0xff]  }
 0x317   :  { %5611 = vmatpush1.bf16.msra.mxu0 %v7679_v49  ;;  %v7777_v49 = vld [vmem:[#allocation8 + $0x664] ss:$16 sps:$4 sm:$0xff]  }
 0x318   :  { %5612 = vmatprep.subr.bf16.mxu0 %v7687_v50  ;;  %v7718_v50 = vld [vmem:[#allocation8 + $0x348] ss:$16 sps:$4 sm:$0xff]  }
 0x319   :  { %5695 = vmatpush1.bf16.msra.mxu1 %v7646_v52  ;;  %v7723_v52 = vld [vmem:[#allocation8 + $0x36c] ss:$16 sps:$4 sm:$0xff]  }
 0x31a   :  { %5696 = vmatprep.subr.bf16.mxu1 %v7654_v54  ;;  %v7775_v54 = vld [vmem:[#allocation8 + $0x660] ss:$16 sps:$4 sm:$0xff]  }
 0x31b   :  { %5613 = vmatpush1.bf16.msra.mxu0 %v7685_v56  ;;  %v7783_v56 = vld [vmem:[#allocation8 + $0x684] ss:$16 sps:$4 sm:$0xff]  }
 0x31c   :  { %5614 = vmatprep.subr.bf16.mxu0 %v7693_v59  ;;  %v7721_v59 = vld [vmem:[#allocation8 + $0x368] ss:$16 sps:$4 sm:$0xff]  }
 0x31d   :  { %5697 = vmatpush1.bf16.msra.mxu1 %v7652_v62  ;;  %v7726_v62 = vld [vmem:[#allocation8 + $0x38c] ss:$16 sps:$4 sm:$0xff]  }
 0x31e   :  { %5698 = vmatprep.subr.bf16.mxu1 %v7660_v24  ;;  %v7781_v24 = vld [vmem:[#allocation8 + $0x680] ss:$16 sps:$4 sm:$0xff]  }
 0x31f   :  { %5615 = vmatpush1.bf16.msra.mxu0 %v7691_v55  ;;  %v7789_v55 = vld [vmem:[#allocation8 + $0x6a4] ss:$16 sps:$4 sm:$0xff]  }
 0x320   :  { %5616 = vmatprep.subr.bf16.mxu0 %v7699_v63  ;;  %v7724_v63 = vld [vmem:[#allocation8 + $0x388] ss:$16 sps:$4 sm:$0xff]  }
 0x321   :  { %5699 = vmatpush1.bf16.msra.mxu1 %v7658_v0  ;;  %v7729_v0 = vld [vmem:[#allocation8 + $0x3ac] ss:$16 sps:$4 sm:$0xff]  }
 0x322   :  { %5700 = vmatprep.subr.bf16.mxu1 %v7666_v60  ;;  %v7787_v60 = vld [vmem:[#allocation8 + $0x6a0] ss:$16 sps:$4 sm:$0xff]  }
 0x323   :  { %5617 = vmatpush1.bf16.msra.mxu0 %v7697_v2  ;;  %v7795_v2 = vld [vmem:[#allocation8 + $0x6c4] ss:$16 sps:$4 sm:$0xff]  }
 0x324   :  { %5618 = vmatprep.subr.bf16.mxu0 %v7705_v45  ;;  %v7727_v45 = vld [vmem:[#allocation8 + $0x3a8] ss:$16 sps:$4 sm:$0xff]  }
 0x325   :  { %5701 = vmatpush1.bf16.msra.mxu1 %v7664_v3  ;;  %v7732_v3 = vld [vmem:[#allocation8 + $0x3cc] ss:$16 sps:$4 sm:$0xff]  }
 0x326   :  { %5711 = vmatprep.subr.bf16.mxu1 %v7672_v4  ;;  %v7793_v4 = vld [vmem:[#allocation8 + $0x6c0] ss:$16 sps:$4 sm:$0xff]  }
 0x327   :  { %5619 = vmatpush1.bf16.msra.mxu0 %v7703_v5  ;;  %v7801_v5 = vld [vmem:[#allocation8 + $0x6e4] ss:$16 sps:$4 sm:$0xff]  }
 0x328   :  { %5703 = vmatmul.mubr.bf16.vlgmr.msra.gmra.mrb[12].mxu1 %v8475_v8  ;;  %5629 = vmatprep.subr.bf16.mxu0 %v7759_v6  ;;  %v698_v8 = vsub.s32 5, %v8447_v10  ;;  %v7730_v6 = vld [vmem:[#allocation8 + $0x3c8] ss:$16 sps:$4 sm:$0xff]  }
 0x329   :  { %5712 = vmatpush1.bf16.msra.mxu1 %v7670_v7  ;;  %5743 = vmatprep.mubr.bf16.mxu1 %v8486_v57  ;;  %v8503_v57 = vld [vmem:[#allocation7] sm:$0xff] }
 0x32a   :  { %5713 = vmatprep.subr.bf16.mxu1 %v7678_v16  ;;  %v695_v17 = vrot.slane %v8503_v57, %v694_v14  ;;  %v699_v61 = vrot.slane %v8503_v57, %v698_v8  ;;  %v7735_v7 = vld [vmem:[#allocation8 + $0x3ec] ss:$16 sps:$4 sm:$0xff]   ;;  %v7799_v16 = vld [vmem:[#allocation8 + $0x6e0] ss:$16 sps:$4 sm:$0xff]   ;;  %v7819_v8 = vld [vmem:[#allocation8 + $0x744] ss:$16 sps:$4 sm:$0xff]  }
 0x32b   :  { %v7811_v14 = vld [vmem:[#allocation8 + $0x720] ss:$16 sps:$4 sm:$0xff]  }
 0x32d   :  { %5714 = vmatpush1.bf16.msra.mxu1 %v7676_v9  ;;  %v7807_v9 = vld [vmem:[#allocation8 + $0x704] ss:$16 sps:$4 sm:$0xff]  }
 0x32e   :  { %5715 = vmatprep.subr.bf16.mxu1 %v7684_v51  ;;  %v7733_v51 = vld [vmem:[#allocation8 + $0x3e8] ss:$16 sps:$4 sm:$0xff]  }
 0x331   :  { %5716 = vmatpush1.bf16.msra.mxu1 %v7682_v11  ;;  %v7738_v11 = vld [vmem:[#allocation8 + $0x40c] ss:$16 sps:$4 sm:$0xff]  }
 0x332   :  { %5717 = vmatprep.subr.bf16.mxu1 %v7690_v12  ;;  %v7805_v12 = vld [vmem:[#allocation8 + $0x700] ss:$16 sps:$4 sm:$0xff]  }
 0x335   :  { %5718 = vmatpush1.bf16.msra.mxu1 %v7688_v30  ;;  %v7813_v30 = vld [vmem:[#allocation8 + $0x724] ss:$16 sps:$4 sm:$0xff]  }
 0x336   :  { %5719 = vmatprep.subr.bf16.mxu1 %v7696_v53  ;;  %v7736_v53 = vld [vmem:[#allocation8 + $0x408] ss:$16 sps:$4 sm:$0xff]  }
 0x339   :  { %5720 = vmatpush1.bf16.msra.mxu1 %v7694_v13  ;;  %v7741_v13 = vld [vmem:[#allocation8 + $0x42c] ss:$16 sps:$4 sm:$0xff]  }
 0x33a   :  { %5721 = vmatprep.subr.bf16.mxu1 %v7702_v15  ;;  %v7739_v15 = vld [vmem:[#allocation8 + $0x428] ss:$16 sps:$4 sm:$0xff]  }
 0x33c   :  { %v3761_v35 = vpop.f32.mrb[4].mxu0 }
 0x33d   :  { %v7396_v22 = vadd.f32 %v3761_v35, %v695_v17  ;;  %v3763_v23 = vpop.f32.mrb[5].mxu0  ;;  %5722 = vmatpush1.bf16.msra.mxu1 %v7700_v18  ;;  %v7744_v17 = vld [vmem:[#allocation8 + $0x44c] ss:$16 sps:$4 sm:$0xff]   ;;  %v7817_v18 = vld [vmem:[#allocation8 + $0x740] ss:$16 sps:$4 sm:$0xff]  }
 0x33e   :  { %v7397_v28 = vadd.f32 %v3763_v23, %v699_v61  ;;  %v3765_v29 = vpop.f32.mrb[6].mxu0  ;;  %5723 = vmatprep.subr.bf16.mxu1 %v7708_v20  ;;  %v7825_v61 = vld [vmem:[#allocation8 + $0x764] ss:$16 sps:$4 sm:$0xff]   ;;  %v7742_v20 = vld [vmem:[#allocation8 + $0x448] ss:$16 sps:$4 sm:$0xff]  }
 0x33f   :  { %v3936_v31 = vmax.f32 %v7396_v22, 0.0  ;;  %v3766_v32 = vpop.f32.mrb[7].mxu0  ;;  %v7747_v35 = vld [vmem:[#allocation8 + $0x46c] ss:$16 sps:$4 sm:$0xff]   ;;  %v7823_v22 = vld [vmem:[#allocation8 + $0x760] ss:$16 sps:$4 sm:$0xff]  }
 0x340   :  { %v3937_v43 = vmax.f32 %v7397_v28, 0.0  ;;  %v7831_v23 = vld [vmem:[#allocation8 + $0x784] ss:$16 sps:$4 sm:$0xff]   ;;  %v7829_v28 = vld [vmem:[#allocation8 + $0x780] ss:$16 sps:$4 sm:$0xff]  }
 0x341   :  { %5724 = vmatpush1.bf16.msra.mxu1 %v7706_v26  ;;  %v8509_v39 = vpack.c.bf16 %v3936_v31, %v3936_v31  ;;  %v7750_v26 = vld [vmem:[#allocation8 + $0x48c] ss:$16 sps:$4 sm:$0xff]   ;;  %v7837_v29 = vld [vmem:[#allocation8 + $0x7a4] ss:$16 sps:$4 sm:$0xff]   ;;  %v7835_v32 = vld [vmem:[#allocation8 + $0x7a0] ss:$16 sps:$4 sm:$0xff]  }
 0x342   :  { %v8507_v36 = vpack.c.bf16 %v3937_v43, %v3937_v43  ;;  %5725 = vmatprep.subr.bf16.mxu1 %v7711_v58  ;;  %v7748_v58 = vld [vmem:[#allocation8 + $0x488] ss:$16 sps:$4 sm:$0xff]   ;;  %v7753_v31 = vld [vmem:[#allocation8 + $0x4ac] ss:$16 sps:$4 sm:$0xff]   ;;  %v7843_v43 = vld [vmem:[#allocation8 + $0x7c4] ss:$16 sps:$4 sm:$0xff]  }
 0x344   :  { %5620 = vmatprep.mubr.bf16.mxu0 %v8507_v36 }
 0x345   :  { %5621 = vmatmul.mubr.bf16.vlgmr.msra.gmra.mrb[8].mxu0 %v8509_v39  ;;  %5726 = vmatpush1.bf16.msra.mxu1 %v7709_v33  ;;  %v7751_v33 = vld [vmem:[#allocation8 + $0x4a8] ss:$16 sps:$4 sm:$0xff]  }
 0x346   :  { %5727 = vmatprep.subr.bf16.mxu1 %v7714_v37  ;;  %5630 = vmatpush1.bf16.msra.mxu0 %v7757_v38  ;;  %v7841_v37 = vld [vmem:[#allocation8 + $0x7c0] ss:$16 sps:$4 sm:$0xff]   ;;  %v7849_v38 = vld [vmem:[#allocation8 + $0x7e4] ss:$16 sps:$4 sm:$0xff]  }
 0x347   :  { %5631 = vmatprep.subr.bf16.mxu0 %v7765_v40  ;;  %v7754_v40 = vld [vmem:[#allocation8 + $0x4c8] ss:$16 sps:$4 sm:$0xff]  }
 0x349   :  { %5728 = vmatpush1.bf16.msra.mxu1 %v7712_v41  ;;  %v7762_v41 = vld [vmem:[#allocation8 + $0x4ec] ss:$16 sps:$4 sm:$0xff]  }
 0x34a   :  { %5729 = vmatprep.subr.bf16.mxu1 %v7717_v42  ;;  %5632 = vmatpush1.bf16.msra.mxu0 %v7763_v44  ;;  %v7847_v42 = vld [vmem:[#allocation8 + $0x7e0] ss:$16 sps:$4 sm:$0xff]  }
 0x34b   :  { %5633 = vmatprep.subr.bf16.mxu0 %v7771_v46  ;;  %v7882_v44 = vld [vmem:[#allocation11 + $0x4] ss:$8 sps:$4 sm:$0xff]  }
 0x34c   :  { %v7760_v46 = vld [vmem:[#allocation8 + $0x4e8] ss:$16 sps:$4 sm:$0xff]  }
 0x34d   :  { %5730 = vmatpush1.bf16.msra.mxu1 %v7715_v47  ;;  %v7768_v47 = vld [vmem:[#allocation8 + $0x50c] ss:$16 sps:$4 sm:$0xff]  }
 0x34e   :  { %5731 = vmatprep.subr.bf16.mxu1 %v7720_v27  ;;  %5634 = vmatpush1.bf16.msra.mxu0 %v7769_v48  ;;  %v7766_v27 = vld [vmem:[#allocation8 + $0x508] ss:$16 sps:$4 sm:$0xff]   ;;  %v7774_v48 = vld [vmem:[#allocation8 + $0x52c] ss:$16 sps:$4 sm:$0xff]  }
 0x34f   :  { %5635 = vmatprep.subr.bf16.mxu0 %v7777_v49  ;;  %v7772_v49 = vld [vmem:[#allocation8 + $0x528] ss:$16 sps:$4 sm:$0xff]  }
 0x351   :  { %5732 = vmatpush1.bf16.msra.mxu1 %v7718_v50  ;;  %v7780_v50 = vld [vmem:[#allocation8 + $0x54c] ss:$16 sps:$4 sm:$0xff]  }
 0x352   :  { %5733 = vmatprep.subr.bf16.mxu1 %v7723_v52  ;;  %5636 = vmatpush1.bf16.msra.mxu0 %v7775_v54  ;;  %v7778_v52 = vld [vmem:[#allocation8 + $0x548] ss:$16 sps:$4 sm:$0xff]   ;;  %v7786_v54 = vld [vmem:[#allocation8 + $0x56c] ss:$16 sps:$4 sm:$0xff]  }
 0x353   :  { %5637 = vmatprep.subr.bf16.mxu0 %v7783_v56  ;;  %v7784_v56 = vld [vmem:[#allocation8 + $0x568] ss:$16 sps:$4 sm:$0xff]  }
 0x355   :  { %5734 = vmatpush1.bf16.msra.mxu1 %v7721_v59  ;;  %v7792_v59 = vld [vmem:[#allocation8 + $0x58c] ss:$16 sps:$4 sm:$0xff]  }
 0x356   :  { %5735 = vmatprep.subr.bf16.mxu1 %v7726_v62  ;;  %5638 = vmatpush1.bf16.msra.mxu0 %v7781_v24  ;;  %v7790_v62 = vld [vmem:[#allocation8 + $0x588] ss:$16 sps:$4 sm:$0xff]   ;;  %v7798_v24 = vld [vmem:[#allocation8 + $0x5ac] ss:$16 sps:$4 sm:$0xff]  }
 0x357   :  { %5639 = vmatprep.subr.bf16.mxu0 %v7789_v55  ;;  %v7796_v55 = vld [vmem:[#allocation8 + $0x5a8] ss:$16 sps:$4 sm:$0xff]  }
 0x359   :  { %5736 = vmatpush1.bf16.msra.mxu1 %v7724_v63  ;;  %v7804_v63 = vld [vmem:[#allocation8 + $0x5cc] ss:$16 sps:$4 sm:$0xff]  }
 0x35a   :  { %5737 = vmatprep.subr.bf16.mxu1 %v7729_v0  ;;  %5640 = vmatpush1.bf16.msra.mxu0 %v7787_v60  ;;  %v7802_v0 = vld [vmem:[#allocation8 + $0x5c8] ss:$16 sps:$4 sm:$0xff]   ;;  %v7810_v60 = vld [vmem:[#allocation8 + $0x5ec] ss:$16 sps:$4 sm:$0xff]  }
 0x35b   :  { %5641 = vmatprep.subr.bf16.mxu0 %v7795_v2  ;;  %v7808_v2 = vld [vmem:[#allocation8 + $0x5e8] ss:$16 sps:$4 sm:$0xff]  }
 0x35d   :  { %5738 = vmatpush1.bf16.msra.mxu1 %v7727_v45  ;;  %v7816_v45 = vld [vmem:[#allocation8 + $0x60c] ss:$16 sps:$4 sm:$0xff]  }
 0x35e   :  { %5739 = vmatprep.subr.bf16.mxu1 %v7732_v3  ;;  %5642 = vmatpush1.bf16.msra.mxu0 %v7793_v4  ;;  %v7814_v3 = vld [vmem:[#allocation8 + $0x608] ss:$16 sps:$4 sm:$0xff]   ;;  %v7822_v4 = vld [vmem:[#allocation8 + $0x62c] ss:$16 sps:$4 sm:$0xff]  }
 0x35f   :  { %5643 = vmatprep.subr.bf16.mxu0 %v7801_v5  ;;  %v7820_v5 = vld [vmem:[#allocation8 + $0x628] ss:$16 sps:$4 sm:$0xff]  }
 0x361   :  { %5740 = vmatpush1.bf16.msra.mxu1 %v7730_v6  ;;  %v7828_v6 = vld [vmem:[#allocation8 + $0x64c] ss:$16 sps:$4 sm:$0xff]  }
 0x362   :  { %5741 = vmatprep.subr.bf16.mxu1 %v7735_v7  ;;  %5644 = vmatpush1.bf16.msra.mxu0 %v7799_v16  ;;  %v7826_v7 = vld [vmem:[#allocation8 + $0x648] ss:$16 sps:$4 sm:$0xff]   ;;  %v7834_v16 = vld [vmem:[#allocation8 + $0x66c] ss:$16 sps:$4 sm:$0xff]  }
 0x363   :  { %5645 = vmatprep.subr.bf16.mxu0 %v7807_v9  ;;  %v7832_v9 = vld [vmem:[#allocation8 + $0x668] ss:$16 sps:$4 sm:$0xff]  }
 0x365   :  { %5742 = vmatpush1.bf16.msra.mxu1 %v7733_v51  ;;  %v7840_v51 = vld [vmem:[#allocation8 + $0x68c] ss:$16 sps:$4 sm:$0xff]  }
 0x366   :  { %5752 = vmatprep.subr.bf16.mxu1 %v7738_v11  ;;  %5646 = vmatpush1.bf16.msra.mxu0 %v7805_v12  ;;  %v702_v11 = vsub.s32 6, %v8447_v10  ;;  %v7838_v12 = vld [vmem:[#allocation8 + $0x688] ss:$16 sps:$4 sm:$0xff]  }
 0x367   :  { %5647 = vmatprep.subr.bf16.mxu0 %v7813_v30  ;;  %v706_v30 = vsub.s32 7, %v8447_v10  ;;  %v7990_v10 = vld [vmem:[#allocation14 + $0x78] sm:$0xff]  }
 0x368   :  { %5744 = vmatmul.mubr.bf16.vlgmr.msra.gmra.mrb[12].mxu1 %v8494_v1  ;;  %v7745_v1 = vld [vmem:[#allocation8 + $0x468] ss:$16 sps:$4 sm:$0xff]  }
 0x369   :  { %5753 = vmatpush1.bf16.msra.mxu1 %v7736_v53  ;;  %5784 = vmatprep.mubr.bf16.mxu1 %v8507_v36  ;;  %v7756_v36 = vld [vmem:[#allocation8 + $0x4cc] ss:$16 sps:$4 sm:$0xff]   ;;  %v703_v53 = vrot.slane %v8503_v57, %v702_v11 }
 0x36a   :  { %5754 = vmatprep.subr.bf16.mxu1 %v7741_v13  ;;  %5648 = vmatpush1.bf16.msra.mxu0 %v7811_v14  ;;  %v707_v13 = vrot.slane %v8503_v57, %v706_v30  ;;  %v7844_v14 = vld [vmem:[#allocation8 + $0x6a8] ss:$16 sps:$4 sm:$0xff]   ;;  %v7913_v11 = vld [vmem:[#allocation11 + $0xb0] ss:$8 sps:$4 sm:$0xff]   ;;  %v7916_v30 = vld [vmem:[#allocation11 + $0xc0] ss:$8 sps:$4 sm:$0xff]  }
 0x36b   :  { %5649 = vmatprep.subr.bf16.mxu0 %v7819_v8  ;;  %v7852_v8 = vld [vmem:[#allocation8 + $0x6cc] ss:$16 sps:$4 sm:$0xff]  }
 0x36d   :  { %5755 = vmatpush1.bf16.msra.mxu1 %v7739_v15 }
 0x36e   :  { %5756 = vmatprep.subr.bf16.mxu1 %v7744_v17  ;;  %5650 = vmatpush1.bf16.msra.mxu0 %v7817_v18 }
 0x36f   :  { %5651 = vmatprep.subr.bf16.mxu0 %v7825_v61 }
 0x371   :  { %5757 = vmatpush1.bf16.msra.mxu1 %v7742_v20 }
 0x372   :  { %5758 = vmatprep.subr.bf16.mxu1 %v7747_v35  ;;  %5652 = vmatpush1.bf16.msra.mxu0 %v7823_v22  ;;  %v7850_v35 = vld [vmem:[#allocation8 + $0x6c8] ss:$16 sps:$4 sm:$0xff]  }
 0x373   :  { %5653 = vmatprep.subr.bf16.mxu0 %v7831_v23 }
 0x375   :  { %5759 = vmatpush1.bf16.msra.mxu1 %v7745_v1  ;;  %v7855_v1 = vld [vmem:[#allocation8 + $0x6ec] ss:$16 sps:$4 sm:$0xff]  }
 0x376   :  { %5760 = vmatprep.subr.bf16.mxu1 %v7750_v26  ;;  %5654 = vmatpush1.bf16.msra.mxu0 %v7829_v28 }
 0x377   :  { %5655 = vmatprep.subr.bf16.mxu0 %v7837_v29  ;;  %v7853_v29 = vld [vmem:[#allocation8 + $0x6e8] ss:$16 sps:$4 sm:$0xff]  }
 0x379   :  { %5761 = vmatpush1.bf16.msra.mxu1 %v7748_v58  ;;  %v7880_v58 = vld [vmem:[#allocation11] ss:$8 sps:$4 sm:$0xff]  }
 0x37a   :  { %5762 = vmatprep.subr.bf16.mxu1 %v7753_v31  ;;  %5656 = vmatpush1.bf16.msra.mxu0 %v7835_v32  ;;  %v7858_v31 = vld [vmem:[#allocation8 + $0x70c] ss:$16 sps:$4 sm:$0xff]   ;;  %v7885_v32 = vld [vmem:[#allocation11 + $0x14] ss:$8 sps:$4 sm:$0xff]  }
 0x37b   :  { %5657 = vmatprep.subr.bf16.mxu0 %v7843_v43  ;;  %v7856_v43 = vld [vmem:[#allocation8 + $0x708] ss:$16 sps:$4 sm:$0xff]  }
 0x37d   :  { %5763 = vmatpush1.bf16.msra.mxu1 %v7751_v33  ;;  %v7883_v33 = vld [vmem:[#allocation11 + $0x10] ss:$8 sps:$4 sm:$0xff]  }
 0x37e   :  { %5764 = vmatprep.subr.bf16.mxu1 %v7756_v36  ;;  %5658 = vmatpush1.bf16.msra.mxu0 %v7841_v37  ;;  %v7861_v36 = vld [vmem:[#allocation8 + $0x72c] ss:$16 sps:$4 sm:$0xff]   ;;  %v7888_v37 = vld [vmem:[#allocation11 + $0x24] ss:$8 sps:$4 sm:$0xff]  }
 0x37f   :  { %5659 = vmatprep.subr.bf16.mxu0 %v7849_v38  ;;  %v7859_v38 = vld [vmem:[#allocation8 + $0x728] ss:$16 sps:$4 sm:$0xff]  }
 0x381   :  { %5765 = vmatpush1.bf16.msra.mxu1 %v7754_v40  ;;  %v7886_v40 = vld [vmem:[#allocation11 + $0x20] ss:$8 sps:$4 sm:$0xff]  }
 0x382   :  { %5766 = vmatprep.subr.bf16.mxu1 %v7762_v41  ;;  %5660 = vmatpush1.bf16.msra.mxu0 %v7847_v42  ;;  %v7864_v41 = vld [vmem:[#allocation8 + $0x74c] ss:$16 sps:$4 sm:$0xff]   ;;  %v7891_v42 = vld [vmem:[#allocation11 + $0x34] ss:$8 sps:$4 sm:$0xff]  }
 0x383   :  { %6238 = vmatprep.subr.bf16.mxu0 %v7882_v44  ;;  %v7862_v44 = vld [vmem:[#allocation8 + $0x748] ss:$16 sps:$4 sm:$0xff]  }
 0x385   :  { %5767 = vmatpush1.bf16.msra.mxu1 %v7760_v46  ;;  %v7889_v46 = vld [vmem:[#allocation11 + $0x30] ss:$8 sps:$4 sm:$0xff]  }
 0x386   :  { %5768 = vmatprep.subr.bf16.mxu1 %v7768_v47  ;;  %v7867_v47 = vld [vmem:[#allocation8 + $0x76c] ss:$16 sps:$4 sm:$0xff]  }
 0x389   :  { %5769 = vmatpush1.bf16.msra.mxu1 %v7766_v27  ;;  %v7894_v27 = vld [vmem:[#allocation11 + $0x44] ss:$8 sps:$4 sm:$0xff]  }
 0x38a   :  { %5770 = vmatprep.subr.bf16.mxu1 %v7774_v48  ;;  %v7865_v48 = vld [vmem:[#allocation8 + $0x768] ss:$16 sps:$4 sm:$0xff]  }
 0x38d   :  { %5771 = vmatpush1.bf16.msra.mxu1 %v7772_v49  ;;  %v7892_v49 = vld [vmem:[#allocation11 + $0x40] ss:$8 sps:$4 sm:$0xff]  }
 0x38e   :  { %5772 = vmatprep.subr.bf16.mxu1 %v7780_v50  ;;  %v7870_v50 = vld [vmem:[#allocation8 + $0x78c] ss:$16 sps:$4 sm:$0xff]  }
 0x391   :  { %5773 = vmatpush1.bf16.msra.mxu1 %v7778_v52  ;;  %v7897_v52 = vld [vmem:[#allocation11 + $0x54] ss:$8 sps:$4 sm:$0xff]  }
 0x392   :  { %5774 = vmatprep.subr.bf16.mxu1 %v7786_v54  ;;  %v7868_v54 = vld [vmem:[#allocation8 + $0x788] ss:$16 sps:$4 sm:$0xff]  }
 0x395   :  { %5775 = vmatpush1.bf16.msra.mxu1 %v7784_v56  ;;  %v7895_v56 = vld [vmem:[#allocation11 + $0x50] ss:$8 sps:$4 sm:$0xff]  }
 0x396   :  { %5776 = vmatprep.subr.bf16.mxu1 %v7792_v59  ;;  %v7873_v59 = vld [vmem:[#allocation8 + $0x7ac] ss:$16 sps:$4 sm:$0xff]  }
 0x399   :  { %5777 = vmatpush1.bf16.msra.mxu1 %v7790_v62  ;;  %v7900_v62 = vld [vmem:[#allocation11 + $0x64] ss:$8 sps:$4 sm:$0xff]  }
 0x39a   :  { %5778 = vmatprep.subr.bf16.mxu1 %v7798_v24  ;;  %v7871_v24 = vld [vmem:[#allocation8 + $0x7a8] ss:$16 sps:$4 sm:$0xff]  }
 0x39d   :  { %5779 = vmatpush1.bf16.msra.mxu1 %v7796_v55  ;;  %v7898_v55 = vld [vmem:[#allocation11 + $0x60] ss:$8 sps:$4 sm:$0xff]  }
 0x39e   :  { %5780 = vmatprep.subr.bf16.mxu1 %v7804_v63  ;;  %v7876_v63 = vld [vmem:[#allocation8 + $0x7cc] ss:$16 sps:$4 sm:$0xff]  }
 0x3a1   :  { %5781 = vmatpush1.bf16.msra.mxu1 %v7802_v0  ;;  %v7903_v0 = vld [vmem:[#allocation11 + $0x74] ss:$8 sps:$4 sm:$0xff]  }
 0x3a2   :  { %5782 = vmatprep.subr.bf16.mxu1 %v7810_v60  ;;  %v7874_v60 = vld [vmem:[#allocation8 + $0x7c8] ss:$16 sps:$4 sm:$0xff]  }
 0x3a5   :  { %5783 = vmatpush1.bf16.msra.mxu1 %v7808_v2  ;;  %v7901_v2 = vld [vmem:[#allocation11 + $0x70] ss:$8 sps:$4 sm:$0xff]  }
 0x3a6   :  { %5793 = vmatprep.subr.bf16.mxu1 %v7816_v45  ;;  %v7879_v45 = vld [vmem:[#allocation8 + $0x7ec] ss:$16 sps:$4 sm:$0xff]  }
 0x3a8   :  { %5785 = vmatmul.mubr.bf16.vlgmr.msra.gmra.mrb[12].mxu1 %v8509_v39  ;;  %v7846_v39 = vld [vmem:[#allocation8 + $0x6ac] ss:$16 sps:$4 sm:$0xff]  }
 0x3a9   :  { %5794 = vmatpush1.bf16.msra.mxu1 %v7814_v3  ;;  %v7906_v3 = vld [vmem:[#allocation11 + $0x84] ss:$8 sps:$4 sm:$0xff]  }
 0x3aa   :  { %5795 = vmatprep.subr.bf16.mxu1 %v7822_v4  ;;  %v7877_v4 = vld [vmem:[#allocation8 + $0x7e8] ss:$16 sps:$4 sm:$0xff]  }
 0x3ad   :  { %5796 = vmatpush1.bf16.msra.mxu1 %v7820_v5  ;;  %v7904_v5 = vld [vmem:[#allocation11 + $0x80] ss:$8 sps:$4 sm:$0xff]  }
 0x3ae   :  { %5797 = vmatprep.subr.bf16.mxu1 %v7828_v6  ;;  %v7909_v6 = vld [vmem:[#allocation11 + $0x94] ss:$8 sps:$4 sm:$0xff]  }
 0x3b1   :  { %5798 = vmatpush1.bf16.msra.mxu1 %v7826_v7  ;;  %v7907_v7 = vld [vmem:[#allocation11 + $0x90] ss:$8 sps:$4 sm:$0xff]  }
 0x3b2   :  { %5799 = vmatprep.subr.bf16.mxu1 %v7834_v16  ;;  %v7912_v16 = vld [vmem:[#allocation11 + $0xa4] ss:$8 sps:$4 sm:$0xff]  }
 0x3b5   :  { %5800 = vmatpush1.bf16.msra.mxu1 %v7832_v9  ;;  %v7910_v9 = vld [vmem:[#allocation11 + $0xa0] ss:$8 sps:$4 sm:$0xff]  }
 0x3b6   :  { %5801 = vmatprep.subr.bf16.mxu1 %v7840_v51  ;;  %v7915_v51 = vld [vmem:[#allocation11 + $0xb4] ss:$8 sps:$4 sm:$0xff]  }
 0x3b9   :  { %5802 = vmatpush1.bf16.msra.mxu1 %v7838_v12  ;;  %v7918_v12 = vld [vmem:[#allocation11 + $0xc4] ss:$8 sps:$4 sm:$0xff]  }
 0x3ba   :  { %5803 = vmatprep.subr.bf16.mxu1 %v7846_v39  ;;  %v7921_v39 = vld [vmem:[#allocation11 + $0xd4] ss:$8 sps:$4 sm:$0xff]  }
 0x3bb   :  { %v3925_v15 = vpop.f32.mrb[8].mxu1 }
 0x3bc   :  { %v7398_v17 = vadd.f32 %v3925_v15, %v703_v53  ;;  %v3927_v18 = vpop.f32.mrb[9].mxu1  ;;  %v7919_v53 = vld [vmem:[#allocation11 + $0xd0] ss:$8 sps:$4 sm:$0xff]  }
 0x3bd   :  { %v7399_v61 = vadd.f32 %v3927_v18, %v707_v13  ;;  %v3929_v20 = vpop.f32.mrb[10].mxu1  ;;  %5804 = vmatpush1.bf16.msra.mxu1 %v7844_v14  ;;  %v7924_v13 = vld [vmem:[#allocation11 + $0xe4] ss:$8 sps:$4 sm:$0xff]   ;;  %v7922_v14 = vld [vmem:[#allocation11 + $0xe0] ss:$8 sps:$4 sm:$0xff]  }
 0x3be   :  { %v3938_v22 = vmax.f32 %v7398_v17, 0.0  ;;  %v3930_v23 = vpop.f32.mrb[11].mxu1  ;;  %5805 = vmatprep.subr.bf16.mxu1 %v7852_v8  ;;  %v7927_v8 = vld [vmem:[#allocation11 + $0xf4] ss:$8 sps:$4 sm:$0xff]   ;;  %v7925_v15 = vld [vmem:[#allocation11 + $0xf0] ss:$8 sps:$4 sm:$0xff]  }
 0x3bf   :  { %v3939_v26 = vmax.f32 %v7399_v61, 0.0  ;;  %v7930_v17 = vld [vmem:[#allocation11 + $0x104] ss:$8 sps:$4 sm:$0xff]   ;;  %v7981_v23 = vld [vmem:[#allocation14 + $0x10] sm:$0xff]  }
 0x3c0   :  { %v8520_v57 = vpack.c.bf16 %v3938_v22, %v3938_v22  ;;  %v7976_v18 = vld [vmem:[#allocation14 + $0x40] sm:$0xff]   ;;  %v7978_v20 = vld [vmem:[#allocation14 + $0x48] sm:$0xff]   ;;  %v7980_v22 = vld [vmem:[#allocation14 + $0x50] sm:$0xff]  }
 0x3c1   :  { %v3947_v28 = vpack.c.bf16 %v3939_v26, %v3939_v26  ;;  %5806 = vmatpush1.bf16.msra.mxu1 %v7850_v35  ;;  %v7977_v61 = vld [vmem:[#allocation14] sm:$0xff]   ;;  %v7979_v35 = vld [vmem:[#allocation14 + $0x8] sm:$0xff]   ;;  %v7983_v26 = vld [vmem:[#allocation14 + $0x18] sm:$0xff]  }
 0x3c2   :  { %5807 = vmatprep.subr.bf16.mxu1 %v7855_v1  ;;  %v7982_v1 = vld [vmem:[#allocation14 + $0x58] sm:$0xff]  }
 0x3c3   :  { %5661 = vmatprep.mubr.bf16.mxu0 %v3947_v28  ;;  %5825 = vmatprep.mubr.bf16.mxu1 %v3947_v28  ;;  %v7984_v28 = vld [vmem:[#allocation14 + $0x60] sm:$0xff]  }
 0x3c4   :  { %5662 = vmatmul.mubr.bf16.vlgmr.msra.gmra.mrb[8].mxu0 %v8520_v57 }
 0x3c5   :  { %5808 = vmatpush1.bf16.msra.mxu1 %v7853_v29  ;;  %6239 = vmatpush1.bf16.msra.mxu0 %v7880_v58  ;;  %v7985_v29 = vld [vmem:[#allocation14 + $0x20] sm:$0xff]   ;;  %v7986_v58 = vld [vmem:[#allocation14 + $0x68] sm:$0xff]  }
 0x3c6   :  { %5809 = vmatprep.subr.bf16.mxu1 %v7858_v31  ;;  %6240 = vmatprep.subr.bf16.mxu0 %v7885_v32  ;;  %v8524_v31 = vld [vmem:[#allocation10] sm:$0xf] }
 0x3c7   :  { %v4209_v32 = vrot.slane %v8524_v31, %v8450_v19 }
 0x3c9   :  { %5810 = vmatpush1.bf16.msra.mxu1 %v7856_v43  ;;  %6241 = vmatpush1.bf16.msra.mxu0 %v7883_v33  ;;  %v4213_v43 = vrot.slane %v8524_v31, %v8455_v25 }
 0x3ca   :  { %5811 = vmatprep.subr.bf16.mxu1 %v7861_v36  ;;  %6242 = vmatprep.subr.bf16.mxu0 %v7888_v37 }
 0x3cd   :  { %5812 = vmatpush1.bf16.msra.mxu1 %v7859_v38  ;;  %6243 = vmatpush1.bf16.msra.mxu0 %v7886_v40 }
 0x3ce   :  { %5813 = vmatprep.subr.bf16.mxu1 %v7864_v41  ;;  %6244 = vmatprep.subr.bf16.mxu0 %v7891_v42 }
 0x3d1   :  { %5814 = vmatpush1.bf16.msra.mxu1 %v7862_v44  ;;  %6245 = vmatpush1.bf16.msra.mxu0 %v7889_v46 }
 0x3d2   :  { %5815 = vmatprep.subr.bf16.mxu1 %v7867_v47  ;;  %6246 = vmatprep.subr.bf16.mxu0 %v7894_v27  ;;  %v7928_v47 = vld [vmem:[#allocation11 + $0x100] ss:$8 sps:$4 sm:$0xff]  }
 0x3d5   :  { %5816 = vmatpush1.bf16.msra.mxu1 %v7865_v48  ;;  %6247 = vmatpush1.bf16.msra.mxu0 %v7892_v49  ;;  %v7933_v48 = vld [vmem:[#allocation11 + $0x114] ss:$8 sps:$4 sm:$0xff]   ;;  %v7931_v49 = vld [vmem:[#allocation11 + $0x110] ss:$8 sps:$4 sm:$0xff]  }
 0x3d6   :  { %5817 = vmatprep.subr.bf16.mxu1 %v7870_v50  ;;  %6248 = vmatprep.subr.bf16.mxu0 %v7897_v52  ;;  %v7936_v50 = vld [vmem:[#allocation11 + $0x124] ss:$8 sps:$4 sm:$0xff]   ;;  %v7934_v52 = vld [vmem:[#allocation11 + $0x120] ss:$8 sps:$4 sm:$0xff]  }
 0x3d9   :  { %5818 = vmatpush1.bf16.msra.mxu1 %v7868_v54  ;;  %6249 = vmatpush1.bf16.msra.mxu0 %v7895_v56  ;;  %v7939_v54 = vld [vmem:[#allocation11 + $0x134] ss:$8 sps:$4 sm:$0xff]   ;;  %v7937_v56 = vld [vmem:[#allocation11 + $0x130] ss:$8 sps:$4 sm:$0xff]  }
 0x3da   :  { %5819 = vmatprep.subr.bf16.mxu1 %v7873_v59  ;;  %6250 = vmatprep.subr.bf16.mxu0 %v7900_v62  ;;  %v7942_v59 = vld [vmem:[#allocation11 + $0x144] ss:$8 sps:$4 sm:$0xff]   ;;  %v7940_v62 = vld [vmem:[#allocation11 + $0x140] ss:$8 sps:$4 sm:$0xff]  }
 0x3dd   :  { %5820 = vmatpush1.bf16.msra.mxu1 %v7871_v24  ;;  %6251 = vmatpush1.bf16.msra.mxu0 %v7898_v55  ;;  %v7945_v24 = vld [vmem:[#allocation11 + $0x154] ss:$8 sps:$4 sm:$0xff]   ;;  %v7943_v55 = vld [vmem:[#allocation11 + $0x150] ss:$8 sps:$4 sm:$0xff]  }
 0x3de   :  { %5821 = vmatprep.subr.bf16.mxu1 %v7876_v63  ;;  %6252 = vmatprep.subr.bf16.mxu0 %v7903_v0  ;;  %v7948_v63 = vld [vmem:[#allocation11 + $0x164] ss:$8 sps:$4 sm:$0xff]   ;;  %v7946_v0 = vld [vmem:[#allocation11 + $0x160] ss:$8 sps:$4 sm:$0xff]  }
 0x3e1   :  { %5822 = vmatpush1.bf16.msra.mxu1 %v7874_v60  ;;  %6253 = vmatpush1.bf16.msra.mxu0 %v7901_v2  ;;  %v7951_v60 = vld [vmem:[#allocation11 + $0x174] ss:$8 sps:$4 sm:$0xff]   ;;  %v7949_v2 = vld [vmem:[#allocation11 + $0x170] ss:$8 sps:$4 sm:$0xff]  }
 0x3e2   :  { %5823 = vmatprep.subr.bf16.mxu1 %v7879_v45  ;;  %6254 = vmatprep.subr.bf16.mxu0 %v7906_v3  ;;  %v4221_v45 = vrot.slane %v8524_v31, %v690_v34  ;;  %v7954_v3 = vld [vmem:[#allocation11 + $0x184] ss:$8 sps:$4 sm:$0xff]   ;;  %v7958_v34 = vld [vmem:[#allocation11 + $0x1a0] ss:$8 sps:$4 sm:$0xff]  }
 0x3e5   :  { %5824 = vmatpush1.bf16.msra.mxu1 %v7877_v4  ;;  %6255 = vmatpush1.bf16.msra.mxu0 %v7904_v5 }
 0x3e6   :  { %6256 = vmatprep.subr.bf16.mxu0 %v7909_v6  ;;  %7368 = vmatprep.subr.bf16.mxu1 %v7976_v18  ;;  %v4217_v18 = vrot.slane %v8524_v31, %v686_v21  ;;  %v7991_v21 = vld [vmem:[#allocation14 + $0x38] sm:$0xff]  }
 0x3e8   :  { %5826 = vmatmul.mubr.bf16.vlgmr.msra.gmra.mrb[12].mxu1 %v8520_v57  ;;  %v7987_v57 = vld [vmem:[#allocation14 + $0x28] sm:$0xff]  }
 0x3e9   :  { %6257 = vmatpush1.bf16.msra.mxu0 %v7907_v7  ;;  %7369 = vmatpush3.bf16.msra.mxu1 %v7977_v61  ;;  %v7972_v61 = vld [vmem:[#allocation11 + $0x1e4] ss:$8 sps:$4 sm:$0xff]  }
 0x3ea   :  { %6258 = vmatprep.subr.bf16.mxu0 %v7912_v16  ;;  %7370 = vmatprep.subr.bf16.mxu1 %v7978_v20  ;;  %v7952_v16 = vld [vmem:[#allocation11 + $0x180] ss:$8 sps:$4 sm:$0xff]  }
 0x3eb   :  { %v7970_v20 = vld [vmem:[#allocation11 + $0x1e0] ss:$8 sps:$4 sm:$0xff]  }
 0x3ed   :  { %6259 = vmatpush1.bf16.msra.mxu0 %v7910_v9  ;;  %7371 = vmatpush3.bf16.msra.mxu1 %v7979_v35 }
 0x3ee   :  { %6260 = vmatprep.subr.bf16.mxu0 %v7915_v51  ;;  %7372 = vmatprep.subr.bf16.mxu1 %v7980_v22  ;;  %v7957_v51 = vld [vmem:[#allocation11 + $0x194] ss:$8 sps:$4 sm:$0xff]  }
 0x3ef   :  { %v7975_v22 = vld [vmem:[#allocation11 + $0x1f4] ss:$8 sps:$4 sm:$0xff]  }
 0x3f1   :  { %6261 = vmatpush1.bf16.msra.mxu0 %v7913_v11  ;;  %7373 = vmatpush3.bf16.msra.mxu1 %v7981_v23  ;;  %v7973_v23 = vld [vmem:[#allocation11 + $0x1f0] ss:$8 sps:$4 sm:$0xff]  }
 0x3f2   :  { %6262 = vmatprep.subr.bf16.mxu0 %v7918_v12  ;;  %7374 = vmatprep.subr.bf16.mxu1 %v7982_v1 }
 0x3f5   :  { %6263 = vmatpush1.bf16.msra.mxu0 %v7916_v30  ;;  %7375 = vmatpush3.bf16.msra.mxu1 %v7983_v26  ;;  %v7955_v30 = vld [vmem:[#allocation11 + $0x190] ss:$8 sps:$4 sm:$0xff]  }
 0x3f6   :  { %6264 = vmatprep.subr.bf16.mxu0 %v7921_v39  ;;  %7376 = vmatprep.subr.bf16.mxu1 %v7984_v28  ;;  %v7960_v39 = vld [vmem:[#allocation11 + $0x1a4] ss:$8 sps:$4 sm:$0xff]   ;;  %v7988_v28 = vld [vmem:[#allocation14 + $0x70] sm:$0xff]  }
 0x3f9   :  { %6265 = vmatpush1.bf16.msra.mxu0 %v7919_v53  ;;  %7377 = vmatpush3.bf16.msra.mxu1 %v7985_v29  ;;  %v7963_v53 = vld [vmem:[#allocation11 + $0x1b4] ss:$8 sps:$4 sm:$0xff]  }
 0x3fa   :  { %6266 = vmatprep.subr.bf16.mxu0 %v7924_v13  ;;  %7378 = vmatprep.subr.bf16.mxu1 %v7986_v58  ;;  %v7961_v13 = vld [vmem:[#allocation11 + $0x1b0] ss:$8 sps:$4 sm:$0xff]   ;;  %v5906_v58 = vld [vmem:[#allocation13] sm:$0x3] }
 0x3fb   :  { %v7989_v29 = vld [vmem:[#allocation14 + $0x30] sm:$0xff]   ;;  %v5915_v31 = vrot.slane %v5906_v58, %v8455_v25 }
 0x3fd   :  { %6267 = vmatpush1.bf16.msra.mxu0 %v7922_v14  ;;  %7379 = vmatpush3.bf16.msra.mxu1 %v7987_v57  ;;  %v7966_v14 = vld [vmem:[#allocation11 + $0x1c4] ss:$8 sps:$4 sm:$0xff]   ;;  %v5911_v57 = vrot.slane %v5906_v58, %v8450_v19 }
 0x3fe   :  { %6268 = vmatprep.subr.bf16.mxu0 %v7927_v8  ;;  %v7964_v8 = vld [vmem:[#allocation11 + $0x1c0] ss:$8 sps:$4 sm:$0xff]   ;;  %7380 = vmatprep.subr.bf16.mxu1 %v7988_v28 }
 0x401   :  { %6269 = vmatpush1.bf16.msra.mxu0 %v7925_v15  ;;  %v7969_v15 = vld [vmem:[#allocation11 + $0x1d4] ss:$8 sps:$4 sm:$0xff]   ;;  %7381 = vmatpush3.bf16.msra.mxu1 %v7989_v29 }
 0x402   :  { %6279 = vmatprep.subr.bf16.mxu0 %v7930_v17  ;;  %v7967_v17 = vld [vmem:[#allocation11 + $0x1d0] ss:$8 sps:$4 sm:$0xff]   ;;  %7382 = vmatprep.subr.bf16.mxu1 %v7990_v10 }
 0x405   :  { %7383 = vmatpush3.bf16.msra.mxu1 %v7991_v21 }
 0x497   :  { %v5663_v33 = vpop.f32.mrb[8].mxu0 }
 0x498   :  { %v7400_v36 = vadd.f32 %v5663_v33, %v4209_v32  ;;  %v5665_v37 = vpop.f32.mrb[9].mxu0 }
 0x499   :  { %v7401_v38 = vadd.f32 %v5665_v37, %v4213_v43  ;;  %v5667_v40 = vpop.f32.mrb[10].mxu0 }
 0x49a   :  { %v5834_v41 = vmax.f32 %v7400_v36, 0.0  ;;  %v5668_v42 = vpop.f32.mrb[11].mxu0 }
 0x49b   :  { %v5835_v44 = vmax.f32 %v7401_v38, 0.0 }
 0x49c   :  { %v5838_v27 = vpack.c.bf16 %v5834_v41, %v5834_v41 }
 0x49d   :  { %v5839_v46 = vpack.c.bf16 %v5835_v44, %v5835_v44 }
 0x49f   :  { %6270 = vmatprep.mubr.bf16.mxu0 %v5839_v46 }
 0x4a0   :  { %6271 = vmatmul.mubr.bf16.vlgmr.msra.gmra.mrb[12].mxu0 %v5838_v27 }
 0x4a1   :  { %6280 = vmatpush1.bf16.msra.mxu0 %v7928_v47  ;;  %v7351_v47 = vld [vmem:[#allocation16] ss:$0 sm:$0xff] }
 0x4a2   :  { %6281 = vmatprep.subr.bf16.mxu0 %v7933_v48 }
 0x4a5   :  { %6282 = vmatpush1.bf16.msra.mxu0 %v7931_v49 }
 0x4a6   :  { %6283 = vmatprep.subr.bf16.mxu0 %v7936_v50 }
 0x4a9   :  { %6284 = vmatpush1.bf16.msra.mxu0 %v7934_v52 }
 0x4aa   :  { %6285 = vmatprep.subr.bf16.mxu0 %v7939_v54 }
 0x4ad   :  { %6286 = vmatpush1.bf16.msra.mxu0 %v7937_v56 }
 0x4ae   :  { %6287 = vmatprep.subr.bf16.mxu0 %v7942_v59 }
 0x4b1   :  { %6288 = vmatpush1.bf16.msra.mxu0 %v7940_v62 }
 0x4b2   :  { %6289 = vmatprep.subr.bf16.mxu0 %v7945_v24 }
 0x4b5   :  { %6290 = vmatpush1.bf16.msra.mxu0 %v7943_v55 }
 0x4b6   :  { %6291 = vmatprep.subr.bf16.mxu0 %v7948_v63 }
 0x4b9   :  { %6292 = vmatpush1.bf16.msra.mxu0 %v7946_v0 }
 0x4ba   :  { %6293 = vmatprep.subr.bf16.mxu0 %v7951_v60 }
 0x4bb   :  { %v5827_v4 = vpop.f32.mrb[12].mxu1 }
 0x4bc   :  { %v5829_v5 = vpop.f32.mrb[13].mxu1  ;;  %v7402_v35 = vadd.f32 %v5827_v4, %v4217_v18 }
 0x4bd   :  { %v7403_v6 = vadd.f32 %v5829_v5, %v4221_v45  ;;  %6294 = vmatpush1.bf16.msra.mxu0 %v7949_v2  ;;  %v5831_v7 = vpop.f32.mrb[14].mxu1 }
 0x4be   :  { %v5832_v9 = vpop.f32.mrb[15].mxu1  ;;  %6295 = vmatprep.subr.bf16.mxu0 %v7954_v3  ;;  %v5836_v1 = vmax.f32 %v7402_v35, 0.0 }
 0x4bf   :  { %v5837_v11 = vmax.f32 %v7403_v6, 0.0 }
 0x4c0   :  { %v5840_v26 = vpack.c.bf16 %v5836_v1, %v5836_v1 }
 0x4c1   :  { %v5841_v12 = vpack.c.bf16 %v5837_v11, %v5837_v11  ;;  %6296 = vmatpush1.bf16.msra.mxu0 %v7952_v16 }
 0x4c2   :  { %6297 = vmatprep.subr.bf16.mxu0 %v7957_v51 }
 0x4c3   :  { %6311 = vmatprep.mubr.bf16.mxu0 %v5841_v12 }
 0x4c5   :  { %6298 = vmatpush1.bf16.msra.mxu0 %v7955_v30 }
 0x4c6   :  { %6299 = vmatprep.subr.bf16.mxu0 %v7960_v39 }
 0x4c9   :  { %6300 = vmatpush1.bf16.msra.mxu0 %v7958_v34 }
 0x4ca   :  { %6301 = vmatprep.subr.bf16.mxu0 %v7963_v53 }
 0x4cd   :  { %6302 = vmatpush1.bf16.msra.mxu0 %v7961_v13 }
 0x4ce   :  { %6303 = vmatprep.subr.bf16.mxu0 %v7966_v14 }
 0x4d1   :  { %6304 = vmatpush1.bf16.msra.mxu0 %v7964_v8 }
 0x4d2   :  { %6305 = vmatprep.subr.bf16.mxu0 %v7969_v15 }
 0x4d5   :  { %6306 = vmatpush1.bf16.msra.mxu0 %v7967_v17 }
 0x4d6   :  { %6307 = vmatprep.subr.bf16.mxu0 %v7972_v61 }
 0x4d9   :  { %6308 = vmatpush1.bf16.msra.mxu0 %v7970_v20 }
 0x4da   :  { %6309 = vmatprep.subr.bf16.mxu0 %v7975_v22 }
 0x4dd   :  { %6310 = vmatpush1.bf16.msra.mxu0 %v7973_v23 }
 0x4e0   :  { %6312 = vmatmul.mubr.bf16.vlgmr.msra.gmra.mrb[12].mxu0 %v5840_v26 }
 0x5b3   :  { %v6313_v32 = vpop.f32.mrb[12].mxu0 }
 0x5b4   :  { %v7404_v43 = vadd.f32 %v6313_v32, %v5911_v57  ;;  %v6315_v33 = vpop.f32.mrb[13].mxu0 }
 0x5b5   :  { %v7405_v36 = vadd.f32 %v6315_v33, %v5915_v31  ;;  %v6317_v37 = vpop.f32.mrb[14].mxu0 }
 0x5b6   :  { %v6320_v38 = vmax.f32 %v7404_v43, 0.0  ;;  %v6318_v40 = vpop.f32.mrb[15].mxu0 }
 0x5b7   :  { %v6321_v41 = vmax.f32 %v7405_v36, 0.0 }
 0x5b8   :  { %v6322_v44 = vpack.c.bf16 %v6320_v38, %v6320_v38 }
 0x5b9   :  { %v6323_v42 = vpack.c.bf16 %v6321_v41, %v6321_v41 }
 0x5bb   :  { %6491 = vmatprep.mubr.bf16.mxu1 %v6323_v42 }
 0x5bc   :  { %6492 = vmatmul.mubr.bf16.vlgmr.msra.gmra.mrb[16].mxu1 %v6322_v44 }
 0x68f   :  { %v7384_v46 = vpop.f32.mrb[16].mxu1 }
 0x690   :  { %v7385_v27 = vpop.f32.mrb[17].mxu1 }
 0x691   :  { %v7386_v19 = vadd.f32 %v7385_v27, %v7384_v46  ;;  %v7387_v48 = vpop.f32.mrb[18].mxu1 }
 0x692   :  { %v7388_v25 = vpop.f32.mrb[19].mxu1 }
 0x693   :  { %v6494_v49 = vadd.f32 %v7386_v19, %v7351_v47 }
 0x695   :  { %6499 = vst [vmem:[#allocation17] sm:$0xff] %v6494_v49 }
 0x696   :  { %8202 = shalt.err (!%p8199_p6)
}
 0x697   :  { %s8203_s22 = scalar_lea.hbm %s8559_s9, 128 }
 0x698   :  { %p8204_p7 = scmp.ne.s32.totalorder %s8559_s9, %s8203_s22  ;;  %p8207_p8 = scmp.lt.u32.totalorder %s8203_s22, %s8559_s9 }
 0x69a   :  { %p8209_p9 = pnand %p8207_p8, %p8204_p7 }
 0x69c   :  { %8212 = shalt.err (!%p8209_p9)
}
 0x69d   :  { %6509 = dma.vmem_to_hbm [thread:$0]  %s6507_s24, 128, %s8559_s9, [#allocation4]  }
 0x69e   :  { %8223 = dma.done.wait [#allocation4], 128  }
 0x69f   :  { %8224 = vsyncadd [#allocation4], 4294967168 }
 0x6a0   :  { %6513 = vsyncpa [#allocation3], 1 }
 0x6a1   :  { %6514 = vsyncpa [#allocation6], 1 }
 0x6a2   :  { %6515 = vsyncpa [#allocation9], 1 }
 0x6a3   :  { %6516 = vsyncpa [#allocation12], 1 }
 0x6a4   :  { %6517 = vsyncpa [#allocation15], 1 }
 0x6a5   :  { %6518 = vsyncpa [#allocation4], 1 }

</bundles_post_ra>
